<compile_context>
chip_gen: v7x
topology: tpu7x:2x2x1
jax: 0.10.0
libtpu: 0.0.40
codegen_flags: <defaults>
</compile_context>

<pallas_src>
import functools
import math

import jax
import jax.numpy as jnp
import numpy as np
from jax.experimental import pallas as pl
from jax.experimental.pallas import tpu as pltpu

KSIZE, STRIDE, PAD = 25, 4, 11
LANE = 128            # pad K / N to multiples of the 128-wide lane dimension
TM_MAX = 2048         # max rows (M) per grid step
TK_MAX = 2048         # K fits a single block at demo sizes; tiled if larger


def _round_up(x, m):
    return (x + m - 1) // m * m


# ----------------------------------------------------------------------------
# Pallas kernel: fused (X @ W) accumulate -> + bias -> leaky_relu
# ----------------------------------------------------------------------------
def _mm_bias_lrelu_kernel(x_ref, w_ref, b_ref, o_ref, acc_ref, *, alpha):
    @pl.when(pl.program_id(1) == 0)
    def _init():
        acc_ref[...] = jnp.zeros_like(acc_ref)

    acc_ref[...] += jnp.dot(x_ref[...], w_ref[...],
                            preferred_element_type=jnp.float32)

    @pl.when(pl.program_id(1) == pl.num_programs(1) - 1)
    def _finalize():
        acc = acc_ref[...] + b_ref[...]                 # f32 bias broadcast
        acc = jnp.where(acc >= 0, acc, alpha * acc)     # leaky_relu in f32
        o_ref[...] = acc.astype(o_ref.dtype)


def matmul_bias_lrelu(x, w, b, *, tm, tk, alpha):
    """x: (M, K) bf16, w: (K, N) bf16, b: (1, N) f32.
    M % tm == 0, K % tk == 0, K and N multiples of 128. Returns (M, N) bf16."""
    M, K = x.shape
    _, N = w.shape
    grid = (M // tm, K // tk)
    return pl.pallas_call(
        functools.partial(_mm_bias_lrelu_kernel, alpha=alpha),
        out_shape=jax.ShapeDtypeStruct((M, N), jnp.bfloat16),
        grid_spec=pltpu.PrefetchScalarGridSpec(
            num_scalar_prefetch=0,
            grid=grid,
            in_specs=[
                pl.BlockSpec((tm, tk), lambda i, k: (i, k)),
                pl.BlockSpec((tk, N), lambda i, k: (k, 0)),
                pl.BlockSpec((1, N), lambda i, k: (0, 0)),
            ],
            out_specs=pl.BlockSpec((tm, N), lambda i, k: (i, 0)),
            scratch_shapes=[pltpu.VMEM((tm, N), jnp.float32)],
        ),
        compiler_params=pltpu.CompilerParams(
            dimension_semantics=("parallel", "arbitrary"),
            vmem_limit_bytes=32 * 1024 * 1024,   # budget fits v5e/v6e/v7x
        ),
    )(x, w, b)


# ----------------------------------------------------------------------------
# Layout helpers (channels-last, padded to lane width)
# ----------------------------------------------------------------------------
def _conv_dims(c_in, c_out):
    k_raw = KSIZE * c_in
    tk = min(_round_up(k_raw, LANE), TK_MAX)
    k_pad = _round_up(k_raw, tk)
    n_pad = _round_up(c_out, LANE)
    return k_raw, k_pad, tk, n_pad


def _pick_tm(m):
    tm = min(TM_MAX, _round_up(m, 16))
    if tm >= m and m >= 32:        # keep >= 2 parallel grid steps (v7x: 2 TCs)
        tm = _round_up(pl.cdiv(m, 2), 16)
    return tm


def im2col_blc(x_blc):
    """(B, L, C) channels-last -> tap-major patches (B*L_out, KSIZE*C), L_out."""
    B, L, C = x_blc.shape
    L_out = (L + 2 * PAD - KSIZE) // STRIDE + 1
    x_pad = jnp.pad(x_blc, ((0, 0), (PAD, PAD), (0, 0)))
    cols = [x_pad[:, k: k + STRIDE * (L_out - 1) + 1: STRIDE, :]
            for k in range(KSIZE)]                      # each (B, L_out, C)
    patches = jnp.stack(cols, axis=2)                   # (B, L_out, K, C)
    return patches.reshape(B * L_out, KSIZE * C), L_out


def phase_shuffle_blc(x, k):
    """x: (B, L, C); k: (B,) int32 in [-shift_factor, shift_factor].
    Matches PhaseShuffle(batch_shuffle=False) for these shifts:
    out[b, l] = x[b, reflect(l - k_b)] with edge-excluded reflect padding."""
    B, L, _ = x.shape
    pos = jnp.arange(L, dtype=jnp.int32)[None, :] - k[:, None]
    pos = jnp.where(pos < 0, -pos, pos)
    pos = jnp.where(pos > L - 1, 2 * (L - 1) - pos, pos)
    idx = jnp.broadcast_to(pos[:, :, None], x.shape)
    return jnp.take_along_axis(x, idx, axis=1)


def conv_layer_pallas(h_blc, w_mat, b_row, c_in, *, alpha):
    """One Conv1d(k=25, s=4, p=11) + leaky_relu. h_blc: (B, L, >=c_in) bf16,
    w_mat: (Kpad, Npad) bf16, b_row: (1, Npad) f32 -> (B, L_out, Npad) bf16."""
    B = h_blc.shape[0]
    x = h_blc[:, :, :c_in]                     # drop zero-padded channels
    patches, L_out = im2col_blc(x)
    m, k_raw = patches.shape
    k_pad, n_pad = w_mat.shape
    tm = _pick_tm(m)
    m_pad = _round_up(m, tm)
    patches = jnp.pad(patches.astype(jnp.bfloat16),
                      ((0, m_pad - m), (0, k_pad - k_raw)))
    tk = min(k_pad, TK_MAX)
    y = matmul_bias_lrelu(patches, w_mat, b_row, tm=tm, tk=tk, alpha=alpha)
    return y[:m].reshape(B, L_out, n_pad)


# ----------------------------------------------------------------------------
# Parameters (synthetic, deterministic, kaiming-style; PyTorch layouts)
# ----------------------------------------------------------------------------
def _conv_io(model_size, num_channels):
    m = model_size
    return [(num_channels, m), (m, 2 * m), (2 * m, 4 * m),
            (4 * m, 8 * m), (8 * m, 16 * m)]


def init_params(key, model_size, num_channels):
    params = {}
    for i, (cin, cout) in enumerate(_conv_io(model_size, num_channels)):
        key, kw, kb = jax.random.split(key, 3)
        fan_in = cin * KSIZE
        w = jax.random.normal(kw, (cout, cin, KSIZE), jnp.float32) * math.sqrt(2.0 / fan_in)
        bound = 1.0 / math.sqrt(fan_in)
        b = jax.random.uniform(kb, (cout,), jnp.float32, -bound, bound)
        params[f"conv{i + 1}"] = (w, b)
    key, kw, kb = jax.random.split(key, 3)
    fan_in = 256 * model_size
    wf = jax.random.normal(kw, (1, fan_in), jnp.float32) * math.sqrt(2.0 / fan_in)
    bound = 1.0 / math.sqrt(fan_in)
    bf = jax.random.uniform(kb, (1,), jnp.float32, -bound, bound)
    params["fc1"] = (wf, bf)
    return params


def pack_params(params, model_size, num_channels):
    """PyTorch-layout params -> padded, matmul-ready bf16/f32 operands."""
    packed = {}
    for i, (cin, cout) in enumerate(_conv_io(model_size, num_channels)):
        w, b = params[f"conv{i + 1}"]
        k_raw, k_pad, _, n_pad = _conv_dims(cin, cout)
        w_mat = jnp.transpose(w, (2, 1, 0)).reshape(k_raw, cout)   # tap-major K
        w_mat = jnp.pad(w_mat, ((0, k_pad - k_raw), (0, n_pad - cout)))
        b_row = jnp.pad(b, (0, n_pad - cout)).reshape(1, n_pad)
        packed[f"conv{i + 1}"] = (w_mat.astype(jnp.bfloat16),
                                  b_row.astype(jnp.float32))
    wf, bf = params["fc1"]
    c5 = 16 * model_size
    l5 = (256 * model_size) // c5                    # = 16 for 16384 samples
    n5_pad = _round_up(c5, LANE)
    # Re-permute fc weight from PyTorch's channel-major flatten (c*l5 + l) to
    # the channels-last flatten (l*n5_pad + c) used here; pad channels with 0.
    wf_cl = jnp.transpose(wf.reshape(c5, l5), (1, 0))           # (l5, c5)
    wf_cl = jnp.pad(wf_cl, ((0, 0), (0, n5_pad - c5))).reshape(l5 * n5_pad)
    packed["fc1"] = (wf_cl.astype(jnp.float32), bf.astype(jnp.float32))
    return packed


# ----------------------------------------------------------------------------
# Forward pass
# ----------------------------------------------------------------------------
def wavegan_discriminator_forward(x_ncl, packed, shifts, *, model_size,
                                  num_channels, alpha=0.2):
    """x_ncl: (B, num_channels, L) f32. shifts: (4, B) int32 phase-shuffle
    shifts in [-shift_factor, shift_factor]. Returns (B, 1) f32."""
    B = x_ncl.shape[0]
    h = jnp.transpose(x_ncl, (0, 2, 1)).astype(jnp.bfloat16)  # channels-last, once
    for li, (cin, _cout) in enumerate(_conv_io(model_size, num_channels)):
        w_mat, b_row = packed[f"conv{li + 1}"]
        h = conv_layer_pallas(h, w_mat, b_row, cin, alpha=alpha)
        if li < 4:
            h = phase_shuffle_blc(h, shifts[li])
    # fc1 + sigmoid: ~4 KFLOP — plain dot (pallas_call here is pure overhead).
    wf_cl, bf = packed["fc1"]
    flat = h.astype(jnp.float32).reshape(B, -1)     # (B, l5 * n5_pad)
    logits = flat @ wf_cl[:, None] + bf[None, :]
    return jax.nn.sigmoid(logits)


# ----------------------------------------------------------------------------
# Main
# ----------------------------------------------------------------------------
if __name__ == "__main__":
    MODEL_SIZE = 4        # small model_size (PyTorch default is 64)
    NUM_CHANNELS = 1
    BATCH = 2
    SEQ_LEN = 16384       # canonical WaveGAN length -> flatten == 256*model_size
    SHIFT_FACTOR = 2

    key = jax.random.PRNGKey(0)
    kx, kp = jax.random.split(key)
    x = jax.random.normal(kx, (BATCH, NUM_CHANNELS, SEQ_LEN), jnp.float32)
    params = init_params(kp, MODEL_SIZE, NUM_CHANNELS)
    packed = pack_params(params, MODEL_SIZE, NUM_CHANNELS)

    # PhaseShuffle draws torch randints per forward; use deterministic
    # host-side shifts (one per shuffle layer per batch element), fed as data.
    rng = np.random.RandomState(0)
    shifts = jnp.asarray(
        rng.randint(0, 2 * SHIFT_FACTOR + 1, size=(4, BATCH)) - SHIFT_FACTOR,
        dtype=jnp.int32)

    fwd = jax.jit(functools.partial(
        wavegan_discriminator_forward,
        model_size=MODEL_SIZE, num_channels=NUM_CHANNELS, alpha=0.2))
    out = jax.block_until_ready(fwd(x, packed, shifts))

    assert out.shape == (BATCH, 1) and out.dtype == jnp.float32
    assert bool(jnp.all(jnp.isfinite(out)))
    print("KERNEL_OK")
</pallas_src>

<mosaic_0001>
module attributes {stable_mosaic.version = 11 : i64} {
  func.func private @main(%arg0: i32) attributes {dimension_semantics = [#tpu.dimension_semantics<core_parallel>], iteration_bounds = array<i64: 2>, tpu.core_type = #tpu.core_type<sc_scalar_subcore>, window_params = []} {
    return
  }
}

module attributes {stable_mosaic.version = 11 : i64} {
  func.func private @main(%arg0: i32) attributes {dimension_semantics = [#tpu.dimension_semantics<core_parallel>], iteration_bounds = array<i64: 2>, tpu.core_type = #tpu.core_type<sc_scalar_subcore>, window_params = []} {
    return
  }
}

module attributes {stable_mosaic.version = 11 : i64} {
  func.func @_mm_bias_lrelu_kernel(%arg0: i32, %arg1: i32, %arg2: memref<2048x128xbf16, #tpu.memory_space<vmem>>, %arg3: memref<128x128xbf16, #tpu.memory_space<vmem>>, %arg4: memref<1x128xf32, #tpu.memory_space<vmem>>, %arg5: memref<2048x128xbf16, #tpu.memory_space<vmem>>, %arg6: memref<2048x128xf32, #tpu.memory_space<vmem>>) attributes {dimension_semantics = [#tpu.dimension_semantics<parallel>, #tpu.dimension_semantics<arbitrary>], iteration_bounds = array<i64: 4, 1>, scalar_prefetch = 0 : i64, scratch_operands = 1 : i64, tpu.core_type = #tpu.core_type<tc>, window_params = [{transform_indices = @transform_0, window_bounds = array<i64: 2048, 128>}, {transform_indices = @transform_1, window_bounds = array<i64: 128, 128>}, {pipeline_mode = #tpu.pipeline_mode<synchronous>, transform_indices = @transform_2, window_bounds = array<i64: 1, 128>}, {transform_indices = @transform_3, window_bounds = array<i64: 2048, 128>}]} {
    %c0_i32 = arith.constant 0 : i32
    %0 = arith.cmpi eq, %arg1, %c0_i32 : i32
    %1 = arith.extui %0 : i1 to i32
    %c0_i32_0 = arith.constant 0 : i32
    %2 = arith.cmpi ne, %1, %c0_i32_0 : i32
    scf.if %2 {
      %cst_10 = arith.constant 0.000000e+00 : f32
      %12 = vector.broadcast %cst_10 : f32 to vector<2048x128xf32>
      %c0_11 = arith.constant 0 : index
      %c0_12 = arith.constant 0 : index
      %13 = vector.load %arg6[%c0_11, %c0_12] : memref<2048x128xf32, #tpu.memory_space<vmem>>, vector<2048x128xf32>
      tpu.vector_store %arg6[%c0_11, %c0_12], %12 {strides = array<i32>} : memref<2048x128xf32, #tpu.memory_space<vmem>>, vector<2048x128xf32>,
    } else {
    }
    %c0 = arith.constant 0 : index
    %c0_1 = arith.constant 0 : index
    %3 = vector.load %arg6[%c0, %c0_1] : memref<2048x128xf32, #tpu.memory_space<vmem>>, vector<2048x128xf32>
    %c0_2 = arith.constant 0 : index
    %c0_3 = arith.constant 0 : index
    %4 = vector.load %arg2[%c0_2, %c0_3] : memref<2048x128xbf16, #tpu.memory_space<vmem>>, vector<2048x128xbf16>
    %c0_4 = arith.constant 0 : index
    %c0_5 = arith.constant 0 : index
    %5 = vector.load %arg3[%c0_4, %c0_5] : memref<128x128xbf16, #tpu.memory_space<vmem>>, vector<128x128xbf16>
    %cst = arith.constant dense<0.000000e+00> : vector<2048x128xf32>
    %6 = tpu.matmul %4, %5, %cst {dimension_numbers = #tpu.dot_dimension_numbers<[1], [0], [0], [1], [0, 0, 1, 1], [], []>} : vector<2048x128xbf16>, vector<128x128xbf16>, vector<2048x128xf32> -> vector<2048x128xf32>
    %7 = arith.addf %3, %6 : vector<2048x128xf32>
    %c0_6 = arith.constant 0 : index
    %c0_7 = arith.constant 0 : index
    %8 = vector.load %arg6[%c0_6, %c0_7] : memref<2048x128xf32, #tpu.memory_space<vmem>>, vector<2048x128xf32>
    tpu.vector_store %arg6[%c0_6, %c0_7], %7 {strides = array<i32>} : memref<2048x128xf32, #tpu.memory_space<vmem>>, vector<2048x128xf32>,
    %c0_i32_8 = arith.constant 0 : i32
    %9 = arith.cmpi eq, %arg1, %c0_i32_8 : i32
    %10 = arith.extui %9 : i1 to i32
    %c0_i32_9 = arith.constant 0 : i32
    %11 = arith.cmpi ne, %10, %c0_i32_9 : i32
    scf.if %11 {
      %c0_10 = arith.constant 0 : index
      %c0_11 = arith.constant 0 : index
      %12 = vector.load %arg6[%c0_10, %c0_11] : memref<2048x128xf32, #tpu.memory_space<vmem>>, vector<2048x128xf32>
      %c0_12 = arith.constant 0 : index
      %c0_13 = arith.constant 0 : index
      %13 = vector.load %arg4[%c0_12, %c0_13] : memref<1x128xf32, #tpu.memory_space<vmem>>, vector<1x128xf32>
      %14 = vector.broadcast %13 : vector<1x128xf32> to vector<2048x128xf32>
      %15 = arith.addf %12, %14 : vector<2048x128xf32>
      %cst_14 = arith.constant 0.000000e+00 : f32
      %16 = vector.broadcast %cst_14 : f32 to vector<2048x128xf32>
      %17 = arith.cmpf oge, %15, %16 : vector<2048x128xf32>
      %cst_15 = arith.constant 2.000000e-01 : f32
      %18 = vector.broadcast %cst_15 : f32 to vector<2048x128xf32>
      %19 = arith.mulf %18, %15 : vector<2048x128xf32>
      %20 = arith.select %17, %15, %19 : vector<2048x128xi1>, vector<2048x128xf32>
      %21 = arith.truncf %20 : vector<2048x128xf32> to vector<2048x128xbf16>
      %c0_16 = arith.constant 0 : index
      %c0_17 = arith.constant 0 : index
      %22 = vector.load %arg5[%c0_16, %c0_17] : memref<2048x128xbf16, #tpu.memory_space<vmem>>, vector<2048x128xbf16>
      tpu.vector_store %arg5[%c0_16, %c0_17], %21 {strides = array<i32>} : memref<2048x128xbf16, #tpu.memory_space<vmem>>, vector<2048x128xbf16>,
    } else {
    }
    return
  }
  func.func @transform_0(%arg0: i32, %arg1: i32) -> (i32, i32) {
    %c0_i32 = arith.constant 0 : i32
    return %arg0, %arg1 : i32, i32
  }
  func.func @transform_1(%arg0: i32, %arg1: i32) -> (i32, i32) {
    %c0_i32 = arith.constant 0 : i32
    %c0_i32_0 = arith.constant 0 : i32
    return %arg1, %c0_i32 : i32, i32
  }
  func.func @transform_2(%arg0: i32, %arg1: i32) -> (i32, i32) {
    %c0_i32 = arith.constant 0 : i32
    %c0_i32_0 = arith.constant 0 : i32
    %c0_i32_1 = arith.constant 0 : i32
    return %c0_i32, %c0_i32_0 : i32, i32
  }
  func.func @transform_3(%arg0: i32, %arg1: i32) -> (i32, i32) {
    %c0_i32 = arith.constant 0 : i32
    %c0_i32_0 = arith.constant 0 : i32
    return %arg0, %c0_i32 : i32, i32
  }
}

module attributes {stable_mosaic.version = 11 : i64} {
  func.func @_mm_bias_lrelu_kernel(%arg0: i32, %arg1: i32, %arg2: memref<1024x128xbf16, #tpu.memory_space<vmem>>, %arg3: memref<128x128xbf16, #tpu.memory_space<vmem>>, %arg4: memref<1x128xf32, #tpu.memory_space<vmem>>, %arg5: memref<1024x128xbf16, #tpu.memory_space<vmem>>, %arg6: memref<1024x128xf32, #tpu.memory_space<vmem>>) attributes {dimension_semantics = [#tpu.dimension_semantics<parallel>, #tpu.dimension_semantics<arbitrary>], iteration_bounds = array<i64: 2, 1>, scalar_prefetch = 0 : i64, scratch_operands = 1 : i64, tpu.core_type = #tpu.core_type<tc>, window_params = [{transform_indices = @transform_0, window_bounds = array<i64: 1024, 128>}, {transform_indices = @transform_1, window_bounds = array<i64: 128, 128>}, {pipeline_mode = #tpu.pipeline_mode<synchronous>, transform_indices = @transform_2, window_bounds = array<i64: 1, 128>}, {transform_indices = @transform_3, window_bounds = array<i64: 1024, 128>}]} {
    %c0_i32 = arith.constant 0 : i32
    %0 = arith.cmpi eq, %arg1, %c0_i32 : i32
    %1 = arith.extui %0 : i1 to i32
    %c0_i32_0 = arith.constant 0 : i32
    %2 = arith.cmpi ne, %1, %c0_i32_0 : i32
    scf.if %2 {
      %cst_10 = arith.constant 0.000000e+00 : f32
      %12 = vector.broadcast %cst_10 : f32 to vector<1024x128xf32>
      %c0_11 = arith.constant 0 : index
      %c0_12 = arith.constant 0 : index
      %13 = vector.load %arg6[%c0_11, %c0_12] : memref<1024x128xf32, #tpu.memory_space<vmem>>, vector<1024x128xf32>
      tpu.vector_store %arg6[%c0_11, %c0_12], %12 {strides = array<i32>} : memref<1024x128xf32, #tpu.memory_space<vmem>>, vector<1024x128xf32>,
    } else {
    }
    %c0 = arith.constant 0 : index
    %c0_1 = arith.constant 0 : index
    %3 = vector.load %arg6[%c0, %c0_1] : memref<1024x128xf32, #tpu.memory_space<vmem>>, vector<1024x128xf32>
    %c0_2 = arith.constant 0 : index
    %c0_3 = arith.constant 0 : index
    %4 = vector.load %arg2[%c0_2, %c0_3] : memref<1024x128xbf16, #tpu.memory_space<vmem>>, vector<1024x128xbf16>
    %c0_4 = arith.constant 0 : index
    %c0_5 = arith.constant 0 : index
    %5 = vector.load %arg3[%c0_4, %c0_5] : memref<128x128xbf16, #tpu.memory_space<vmem>>, vector<128x128xbf16>
    %cst = arith.constant dense<0.000000e+00> : vector<1024x128xf32>
    %6 = tpu.matmul %4, %5, %cst {dimension_numbers = #tpu.dot_dimension_numbers<[1], [0], [0], [1], [0, 0, 1, 1], [], []>} : vector<1024x128xbf16>, vector<128x128xbf16>, vector<1024x128xf32> -> vector<1024x128xf32>
    %7 = arith.addf %3, %6 : vector<1024x128xf32>
    %c0_6 = arith.constant 0 : index
    %c0_7 = arith.constant 0 : index
    %8 = vector.load %arg6[%c0_6, %c0_7] : memref<1024x128xf32, #tpu.memory_space<vmem>>, vector<1024x128xf32>
    tpu.vector_store %arg6[%c0_6, %c0_7], %7 {strides = array<i32>} : memref<1024x128xf32, #tpu.memory_space<vmem>>, vector<1024x128xf32>,
    %c0_i32_8 = arith.constant 0 : i32
    %9 = arith.cmpi eq, %arg1, %c0_i32_8 : i32
    %10 = arith.extui %9 : i1 to i32
    %c0_i32_9 = arith.constant 0 : i32
    %11 = arith.cmpi ne, %10, %c0_i32_9 : i32
    scf.if %11 {
      %c0_10 = arith.constant 0 : index
      %c0_11 = arith.constant 0 : index
      %12 = vector.load %arg6[%c0_10, %c0_11] : memref<1024x128xf32, #tpu.memory_space<vmem>>, vector<1024x128xf32>
      %c0_12 = arith.constant 0 : index
      %c0_13 = arith.constant 0 : index
      %13 = vector.load %arg4[%c0_12, %c0_13] : memref<1x128xf32, #tpu.memory_space<vmem>>, vector<1x128xf32>
      %14 = vector.broadcast %13 : vector<1x128xf32> to vector<1024x128xf32>
      %15 = arith.addf %12, %14 : vector<1024x128xf32>
      %cst_14 = arith.constant 0.000000e+00 : f32
      %16 = vector.broadcast %cst_14 : f32 to vector<1024x128xf32>
      %17 = arith.cmpf oge, %15, %16 : vector<1024x128xf32>
      %cst_15 = arith.constant 2.000000e-01 : f32
      %18 = vector.broadcast %cst_15 : f32 to vector<1024x128xf32>
      %19 = arith.mulf %18, %15 : vector<1024x128xf32>
      %20 = arith.select %17, %15, %19 : vector<1024x128xi1>, vector<1024x128xf32>
      %21 = arith.truncf %20 : vector<1024x128xf32> to vector<1024x128xbf16>
      %c0_16 = arith.constant 0 : index
      %c0_17 = arith.constant 0 : index
      %22 = vector.load %arg5[%c0_16, %c0_17] : memref<1024x128xbf16, #tpu.memory_space<vmem>>, vector<1024x128xbf16>
      tpu.vector_store %arg5[%c0_16, %c0_17], %21 {strides = array<i32>} : memref<1024x128xbf16, #tpu.memory_space<vmem>>, vector<1024x128xbf16>,
    } else {
    }
    return
  }
  func.func @transform_0(%arg0: i32, %arg1: i32) -> (i32, i32) {
    %c0_i32 = arith.constant 0 : i32
    return %arg0, %arg1 : i32, i32
  }
  func.func @transform_1(%arg0: i32, %arg1: i32) -> (i32, i32) {
    %c0_i32 = arith.constant 0 : i32
    %c0_i32_0 = arith.constant 0 : i32
    return %arg1, %c0_i32 : i32, i32
  }
  func.func @transform_2(%arg0: i32, %arg1: i32) -> (i32, i32) {
    %c0_i32 = arith.constant 0 : i32
    %c0_i32_0 = arith.constant 0 : i32
    %c0_i32_1 = arith.constant 0 : i32
    return %c0_i32, %c0_i32_0 : i32, i32
  }
  func.func @transform_3(%arg0: i32, %arg1: i32) -> (i32, i32) {
    %c0_i32 = arith.constant 0 : i32
    %c0_i32_0 = arith.constant 0 : i32
    return %arg0, %c0_i32 : i32, i32
  }
}

module attributes {stable_mosaic.version = 11 : i64} {
  func.func @_mm_bias_lrelu_kernel(%arg0: i32, %arg1: i32, %arg2: memref<256x256xbf16, #tpu.memory_space<vmem>>, %arg3: memref<256x128xbf16, #tpu.memory_space<vmem>>, %arg4: memref<1x128xf32, #tpu.memory_space<vmem>>, %arg5: memref<256x128xbf16, #tpu.memory_space<vmem>>, %arg6: memref<256x128xf32, #tpu.memory_space<vmem>>) attributes {dimension_semantics = [#tpu.dimension_semantics<parallel>, #tpu.dimension_semantics<arbitrary>], iteration_bounds = array<i64: 2, 1>, scalar_prefetch = 0 : i64, scratch_operands = 1 : i64, tpu.core_type = #tpu.core_type<tc>, window_params = [{transform_indices = @transform_0, window_bounds = array<i64: 256, 256>}, {transform_indices = @transform_1, window_bounds = array<i64: 256, 128>}, {pipeline_mode = #tpu.pipeline_mode<synchronous>, transform_indices = @transform_2, window_bounds = array<i64: 1, 128>}, {transform_indices = @transform_3, window_bounds = array<i64: 256, 128>}]} {
    %c0_i32 = arith.constant 0 : i32
    %0 = arith.cmpi eq, %arg1, %c0_i32 : i32
    %1 = arith.extui %0 : i1 to i32
    %c0_i32_0 = arith.constant 0 : i32
    %2 = arith.cmpi ne, %1, %c0_i32_0 : i32
    scf.if %2 {
      %cst_10 = arith.constant 0.000000e+00 : f32
      %12 = vector.broadcast %cst_10 : f32 to vector<256x128xf32>
      %c0_11 = arith.constant 0 : index
      %c0_12 = arith.constant 0 : index
      %13 = vector.load %arg6[%c0_11, %c0_12] : memref<256x128xf32, #tpu.memory_space<vmem>>, vector<256x128xf32>
      tpu.vector_store %arg6[%c0_11, %c0_12], %12 {strides = array<i32>} : memref<256x128xf32, #tpu.memory_space<vmem>>, vector<256x128xf32>,
    } else {
    }
    %c0 = arith.constant 0 : index
    %c0_1 = arith.constant 0 : index
    %3 = vector.load %arg6[%c0, %c0_1] : memref<256x128xf32, #tpu.memory_space<vmem>>, vector<256x128xf32>
    %c0_2 = arith.constant 0 : index
    %c0_3 = arith.constant 0 : index
    %4 = vector.load %arg2[%c0_2, %c0_3] : memref<256x256xbf16, #tpu.memory_space<vmem>>, vector<256x256xbf16>
    %c0_4 = arith.constant 0 : index
    %c0_5 = arith.constant 0 : index
    %5 = vector.load %arg3[%c0_4, %c0_5] : memref<256x128xbf16, #tpu.memory_space<vmem>>, vector<256x128xbf16>
    %cst = arith.constant dense<0.000000e+00> : vector<256x128xf32>
    %6 = tpu.matmul %4, %5, %cst {dimension_numbers = #tpu.dot_dimension_numbers<[1], [0], [0], [1], [0, 0, 1, 1], [], []>} : vector<256x256xbf16>, vector<256x128xbf16>, vector<256x128xf32> -> vector<256x128xf32>
    %7 = arith.addf %3, %6 : vector<256x128xf32>
    %c0_6 = arith.constant 0 : index
    %c0_7 = arith.constant 0 : index
    %8 = vector.load %arg6[%c0_6, %c0_7] : memref<256x128xf32, #tpu.memory_space<vmem>>, vector<256x128xf32>
    tpu.vector_store %arg6[%c0_6, %c0_7], %7 {strides = array<i32>} : memref<256x128xf32, #tpu.memory_space<vmem>>, vector<256x128xf32>,
    %c0_i32_8 = arith.constant 0 : i32
    %9 = arith.cmpi eq, %arg1, %c0_i32_8 : i32
    %10 = arith.extui %9 : i1 to i32
    %c0_i32_9 = arith.constant 0 : i32
    %11 = arith.cmpi ne, %10, %c0_i32_9 : i32
    scf.if %11 {
      %c0_10 = arith.constant 0 : index
      %c0_11 = arith.constant 0 : index
      %12 = vector.load %arg6[%c0_10, %c0_11] : memref<256x128xf32, #tpu.memory_space<vmem>>, vector<256x128xf32>
      %c0_12 = arith.constant 0 : index
      %c0_13 = arith.constant 0 : index
      %13 = vector.load %arg4[%c0_12, %c0_13] : memref<1x128xf32, #tpu.memory_space<vmem>>, vector<1x128xf32>
      %14 = vector.broadcast %13 : vector<1x128xf32> to vector<256x128xf32>
      %15 = arith.addf %12, %14 : vector<256x128xf32>
      %cst_14 = arith.constant 0.000000e+00 : f32
      %16 = vector.broadcast %cst_14 : f32 to vector<256x128xf32>
      %17 = arith.cmpf oge, %15, %16 : vector<256x128xf32>
      %cst_15 = arith.constant 2.000000e-01 : f32
      %18 = vector.broadcast %cst_15 : f32 to vector<256x128xf32>
      %19 = arith.mulf %18, %15 : vector<256x128xf32>
      %20 = arith.select %17, %15, %19 : vector<256x128xi1>, vector<256x128xf32>
      %21 = arith.truncf %20 : vector<256x128xf32> to vector<256x128xbf16>
      %c0_16 = arith.constant 0 : index
      %c0_17 = arith.constant 0 : index
      %22 = vector.load %arg5[%c0_16, %c0_17] : memref<256x128xbf16, #tpu.memory_space<vmem>>, vector<256x128xbf16>
      tpu.vector_store %arg5[%c0_16, %c0_17], %21 {strides = array<i32>} : memref<256x128xbf16, #tpu.memory_space<vmem>>, vector<256x128xbf16>,
    } else {
    }
    return
  }
  func.func @transform_0(%arg0: i32, %arg1: i32) -> (i32, i32) {
    %c0_i32 = arith.constant 0 : i32
    return %arg0, %arg1 : i32, i32
  }
  func.func @transform_1(%arg0: i32, %arg1: i32) -> (i32, i32) {
    %c0_i32 = arith.constant 0 : i32
    %c0_i32_0 = arith.constant 0 : i32
    return %arg1, %c0_i32 : i32, i32
  }
  func.func @transform_2(%arg0: i32, %arg1: i32) -> (i32, i32) {
    %c0_i32 = arith.constant 0 : i32
    %c0_i32_0 = arith.constant 0 : i32
    %c0_i32_1 = arith.constant 0 : i32
    return %c0_i32, %c0_i32_0 : i32, i32
  }
  func.func @transform_3(%arg0: i32, %arg1: i32) -> (i32, i32) {
    %c0_i32 = arith.constant 0 : i32
    %c0_i32_0 = arith.constant 0 : i32
    return %arg0, %c0_i32 : i32, i32
  }
}

module attributes {stable_mosaic.version = 11 : i64} {
  func.func @_mm_bias_lrelu_kernel(%arg0: i32, %arg1: i32, %arg2: memref<64x512xbf16, #tpu.memory_space<vmem>>, %arg3: memref<512x128xbf16, #tpu.memory_space<vmem>>, %arg4: memref<1x128xf32, #tpu.memory_space<vmem>>, %arg5: memref<64x128xbf16, #tpu.memory_space<vmem>>, %arg6: memref<64x128xf32, #tpu.memory_space<vmem>>) attributes {dimension_semantics = [#tpu.dimension_semantics<parallel>, #tpu.dimension_semantics<arbitrary>], iteration_bounds = array<i64: 2, 1>, scalar_prefetch = 0 : i64, scratch_operands = 1 : i64, tpu.core_type = #tpu.core_type<tc>, window_params = [{transform_indices = @transform_0, window_bounds = array<i64: 64, 512>}, {transform_indices = @transform_1, window_bounds = array<i64: 512, 128>}, {pipeline_mode = #tpu.pipeline_mode<synchronous>, transform_indices = @transform_2, window_bounds = array<i64: 1, 128>}, {transform_indices = @transform_3, window_bounds = array<i64: 64, 128>}]} {
    %c0_i32 = arith.constant 0 : i32
    %0 = arith.cmpi eq, %arg1, %c0_i32 : i32
    %1 = arith.extui %0 : i1 to i32
    %c0_i32_0 = arith.constant 0 : i32
    %2 = arith.cmpi ne, %1, %c0_i32_0 : i32
    scf.if %2 {
      %cst_10 = arith.constant 0.000000e+00 : f32
      %12 = vector.broadcast %cst_10 : f32 to vector<64x128xf32>
      %c0_11 = arith.constant 0 : index
      %c0_12 = arith.constant 0 : index
      %13 = vector.load %arg6[%c0_11, %c0_12] : memref<64x128xf32, #tpu.memory_space<vmem>>, vector<64x128xf32>
      tpu.vector_store %arg6[%c0_11, %c0_12], %12 {strides = array<i32>} : memref<64x128xf32, #tpu.memory_space<vmem>>, vector<64x128xf32>,
    } else {
    }
    %c0 = arith.constant 0 : index
    %c0_1 = arith.constant 0 : index
    %3 = vector.load %arg6[%c0, %c0_1] : memref<64x128xf32, #tpu.memory_space<vmem>>, vector<64x128xf32>
    %c0_2 = arith.constant 0 : index
    %c0_3 = arith.constant 0 : index
    %4 = vector.load %arg2[%c0_2, %c0_3] : memref<64x512xbf16, #tpu.memory_space<vmem>>, vector<64x512xbf16>
    %c0_4 = arith.constant 0 : index
    %c0_5 = arith.constant 0 : index
    %5 = vector.load %arg3[%c0_4, %c0_5] : memref<512x128xbf16, #tpu.memory_space<vmem>>, vector<512x128xbf16>
    %cst = arith.constant dense<0.000000e+00> : vector<64x128xf32>
    %6 = tpu.matmul %4, %5, %cst {dimension_numbers = #tpu.dot_dimension_numbers<[1], [0], [0], [1], [0, 0, 1, 1], [], []>} : vector<64x512xbf16>, vector<512x128xbf16>, vector<64x128xf32> -> vector<64x128xf32>
    %7 = arith.addf %3, %6 : vector<64x128xf32>
    %c0_6 = arith.constant 0 : index
    %c0_7 = arith.constant 0 : index
    %8 = vector.load %arg6[%c0_6, %c0_7] : memref<64x128xf32, #tpu.memory_space<vmem>>, vector<64x128xf32>
    tpu.vector_store %arg6[%c0_6, %c0_7], %7 {strides = array<i32>} : memref<64x128xf32, #tpu.memory_space<vmem>>, vector<64x128xf32>,
    %c0_i32_8 = arith.constant 0 : i32
    %9 = arith.cmpi eq, %arg1, %c0_i32_8 : i32
    %10 = arith.extui %9 : i1 to i32
    %c0_i32_9 = arith.constant 0 : i32
    %11 = arith.cmpi ne, %10, %c0_i32_9 : i32
    scf.if %11 {
      %c0_10 = arith.constant 0 : index
      %c0_11 = arith.constant 0 : index
      %12 = vector.load %arg6[%c0_10, %c0_11] : memref<64x128xf32, #tpu.memory_space<vmem>>, vector<64x128xf32>
      %c0_12 = arith.constant 0 : index
      %c0_13 = arith.constant 0 : index
      %13 = vector.load %arg4[%c0_12, %c0_13] : memref<1x128xf32, #tpu.memory_space<vmem>>, vector<1x128xf32>
      %14 = vector.broadcast %13 : vector<1x128xf32> to vector<64x128xf32>
      %15 = arith.addf %12, %14 : vector<64x128xf32>
      %cst_14 = arith.constant 0.000000e+00 : f32
      %16 = vector.broadcast %cst_14 : f32 to vector<64x128xf32>
      %17 = arith.cmpf oge, %15, %16 : vector<64x128xf32>
      %cst_15 = arith.constant 2.000000e-01 : f32
      %18 = vector.broadcast %cst_15 : f32 to vector<64x128xf32>
      %19 = arith.mulf %18, %15 : vector<64x128xf32>
      %20 = arith.select %17, %15, %19 : vector<64x128xi1>, vector<64x128xf32>
      %21 = arith.truncf %20 : vector<64x128xf32> to vector<64x128xbf16>
      %c0_16 = arith.constant 0 : index
      %c0_17 = arith.constant 0 : index
      %22 = vector.load %arg5[%c0_16, %c0_17] : memref<64x128xbf16, #tpu.memory_space<vmem>>, vector<64x128xbf16>
      tpu.vector_store %arg5[%c0_16, %c0_17], %21 {strides = array<i32>} : memref<64x128xbf16, #tpu.memory_space<vmem>>, vector<64x128xbf16>,
    } else {
    }
    return
  }
  func.func @transform_0(%arg0: i32, %arg1: i32) -> (i32, i32) {
    %c0_i32 = arith.constant 0 : i32
    return %arg0, %arg1 : i32, i32
  }
  func.func @transform_1(%arg0: i32, %arg1: i32) -> (i32, i32) {
    %c0_i32 = arith.constant 0 : i32
    %c0_i32_0 = arith.constant 0 : i32
    return %arg1, %c0_i32 : i32, i32
  }
  func.func @transform_2(%arg0: i32, %arg1: i32) -> (i32, i32) {
    %c0_i32 = arith.constant 0 : i32
    %c0_i32_0 = arith.constant 0 : i32
    %c0_i32_1 = arith.constant 0 : i32
    return %c0_i32, %c0_i32_0 : i32, i32
  }
  func.func @transform_3(%arg0: i32, %arg1: i32) -> (i32, i32) {
    %c0_i32 = arith.constant 0 : i32
    %c0_i32_0 = arith.constant 0 : i32
    return %arg0, %c0_i32 : i32, i32
  }
}

module attributes {stable_mosaic.version = 11 : i64} {
  func.func @_mm_bias_lrelu_kernel(%arg0: i32, %arg1: i32, %arg2: memref<16x896xbf16, #tpu.memory_space<vmem>>, %arg3: memref<896x128xbf16, #tpu.memory_space<vmem>>, %arg4: memref<1x128xf32, #tpu.memory_space<vmem>>, %arg5: memref<16x128xbf16, #tpu.memory_space<vmem>>, %arg6: memref<16x128xf32, #tpu.memory_space<vmem>>) attributes {dimension_semantics = [#tpu.dimension_semantics<parallel>, #tpu.dimension_semantics<arbitrary>], iteration_bounds = array<i64: 2, 1>, scalar_prefetch = 0 : i64, scratch_operands = 1 : i64, tpu.core_type = #tpu.core_type<tc>, window_params = [{transform_indices = @transform_0, window_bounds = array<i64: 16, 896>}, {transform_indices = @transform_1, window_bounds = array<i64: 896, 128>}, {pipeline_mode = #tpu.pipeline_mode<synchronous>, transform_indices = @transform_2, window_bounds = array<i64: 1, 128>}, {transform_indices = @transform_3, window_bounds = array<i64: 16, 128>}]} {
    %c0_i32 = arith.constant 0 : i32
    %0 = arith.cmpi eq, %arg1, %c0_i32 : i32
    %1 = arith.extui %0 : i1 to i32
    %c0_i32_0 = arith.constant 0 : i32
    %2 = arith.cmpi ne, %1, %c0_i32_0 : i32
    scf.if %2 {
      %cst_10 = arith.constant 0.000000e+00 : f32
      %12 = vector.broadcast %cst_10 : f32 to vector<16x128xf32>
      %c0_11 = arith.constant 0 : index
      %c0_12 = arith.constant 0 : index
      %13 = vector.load %arg6[%c0_11, %c0_12] : memref<16x128xf32, #tpu.memory_space<vmem>>, vector<16x128xf32>
      tpu.vector_store %arg6[%c0_11, %c0_12], %12 {strides = array<i32>} : memref<16x128xf32, #tpu.memory_space<vmem>>, vector<16x128xf32>,
    } else {
    }
    %c0 = arith.constant 0 : index
    %c0_1 = arith.constant 0 : index
    %3 = vector.load %arg6[%c0, %c0_1] : memref<16x128xf32, #tpu.memory_space<vmem>>, vector<16x128xf32>
    %c0_2 = arith.constant 0 : index
    %c0_3 = arith.constant 0 : index
    %4 = vector.load %arg2[%c0_2, %c0_3] : memref<16x896xbf16, #tpu.memory_space<vmem>>, vector<16x896xbf16>
    %c0_4 = arith.constant 0 : index
    %c0_5 = arith.constant 0 : index
    %5 = vector.load %arg3[%c0_4, %c0_5] : memref<896x128xbf16, #tpu.memory_space<vmem>>, vector<896x128xbf16>
    %cst = arith.constant dense<0.000000e+00> : vector<16x128xf32>
    %6 = tpu.matmul %4, %5, %cst {dimension_numbers = #tpu.dot_dimension_numbers<[1], [0], [0], [1], [0, 0, 1, 1], [], []>} : vector<16x896xbf16>, vector<896x128xbf16>, vector<16x128xf32> -> vector<16x128xf32>
    %7 = arith.addf %3, %6 : vector<16x128xf32>
    %c0_6 = arith.constant 0 : index
    %c0_7 = arith.constant 0 : index
    %8 = vector.load %arg6[%c0_6, %c0_7] : memref<16x128xf32, #tpu.memory_space<vmem>>, vector<16x128xf32>
    tpu.vector_store %arg6[%c0_6, %c0_7], %7 {strides = array<i32>} : memref<16x128xf32, #tpu.memory_space<vmem>>, vector<16x128xf32>,
    %c0_i32_8 = arith.constant 0 : i32
    %9 = arith.cmpi eq, %arg1, %c0_i32_8 : i32
    %10 = arith.extui %9 : i1 to i32
    %c0_i32_9 = arith.constant 0 : i32
    %11 = arith.cmpi ne, %10, %c0_i32_9 : i32
    scf.if %11 {
      %c0_10 = arith.constant 0 : index
      %c0_11 = arith.constant 0 : index
      %12 = vector.load %arg6[%c0_10, %c0_11] : memref<16x128xf32, #tpu.memory_space<vmem>>, vector<16x128xf32>
      %c0_12 = arith.constant 0 : index
      %c0_13 = arith.constant 0 : index
      %13 = vector.load %arg4[%c0_12, %c0_13] : memref<1x128xf32, #tpu.memory_space<vmem>>, vector<1x128xf32>
      %14 = vector.broadcast %13 : vector<1x128xf32> to vector<16x128xf32>
      %15 = arith.addf %12, %14 : vector<16x128xf32>
      %cst_14 = arith.constant 0.000000e+00 : f32
      %16 = vector.broadcast %cst_14 : f32 to vector<16x128xf32>
      %17 = arith.cmpf oge, %15, %16 : vector<16x128xf32>
      %cst_15 = arith.constant 2.000000e-01 : f32
      %18 = vector.broadcast %cst_15 : f32 to vector<16x128xf32>
      %19 = arith.mulf %18, %15 : vector<16x128xf32>
      %20 = arith.select %17, %15, %19 : vector<16x128xi1>, vector<16x128xf32>
      %21 = arith.truncf %20 : vector<16x128xf32> to vector<16x128xbf16>
      %c0_16 = arith.constant 0 : index
      %c0_17 = arith.constant 0 : index
      %22 = vector.load %arg5[%c0_16, %c0_17] : memref<16x128xbf16, #tpu.memory_space<vmem>>, vector<16x128xbf16>
      tpu.vector_store %arg5[%c0_16, %c0_17], %21 {strides = array<i32>} : memref<16x128xbf16, #tpu.memory_space<vmem>>, vector<16x128xbf16>,
    } else {
    }
    return
  }
  func.func @transform_0(%arg0: i32, %arg1: i32) -> (i32, i32) {
    %c0_i32 = arith.constant 0 : i32
    return %arg0, %arg1 : i32, i32
  }
  func.func @transform_1(%arg0: i32, %arg1: i32) -> (i32, i32) {
    %c0_i32 = arith.constant 0 : i32
    %c0_i32_0 = arith.constant 0 : i32
    return %arg1, %c0_i32 : i32, i32
  }
  func.func @transform_2(%arg0: i32, %arg1: i32) -> (i32, i32) {
    %c0_i32 = arith.constant 0 : i32
    %c0_i32_0 = arith.constant 0 : i32
    %c0_i32_1 = arith.constant 0 : i32
    return %c0_i32, %c0_i32_0 : i32, i32
  }
  func.func @transform_3(%arg0: i32, %arg1: i32) -> (i32, i32) {
    %c0_i32 = arith.constant 0 : i32
    %c0_i32_0 = arith.constant 0 : i32
    return %arg0, %c0_i32 : i32, i32
  }
}

</mosaic_0001>

<bundles_post_ra>
// kernel: wavegan_discriminator_forward.5
= control target key start
LH: loop header
LB: loop body
LE: loop exit
PB: predicated region body
PF: predicated region fallthrough
CT: control target
= control target key end

     0   :  { %8 = vsyncpa [#allocation4], 0  ;;  %s9426_s0 = inlined_call_operand.vmem [shape: bf16[8192,128], index: 0, kind: input, shape index: {}]   ;;  %s9427_s1 = inlined_call_operand.vmem [shape: bf16[128,128], index: 1, kind: input, shape index: {}]   ;;  %s9428_s2 = inlined_call_operand.vmem [shape: f32[1,128], index: 2, kind: input, shape index: {}]   ;;  %s9429_s3 = inlined_call_operand.hbm [shape: bf16[8192,128], index: 3, kind: output, shape index: {}]  }
   0x1   :  { %10 = vsyncpa [#allocation4 + $0x1], 0  ;;  %s8216_s12 = smov 0   ;;  %s8218_s13 = smov 0  }
   0x2   :  { %s8220_s14 = smov 0   ;;  %s8222_s15 = smov 0  }
   0x3   :  { %s8224_s16 = smov 0   ;;  %s8226_s17 = smov 0  }
   0x4 LB: > { %s6063_s18 = sadd.s32 4294967295, %s8191_s17   ;;  %s6064_s19 = sadd.s32 4294967294, %s8191_s17   ;;  %s8191_s17 = sphi %s8226_s17, %s16_s17   ;;  %s8187_s16 = sphi %s8224_s16, %s9436_s16   ;;  %s8183_s15 = sphi %s8222_s15, %s9435_s15   ;;  %s8179_s14 = sphi %s8220_s14, %s9434_s14   ;;  %s8175_s13 = sphi %s8218_s13, %s9433_s13   ;;  %s8171_s12 = sphi %s8216_s12, %s9432_s12  }
   0x5   : > { %s28_s20 = sadd.s32 1, %s8187_s16  ;;  %s110_s21 = sadd.s32 1, %s8179_s14 }
   0x6   : > { %p30_p0 = scmp.ge.s32.totalorder %s28_s20, 4  ;;  %p120_p1 = scmp.ne.s32.totalorder %s8179_s14, %s8175_s13 }
   0x7   : > { %p121_p2 = scmp.eq.s32.totalorder %s6063_s18, 3  ;;  %p126_p3 = scmp.ne.s32.totalorder %s8175_s13, %s8171_s12 }
   0x8   : > { %s9438_s20 = smov (%p30_p0, %s28_s20), 0  ;;  %p127_p5 = scmp.eq.s32.totalorder %s6064_s19, 3 }
   0x9   : > { %p8256_p4 = por %p121_p2, %p120_p1  ;;  %s107_s23 = ssub.s32 %s8187_s16, %s9438_s20 }
   0xa   : > { %p6068_p6 = scmp.ge.s32.totalorder %s8191_s17, 1  ;;  %p108_p7 = scmp.eq.s32.totalorder %s107_s23, 0 }
   0xb   : > { %p8263_p8 = por %p127_p5, %p126_p3  ;;  %p169_p9 = scmp.lt.s32.totalorder %s8191_s17, 5 }
   0xc   : > { %s8269_s25 = scalar_select %p108_p7, %s8179_s14, %s110_s21  }
   0xd   : > { %p170_p10 = pnand %p6068_p6, %p169_p9 }
   0xe   : > { %v7975_v0 = vld [vmem:[%s9427_s1] sm:$0xff] (!%p170_p10)   ;;  %s6070_s28 = sshll.u32 (!%p170_p10), %s8183_s15, 8  ;;  %v7976_v1 = vld [vmem:[%s9427_s1 + $0x8] sm:$0xff] (!%p170_p10)   ;;  %v7977_v2 = vld [vmem:[%s9427_s1 + $0x10] sm:$0xff] (!%p170_p10)   ;;  %s198_s5 = sand.u32 (!%p170_p10), 1, %s8175_s13  }
   0xf   : > { %173 = sbr.rel (%p170_p10) target bundleno = 567 (0x237), region = 32  ;;  %p202_p11 = scmp.lt.s32.totalorder (!%p170_p10), %s6070_s28, 1023  ;;  %7630 = vmatprep.subr.bf16.mxu0 (!%p170_p10), %v7975_v0  ;;  %7902 = vmatprep.subr.bf16.mxu1 (!%p170_p10), %v7975_v0  ;;  %v7978_v3 = vld [vmem:[%s9427_s1 + $0x18] sm:$0xff] (!%p170_p10)   ;;  %v7979_v6 = vld [vmem:[%s9427_s1 + $0x20] sm:$0xff] (!%p170_p10)   ;;  %v7980_v7 = vld [vmem:[%s9427_s1 + $0x28] sm:$0xff] (!%p170_p10)  }
  0x10   : > { %7631 = vmatpush3.bf16.msra.mxu0 (!%p170_p10), %v7975_v0  ;;  %7910 = vmatpush3.bf16.msra.mxu1 (!%p170_p10), %v7975_v0  ;;  %v7981_v8 = vld [vmem:[%s9427_s1 + $0x30] sm:$0xff] (!%p170_p10)   ;;  %v7982_v9 = vld [vmem:[%s9427_s1 + $0x38] sm:$0xff] (!%p170_p10)   ;;  %s6726_s18 = sshll.u32 (!%p170_p10), %s8183_s15, 14  ;;  %s9380_s26 = scalar_lea.sflag (!%p170_p10), [#allocation4], %s198_s5 }
  0x11   : > { %7632 = vmatprep.subr.bf16.mxu0 (!%p170_p10), %v7976_v1  ;;  %7903 = vmatprep.subr.bf16.mxu1 (!%p170_p10), %v7976_v1  ;;  %s9370_s23 = scalar_lea.hbm (!%p170_p10), %s9429_s3, %s6726_s18 }
  0x14   : > { %7633 = vmatpush3.bf16.msra.mxu0 (!%p170_p10), %v7976_v1  ;;  %7911 = vmatpush3.bf16.msra.mxu1 (!%p170_p10), %v7976_v1 }
  0x15   : > { %7634 = vmatprep.subr.bf16.mxu0 (!%p170_p10), %v7977_v2  ;;  %7904 = vmatprep.subr.bf16.mxu1 (!%p170_p10), %v7977_v2 }
  0x16   : > { %s9440_s28 = smov (!%p202_p11, %s6070_s28), 1023 }
  0x17   : > { %s6071_s6 = sshll.u32 %s9440_s28, 2  ;;  %s8193_s28 = smov [#allocation3]  }
  0x18   : > { %s8284_s9 = scalar_lea.vmem %s9426_s0, %s6071_s6  ;;  %7635 = vmatpush3.bf16.msra.mxu0 %v7977_v2  ;;  %7912 = vmatpush3.bf16.msra.mxu1 %v7977_v2  ;;  %s8429_s6 = sshll.u32 %s198_s5, 10 }
  0x19   : > { %v7983_v4 = vld [vmem:[%s8284_s9] sm:$0xff]   ;;  %7636 = vmatprep.subr.bf16.mxu0 %v7978_v3  ;;  %7905 = vmatprep.subr.bf16.mxu1 %v7978_v3  ;;  %v7985_v10 = vld [vmem:[%s8284_s9 + $0x8] sm:$0xff]   ;;  %v7987_v12 = vld [vmem:[%s8284_s9 + $0x10] sm:$0xff]   ;;  %s8442_s7 = scalar_lea.vmem [#allocation3], %s8429_s6  ;;  %s8117_s29 = sshll.u32 %s8193_s28, 4  ;;  %s8118_s29 = int_to_ptr.vmem [resolvable:$false] %s8117_s29 }
  0x1a   : > { %v7984_v5 = vld [vmem:[%s8284_s9 + $0x200] sm:$0xff]   ;;  %7646 = vmatprep.mubr.bf16.mxu0 %v7983_v4  ;;  %v7986_v11 = vld [vmem:[%s8284_s9 + $0x208] sm:$0xff]   ;;  %v7988_v13 = vld [vmem:[%s8284_s9 + $0x210] sm:$0xff]   ;;  %s5975_s19 = sshll.u32 %s8442_s7, 4  ;;  %s8119_s30 = scalar_lea.vmem %s8118_s29, 32768  ;;  %s9372_s19 = int_to_ptr.vmem [resolvable:$true] %s5975_s19 }
  0x1b   : > { %7774 = vmatprep.mubr.bf16.mxu1 %v7984_v5  ;;  %v7989_v14 = vld [vmem:[%s8284_s9 + $0x18] sm:$0xff]   ;;  %v7991_v16 = vld [vmem:[%s8284_s9 + $0x20] sm:$0xff]   ;;  %v7993_v18 = vld [vmem:[%s8284_s9 + $0x28] sm:$0xff]   ;;  %s8113_s27 = scalar_lea.vmem %s9372_s19, 16384  ;;  %p8120_p1 = scmp.lt.s32.totalorder %s9372_s19, %s8118_s29 }
  0x1c   : > { %7637 = vmatpush3.bf16.msra.mxu0 %v7978_v3  ;;  %7913 = vmatpush3.bf16.msra.mxu1 %v7978_v3  ;;  %v7990_v15 = vld [vmem:[%s8284_s9 + $0x218] sm:$0xff]   ;;  %v7992_v17 = vld [vmem:[%s8284_s9 + $0x220] sm:$0xff]   ;;  %v7994_v19 = vld [vmem:[%s8284_s9 + $0x228] sm:$0xff]   ;;  %p8114_p12 = scmp.ne.s32.totalorder %s9372_s19, %s8113_s27  ;;  %p8121_p2 = scmp.lt.s32.totalorder %s8119_s30, %s8113_s27 }
  0x1d   : > { %7638 = vmatprep.subr.bf16.mxu0 %v7979_v6  ;;  %7906 = vmatprep.subr.bf16.mxu1 %v7979_v6  ;;  %v7995_v20 = vld [vmem:[%s8284_s9 + $0x30] sm:$0xff]   ;;  %v7997_v22 = vld [vmem:[%s8284_s9 + $0x38] sm:$0xff]   ;;  %v7999_v24 = vld [vmem:[%s8284_s9 + $0x40] sm:$0xff]  }
  0x1e   : > { %v7996_v21 = vld [vmem:[%s8284_s9 + $0x230] sm:$0xff]   ;;  %v7998_v23 = vld [vmem:[%s8284_s9 + $0x238] sm:$0xff]   ;;  %v8000_v25 = vld [vmem:[%s8284_s9 + $0x240] sm:$0xff]   ;;  %p8115_p13 = pnand %p8114_p12, %p8256_p4  ;;  %p8122_p3 = por %p8121_p2, %p8120_p1 }
  0x1f   : > { %v8001_v26 = vld [vmem:[%s8284_s9 + $0x48] sm:$0xff]   ;;  %v8003_v28 = vld [vmem:[%s8284_s9 + $0x50] sm:$0xff]   ;;  %v8005_v30 = vld [vmem:[%s8284_s9 + $0x58] sm:$0xff]  }
  0x20   : > { %7639 = vmatpush3.bf16.msra.mxu0 %v7979_v6  ;;  %7914 = vmatpush3.bf16.msra.mxu1 %v7979_v6  ;;  %v8002_v27 = vld [vmem:[%s8284_s9 + $0x248] sm:$0xff]   ;;  %v8004_v29 = vld [vmem:[%s8284_s9 + $0x250] sm:$0xff]   ;;  %v8006_v31 = vld [vmem:[%s8284_s9 + $0x258] sm:$0xff]   ;;  %p8116_p0 = pneg %p8115_p13 }
  0x21   : > { %7640 = vmatprep.subr.bf16.mxu0 %v7980_v7  ;;  %7907 = vmatprep.subr.bf16.mxu1 %v7980_v7  ;;  %v8007_v32 = vld [vmem:[%s8284_s9 + $0x60] sm:$0xff]   ;;  %v8009_v34 = vld [vmem:[%s8284_s9 + $0x68] sm:$0xff]   ;;  %v8011_v36 = vld [vmem:[%s8284_s9 + $0x70] sm:$0xff]  }
  0x22   : > { %v8008_v33 = vld [vmem:[%s8284_s9 + $0x260] sm:$0xff]   ;;  %v8010_v35 = vld [vmem:[%s8284_s9 + $0x268] sm:$0xff]   ;;  %v8012_v37 = vld [vmem:[%s8284_s9 + $0x270] sm:$0xff]   ;;  %p8123_p5 = pnand %p8122_p3, %p8116_p0 }
  0x23   : > { %v8013_v38 = vld [vmem:[%s8284_s9 + $0x78] sm:$0xff]   ;;  %v8015_v40 = vld [vmem:[%s8284_s9 + $0x80] sm:$0xff]   ;;  %v8017_v42 = vld [vmem:[%s8284_s9 + $0x88] sm:$0xff]  }
  0x24   : > { %7641 = vmatpush3.bf16.msra.mxu0 %v7980_v7  ;;  %7915 = vmatpush3.bf16.msra.mxu1 %v7980_v7  ;;  %v8014_v39 = vld [vmem:[%s8284_s9 + $0x278] sm:$0xff]   ;;  %v8016_v41 = vld [vmem:[%s8284_s9 + $0x280] sm:$0xff]   ;;  %v8018_v43 = vld [vmem:[%s8284_s9 + $0x288] sm:$0xff]  }
  0x25   : > { %7642 = vmatprep.subr.bf16.mxu0 %v7981_v8  ;;  %7908 = vmatprep.subr.bf16.mxu1 %v7981_v8  ;;  %v8019_v44 = vld [vmem:[%s8284_s9 + $0x90] sm:$0xff]   ;;  %v8021_v46 = vld [vmem:[%s8284_s9 + $0x98] sm:$0xff]   ;;  %v8023_v48 = vld [vmem:[%s8284_s9 + $0xa0] sm:$0xff]  }
  0x26   : > { %v8020_v45 = vld [vmem:[%s8284_s9 + $0x290] sm:$0xff]   ;;  %v8022_v47 = vld [vmem:[%s8284_s9 + $0x298] sm:$0xff]   ;;  %v8024_v49 = vld [vmem:[%s8284_s9 + $0x2a0] sm:$0xff]  }
  0x27   : > { %v8025_v50 = vld [vmem:[%s8284_s9 + $0xa8] sm:$0xff]   ;;  %v8027_v52 = vld [vmem:[%s8284_s9 + $0xb0] sm:$0xff]   ;;  %v8029_v54 = vld [vmem:[%s8284_s9 + $0xb8] sm:$0xff]  }
  0x28   : > { %7643 = vmatpush3.bf16.msra.mxu0 %v7981_v8  ;;  %7916 = vmatpush3.bf16.msra.mxu1 %v7981_v8  ;;  %v8026_v51 = vld [vmem:[%s8284_s9 + $0x2a8] sm:$0xff]   ;;  %v8028_v53 = vld [vmem:[%s8284_s9 + $0x2b0] sm:$0xff]   ;;  %v8030_v55 = vld [vmem:[%s8284_s9 + $0x2b8] sm:$0xff]  }
  0x29   : > { %7644 = vmatprep.subr.bf16.mxu0 %v7982_v9  ;;  %7909 = vmatprep.subr.bf16.mxu1 %v7982_v9  ;;  %v8031_v56 = vld [vmem:[%s8284_s9 + $0xc0] sm:$0xff]   ;;  %v8033_v58 = vld [vmem:[%s8284_s9 + $0xc8] sm:$0xff]   ;;  %v8035_v60 = vld [vmem:[%s8284_s9 + $0xd0] sm:$0xff]  }
  0x2a   : > { %v8032_v57 = vld [vmem:[%s8284_s9 + $0x2c0] sm:$0xff]   ;;  %v8034_v59 = vld [vmem:[%s8284_s9 + $0x2c8] sm:$0xff]   ;;  %v8036_v61 = vld [vmem:[%s8284_s9 + $0x2d0] sm:$0xff]  }
  0x2b   : > { %v8037_v62 = vld [vmem:[%s8284_s9 + $0xd8] sm:$0xff]   ;;  %v8039_v0 = vld [vmem:[%s8284_s9 + $0xe0] sm:$0xff]   ;;  %v8041_v2 = vld [vmem:[%s8284_s9 + $0xe8] sm:$0xff]  }
  0x2c   : > { %7645 = vmatpush3.bf16.msra.mxu0 %v7982_v9  ;;  %7917 = vmatpush3.bf16.msra.mxu1 %v7982_v9  ;;  %v8038_v63 = vld [vmem:[%s8284_s9 + $0x2d8] sm:$0xff]   ;;  %v8040_v1 = vld [vmem:[%s8284_s9 + $0x2e0] sm:$0xff]   ;;  %v8042_v3 = vld [vmem:[%s8284_s9 + $0x2e8] sm:$0xff]  }
  0x2d   : > { %v8043_v4 = vld [vmem:[%s8284_s9 + $0xf0] sm:$0xff]   ;;  %v8045_v6 = vld [vmem:[%s8284_s9 + $0xf8] sm:$0xff]   ;;  %v8047_v8 = vld [vmem:[%s8284_s9 + $0x100] sm:$0xff]  }
  0x2e   : > { %v8044_v5 = vld [vmem:[%s8284_s9 + $0x2f0] sm:$0xff]   ;;  %v8046_v7 = vld [vmem:[%s8284_s9 + $0x2f8] sm:$0xff]   ;;  %v8048_v9 = vld [vmem:[%s8284_s9 + $0x300] sm:$0xff]  }
  0x2f   : > { %7647 = vmatmul.mubr.bf16.vlgmr.msra.gmra.mrb[0].mxu0 %v7985_v10  ;;  %7775 = vmatmul.mubr.bf16.vlgmr.msra.gmra.mrb[0].mxu1 %v7986_v11  ;;  %v8049_v10 = vld [vmem:[%s8284_s9 + $0x108] sm:$0xff]  }
  0x30   : > { %7650 = vmatprep.mubr.bf16.mxu0 %v7987_v12  ;;  %7778 = vmatprep.mubr.bf16.mxu1 %v7988_v13  ;;  %v8050_v11 = vld [vmem:[%s8284_s9 + $0x308] sm:$0xff]   ;;  %v8051_v12 = vld [vmem:[%s8284_s9 + $0x110] sm:$0xff]  }
  0x31   : > { %v8052_v13 = vld [vmem:[%s8284_s9 + $0x310] sm:$0xff]  }
  0x37   : > { %7651 = vmatmul.mubr.bf16.gmra.mrb[4].mxu0 %v7989_v14  ;;  %7779 = vmatmul.mubr.bf16.gmra.mrb[4].mxu1 %v7990_v15  ;;  %v8053_v14 = vld [vmem:[%s8284_s9 + $0x118] sm:$0xff]  }
  0x38   : > { %7654 = vmatprep.mubr.bf16.mxu0 %v7991_v16  ;;  %7782 = vmatprep.mubr.bf16.mxu1 %v7992_v17  ;;  %v8054_v15 = vld [vmem:[%s8284_s9 + $0x318] sm:$0xff]   ;;  %v8055_v16 = vld [vmem:[%s8284_s9 + $0x120] sm:$0xff]  }
  0x39   : > { %v8056_v17 = vld [vmem:[%s8284_s9 + $0x320] sm:$0xff]  }
  0x3f   : > { %7655 = vmatmul.mubr.bf16.gmra.mrb[8].mxu0 %v7993_v18  ;;  %7783 = vmatmul.mubr.bf16.gmra.mrb[8].mxu1 %v7994_v19  ;;  %v8057_v18 = vld [vmem:[%s8284_s9 + $0x128] sm:$0xff]  }
  0x40   : > { %7658 = vmatprep.mubr.bf16.mxu0 %v7995_v20  ;;  %7786 = vmatprep.mubr.bf16.mxu1 %v7996_v21  ;;  %v8058_v19 = vld [vmem:[%s8284_s9 + $0x328] sm:$0xff]   ;;  %v8059_v20 = vld [vmem:[%s8284_s9 + $0x130] sm:$0xff]  }
  0x41   : > { %v8060_v21 = vld [vmem:[%s8284_s9 + $0x330] sm:$0xff]  }
  0x47   : > { %7659 = vmatmul.mubr.bf16.gmra.mrb[12].mxu0 %v7997_v22  ;;  %7787 = vmatmul.mubr.bf16.gmra.mrb[12].mxu1 %v7998_v23  ;;  %v8061_v22 = vld [vmem:[%s8284_s9 + $0x138] sm:$0xff]  }
  0x48   : > { %7662 = vmatprep.mubr.bf16.mxu0 %v7999_v24  ;;  %7790 = vmatprep.mubr.bf16.mxu1 %v8000_v25  ;;  %v8062_v23 = vld [vmem:[%s8284_s9 + $0x338] sm:$0xff]   ;;  %v8063_v24 = vld [vmem:[%s8284_s9 + $0x140] sm:$0xff]  }
  0x49   : > { %v8064_v25 = vld [vmem:[%s8284_s9 + $0x340] sm:$0xff]  }
  0x4f   : > { %7663 = vmatmul.mubr.bf16.gmra.mrb[16].mxu0 %v8001_v26  ;;  %7791 = vmatmul.mubr.bf16.gmra.mrb[16].mxu1 %v8002_v27  ;;  %v8065_v26 = vld [vmem:[%s8284_s9 + $0x148] sm:$0xff]  }
  0x50   : > { %7666 = vmatprep.mubr.bf16.mxu0 %v8003_v28  ;;  %7794 = vmatprep.mubr.bf16.mxu1 %v8004_v29  ;;  %v8066_v27 = vld [vmem:[%s8284_s9 + $0x348] sm:$0xff]   ;;  %v8067_v28 = vld [vmem:[%s8284_s9 + $0x150] sm:$0xff]  }
  0x51   : > { %v8068_v29 = vld [vmem:[%s8284_s9 + $0x350] sm:$0xff]  }
  0x57   : > { %7667 = vmatmul.mubr.bf16.gmra.mrb[20].mxu0 %v8005_v30  ;;  %7795 = vmatmul.mubr.bf16.gmra.mrb[20].mxu1 %v8006_v31  ;;  %v8069_v30 = vld [vmem:[%s8284_s9 + $0x158] sm:$0xff]  }
  0x58   : > { %7670 = vmatprep.mubr.bf16.mxu0 %v8007_v32  ;;  %7798 = vmatprep.mubr.bf16.mxu1 %v8008_v33  ;;  %v8070_v31 = vld [vmem:[%s8284_s9 + $0x358] sm:$0xff]   ;;  %v8071_v32 = vld [vmem:[%s8284_s9 + $0x160] sm:$0xff]  }
  0x59   : > { %v8072_v33 = vld [vmem:[%s8284_s9 + $0x360] sm:$0xff]  }
  0x5f   : > { %7671 = vmatmul.mubr.bf16.gmra.mrb[24].mxu0 %v8009_v34  ;;  %7799 = vmatmul.mubr.bf16.gmra.mrb[24].mxu1 %v8010_v35  ;;  %v8073_v34 = vld [vmem:[%s8284_s9 + $0x168] sm:$0xff]  }
  0x60   : > { %7674 = vmatprep.mubr.bf16.mxu0 %v8011_v36  ;;  %7802 = vmatprep.mubr.bf16.mxu1 %v8012_v37  ;;  %v8074_v35 = vld [vmem:[%s8284_s9 + $0x368] sm:$0xff]   ;;  %v8075_v36 = vld [vmem:[%s8284_s9 + $0x170] sm:$0xff]  }
  0x61   : > { %v8076_v37 = vld [vmem:[%s8284_s9 + $0x370] sm:$0xff]  }
  0x67   : > { %7675 = vmatmul.mubr.bf16.gmra.mrb[28].mxu0 %v8013_v38  ;;  %7803 = vmatmul.mubr.bf16.gmra.mrb[28].mxu1 %v8014_v39  ;;  %v8077_v38 = vld [vmem:[%s8284_s9 + $0x178] sm:$0xff]  }
  0x68   : > { %7678 = vmatprep.mubr.bf16.mxu0 %v8015_v40  ;;  %7806 = vmatprep.mubr.bf16.mxu1 %v8016_v41  ;;  %v8078_v39 = vld [vmem:[%s8284_s9 + $0x378] sm:$0xff]   ;;  %v8079_v40 = vld [vmem:[%s8284_s9 + $0x180] sm:$0xff]  }
  0x69   : > { %v8080_v41 = vld [vmem:[%s8284_s9 + $0x380] sm:$0xff]  }
  0x6f   : > { %7679 = vmatmul.mubr.bf16.gmra.mrb[32].mxu0 %v8017_v42  ;;  %7807 = vmatmul.mubr.bf16.gmra.mrb[32].mxu1 %v8018_v43  ;;  %v8081_v42 = vld [vmem:[%s8284_s9 + $0x188] sm:$0xff]  }
  0x70   : > { %7682 = vmatprep.mubr.bf16.mxu0 %v8019_v44  ;;  %7810 = vmatprep.mubr.bf16.mxu1 %v8020_v45  ;;  %v8082_v43 = vld [vmem:[%s8284_s9 + $0x388] sm:$0xff]   ;;  %v8083_v44 = vld [vmem:[%s8284_s9 + $0x190] sm:$0xff]  }
  0x71   : > { %v8084_v45 = vld [vmem:[%s8284_s9 + $0x390] sm:$0xff]  }
  0x77   : > { %7683 = vmatmul.mubr.bf16.gmra.mrb[36].mxu0 %v8021_v46  ;;  %7811 = vmatmul.mubr.bf16.gmra.mrb[36].mxu1 %v8022_v47  ;;  %v8085_v46 = vld [vmem:[%s8284_s9 + $0x198] sm:$0xff]  }
  0x78   : > { %7686 = vmatprep.mubr.bf16.mxu0 %v8023_v48  ;;  %7814 = vmatprep.mubr.bf16.mxu1 %v8024_v49  ;;  %v8086_v47 = vld [vmem:[%s8284_s9 + $0x398] sm:$0xff]   ;;  %v8087_v48 = vld [vmem:[%s8284_s9 + $0x1a0] sm:$0xff]  }
  0x79   : > { %v8088_v49 = vld [vmem:[%s8284_s9 + $0x3a0] sm:$0xff]  }
  0x7f   : > { %7687 = vmatmul.mubr.bf16.gmra.mrb[40].mxu0 %v8025_v50  ;;  %7815 = vmatmul.mubr.bf16.gmra.mrb[40].mxu1 %v8026_v51  ;;  %v8089_v50 = vld [vmem:[%s8284_s9 + $0x1a8] sm:$0xff]  }
  0x80   : > { %7690 = vmatprep.mubr.bf16.mxu0 %v8027_v52  ;;  %7818 = vmatprep.mubr.bf16.mxu1 %v8028_v53  ;;  %v8090_v51 = vld [vmem:[%s8284_s9 + $0x3a8] sm:$0xff]   ;;  %v8091_v52 = vld [vmem:[%s8284_s9 + $0x1b0] sm:$0xff]  }
  0x81   : > { %v8092_v53 = vld [vmem:[%s8284_s9 + $0x3b0] sm:$0xff]  }
  0x87   : > { %7691 = vmatmul.mubr.bf16.gmra.mrb[44].mxu0 %v8029_v54  ;;  %7819 = vmatmul.mubr.bf16.gmra.mrb[44].mxu1 %v8030_v55  ;;  %v8414_v54 = vld [vmem:[%s9428_s2] ss:$0 sm:$0xff] }
  0x88   : > { %7694 = vmatprep.mubr.bf16.mxu0 %v8031_v56  ;;  %7822 = vmatprep.mubr.bf16.mxu1 %v8032_v57 }
  0x8f   : > { %7695 = vmatmul.mubr.bf16.gmra.mrb[48].mxu0 %v8033_v58  ;;  %7823 = vmatmul.mubr.bf16.gmra.mrb[48].mxu1 %v8034_v59 }
  0x90   : > { %7698 = vmatprep.mubr.bf16.mxu0 %v8035_v60  ;;  %7826 = vmatprep.mubr.bf16.mxu1 %v8036_v61  ;;  %v8093_v61 = vld [vmem:[%s8284_s9 + $0x1b8] sm:$0xff]  }
  0x97   : > { %7699 = vmatmul.mubr.bf16.gmra.mrb[52].mxu0 %v8037_v62  ;;  %7827 = vmatmul.mubr.bf16.gmra.mrb[52].mxu1 %v8038_v63 }
  0x98   : > { %7702 = vmatprep.mubr.bf16.mxu0 %v8039_v0  ;;  %7830 = vmatprep.mubr.bf16.mxu1 %v8040_v1 }
  0x9f   : > { %7703 = vmatmul.mubr.bf16.gmra.mrb[56].mxu0 %v8041_v2  ;;  %7831 = vmatmul.mubr.bf16.gmra.mrb[56].mxu1 %v8042_v3  ;;  %v8094_v2 = vld [vmem:[%s8284_s9 + $0x3b8] sm:$0xff]   ;;  %v8095_v3 = vld [vmem:[%s8284_s9 + $0x1c0] sm:$0xff]  }
  0xa0   : > { %7706 = vmatprep.mubr.bf16.mxu0 %v8043_v4  ;;  %7834 = vmatprep.mubr.bf16.mxu1 %v8044_v5  ;;  %v8096_v4 = vld [vmem:[%s8284_s9 + $0x3c0] sm:$0xff]  }
  0xa7   : > { %7707 = vmatmul.mubr.bf16.gmra.mrb[60].mxu0 %v8045_v6  ;;  %7835 = vmatmul.mubr.bf16.gmra.mrb[60].mxu1 %v8046_v7 }
  0xa8   : > { %7710 = vmatprep.mubr.bf16.mxu0 %v8047_v8  ;;  %7838 = vmatprep.mubr.bf16.mxu1 %v8048_v9 }
  0xaf   : > { %7711 = vmatmul.mubr.bf16.gmra.mrb[64].mxu0 %v8049_v10  ;;  %7839 = vmatmul.mubr.bf16.gmra.mrb[64].mxu1 %v8050_v11 }
  0xb0   : > { %7714 = vmatprep.mubr.bf16.mxu0 %v8051_v12  ;;  %7842 = vmatprep.mubr.bf16.mxu1 %v8052_v13 }
  0xb7   : > { %7715 = vmatmul.mubr.bf16.gmra.mrb[68].mxu0 %v8053_v14  ;;  %7843 = vmatmul.mubr.bf16.gmra.mrb[68].mxu1 %v8054_v15 }
  0xb8   : > { %7718 = vmatprep.mubr.bf16.mxu0 %v8055_v16  ;;  %7846 = vmatprep.mubr.bf16.mxu1 %v8056_v17 }
  0xbf   : > { %7719 = vmatmul.mubr.bf16.gmra.mrb[72].mxu0 %v8057_v18  ;;  %7847 = vmatmul.mubr.bf16.gmra.mrb[72].mxu1 %v8058_v19 }
  0xc0   : > { %7722 = vmatprep.mubr.bf16.mxu0 %v8059_v20  ;;  %7850 = vmatprep.mubr.bf16.mxu1 %v8060_v21 }
  0xc7   : > { %7723 = vmatmul.mubr.bf16.gmra.mrb[76].mxu0 %v8061_v22  ;;  %7851 = vmatmul.mubr.bf16.gmra.mrb[76].mxu1 %v8062_v23 }
  0xc8   : > { %7726 = vmatprep.mubr.bf16.mxu0 %v8063_v24  ;;  %7854 = vmatprep.mubr.bf16.mxu1 %v8064_v25 }
  0xcf   : > { %7727 = vmatmul.mubr.bf16.gmra.mrb[80].mxu0 %v8065_v26  ;;  %7855 = vmatmul.mubr.bf16.gmra.mrb[80].mxu1 %v8066_v27  ;;  %v8097_v27 = vld [vmem:[%s8284_s9 + $0x1c8] sm:$0xff]  }
  0xd0   : > { %7730 = vmatprep.mubr.bf16.mxu0 %v8067_v28  ;;  %7858 = vmatprep.mubr.bf16.mxu1 %v8068_v29 }
  0xd7   : > { %7731 = vmatmul.mubr.bf16.gmra.mrb[84].mxu0 %v8069_v30  ;;  %7859 = vmatmul.mubr.bf16.gmra.mrb[84].mxu1 %v8070_v31 }
  0xd8   : > { %7734 = vmatprep.mubr.bf16.mxu0 %v8071_v32  ;;  %7862 = vmatprep.mubr.bf16.mxu1 %v8072_v33 }
  0xdf   : > { %7735 = vmatmul.mubr.bf16.gmra.mrb[88].mxu0 %v8073_v34  ;;  %7863 = vmatmul.mubr.bf16.gmra.mrb[88].mxu1 %v8074_v35  ;;  %v8098_v34 = vld [vmem:[%s8284_s9 + $0x3c8] sm:$0xff]   ;;  %v8099_v35 = vld [vmem:[%s8284_s9 + $0x1d0] sm:$0xff]  }
  0xe0   : > { %7738 = vmatprep.mubr.bf16.mxu0 %v8075_v36  ;;  %7866 = vmatprep.mubr.bf16.mxu1 %v8076_v37 }
  0xe7   : > { %7739 = vmatmul.mubr.bf16.gmra.mrb[92].mxu0 %v8077_v38  ;;  %7867 = vmatmul.mubr.bf16.gmra.mrb[92].mxu1 %v8078_v39 }
  0xe8   : > { %7742 = vmatprep.mubr.bf16.mxu0 %v8079_v40  ;;  %7870 = vmatprep.mubr.bf16.mxu1 %v8080_v41 }
  0xef   : > { %7743 = vmatmul.mubr.bf16.gmra.mrb[96].mxu0 %v8081_v42  ;;  %7871 = vmatmul.mubr.bf16.gmra.mrb[96].mxu1 %v8082_v43  ;;  %v8100_v42 = vld [vmem:[%s8284_s9 + $0x3d0] sm:$0xff]  }
  0xf0   : > { %7746 = vmatprep.mubr.bf16.mxu0 %v8083_v44  ;;  %7874 = vmatprep.mubr.bf16.mxu1 %v8084_v45 }
  0xf7   : > { %7747 = vmatmul.mubr.bf16.gmra.mrb[100].mxu0 %v8085_v46  ;;  %7875 = vmatmul.mubr.bf16.gmra.mrb[100].mxu1 %v8086_v47 }
  0xf8   : > { %7750 = vmatprep.mubr.bf16.mxu0 %v8087_v48  ;;  %7878 = vmatprep.mubr.bf16.mxu1 %v8088_v49 }
  0xff   : > { %7751 = vmatmul.mubr.bf16.gmra.mrb[104].mxu0 %v8089_v50  ;;  %7879 = vmatmul.mubr.bf16.gmra.mrb[104].mxu1 %v8090_v51 }
 0x100   : > { %7754 = vmatprep.mubr.bf16.mxu0 %v8091_v52  ;;  %7882 = vmatprep.mubr.bf16.mxu1 %v8092_v53 }
 0x102   : > { %v7648_v55 = vpop.f32.mrb[0].mxu0  ;;  %v7776_v56 = vpop.f32.mrb[0].mxu1 }
 0x103   : > { %v3659_v57 = vadd.f32 %v7648_v55, %v8414_v54  ;;  %v3787_v58 = vadd.f32 %v7776_v56, %v8414_v54  ;;  %v1856_v59 = vpop.f32.mrb[1].mxu0  ;;  %v2368_v60 = vpop.f32.mrb[1].mxu1 }
 0x104   : > { %v3657_v62 = vadd.f32 %v8414_v54, %v1856_v59  ;;  %v3785_v63 = vadd.f32 %v8414_v54, %v2368_v60  ;;  %v7649_v0 = vpop.f32.mrb[2].mxu0  ;;  %v7777_v1 = vpop.f32.mrb[2].mxu1 }
 0x105   : > { %vm3915_vm0 = vcmp.ge.f32.partialorder %v3659_v57, 0.0  ;;  %v4171_v5 = vmul.f32 0.2, %v3659_v57  ;;  %vm4043_vm1 = vcmp.ge.f32.partialorder %v3787_v58, 0.0  ;;  %v4299_v6 = vmul.f32 0.2, %v3787_v58 }
 0x106   : > { %vm3913_vm2 = vcmp.ge.f32.partialorder %v3657_v62, 0.0  ;;  %v4169_v7 = vmul.f32 0.2, %v3657_v62  ;;  %vm4041_vm3 = vcmp.ge.f32.partialorder %v3785_v63, 0.0  ;;  %v4297_v8 = vmul.f32 0.2, %v3785_v63 }
 0x107   : > { %v3660_v9 = vadd.f32 %v7649_v0, %v8414_v54  ;;  %v3788_v10 = vadd.f32 %v7777_v1, %v8414_v54  ;;  %v1859_v11 = vpop.f32.mrb[3].mxu0  ;;  %v2371_v12 = vpop.f32.mrb[3].mxu1  ;;  %7755 = vmatmul.mubr.bf16.gmra.mrb[108].mxu0 %v8093_v61  ;;  %v4427_v13 = vsel %vm3915_vm0, %v3659_v57, %v4171_v5  ;;  %v4555_v14 = vsel %vm4043_vm1, %v3787_v58, %v4299_v6 }
 0x108   : > { %v3658_v15 = vadd.f32 %v8414_v54, %v1859_v11  ;;  %v3786_v16 = vadd.f32 %v8414_v54, %v2371_v12  ;;  %7883 = vmatmul.mubr.bf16.gmra.mrb[108].mxu1 %v8094_v2  ;;  %7758 = vmatprep.mubr.bf16.mxu0 %v8095_v3  ;;  %v4425_v21 = vsel %vm3913_vm2, %v3657_v62, %v4169_v7  ;;  %v8102_v11 = vld [vmem:[%s8284_s9 + $0x3d8] sm:$0xff]   ;;  %v8103_v12 = vld [vmem:[%s8284_s9 + $0x1e0] sm:$0xff]  }
 0x109   : > { %vm3916_vm4 = vcmp.ge.f32.partialorder %v3660_v9, 0.0  ;;  %v4172_v17 = vmul.f32 0.2, %v3660_v9  ;;  %vm4044_vm5 = vcmp.ge.f32.partialorder %v3788_v10, 0.0  ;;  %v4300_v18 = vmul.f32 0.2, %v3788_v10  ;;  %7886 = vmatprep.mubr.bf16.mxu1 %v8096_v4 }
 0x10a   : > { %vm3914_vm6 = vcmp.ge.f32.partialorder %v3658_v15, 0.0  ;;  %v4170_v19 = vmul.f32 0.2, %v3658_v15  ;;  %vm4042_vm7 = vcmp.ge.f32.partialorder %v3786_v16, 0.0  ;;  %v4298_v20 = vmul.f32 0.2, %v3786_v16 }
 0x10b   : > { %v4553_v22 = vsel %vm4041_vm3, %v3785_v63, %v4297_v8  ;;  %v4428_v23 = vsel %vm3916_vm4, %v3660_v9, %v4172_v17  ;;  %v4556_v24 = vsel %vm4044_vm5, %v3788_v10, %v4300_v18  ;;  %v7652_v25 = vpop.f32.mrb[4].mxu0  ;;  %v7780_v26 = vpop.f32.mrb[4].mxu1  ;;  %v8101_v4 = vld [vmem:[%s8284_s9 + $0x1d8] sm:$0xff]  }
 0x10c   : > { %v6735_v28 = vpack.c.bf16 %v4428_v23, %v4427_v13  ;;  %v7055_v29 = vpack.c.bf16 %v4556_v24, %v4555_v14  ;;  %v4426_v30 = vsel %vm3914_vm6, %v3658_v15, %v4170_v19  ;;  %v4554_v31 = vsel %vm4042_vm7, %v3786_v16, %v4298_v20  ;;  %v1872_v32 = vpop.f32.mrb[5].mxu0  ;;  %v2384_v33 = vpop.f32.mrb[5].mxu1  ;;  %v8104_v13 = vld [vmem:[%s8284_s9 + $0x3e0] sm:$0xff]  }
 0x10d   : > { %v6730_v36 = vpack.c.bf16 %v4426_v30, %v4425_v21  ;;  %v7050_v37 = vpack.c.bf16 %v4554_v31, %v4553_v22  ;;  %v3663_v38 = vadd.f32 %v7652_v25, %v8414_v54  ;;  %v3791_v39 = vadd.f32 %v7780_v26, %v8414_v54  ;;  %v7653_v40 = vpop.f32.mrb[6].mxu0  ;;  %v7781_v41 = vpop.f32.mrb[6].mxu1  ;;  %v8105_v31 = vld [vmem:[%s8284_s9 + $0x1e8] sm:$0xff]  }
 0x10e   : > { %7367 = vst [vmem:[%s8442_s7 + $0x8] sm:$0xff] %v6735_v28   ;;  %7431 = vst [vmem:[%s8442_s7 + $0x208] sm:$0xff] %v7055_v29   ;;  %v3661_v43 = vadd.f32 %v8414_v54, %v1872_v32  ;;  %v3789_v44 = vadd.f32 %v8414_v54, %v2384_v33  ;;  %v3664_v45 = vadd.f32 %v7653_v40, %v8414_v54  ;;  %v1875_v47 = vpop.f32.mrb[7].mxu0  ;;  %v2387_v48 = vpop.f32.mrb[7].mxu1 }
 0x10f   : > { %v3792_v46 = vadd.f32 %v7781_v41, %v8414_v54  ;;  %6731 = vst [vmem:[%s8442_s7] sm:$0xff] %v6730_v36   ;;  %7430 = vst [vmem:[%s8442_s7 + $0x200] sm:$0xff] %v7050_v37   ;;  %vm3919_vm8 = vcmp.ge.f32.partialorder %v3663_v38, 0.0  ;;  %v4175_v49 = vmul.f32 0.2, %v3663_v38  ;;  %vm4047_vm9 = vcmp.ge.f32.partialorder %v3791_v39, 0.0  ;;  %7759 = vmatmul.mubr.bf16.gmra.mrb[112].mxu0 %v8097_v27  ;;  %v8106_v37 = vld [vmem:[%s8284_s9 + $0x3e8] sm:$0xff]  }
 0x110   : > { %v4303_v50 = vmul.f32 0.2, %v3791_v39  ;;  %vm3917_vm10 = vcmp.ge.f32.partialorder %v3661_v43, 0.0  ;;  %v4173_v51 = vmul.f32 0.2, %v3661_v43  ;;  %vm4045_vm11 = vcmp.ge.f32.partialorder %v3789_v44, 0.0  ;;  %7887 = vmatmul.mubr.bf16.gmra.mrb[112].mxu1 %v8098_v34  ;;  %7762 = vmatprep.mubr.bf16.mxu0 %v8099_v35 }
 0x111   : > { %v4301_v52 = vmul.f32 0.2, %v3789_v44  ;;  %v4431_v53 = vsel %vm3919_vm8, %v3663_v38, %v4175_v49  ;;  %vm3920_vm12 = vcmp.ge.f32.partialorder %v3664_v45, 0.0  ;;  %v4176_v56 = vmul.f32 0.2, %v3664_v45  ;;  %7890 = vmatprep.mubr.bf16.mxu1 %v8100_v42 }
 0x112   : > { %v4559_v55 = vsel %vm4047_vm9, %v3791_v39, %v4303_v50  ;;  %v4429_v57 = vsel %vm3917_vm10, %v3661_v43, %v4173_v51  ;;  %vm4048_vm13 = vcmp.ge.f32.partialorder %v3792_v46, 0.0  ;;  %v4304_v59 = vmul.f32 0.2, %v3792_v46  ;;  %v7656_v60 = vpop.f32.mrb[8].mxu0  ;;  %v7784_v61 = vpop.f32.mrb[8].mxu1  ;;  %v8107_v43 = vld [vmem:[%s8284_s9 + $0x1f0] sm:$0xff]  }
 0x113   : > { %v4557_v58 = vsel %vm4045_vm11, %v3789_v44, %v4301_v52  ;;  %v4432_v62 = vsel %vm3920_vm12, %v3664_v45, %v4176_v56  ;;  %v3662_v63 = vadd.f32 %v8414_v54, %v1875_v47  ;;  %v3790_v0 = vadd.f32 %v8414_v54, %v2387_v48  ;;  %v1888_v2 = vpop.f32.mrb[9].mxu0  ;;  %v2400_v3 = vpop.f32.mrb[9].mxu1  ;;  %v8108_v44 = vld [vmem:[%s8284_s9 + $0x3f0] sm:$0xff]  }
 0x114   : > { %v3667_v1 = vadd.f32 %v7656_v60, %v8414_v54  ;;  %v6745_v5 = vpack.c.bf16 %v4432_v62, %v4431_v53  ;;  %v4560_v6 = vsel %vm4048_vm13, %v3792_v46, %v4304_v59  ;;  %v3795_v7 = vadd.f32 %v7784_v61, %v8414_v54  ;;  %v7657_v9 = vpop.f32.mrb[10].mxu0  ;;  %v7785_v10 = vpop.f32.mrb[10].mxu1 }
 0x115   : > { %v3665_v8 = vadd.f32 %v8414_v54, %v1888_v2  ;;  %v7065_v14 = vpack.c.bf16 %v4560_v6, %v4559_v55  ;;  %vm3918_vm14 = vcmp.ge.f32.partialorder %v3662_v63, 0.0  ;;  %v4174_v15 = vmul.f32 0.2, %v3662_v63  ;;  %v1891_v16 = vpop.f32.mrb[11].mxu0  ;;  %v2403_v17 = vpop.f32.mrb[11].mxu1 }
 0x116   : > { %vm4046_vm15 = vcmp.ge.f32.partialorder %v3790_v0, 0.0  ;;  %7369 = vst [vmem:[%s8442_s7 + $0x18] sm:$0xff] %v6745_v5   ;;  %v4302_v18 = vmul.f32 0.2, %v3790_v0  ;;  %vm3923_vm0 = vcmp.ge.f32.partialorder %v3667_v1, 0.0  ;;  %vm4051_vm1 = vcmp.ge.f32.partialorder %v3795_v7, 0.0 }
 0x117   : > { %v4179_v19 = vmul.f32 0.2, %v3667_v1  ;;  %7433 = vst [vmem:[%s8442_s7 + $0x218] sm:$0xff] %v7065_v14   ;;  %v4430_v20 = vsel %vm3918_vm14, %v3662_v63, %v4174_v15  ;;  %v4307_v21 = vmul.f32 0.2, %v3795_v7  ;;  %vm3921_vm2 = vcmp.ge.f32.partialorder %v3665_v8, 0.0  ;;  %7763 = vmatmul.mubr.bf16.gmra.mrb[116].mxu0 %v8101_v4 }
 0x118   : > { %v4177_v22 = vmul.f32 0.2, %v3665_v8  ;;  %v6740_v23 = vpack.c.bf16 %v4430_v20, %v4429_v57  ;;  %v4558_v24 = vsel %vm4046_vm15, %v3790_v0, %v4302_v18  ;;  %v3793_v26 = vadd.f32 %v8414_v54, %v2400_v3  ;;  %7891 = vmatmul.mubr.bf16.gmra.mrb[116].mxu1 %v8102_v11  ;;  %7766 = vmatprep.mubr.bf16.mxu0 %v8103_v12  ;;  %v8109_v5 = vld [vmem:[%s8284_s9 + $0x1f8] sm:$0xff]  }
 0x119   : > { %v4435_v25 = vsel %vm3923_vm0, %v3667_v1, %v4179_v19  ;;  %v7060_v27 = vpack.c.bf16 %v4558_v24, %v4557_v58  ;;  %v4563_v28 = vsel %vm4051_vm1, %v3795_v7, %v4307_v21  ;;  %v3668_v30 = vadd.f32 %v7657_v9, %v8414_v54  ;;  %7894 = vmatprep.mubr.bf16.mxu1 %v8104_v13  ;;  %v8110_v11 = vld [vmem:[%s8284_s9 + $0x3f8] sm:$0xff]  }
 0x11a   : > { %v4433_v29 = vsel %vm3921_vm2, %v3665_v8, %v4177_v22  ;;  %7368 = vst [vmem:[%s8442_s7 + $0x10] sm:$0xff] %v6740_v23   ;;  %vm4049_vm3 = vcmp.ge.f32.partialorder %v3793_v26, 0.0  ;;  %v4305_v32 = vmul.f32 0.2, %v3793_v26  ;;  %v3796_v33 = vadd.f32 %v7785_v10, %v8414_v54  ;;  %v7660_v35 = vpop.f32.mrb[12].mxu0  ;;  %v7788_v36 = vpop.f32.mrb[12].mxu1 }
 0x11b   : > { %v3666_v34 = vadd.f32 %v8414_v54, %v1891_v16  ;;  %7432 = vst [vmem:[%s8442_s7 + $0x210] sm:$0xff] %v7060_v27   ;;  %vm3924_vm4 = vcmp.ge.f32.partialorder %v3668_v30, 0.0  ;;  %v4180_v38 = vmul.f32 0.2, %v3668_v30  ;;  %v3794_v39 = vadd.f32 %v8414_v54, %v2403_v17  ;;  %v1904_v41 = vpop.f32.mrb[13].mxu0  ;;  %v2416_v42 = vpop.f32.mrb[13].mxu1 }
 0x11c   : > { %v3671_v40 = vadd.f32 %v7660_v35, %v8414_v54  ;;  %v4561_v45 = vsel %vm4049_vm3, %v3793_v26, %v4305_v32  ;;  %vm4052_vm5 = vcmp.ge.f32.partialorder %v3796_v33, 0.0  ;;  %v4308_v46 = vmul.f32 0.2, %v3796_v33  ;;  %v7661_v47 = vpop.f32.mrb[14].mxu0  ;;  %v7789_v48 = vpop.f32.mrb[14].mxu1 }
 0x11d   : > { %vm3922_vm6 = vcmp.ge.f32.partialorder %v3666_v34, 0.0  ;;  %v4436_v49 = vsel %vm3924_vm4, %v3668_v30, %v4180_v38  ;;  %v4178_v50 = vmul.f32 0.2, %v3666_v34  ;;  %vm4050_vm7 = vcmp.ge.f32.partialorder %v3794_v39, 0.0  ;;  %v1907_v52 = vpop.f32.mrb[15].mxu0  ;;  %v2419_v57 = vpop.f32.mrb[15].mxu1 }
 0x11e   : > { %v4306_v51 = vmul.f32 0.2, %v3794_v39  ;;  %v6755_v53 = vpack.c.bf16 %v4436_v49, %v4435_v25  ;;  %v4564_v55 = vsel %vm4052_vm5, %v3796_v33, %v4308_v46  ;;  %vm3927_vm8 = vcmp.ge.f32.partialorder %v3671_v40, 0.0 }
 0x11f   : > { %v4183_v56 = vmul.f32 0.2, %v3671_v40  ;;  %v7075_v58 = vpack.c.bf16 %v4564_v55, %v4563_v28  ;;  %v4434_v59 = vsel %vm3922_vm6, %v3666_v34, %v4178_v50  ;;  %v3799_v61 = vadd.f32 %v7788_v36, %v8414_v54  ;;  %7767 = vmatmul.mubr.bf16.gmra.mrb[120].mxu0 %v8105_v31 }
 0x120   : > { %v4562_v60 = vsel %vm4050_vm7, %v3794_v39, %v4306_v51  ;;  %7371 = vst [vmem:[%s8442_s7 + $0x28] sm:$0xff] %v6755_v53   ;;  %v6750_v62 = vpack.c.bf16 %v4434_v59, %v4433_v29  ;;  %v3669_v1 = vadd.f32 %v8414_v54, %v1904_v41  ;;  %7895 = vmatmul.mubr.bf16.gmra.mrb[120].mxu1 %v8106_v37 }
 0x121   : > { %v7070_v63 = vpack.c.bf16 %v4562_v60, %v4561_v45  ;;  %v4439_v0 = vsel %vm3927_vm8, %v3671_v40, %v4183_v56  ;;  %7435 = vst [vmem:[%s8442_s7 + $0x228] sm:$0xff] %v7075_v58   ;;  %vm4055_vm9 = vcmp.ge.f32.partialorder %v3799_v61, 0.0  ;;  %v4311_v2 = vmul.f32 0.2, %v3799_v61  ;;  %7770 = vmatprep.mubr.bf16.mxu0 %v8107_v43  ;;  %7898 = vmatprep.mubr.bf16.mxu1 %v8108_v44 }
 0x122   : > { %v3797_v3 = vadd.f32 %v8414_v54, %v2416_v42  ;;  %v3672_v4 = vadd.f32 %v7661_v47, %v8414_v54  ;;  %7370 = vst [vmem:[%s8442_s7 + $0x20] sm:$0xff] %v6750_v62   ;;  %vm3925_vm10 = vcmp.ge.f32.partialorder %v3669_v1, 0.0  ;;  %v4181_v6 = vmul.f32 0.2, %v3669_v1  ;;  %v7664_v9 = vpop.f32.mrb[16].mxu0  ;;  %v7792_v10 = vpop.f32.mrb[16].mxu1 }
 0x123   : > { %7434 = vst [vmem:[%s8442_s7 + $0x220] sm:$0xff] %v7070_v63   ;;  %v3800_v7 = vadd.f32 %v7789_v48, %v8414_v54  ;;  %v3670_v8 = vadd.f32 %v8414_v54, %v1907_v52  ;;  %v4567_v12 = vsel %vm4055_vm9, %v3799_v61, %v4311_v2  ;;  %v1920_v14 = vpop.f32.mrb[17].mxu0  ;;  %v2432_v15 = vpop.f32.mrb[17].mxu1  ;;  %v3798_v22 = vadd.f32 %v8414_v54, %v2419_v57 }
 0x124   : > { %vm4053_vm11 = vcmp.ge.f32.partialorder %v3797_v3, 0.0  ;;  %v4309_v13 = vmul.f32 0.2, %v3797_v3  ;;  %vm3928_vm12 = vcmp.ge.f32.partialorder %v3672_v4, 0.0  ;;  %v4437_v16 = vsel %vm3925_vm10, %v3669_v1, %v4181_v6  ;;  %v7665_v19 = vpop.f32.mrb[18].mxu0  ;;  %v7793_v23 = vpop.f32.mrb[18].mxu1 }
 0x125   : > { %v4184_v17 = vmul.f32 0.2, %v3672_v4  ;;  %vm4056_vm13 = vcmp.ge.f32.partialorder %v3800_v7, 0.0  ;;  %v4312_v18 = vmul.f32 0.2, %v3800_v7  ;;  %vm3926_vm14 = vcmp.ge.f32.partialorder %v3670_v8, 0.0 }
 0x126   : > { %v4565_v20 = vsel %vm4053_vm11, %v3797_v3, %v4309_v13  ;;  %v4182_v21 = vmul.f32 0.2, %v3670_v8  ;;  %v1923_v24 = vpop.f32.mrb[19].mxu0  ;;  %v3675_v27 = vadd.f32 %v7664_v9, %v8414_v54  ;;  %v3803_v28 = vadd.f32 %v7792_v10, %v8414_v54  ;;  %v2435_v29 = vpop.f32.mrb[19].mxu1 }
 0x127   : > { %v4440_v25 = vsel %vm3928_vm12, %v3672_v4, %v4184_v17  ;;  %v4568_v26 = vsel %vm4056_vm13, %v3800_v7, %v4312_v18  ;;  %vm4054_vm15 = vcmp.ge.f32.partialorder %v3798_v22, 0.0  ;;  %7771 = vmatmul.mubr.bf16.gmra.mrb[124].mxu0 %v8109_v5  ;;  %v4310_v34 = vmul.f32 0.2, %v3798_v22 }
 0x128   : > { %v6765_v30 = vpack.c.bf16 %v4440_v25, %v4439_v0  ;;  %v7085_v31 = vpack.c.bf16 %v4568_v26, %v4567_v12  ;;  %v4438_v32 = vsel %vm3926_vm14, %v3670_v8, %v4182_v21  ;;  %vm3931_vm0 = vcmp.ge.f32.partialorder %v3675_v27, 0.0  ;;  %7899 = vmatmul.mubr.bf16.gmra.mrb[124].mxu1 %v8110_v11 }
 0x129   : > { %v6760_v33 = vpack.c.bf16 %v4438_v32, %v4437_v16  ;;  %v4187_v35 = vmul.f32 0.2, %v3675_v27  ;;  %vm4059_vm1 = vcmp.ge.f32.partialorder %v3803_v28, 0.0  ;;  %v4315_v36 = vmul.f32 0.2, %v3803_v28 }
 0x12a   : > { %7373 = vst [vmem:[%s8442_s7 + $0x38] sm:$0xff] %v6765_v30   ;;  %7437 = vst [vmem:[%s8442_s7 + $0x238] sm:$0xff] %v7085_v31   ;;  %v3673_v37 = vadd.f32 %v8414_v54, %v1920_v14  ;;  %v3801_v38 = vadd.f32 %v8414_v54, %v2432_v15  ;;  %v4566_v39 = vsel %vm4054_vm15, %v3798_v22, %v4310_v34  ;;  %v7668_v43 = vpop.f32.mrb[20].mxu0  ;;  %v7796_v44 = vpop.f32.mrb[20].mxu1 }
 0x12b   : > { %7372 = vst [vmem:[%s8442_s7 + $0x30] sm:$0xff] %v6760_v33   ;;  %v4443_v40 = vsel %vm3931_vm0, %v3675_v27, %v4187_v35  ;;  %v3676_v41 = vadd.f32 %v7665_v19, %v8414_v54  ;;  %v3804_v42 = vadd.f32 %v7793_v23, %v8414_v54  ;;  %v7080_v45 = vpack.c.bf16 %v4566_v39, %v4565_v20  ;;  %v1936_v48 = vpop.f32.mrb[21].mxu0  ;;  %v2448_v49 = vpop.f32.mrb[21].mxu1 }
 0x12c   : > { %v4571_v46 = vsel %vm4059_vm1, %v3803_v28, %v4315_v36  ;;  %vm3929_vm2 = vcmp.ge.f32.partialorder %v3673_v37, 0.0  ;;  %v4185_v47 = vmul.f32 0.2, %v3673_v37  ;;  %vm4057_vm3 = vcmp.ge.f32.partialorder %v3801_v38, 0.0  ;;  %v7669_v56 = vpop.f32.mrb[22].mxu0  ;;  %v7797_v57 = vpop.f32.mrb[22].mxu1 }
 0x12d   : > { %v4313_v50 = vmul.f32 0.2, %v3801_v38  ;;  %vm3932_vm4 = vcmp.ge.f32.partialorder %v3676_v41, 0.0  ;;  %v4188_v51 = vmul.f32 0.2, %v3676_v41  ;;  %7436 = vst [vmem:[%s8442_s7 + $0x230] sm:$0xff] %v7080_v45   ;;  %v3674_v55 = vadd.f32 %v8414_v54, %v1923_v24 }
 0x12e   : > { %v4441_v52 = vsel %vm3929_vm2, %v3673_v37, %v4185_v47  ;;  %vm4060_vm5 = vcmp.ge.f32.partialorder %v3804_v42, 0.0  ;;  %v4316_v53 = vmul.f32 0.2, %v3804_v42  ;;  %v3802_v60 = vadd.f32 %v8414_v54, %v2435_v29  ;;  %v1939_v62 = vpop.f32.mrb[23].mxu0  ;;  %v2451_v63 = vpop.f32.mrb[23].mxu1 }
 0x12f   : > { %v4569_v58 = vsel %vm4057_vm3, %v3801_v38, %v4313_v50  ;;  %v4444_v59 = vsel %vm3932_vm4, %v3676_v41, %v4188_v51  ;;  %v3679_v61 = vadd.f32 %v7668_v43, %v8414_v54  ;;  %vm3930_vm6 = vcmp.ge.f32.partialorder %v3674_v55, 0.0 }
 0x130   : > { %v6775_v0 = vpack.c.bf16 %v4444_v59, %v4443_v40  ;;  %v4572_v1 = vsel %vm4060_vm5, %v3804_v42, %v4316_v53  ;;  %v4186_v2 = vmul.f32 0.2, %v3674_v55  ;;  %vm4058_vm7 = vcmp.ge.f32.partialorder %v3802_v60, 0.0 }
 0x131   : > { %v7095_v3 = vpack.c.bf16 %v4572_v1, %v4571_v46  ;;  %v4314_v4 = vmul.f32 0.2, %v3802_v60  ;;  %vm3935_vm8 = vcmp.ge.f32.partialorder %v3679_v61, 0.0  ;;  %v4191_v6 = vmul.f32 0.2, %v3679_v61 }
 0x132   : > { %7375 = vst [vmem:[%s8442_s7 + $0x48] sm:$0xff] %v6775_v0   ;;  %v4442_v5 = vsel %vm3930_vm6, %v3674_v55, %v4186_v2  ;;  %v3807_v7 = vadd.f32 %v7796_v44, %v8414_v54  ;;  %v3677_v8 = vadd.f32 %v8414_v54, %v1936_v48  ;;  %v3805_v11 = vadd.f32 %v8414_v54, %v2448_v49  ;;  %v7672_v13 = vpop.f32.mrb[24].mxu0  ;;  %v7800_v14 = vpop.f32.mrb[24].mxu1 }
 0x133   : > { %7439 = vst [vmem:[%s8442_s7 + $0x248] sm:$0xff] %v7095_v3   ;;  %v6770_v9 = vpack.c.bf16 %v4442_v5, %v4441_v52  ;;  %v4570_v10 = vsel %vm4058_vm7, %v3802_v60, %v4314_v4  ;;  %v3680_v12 = vadd.f32 %v7669_v56, %v8414_v54  ;;  %v4447_v16 = vsel %vm3935_vm8, %v3679_v61, %v4191_v6  ;;  %v1952_v18 = vpop.f32.mrb[25].mxu0  ;;  %v2464_v19 = vpop.f32.mrb[25].mxu1 }
 0x134   : > { %v7090_v15 = vpack.c.bf16 %v4570_v10, %v4569_v58  ;;  %vm4063_vm9 = vcmp.ge.f32.partialorder %v3807_v7, 0.0  ;;  %v4319_v17 = vmul.f32 0.2, %v3807_v7  ;;  %vm3933_vm10 = vcmp.ge.f32.partialorder %v3677_v8, 0.0  ;;  %v7673_v25 = vpop.f32.mrb[26].mxu0  ;;  %v7801_v26 = vpop.f32.mrb[26].mxu1 }
 0x135   : > { %7374 = vst [vmem:[%s8442_s7 + $0x40] sm:$0xff] %v6770_v9   ;;  %v4189_v20 = vmul.f32 0.2, %v3677_v8  ;;  %vm4061_vm11 = vcmp.ge.f32.partialorder %v3805_v11, 0.0  ;;  %v4317_v21 = vmul.f32 0.2, %v3805_v11  ;;  %v3808_v24 = vadd.f32 %v7797_v57, %v8414_v54 }
 0x136   : > { %7438 = vst [vmem:[%s8442_s7 + $0x240] sm:$0xff] %v7090_v15   ;;  %v4575_v22 = vsel %vm4063_vm9, %v3807_v7, %v4319_v17  ;;  %vm3936_vm12 = vcmp.ge.f32.partialorder %v3680_v12, 0.0  ;;  %v4192_v23 = vmul.f32 0.2, %v3680_v12  ;;  %v3678_v29 = vadd.f32 %v8414_v54, %v1939_v62  ;;  %v1955_v31 = vpop.f32.mrb[27].mxu0  ;;  %v2467_v32 = vpop.f32.mrb[27].mxu1 }
 0x137   : > { %v4445_v27 = vsel %vm3933_vm10, %v3677_v8, %v4189_v20  ;;  %v4573_v28 = vsel %vm4061_vm11, %v3805_v11, %v4317_v21  ;;  %v3806_v30 = vadd.f32 %v8414_v54, %v2451_v63  ;;  %vm4064_vm13 = vcmp.ge.f32.partialorder %v3808_v24, 0.0 }
 0x138   : > { %v4448_v33 = vsel %vm3936_vm12, %v3680_v12, %v4192_v23  ;;  %v4320_v34 = vmul.f32 0.2, %v3808_v24  ;;  %v3683_v35 = vadd.f32 %v7672_v13, %v8414_v54  ;;  %vm3934_vm14 = vcmp.ge.f32.partialorder %v3678_v29, 0.0 }
 0x139   : > { %v6785_v36 = vpack.c.bf16 %v4448_v33, %v4447_v16  ;;  %v4190_v37 = vmul.f32 0.2, %v3678_v29  ;;  %vm4062_vm15 = vcmp.ge.f32.partialorder %v3806_v30, 0.0  ;;  %v4318_v39 = vmul.f32 0.2, %v3806_v30 }
 0x13a   : > { %v4576_v38 = vsel %vm4064_vm13, %v3808_v24, %v4320_v34  ;;  %vm3939_vm0 = vcmp.ge.f32.partialorder %v3683_v35, 0.0  ;;  %v4195_v40 = vmul.f32 0.2, %v3683_v35  ;;  %v3811_v43 = vadd.f32 %v7800_v14, %v8414_v54  ;;  %v7676_v45 = vpop.f32.mrb[28].mxu0  ;;  %v7804_v46 = vpop.f32.mrb[28].mxu1 }
 0x13b   : > { %7377 = vst [vmem:[%s8442_s7 + $0x58] sm:$0xff] %v6785_v36   ;;  %v7105_v41 = vpack.c.bf16 %v4576_v38, %v4575_v22  ;;  %v4446_v42 = vsel %vm3934_vm14, %v3678_v29, %v4190_v37  ;;  %v3681_v44 = vadd.f32 %v8414_v54, %v1952_v18  ;;  %v4574_v48 = vsel %vm4062_vm15, %v3806_v30, %v4318_v39  ;;  %v1968_v51 = vpop.f32.mrb[29].mxu0  ;;  %v2480_v52 = vpop.f32.mrb[29].mxu1 }
 0x13c   : > { %v6780_v47 = vpack.c.bf16 %v4446_v42, %v4445_v27  ;;  %v4451_v49 = vsel %vm3939_vm0, %v3683_v35, %v4195_v40  ;;  %v3809_v50 = vadd.f32 %v8414_v54, %v2464_v19  ;;  %v7100_v53 = vpack.c.bf16 %v4574_v48, %v4573_v28  ;;  %v7677_v56 = vpop.f32.mrb[30].mxu0  ;;  %v7805_v57 = vpop.f32.mrb[30].mxu1 }
 0x13d   : > { %7441 = vst [vmem:[%s8442_s7 + $0x258] sm:$0xff] %v7105_v41   ;;  %vm4067_vm1 = vcmp.ge.f32.partialorder %v3811_v43, 0.0  ;;  %v4323_v55 = vmul.f32 0.2, %v3811_v43  ;;  %vm3937_vm2 = vcmp.ge.f32.partialorder %v3681_v44, 0.0  ;;  %v3684_v60 = vadd.f32 %v7673_v25, %v8414_v54  ;;  %v1971_v61 = vpop.f32.mrb[31].mxu0 }
 0x13e   : > { %7376 = vst [vmem:[%s8442_s7 + $0x50] sm:$0xff] %v6780_v47   ;;  %v4193_v58 = vmul.f32 0.2, %v3681_v44  ;;  %vm4065_vm3 = vcmp.ge.f32.partialorder %v3809_v50, 0.0  ;;  %v4321_v59 = vmul.f32 0.2, %v3809_v50  ;;  %v3812_v63 = vadd.f32 %v7801_v26, %v8414_v54 }
 0x13f   : > { %7440 = vst [vmem:[%s8442_s7 + $0x250] sm:$0xff] %v7100_v53   ;;  %v4579_v62 = vsel %vm4067_vm1, %v3811_v43, %v4323_v55  ;;  %v3682_v0 = vadd.f32 %v8414_v54, %v1955_v31  ;;  %v3810_v1 = vadd.f32 %v8414_v54, %v2467_v32  ;;  %v2483_v2 = vpop.f32.mrb[31].mxu1  ;;  %vm3940_vm4 = vcmp.ge.f32.partialorder %v3684_v60, 0.0 }
 0x140   : > { %v4449_v3 = vsel %vm3937_vm2, %v3681_v44, %v4193_v58  ;;  %v4577_v4 = vsel %vm4065_vm3, %v3809_v50, %v4321_v59  ;;  %v4196_v5 = vmul.f32 0.2, %v3684_v60  ;;  %vm4068_vm5 = vcmp.ge.f32.partialorder %v3812_v63, 0.0 }
 0x141   : > { %v4324_v6 = vmul.f32 0.2, %v3812_v63  ;;  %vm3938_vm6 = vcmp.ge.f32.partialorder %v3682_v0, 0.0  ;;  %v4194_v7 = vmul.f32 0.2, %v3682_v0  ;;  %vm4066_vm7 = vcmp.ge.f32.partialorder %v3810_v1, 0.0 }
 0x142   : > { %v4452_v8 = vsel %vm3940_vm4, %v3684_v60, %v4196_v5  ;;  %v4322_v9 = vmul.f32 0.2, %v3810_v1  ;;  %v3687_v10 = vadd.f32 %v7676_v45, %v8414_v54  ;;  %v3815_v14 = vadd.f32 %v7804_v46, %v8414_v54  ;;  %v7680_v15 = vpop.f32.mrb[32].mxu0  ;;  %v7808_v16 = vpop.f32.mrb[32].mxu1 }
 0x143   : > { %v6795_v11 = vpack.c.bf16 %v4452_v8, %v4451_v49  ;;  %v4580_v12 = vsel %vm4068_vm5, %v3812_v63, %v4324_v6  ;;  %v4450_v13 = vsel %vm3938_vm6, %v3682_v0, %v4194_v7  ;;  %v1984_v20 = vpop.f32.mrb[33].mxu0  ;;  %v2496_v21 = vpop.f32.mrb[33].mxu1  ;;  %v3685_v26 = vadd.f32 %v8414_v54, %v1968_v51 }
 0x144   : > { %v7115_v17 = vpack.c.bf16 %v4580_v12, %v4579_v62  ;;  %v6790_v18 = vpack.c.bf16 %v4450_v13, %v4449_v3  ;;  %v4578_v19 = vsel %vm4066_vm7, %v3810_v1, %v4322_v9  ;;  %vm3943_vm8 = vcmp.ge.f32.partialorder %v3687_v10, 0.0  ;;  %v7681_v25 = vpop.f32.mrb[34].mxu0  ;;  %v7809_v30 = vpop.f32.mrb[34].mxu1 }
 0x145   : > { %7379 = vst [vmem:[%s8442_s7 + $0x68] sm:$0xff] %v6795_v11   ;;  %v7110_v22 = vpack.c.bf16 %v4578_v19, %v4577_v4  ;;  %v4199_v23 = vmul.f32 0.2, %v3687_v10  ;;  %vm4071_vm9 = vcmp.ge.f32.partialorder %v3815_v14, 0.0  ;;  %v4327_v24 = vmul.f32 0.2, %v3815_v14 }
 0x146   : > { %7443 = vst [vmem:[%s8442_s7 + $0x268] sm:$0xff] %v7115_v17   ;;  %7378 = vst [vmem:[%s8442_s7 + $0x60] sm:$0xff] %v6790_v18   ;;  %v3813_v27 = vadd.f32 %v8414_v54, %v2480_v52  ;;  %v3688_v28 = vadd.f32 %v7677_v56, %v8414_v54  ;;  %v3816_v29 = vadd.f32 %v7805_v57, %v8414_v54  ;;  %v1987_v31 = vpop.f32.mrb[35].mxu0  ;;  %v2499_v36 = vpop.f32.mrb[35].mxu1  ;;  %vm3941_vm10 = vcmp.ge.f32.partialorder %v3685_v26, 0.0 }
 0x147   : > { %7442 = vst [vmem:[%s8442_s7 + $0x260] sm:$0xff] %v7110_v22   ;;  %v4455_v32 = vsel %vm3943_vm8, %v3687_v10, %v4199_v23  ;;  %v4583_v33 = vsel %vm4071_vm9, %v3815_v14, %v4327_v24  ;;  %v3686_v34 = vadd.f32 %v8414_v54, %v1971_v61  ;;  %v3814_v35 = vadd.f32 %v8414_v54, %v2483_v2 }
 0x148   : > { %v4197_v37 = vmul.f32 0.2, %v3685_v26  ;;  %vm4069_vm11 = vcmp.ge.f32.partialorder %v3813_v27, 0.0  ;;  %v4325_v38 = vmul.f32 0.2, %v3813_v27  ;;  %vm3944_vm12 = vcmp.ge.f32.partialorder %v3688_v28, 0.0 }
 0x149   : > { %v4200_v39 = vmul.f32 0.2, %v3688_v28  ;;  %vm4072_vm13 = vcmp.ge.f32.partialorder %v3816_v29, 0.0  ;;  %v4328_v40 = vmul.f32 0.2, %v3816_v29  ;;  %vm3942_vm14 = vcmp.ge.f32.partialorder %v3686_v34, 0.0 }
 0x14a   : > { %v4453_v41 = vsel %vm3941_vm10, %v3685_v26, %v4197_v37  ;;  %v4581_v42 = vsel %vm4069_vm11, %v3813_v27, %v4325_v38  ;;  %v4198_v43 = vmul.f32 0.2, %v3686_v34  ;;  %vm4070_vm15 = vcmp.ge.f32.partialorder %v3814_v35, 0.0  ;;  %v7684_v47 = vpop.f32.mrb[36].mxu0  ;;  %v7812_v48 = vpop.f32.mrb[36].mxu1 }
 0x14b   : > { %v4456_v44 = vsel %vm3944_vm12, %v3688_v28, %v4200_v39  ;;  %v4584_v45 = vsel %vm4072_vm13, %v3816_v29, %v4328_v40  ;;  %v4326_v46 = vmul.f32 0.2, %v3814_v35  ;;  %v3691_v52 = vadd.f32 %v7680_v15, %v8414_v54  ;;  %v8540_v53 = vpop.f32.mrb[37].mxu0  ;;  %v8542_v55 = vpop.f32.mrb[37].mxu1 }
 0x14c   : > { %v6805_v49 = vpack.c.bf16 %v4456_v44, %v4455_v32  ;;  %v7125_v50 = vpack.c.bf16 %v4584_v45, %v4583_v33  ;;  %v4454_v51 = vsel %vm3942_vm14, %v3686_v34, %v4198_v43  ;;  %v3819_v58 = vadd.f32 %v7808_v16, %v8414_v54  ;;  %v7685_v60 = vpop.f32.mrb[38].mxu0  ;;  %v7813_v61 = vpop.f32.mrb[38].mxu1 }
 0x14d   : > { %v6800_v56 = vpack.c.bf16 %v4454_v51, %v4453_v41  ;;  %v4582_v57 = vsel %vm4070_vm15, %v3814_v35, %v4326_v46  ;;  %v3689_v59 = vadd.f32 %v8414_v54, %v1984_v20  ;;  %vm3947_vm0 = vcmp.ge.f32.partialorder %v3691_v52, 0.0  ;;  %v2003_v1 = vpop.f32.mrb[39].mxu0  ;;  %v2515_v2 = vpop.f32.mrb[39].mxu1 }
 0x14e   : > { %7381 = vst [vmem:[%s8442_s7 + $0x78] sm:$0xff] %v6805_v49   ;;  %7445 = vst [vmem:[%s8442_s7 + $0x278] sm:$0xff] %v7125_v50   ;;  %v7120_v62 = vpack.c.bf16 %v4582_v57, %v4581_v42  ;;  %v4203_v63 = vmul.f32 0.2, %v3691_v52  ;;  %v3817_v0 = vadd.f32 %v8414_v54, %v2496_v21  ;;  %vm4075_vm1 = vcmp.ge.f32.partialorder %v3819_v58, 0.0 }
 0x14f   : > { %7380 = vst [vmem:[%s8442_s7 + $0x70] sm:$0xff] %v6800_v56   ;;  %v4331_v3 = vmul.f32 0.2, %v3819_v58  ;;  %vm3945_vm2 = vcmp.ge.f32.partialorder %v3689_v59, 0.0  ;;  %v4201_v4 = vmul.f32 0.2, %v3689_v59  ;;  %v3692_v7 = vadd.f32 %v7681_v25, %v8414_v54 }
 0x150   : > { %7444 = vst [vmem:[%s8442_s7 + $0x270] sm:$0xff] %v7120_v62   ;;  %v4459_v5 = vsel %vm3947_vm0, %v3691_v52, %v4203_v63  ;;  %vm4073_vm3 = vcmp.ge.f32.partialorder %v3817_v0, 0.0  ;;  %v4329_v6 = vmul.f32 0.2, %v3817_v0  ;;  %v3820_v10 = vadd.f32 %v7809_v30, %v8414_v54  ;;  %v8587_v63 = vld [vmem:[%s9428_s2] ss:$0 sm:$0xff] }
 0x151   : > { %v4587_v8 = vsel %vm4075_vm1, %v3819_v58, %v4331_v3  ;;  %v4457_v9 = vsel %vm3945_vm2, %v3689_v59, %v4201_v4  ;;  %v3690_v11 = vadd.f32 %v8414_v54, %v1987_v31  ;;  %vm3948_vm4 = vcmp.ge.f32.partialorder %v3692_v7, 0.0 }
 0x152   : > { %v4585_v12 = vsel %vm4073_vm3, %v3817_v0, %v4329_v6  ;;  %v4204_v13 = vmul.f32 0.2, %v3692_v7  ;;  %v3818_v14 = vadd.f32 %v8414_v54, %v2499_v36  ;;  %vm4076_vm5 = vcmp.ge.f32.partialorder %v3820_v10, 0.0  ;;  %v7688_v20 = vpop.f32.mrb[40].mxu0  ;;  %v7816_v21 = vpop.f32.mrb[40].mxu1 }
 0x153   : > { %v4332_v15 = vmul.f32 0.2, %v3820_v10  ;;  %vm3946_vm6 = vcmp.ge.f32.partialorder %v3690_v11, 0.0  ;;  %v4202_v16 = vmul.f32 0.2, %v3690_v11  ;;  %v3695_v19 = vadd.f32 %v7684_v47, %v8414_v54  ;;  %v2016_v26 = vpop.f32.mrb[41].mxu0 }
 0x154   : > { %v4460_v17 = vsel %vm3948_vm4, %v3692_v7, %v4204_v13  ;;  %vm4074_vm7 = vcmp.ge.f32.partialorder %v3818_v14, 0.0  ;;  %v4330_v18 = vmul.f32 0.2, %v3818_v14  ;;  %v3823_v25 = vadd.f32 %v7812_v48, %v8414_v54  ;;  %v8557_v27 = vpop.f32.mrb[41].mxu1  ;;  %v8559_v31 = vpop.f32.mrb[42].mxu0 }
 0x155   : > { %v6815_v22 = vpack.c.bf16 %v4460_v17, %v4459_v5  ;;  %v4588_v23 = vsel %vm4076_vm5, %v3820_v10, %v4332_v15  ;;  %v4458_v24 = vsel %vm3946_vm6, %v3690_v11, %v4202_v16  ;;  %vm3951_vm8 = vcmp.ge.f32.partialorder %v3695_v19, 0.0  ;;  %v8561_v32 = vpop.f32.mrb[42].mxu1  ;;  %v8564_v36 = vpop.f32.mrb[43].mxu0 }
 0x156   : > { %v7135_v28 = vpack.c.bf16 %v4588_v23, %v4587_v8  ;;  %v6810_v29 = vpack.c.bf16 %v4458_v24, %v4457_v9  ;;  %v4586_v30 = vsel %vm4074_vm7, %v3818_v14, %v4330_v18  ;;  %v4207_v34 = vmul.f32 0.2, %v3695_v19  ;;  %v8574_v41 = vpop.f32.mrb[43].mxu1 }
 0x157   : > { %7383 = vst [vmem:[%s8442_s7 + $0x88] sm:$0xff] %v6815_v22   ;;  %v7130_v33 = vpack.c.bf16 %v4586_v30, %v4585_v12  ;;  %vm4079_vm9 = vcmp.ge.f32.partialorder %v3823_v25, 0.0  ;;  %v4335_v35 = vmul.f32 0.2, %v3823_v25  ;;  %v3693_v37 = vadd.f32 %v8414_v54, %v8540_v53 }
 0x158   : > { %7447 = vst [vmem:[%s8442_s7 + $0x288] sm:$0xff] %v7135_v28   ;;  %7382 = vst [vmem:[%s8442_s7 + $0x80] sm:$0xff] %v6810_v29   ;;  %v3821_v38 = vadd.f32 %v8414_v54, %v8542_v55  ;;  %v3696_v39 = vadd.f32 %v7685_v60, %v8414_v54  ;;  %v3824_v40 = vadd.f32 %v7813_v61, %v8414_v54 }
 0x159   : > { %7446 = vst [vmem:[%s8442_s7 + $0x280] sm:$0xff] %v7130_v33   ;;  %v4463_v42 = vsel %vm3951_vm8, %v3695_v19, %v4207_v34  ;;  %v4591_v43 = vsel %vm4079_vm9, %v3823_v25, %v4335_v35  ;;  %v3694_v44 = vadd.f32 %v8414_v54, %v2003_v1  ;;  %v3822_v45 = vadd.f32 %v8414_v54, %v2515_v2 }
 0x15a   : > { %vm3949_vm10 = vcmp.ge.f32.partialorder %v3693_v37, 0.0  ;;  %v4205_v46 = vmul.f32 0.2, %v3693_v37  ;;  %vm4077_vm11 = vcmp.ge.f32.partialorder %v3821_v38, 0.0  ;;  %v4333_v47 = vmul.f32 0.2, %v3821_v38 }
 0x15b   : > { %vm3952_vm12 = vcmp.ge.f32.partialorder %v3696_v39, 0.0  ;;  %v4208_v48 = vmul.f32 0.2, %v3696_v39  ;;  %vm4080_vm13 = vcmp.ge.f32.partialorder %v3824_v40, 0.0  ;;  %v4336_v49 = vmul.f32 0.2, %v3824_v40 }
 0x15c   : > { %v4461_v50 = vsel %vm3949_vm10, %v3693_v37, %v4205_v46  ;;  %v4589_v51 = vsel %vm4077_vm11, %v3821_v38, %v4333_v47  ;;  %vm3950_vm14 = vcmp.ge.f32.partialorder %v3694_v44, 0.0  ;;  %v4206_v52 = vmul.f32 0.2, %v3694_v44  ;;  %v7692_v53 = vpop.f32.mrb[44].mxu0  ;;  %v7820_v55 = vpop.f32.mrb[44].mxu1 }
 0x15d   : > { %v4464_v56 = vsel %vm3952_vm12, %v3696_v39, %v4208_v48  ;;  %v4592_v57 = vsel %vm4080_vm13, %v3824_v40, %v4336_v49  ;;  %vm4078_vm15 = vcmp.ge.f32.partialorder %v3822_v45, 0.0  ;;  %v4334_v58 = vmul.f32 0.2, %v3822_v45  ;;  %v8580_v54 = vpop.f32.mrb[45].mxu0  ;;  %v8582_v59 = vpop.f32.mrb[45].mxu1 }
 0x15e   : > { %v6825_v60 = vpack.c.bf16 %v4464_v56, %v4463_v42  ;;  %v7145_v61 = vpack.c.bf16 %v4592_v57, %v4591_v43  ;;  %v4462_v62 = vsel %vm3950_vm14, %v3694_v44, %v4206_v52  ;;  %v3699_v0 = vadd.f32 %v8587_v63, %v7688_v20  ;;  %v8590_v1 = vpop.f32.mrb[46].mxu0  ;;  %v8592_v2 = vpop.f32.mrb[46].mxu1 }
 0x15f   : > { %v6820_v3 = vpack.c.bf16 %v4462_v62, %v4461_v50  ;;  %v4590_v4 = vsel %vm4078_vm15, %v3822_v45, %v4334_v58  ;;  %v3827_v5 = vadd.f32 %v8587_v63, %v7816_v21  ;;  %v3697_v6 = vadd.f32 %v8587_v63, %v2016_v26  ;;  %v8596_v7 = vpop.f32.mrb[47].mxu0  ;;  %v8598_v8 = vpop.f32.mrb[47].mxu1 }
 0x160   : > { %7385 = vst [vmem:[%s8442_s7 + $0x98] sm:$0xff] %v6825_v60   ;;  %7449 = vst [vmem:[%s8442_s7 + $0x298] sm:$0xff] %v7145_v61   ;;  %v7140_v9 = vpack.c.bf16 %v4590_v4, %v4589_v51  ;;  %vm3955_vm0 = vcmp.ge.f32.partialorder %v3699_v0, 0.0  ;;  %v4211_v10 = vmul.f32 0.2, %v3699_v0  ;;  %v3825_v11 = vadd.f32 %v8587_v63, %v8557_v27 }
 0x161   : > { %7384 = vst [vmem:[%s8442_s7 + $0x90] sm:$0xff] %v6820_v3   ;;  %vm4083_vm1 = vcmp.ge.f32.partialorder %v3827_v5, 0.0  ;;  %v4339_v12 = vmul.f32 0.2, %v3827_v5  ;;  %vm3953_vm2 = vcmp.ge.f32.partialorder %v3697_v6, 0.0  ;;  %v3700_v16 = vadd.f32 %v8587_v63, %v8559_v31 }
 0x162   : > { %v4209_v13 = vmul.f32 0.2, %v3697_v6  ;;  %7448 = vst [vmem:[%s8442_s7 + $0x290] sm:$0xff] %v7140_v9   ;;  %v4467_v14 = vsel %vm3955_vm0, %v3699_v0, %v4211_v10  ;;  %vm4081_vm3 = vcmp.ge.f32.partialorder %v3825_v11, 0.0  ;;  %v4337_v15 = vmul.f32 0.2, %v3825_v11 }
 0x163   : > { %v4595_v17 = vsel %vm4083_vm1, %v3827_v5, %v4339_v12  ;;  %v3828_v19 = vadd.f32 %v8587_v63, %v8561_v32  ;;  %v3698_v20 = vadd.f32 %v8587_v63, %v8564_v36  ;;  %v8612_v21 = vpop.f32.mrb[48].mxu0  ;;  %v8614_v22 = vpop.f32.mrb[48].mxu1  ;;  %vm3956_vm4 = vcmp.ge.f32.partialorder %v3700_v16, 0.0 }
 0x164   : > { %v4465_v18 = vsel %vm3953_vm2, %v3697_v6, %v4209_v13  ;;  %v4593_v23 = vsel %vm4081_vm3, %v3825_v11, %v4337_v15  ;;  %v4212_v24 = vmul.f32 0.2, %v3700_v16  ;;  %v3826_v25 = vadd.f32 %v8587_v63, %v8574_v41  ;;  %v8618_v26 = vpop.f32.mrb[49].mxu0  ;;  %v8620_v27 = vpop.f32.mrb[49].mxu1 }
 0x165   : > { %vm4084_vm5 = vcmp.ge.f32.partialorder %v3828_v19, 0.0  ;;  %v4340_v28 = vmul.f32 0.2, %v3828_v19  ;;  %vm3954_vm6 = vcmp.ge.f32.partialorder %v3698_v20, 0.0  ;;  %v4210_v29 = vmul.f32 0.2, %v3698_v20 }
 0x166   : > { %v4468_v30 = vsel %vm3956_vm4, %v3700_v16, %v4212_v24  ;;  %vm4082_vm7 = vcmp.ge.f32.partialorder %v3826_v25, 0.0  ;;  %v4338_v31 = vmul.f32 0.2, %v3826_v25  ;;  %v3703_v32 = vadd.f32 %v8587_v63, %v7692_v53  ;;  %v8623_v33 = vpop.f32.mrb[50].mxu0  ;;  %v8625_v34 = vpop.f32.mrb[50].mxu1 }
 0x167   : > { %v6835_v35 = vpack.c.bf16 %v4468_v30, %v4467_v14  ;;  %v4596_v36 = vsel %vm4084_vm5, %v3828_v19, %v4340_v28  ;;  %v4466_v37 = vsel %vm3954_vm6, %v3698_v20, %v4210_v29  ;;  %v3831_v38 = vadd.f32 %v8587_v63, %v7820_v55  ;;  %v8628_v39 = vpop.f32.mrb[51].mxu0  ;;  %v8630_v40 = vpop.f32.mrb[51].mxu1 }
 0x168   : > { %v7155_v41 = vpack.c.bf16 %v4596_v36, %v4595_v17  ;;  %v6830_v42 = vpack.c.bf16 %v4466_v37, %v4465_v18  ;;  %v4594_v43 = vsel %vm4082_vm7, %v3826_v25, %v4338_v31  ;;  %vm3959_vm8 = vcmp.ge.f32.partialorder %v3703_v32, 0.0 }
 0x169   : > { %7387 = vst [vmem:[%s8442_s7 + $0xa8] sm:$0xff] %v6835_v35   ;;  %v7150_v44 = vpack.c.bf16 %v4594_v43, %v4593_v23  ;;  %v4215_v45 = vmul.f32 0.2, %v3703_v32  ;;  %vm4087_vm9 = vcmp.ge.f32.partialorder %v3831_v38, 0.0  ;;  %v4343_v46 = vmul.f32 0.2, %v3831_v38 }
 0x16a   : > { %7451 = vst [vmem:[%s8442_s7 + $0x2a8] sm:$0xff] %v7155_v41   ;;  %7386 = vst [vmem:[%s8442_s7 + $0xa0] sm:$0xff] %v6830_v42   ;;  %v3701_v47 = vadd.f32 %v8587_v63, %v8580_v54  ;;  %v3829_v48 = vadd.f32 %v8587_v63, %v8582_v59  ;;  %v3704_v49 = vadd.f32 %v8587_v63, %v8590_v1  ;;  %v8648_v56 = vpop.f32.mrb[52].mxu0  ;;  %v8650_v57 = vpop.f32.mrb[52].mxu1 }
 0x16b   : > { %v3832_v50 = vadd.f32 %v8587_v63, %v8592_v2  ;;  %7450 = vst [vmem:[%s8442_s7 + $0x2a0] sm:$0xff] %v7150_v44   ;;  %v4471_v51 = vsel %vm3959_vm8, %v3703_v32, %v4215_v45  ;;  %v4599_v52 = vsel %vm4087_vm9, %v3831_v38, %v4343_v46  ;;  %v3702_v53 = vadd.f32 %v8587_v63, %v8596_v7  ;;  %v8652_v1 = vpop.f32.mrb[53].mxu0  ;;  %v8654_v2 = vpop.f32.mrb[53].mxu1 }
 0x16c   : > { %v3830_v55 = vadd.f32 %v8587_v63, %v8598_v8  ;;  %vm3957_vm10 = vcmp.ge.f32.partialorder %v3701_v47, 0.0  ;;  %v4213_v58 = vmul.f32 0.2, %v3701_v47  ;;  %vm4085_vm11 = vcmp.ge.f32.partialorder %v3829_v48, 0.0  ;;  %v8656_v6 = vpop.f32.mrb[54].mxu0  ;;  %v8658_v7 = vpop.f32.mrb[54].mxu1 }
 0x16d   : > { %v4341_v54 = vmul.f32 0.2, %v3829_v48  ;;  %vm3960_vm12 = vcmp.ge.f32.partialorder %v3704_v49, 0.0  ;;  %v4216_v59 = vmul.f32 0.2, %v3704_v49  ;;  %vm4088_vm13 = vcmp.ge.f32.partialorder %v3832_v50, 0.0 }
 0x16e   : > { %v4344_v60 = vmul.f32 0.2, %v3832_v50  ;;  %v4469_v61 = vsel %vm3957_vm10, %v3701_v47, %v4213_v58  ;;  %vm3958_vm14 = vcmp.ge.f32.partialorder %v3702_v53, 0.0  ;;  %v4214_v0 = vmul.f32 0.2, %v3702_v53  ;;  %v8662_v12 = vpop.f32.mrb[55].mxu0 }
 0x16f   : > { %v4597_v62 = vsel %vm4085_vm11, %v3829_v48, %v4341_v54  ;;  %v4472_v3 = vsel %vm3960_vm12, %v3704_v49, %v4216_v59  ;;  %vm4086_vm15 = vcmp.ge.f32.partialorder %v3830_v55, 0.0  ;;  %v4342_v5 = vmul.f32 0.2, %v3830_v55  ;;  %v8664_v13 = vpop.f32.mrb[55].mxu1 }
 0x170   : > { %v4600_v4 = vsel %vm4088_vm13, %v3832_v50, %v4344_v60  ;;  %v6845_v8 = vpack.c.bf16 %v4472_v3, %v4471_v51  ;;  %v4470_v10 = vsel %vm3958_vm14, %v3702_v53, %v4214_v0  ;;  %v3707_v11 = vadd.f32 %v8587_v63, %v8612_v21 }
 0x171   : > { %v7165_v9 = vpack.c.bf16 %v4600_v4, %v4599_v52  ;;  %v6840_v14 = vpack.c.bf16 %v4470_v10, %v4469_v61  ;;  %v4598_v15 = vsel %vm4086_vm15, %v3830_v55, %v4342_v5  ;;  %v3835_v16 = vadd.f32 %v8587_v63, %v8614_v22 }
 0x172   : > { %v3705_v17 = vadd.f32 %v8587_v63, %v8618_v26  ;;  %7389 = vst [vmem:[%s8442_s7 + $0xb8] sm:$0xff] %v6845_v8   ;;  %v7160_v18 = vpack.c.bf16 %v4598_v15, %v4597_v62  ;;  %vm3963_vm0 = vcmp.ge.f32.partialorder %v3707_v11, 0.0  ;;  %v4219_v19 = vmul.f32 0.2, %v3707_v11  ;;  %v8678_v26 = vpop.f32.mrb[56].mxu0  ;;  %v8680_v28 = vpop.f32.mrb[56].mxu1 }
 0x173   : > { %7453 = vst [vmem:[%s8442_s7 + $0x2b8] sm:$0xff] %v7165_v9   ;;  %v3833_v20 = vadd.f32 %v8587_v63, %v8620_v27  ;;  %7388 = vst [vmem:[%s8442_s7 + $0xb0] sm:$0xff] %v6840_v14   ;;  %vm4091_vm1 = vcmp.ge.f32.partialorder %v3835_v16, 0.0  ;;  %v4347_v21 = vmul.f32 0.2, %v3835_v16  ;;  %v3708_v25 = vadd.f32 %v8587_v63, %v8623_v33  ;;  %v8686_v32 = vpop.f32.mrb[57].mxu0 }
 0x174   : > { %vm3961_vm2 = vcmp.ge.f32.partialorder %v3705_v17, 0.0  ;;  %v4217_v23 = vmul.f32 0.2, %v3705_v17  ;;  %7452 = vst [vmem:[%s8442_s7 + $0x2b0] sm:$0xff] %v7160_v18   ;;  %v4475_v24 = vsel %vm3963_vm0, %v3707_v11, %v4219_v19  ;;  %v3836_v27 = vadd.f32 %v8587_v63, %v8625_v34  ;;  %v8688_v35 = vpop.f32.mrb[57].mxu1  ;;  %v8692_v38 = vpop.f32.mrb[58].mxu0 }
 0x175   : > { %vm4089_vm3 = vcmp.ge.f32.partialorder %v3833_v20, 0.0  ;;  %v4345_v22 = vmul.f32 0.2, %v3833_v20  ;;  %v4603_v29 = vsel %vm4091_vm1, %v3835_v16, %v4347_v21  ;;  %v3706_v31 = vadd.f32 %v8587_v63, %v8628_v39  ;;  %v8694_v41 = vpop.f32.mrb[58].mxu1  ;;  %v8698_v45 = vpop.f32.mrb[59].mxu0 }
 0x176   : > { %v4473_v30 = vsel %vm3961_vm2, %v3705_v17, %v4217_v23  ;;  %vm3964_vm4 = vcmp.ge.f32.partialorder %v3708_v25, 0.0  ;;  %v4220_v37 = vmul.f32 0.2, %v3708_v25  ;;  %v3834_v33 = vadd.f32 %v8587_v63, %v8630_v40  ;;  %v8700_v46 = vpop.f32.mrb[59].mxu1 }
 0x177   : > { %v4601_v36 = vsel %vm4089_vm3, %v3833_v20, %v4345_v22  ;;  %vm4092_vm5 = vcmp.ge.f32.partialorder %v3836_v27, 0.0  ;;  %v4348_v42 = vmul.f32 0.2, %v3836_v27  ;;  %vm3962_vm6 = vcmp.ge.f32.partialorder %v3706_v31, 0.0 }
 0x178   : > { %v4218_v34 = vmul.f32 0.2, %v3706_v31  ;;  %v4476_v39 = vsel %vm3964_vm4, %v3708_v25, %v4220_v37  ;;  %vm4090_vm7 = vcmp.ge.f32.partialorder %v3834_v33, 0.0  ;;  %v4346_v43 = vmul.f32 0.2, %v3834_v33 }
 0x179   : > { %v3711_v44 = vadd.f32 %v8587_v63, %v8648_v56  ;;  %v6855_v40 = vpack.c.bf16 %v4476_v39, %v4475_v24  ;;  %v4604_v47 = vsel %vm4092_vm5, %v3836_v27, %v4348_v42  ;;  %v3839_v49 = vadd.f32 %v8587_v63, %v8650_v57 }
 0x17a   : > { %v4474_v48 = vsel %vm3962_vm6, %v3706_v31, %v4218_v34  ;;  %v7175_v50 = vpack.c.bf16 %v4604_v47, %v4603_v29  ;;  %v4602_v52 = vsel %vm4090_vm7, %v3834_v33, %v4346_v43  ;;  %v8705_v58 = vpop.f32.mrb[60].mxu0  ;;  %v3709_v54 = vadd.f32 %v8587_v63, %v8652_v1  ;;  %v8717_v61 = vpop.f32.mrb[60].mxu1 }
 0x17b   : > { %v6850_v51 = vpack.c.bf16 %v4474_v48, %v4473_v30  ;;  %vm3967_vm8 = vcmp.ge.f32.partialorder %v3711_v44, 0.0  ;;  %7391 = vst [vmem:[%s8442_s7 + $0xc8] sm:$0xff] %v6855_v40   ;;  %v7170_v53 = vpack.c.bf16 %v4602_v52, %v4601_v36  ;;  %v4223_v55 = vmul.f32 0.2, %v3711_v44  ;;  %v8719_v62 = vpop.f32.mrb[61].mxu0  ;;  %v8727_v4 = vpop.f32.mrb[61].mxu1 }
 0x17c   : > { %vm4095_vm9 = vcmp.ge.f32.partialorder %v3839_v49, 0.0  ;;  %v4351_v56 = vmul.f32 0.2, %v3839_v49  ;;  %7455 = vst [vmem:[%s8442_s7 + $0x2c8] sm:$0xff] %v7175_v50   ;;  %v3837_v57 = vadd.f32 %v8587_v63, %v8654_v2  ;;  %v3712_v59 = vadd.f32 %v8587_v63, %v8656_v6  ;;  %v8729_v5 = vpop.f32.mrb[62].mxu0 }
 0x17d   : > { %7390 = vst [vmem:[%s8442_s7 + $0xc0] sm:$0xff] %v6850_v51   ;;  %v3840_v60 = vadd.f32 %v8587_v63, %v8658_v7  ;;  %7454 = vst [vmem:[%s8442_s7 + $0x2c0] sm:$0xff] %v7170_v53   ;;  %v4479_v0 = vsel %vm3967_vm8, %v3711_v44, %v4223_v55  ;;  %v3710_v1 = vadd.f32 %v8587_v63, %v8662_v12  ;;  %vm3965_vm10 = vcmp.ge.f32.partialorder %v3709_v54, 0.0  ;;  %v8731_v12 = vpop.f32.mrb[62].mxu1  ;;  %v8733_v15 = vpop.f32.mrb[63].mxu0 }
 0x17e   : > { %v4607_v3 = vsel %vm4095_vm9, %v3839_v49, %v4351_v56  ;;  %v3838_v2 = vadd.f32 %v8587_v63, %v8664_v13  ;;  %v4221_v6 = vmul.f32 0.2, %v3709_v54  ;;  %vm4093_vm11 = vcmp.ge.f32.partialorder %v3837_v57, 0.0  ;;  %v8735_v18 = vpop.f32.mrb[63].mxu1 }
 0x17f   : > { %v4349_v7 = vmul.f32 0.2, %v3837_v57  ;;  %vm3968_vm12 = vcmp.ge.f32.partialorder %v3712_v59, 0.0  ;;  %v4224_v8 = vmul.f32 0.2, %v3712_v59  ;;  %vm4096_vm13 = vcmp.ge.f32.partialorder %v3840_v60, 0.0 }
 0x180   : > { %v4352_v9 = vmul.f32 0.2, %v3840_v60  ;;  %v4477_v10 = vsel %vm3965_vm10, %v3709_v54, %v4221_v6  ;;  %vm3966_vm14 = vcmp.ge.f32.partialorder %v3710_v1, 0.0  ;;  %v4222_v14 = vmul.f32 0.2, %v3710_v1 }
 0x181   : > { %v4605_v11 = vsel %vm4093_vm11, %v3837_v57, %v4349_v7  ;;  %v4480_v13 = vsel %vm3968_vm12, %v3712_v59, %v4224_v8  ;;  %vm4094_vm15 = vcmp.ge.f32.partialorder %v3838_v2, 0.0  ;;  %v4350_v17 = vmul.f32 0.2, %v3838_v2 }
 0x182   : > { %v4608_v16 = vsel %vm4096_vm13, %v3840_v60, %v4352_v9  ;;  %v6865_v19 = vpack.c.bf16 %v4480_v13, %v4479_v0  ;;  %v4478_v21 = vsel %vm3966_vm14, %v3710_v1, %v4222_v14  ;;  %v3715_v23 = vadd.f32 %v8587_v63, %v8678_v26  ;;  %v8743_v30 = vpop.f32.mrb[64].mxu0  ;;  %v8745_v27 = vpop.f32.mrb[64].mxu1 }
 0x183   : > { %v7185_v20 = vpack.c.bf16 %v4608_v16, %v4607_v3  ;;  %v6860_v24 = vpack.c.bf16 %v4478_v21, %v4477_v10  ;;  %v4606_v22 = vsel %vm4094_vm15, %v3838_v2, %v4350_v17  ;;  %v3843_v25 = vadd.f32 %v8587_v63, %v8680_v28  ;;  %v8751_v37 = vpop.f32.mrb[65].mxu0  ;;  %v8753_v33 = vpop.f32.mrb[65].mxu1 }
 0x184   : > { %v3713_v29 = vadd.f32 %v8587_v63, %v8686_v32  ;;  %7393 = vst [vmem:[%s8442_s7 + $0xd8] sm:$0xff] %v6865_v19   ;;  %v7180_v31 = vpack.c.bf16 %v4606_v22, %v4605_v11  ;;  %vm3971_vm0 = vcmp.ge.f32.partialorder %v3715_v23, 0.0  ;;  %v4227_v36 = vmul.f32 0.2, %v3715_v23  ;;  %v8759_v43 = vpop.f32.mrb[66].mxu0  ;;  %v8761_v44 = vpop.f32.mrb[66].mxu1 }
 0x185   : > { %7457 = vst [vmem:[%s8442_s7 + $0x2d8] sm:$0xff] %v7185_v20   ;;  %v3841_v26 = vadd.f32 %v8587_v63, %v8688_v35  ;;  %7392 = vst [vmem:[%s8442_s7 + $0xd0] sm:$0xff] %v6860_v24   ;;  %vm4099_vm1 = vcmp.ge.f32.partialorder %v3843_v25, 0.0  ;;  %v4355_v28 = vmul.f32 0.2, %v3843_v25  ;;  %v3716_v39 = vadd.f32 %v8587_v63, %v8692_v38  ;;  %v8767_v49 = vpop.f32.mrb[67].mxu0 }
 0x186   : > { %vm3969_vm2 = vcmp.ge.f32.partialorder %v3713_v29, 0.0  ;;  %v4225_v32 = vmul.f32 0.2, %v3713_v29  ;;  %7456 = vst [vmem:[%s8442_s7 + $0x2d0] sm:$0xff] %v7180_v31   ;;  %v4483_v42 = vsel %vm3971_vm0, %v3715_v23, %v4227_v36  ;;  %v3844_v47 = vadd.f32 %v8587_v63, %v8694_v41  ;;  %v8769_v50 = vpop.f32.mrb[67].mxu1 }
 0x187   : > { %vm4097_vm3 = vcmp.ge.f32.partialorder %v3841_v26, 0.0  ;;  %v4353_v34 = vmul.f32 0.2, %v3841_v26  ;;  %v4611_v35 = vsel %vm4099_vm1, %v3843_v25, %v4355_v28  ;;  %v3714_v48 = vadd.f32 %v8587_v63, %v8698_v45 }
 0x188   : > { %v4481_v40 = vsel %vm3969_vm2, %v3713_v29, %v4225_v32  ;;  %vm3972_vm4 = vcmp.ge.f32.partialorder %v3716_v39, 0.0  ;;  %v4228_v52 = vmul.f32 0.2, %v3716_v39  ;;  %v3842_v38 = vadd.f32 %v8587_v63, %v8700_v46 }
 0x189   : > { %v4609_v51 = vsel %vm4097_vm3, %v3841_v26, %v4353_v34  ;;  %vm4100_vm5 = vcmp.ge.f32.partialorder %v3844_v47, 0.0  ;;  %v4356_v53 = vmul.f32 0.2, %v3844_v47  ;;  %vm3970_vm6 = vcmp.ge.f32.partialorder %v3714_v48, 0.0 }
 0x18a   : > { %v4226_v55 = vmul.f32 0.2, %v3714_v48  ;;  %v4484_v56 = vsel %vm3972_vm4, %v3716_v39, %v4228_v52  ;;  %vm4098_vm7 = vcmp.ge.f32.partialorder %v3842_v38, 0.0  ;;  %v4354_v41 = vmul.f32 0.2, %v3842_v38  ;;  %v8777_v46 = vpop.f32.mrb[68].mxu0 }
 0x18b   : > { %v3719_v45 = vadd.f32 %v8587_v63, %v8705_v58  ;;  %v6875_v54 = vpack.c.bf16 %v4484_v56, %v4483_v42  ;;  %v4612_v57 = vsel %vm4100_vm5, %v3844_v47, %v4356_v53  ;;  %v3847_v60 = vadd.f32 %v8587_v63, %v8717_v61  ;;  %v8779_v0 = vpop.f32.mrb[68].mxu1  ;;  %v8781_v6 = vpop.f32.mrb[69].mxu0 }
 0x18c   : > { %v4482_v59 = vsel %vm3970_vm6, %v3714_v48, %v4226_v55  ;;  %v7195_v3 = vpack.c.bf16 %v4612_v57, %v4611_v35  ;;  %v4610_v2 = vsel %vm4098_vm7, %v3842_v38, %v4354_v41  ;;  %v8783_v58 = vpop.f32.mrb[69].mxu1  ;;  %v8786_v61 = vpop.f32.mrb[70].mxu0  ;;  %v3717_v10 = vadd.f32 %v8587_v63, %v8719_v62 }
 0x18d   : > { %v6870_v1 = vpack.c.bf16 %v4482_v59, %v4481_v40  ;;  %vm3975_vm8 = vcmp.ge.f32.partialorder %v3719_v45, 0.0  ;;  %7395 = vst [vmem:[%s8442_s7 + $0xe8] sm:$0xff] %v6875_v54   ;;  %v7190_v7 = vpack.c.bf16 %v4610_v2, %v4609_v51  ;;  %v4231_v8 = vmul.f32 0.2, %v3719_v45  ;;  %v8798_v16 = vpop.f32.mrb[70].mxu1  ;;  %v8800_v17 = vpop.f32.mrb[71].mxu0 }
 0x18e   : > { %vm4103_vm9 = vcmp.ge.f32.partialorder %v3847_v60, 0.0  ;;  %v4359_v9 = vmul.f32 0.2, %v3847_v60  ;;  %7459 = vst [vmem:[%s8442_s7 + $0x2e8] sm:$0xff] %v7195_v3   ;;  %v3845_v11 = vadd.f32 %v8587_v63, %v8727_v4  ;;  %v3720_v14 = vadd.f32 %v8587_v63, %v8729_v5  ;;  %v8808_v21 = vpop.f32.mrb[71].mxu1 }
 0x18f   : > { %7394 = vst [vmem:[%s8442_s7 + $0xe0] sm:$0xff] %v6870_v1   ;;  %v3848_v13 = vadd.f32 %v8587_v63, %v8731_v12  ;;  %7458 = vst [vmem:[%s8442_s7 + $0x2e0] sm:$0xff] %v7190_v7   ;;  %v4487_v19 = vsel %vm3975_vm8, %v3719_v45, %v4231_v8  ;;  %v3718_v62 = vadd.f32 %v8587_v63, %v8733_v15  ;;  %vm3973_vm10 = vcmp.ge.f32.partialorder %v3717_v10, 0.0 }
 0x190   : > { %v4615_v20 = vsel %vm4103_vm9, %v3847_v60, %v4359_v9  ;;  %v3846_v4 = vadd.f32 %v8587_v63, %v8735_v18  ;;  %v4229_v5 = vmul.f32 0.2, %v3717_v10  ;;  %vm4101_vm11 = vcmp.ge.f32.partialorder %v3845_v11, 0.0 }
 0x191   : > { %v4357_v12 = vmul.f32 0.2, %v3845_v11  ;;  %vm3976_vm12 = vcmp.ge.f32.partialorder %v3720_v14, 0.0  ;;  %v4232_v23 = vmul.f32 0.2, %v3720_v14  ;;  %vm4104_vm13 = vcmp.ge.f32.partialorder %v3848_v13, 0.0 }
 0x192   : > { %v4360_v24 = vmul.f32 0.2, %v3848_v13  ;;  %v4485_v22 = vsel %vm3973_vm10, %v3717_v10, %v4229_v5  ;;  %vm3974_vm14 = vcmp.ge.f32.partialorder %v3718_v62, 0.0  ;;  %v4230_v29 = vmul.f32 0.2, %v3718_v62  ;;  %v8810_v18 = vpop.f32.mrb[72].mxu0 }
 0x193   : > { %v4613_v25 = vsel %vm4101_vm11, %v3845_v11, %v4357_v12  ;;  %v4488_v31 = vsel %vm3976_vm12, %v3720_v14, %v4232_v23  ;;  %vm4102_vm15 = vcmp.ge.f32.partialorder %v3846_v4, 0.0  ;;  %v4358_v15 = vmul.f32 0.2, %v3846_v4  ;;  %v8812_v26 = vpop.f32.mrb[72].mxu1  ;;  %v8816_v39 = vpop.f32.mrb[73].mxu0 }
 0x194   : > { %v4616_v36 = vsel %vm4104_vm13, %v3848_v13, %v4360_v24  ;;  %v6885_v28 = vpack.c.bf16 %v4488_v31, %v4487_v19  ;;  %v4486_v42 = vsel %vm3974_vm14, %v3718_v62, %v4230_v29  ;;  %v3723_v34 = vadd.f32 %v8587_v63, %v8743_v30  ;;  %v8818_v35 = vpop.f32.mrb[73].mxu1  ;;  %v8824_v52 = vpop.f32.mrb[74].mxu0 }
 0x195   : > { %v7205_v32 = vpack.c.bf16 %v4616_v36, %v4615_v20  ;;  %v6880_v40 = vpack.c.bf16 %v4486_v42, %v4485_v22  ;;  %v4614_v47 = vsel %vm4102_vm15, %v3846_v4, %v4358_v15  ;;  %v3851_v48 = vadd.f32 %v8587_v63, %v8745_v27  ;;  %v8826_v38 = vpop.f32.mrb[74].mxu1  ;;  %v8832_v56 = vpop.f32.mrb[75].mxu0 }
 0x196   : > { %v3721_v51 = vadd.f32 %v8587_v63, %v8751_v37  ;;  %7397 = vst [vmem:[%s8442_s7 + $0xf8] sm:$0xff] %v6885_v28   ;;  %v7200_v30 = vpack.c.bf16 %v4614_v47, %v4613_v25  ;;  %vm3979_vm0 = vcmp.ge.f32.partialorder %v3723_v34, 0.0  ;;  %v4235_v53 = vmul.f32 0.2, %v3723_v34  ;;  %v8834_v41 = vpop.f32.mrb[75].mxu1 }
 0x197   : > { %7461 = vst [vmem:[%s8442_s7 + $0x2f8] sm:$0xff] %v7205_v32   ;;  %v3849_v55 = vadd.f32 %v8587_v63, %v8753_v33  ;;  %7396 = vst [vmem:[%s8442_s7 + $0xf0] sm:$0xff] %v6880_v40   ;;  %vm4107_vm1 = vcmp.ge.f32.partialorder %v3851_v48, 0.0  ;;  %v4363_v27 = vmul.f32 0.2, %v3851_v48  ;;  %v3724_v57 = vadd.f32 %v8587_v63, %v8759_v43 }
 0x198   : > { %vm3977_vm2 = vcmp.ge.f32.partialorder %v3721_v51, 0.0  ;;  %v4233_v37 = vmul.f32 0.2, %v3721_v51  ;;  %7460 = vst [vmem:[%s8442_s7 + $0x2f0] sm:$0xff] %v7200_v30   ;;  %v4491_v45 = vsel %vm3979_vm0, %v3723_v34, %v4235_v53  ;;  %v3852_v33 = vadd.f32 %v8587_v63, %v8761_v44 }
 0x199   : > { %vm4105_vm3 = vcmp.ge.f32.partialorder %v3849_v55, 0.0  ;;  %v4361_v54 = vmul.f32 0.2, %v3849_v55  ;;  %v4619_v59 = vsel %vm4107_vm1, %v3851_v48, %v4363_v27  ;;  %v3722_v3 = vadd.f32 %v8587_v63, %v8767_v49 }
 0x19a   : > { %v4489_v60 = vsel %vm3977_vm2, %v3721_v51, %v4233_v37  ;;  %vm3980_vm4 = vcmp.ge.f32.partialorder %v3724_v57, 0.0  ;;  %v4236_v2 = vmul.f32 0.2, %v3724_v57  ;;  %v3850_v7 = vadd.f32 %v8587_v63, %v8769_v50  ;;  %v8848_v11 = vpop.f32.mrb[76].mxu0  ;;  %v8850_v49 = vpop.f32.mrb[76].mxu1 }
 0x19b   : > { %v4617_v1 = vsel %vm4105_vm3, %v3849_v55, %v4361_v54  ;;  %vm4108_vm5 = vcmp.ge.f32.partialorder %v3852_v33, 0.0  ;;  %v4364_v8 = vmul.f32 0.2, %v3852_v33  ;;  %vm3978_vm6 = vcmp.ge.f32.partialorder %v3722_v3, 0.0  ;;  %v8854_v20 = vpop.f32.mrb[77].mxu0  ;;  %v8856_v62 = vpop.f32.mrb[77].mxu1 }
 0x19c   : > { %v4234_v9 = vmul.f32 0.2, %v3722_v3  ;;  %v4492_v10 = vsel %vm3980_vm4, %v3724_v57, %v4236_v2  ;;  %vm4106_vm7 = vcmp.ge.f32.partialorder %v3850_v7, 0.0  ;;  %v4362_v43 = vmul.f32 0.2, %v3850_v7  ;;  %v8860_v23 = vpop.f32.mrb[78].mxu1 }
 0x19d   : > { %v3727_v44 = vadd.f32 %v8587_v63, %v8777_v46  ;;  %v6895_v14 = vpack.c.bf16 %v4492_v10, %v4491_v45  ;;  %v4620_v13 = vsel %vm4108_vm5, %v3852_v33, %v4364_v8  ;;  %v3855_v50 = vadd.f32 %v8587_v63, %v8779_v0  ;;  %v8858_v46 = vpop.f32.mrb[78].mxu0  ;;  %v8875_v28 = vpop.f32.mrb[79].mxu1 }
 0x19e   : > { %v4490_v19 = vsel %vm3978_vm6, %v3722_v3, %v4234_v9  ;;  %v7215_v4 = vpack.c.bf16 %v4620_v13, %v4619_v59  ;;  %v4618_v12 = vsel %vm4106_vm7, %v3850_v7, %v4362_v43  ;;  %v8863_v0 = vpop.f32.mrb[79].mxu0  ;;  %v3725_v29 = vadd.f32 %v8587_v63, %v8781_v6 }
 0x19f   : > { %v6890_v5 = vpack.c.bf16 %v4490_v19, %v4489_v60  ;;  %vm3983_vm8 = vcmp.ge.f32.partialorder %v3727_v44, 0.0  ;;  %7399 = vst [vmem:[%s8442_s7 + $0x108] sm:$0xff] %v6895_v14   ;;  %v7210_v24 = vpack.c.bf16 %v4618_v12, %v4617_v1  ;;  %v4239_v22 = vmul.f32 0.2, %v3727_v44 }
 0x1a0   : > { %vm4111_vm9 = vcmp.ge.f32.partialorder %v3855_v50, 0.0  ;;  %v4367_v25 = vmul.f32 0.2, %v3855_v50  ;;  %7463 = vst [vmem:[%s8442_s7 + $0x308] sm:$0xff] %v7215_v4   ;;  %v3853_v31 = vadd.f32 %v8587_v63, %v8783_v58  ;;  %v3728_v36 = vadd.f32 %v8587_v63, %v8786_v61 }
 0x1a1   : > { %7398 = vst [vmem:[%s8442_s7 + $0x100] sm:$0xff] %v6890_v5   ;;  %v3856_v15 = vadd.f32 %v8587_v63, %v8798_v16  ;;  %7462 = vst [vmem:[%s8442_s7 + $0x300] sm:$0xff] %v7210_v24   ;;  %v4495_v32 = vsel %vm3983_vm8, %v3727_v44, %v4239_v22  ;;  %v3726_v34 = vadd.f32 %v8587_v63, %v8800_v17  ;;  %vm3981_vm10 = vcmp.ge.f32.partialorder %v3725_v29, 0.0 }
 0x1a2   : > { %v4623_v42 = vsel %vm4111_vm9, %v3855_v50, %v4367_v25  ;;  %v3854_v6 = vadd.f32 %v8587_v63, %v8808_v21  ;;  %v4237_v58 = vmul.f32 0.2, %v3725_v29  ;;  %vm4109_vm11 = vcmp.ge.f32.partialorder %v3853_v31, 0.0  ;;  %v8883_v30 = vpop.f32.mrb[80].mxu0  ;;  %v8885_v53 = vpop.f32.mrb[80].mxu1 }
 0x1a3   : > { %v4365_v40 = vmul.f32 0.2, %v3853_v31  ;;  %vm3984_vm12 = vcmp.ge.f32.partialorder %v3728_v36, 0.0  ;;  %v4240_v61 = vmul.f32 0.2, %v3728_v36  ;;  %vm4112_vm13 = vcmp.ge.f32.partialorder %v3856_v15, 0.0 }
 0x1a4   : > { %v4368_v16 = vmul.f32 0.2, %v3856_v15  ;;  %v4493_v47 = vsel %vm3981_vm10, %v3725_v29, %v4237_v58  ;;  %vm3982_vm14 = vcmp.ge.f32.partialorder %v3726_v34, 0.0  ;;  %v4238_v51 = vmul.f32 0.2, %v3726_v34  ;;  %v8887_v27 = vpop.f32.mrb[81].mxu0 }
 0x1a5   : > { %v4621_v48 = vsel %vm4109_vm11, %v3853_v31, %v4365_v40  ;;  %v4496_v17 = vsel %vm3984_vm12, %v3728_v36, %v4240_v61  ;;  %vm4110_vm15 = vcmp.ge.f32.partialorder %v3854_v6, 0.0  ;;  %v4366_v21 = vmul.f32 0.2, %v3854_v6  ;;  %v8889_v37 = vpop.f32.mrb[81].mxu1  ;;  %v8893_v60 = vpop.f32.mrb[82].mxu0 }
 0x1a6   : > { %v4624_v55 = vsel %vm4112_vm13, %v3856_v15, %v4368_v16  ;;  %v6905_v45 = vpack.c.bf16 %v4496_v17, %v4495_v32  ;;  %v4494_v57 = vsel %vm3982_vm14, %v3726_v34, %v4238_v51  ;;  %v3731_v59 = vadd.f32 %v8587_v63, %v8810_v18  ;;  %v8895_v33 = vpop.f32.mrb[82].mxu1  ;;  %v8901_v8 = vpop.f32.mrb[83].mxu0 }
 0x1a7   : > { %v7225_v54 = vpack.c.bf16 %v4624_v55, %v4623_v42  ;;  %v6900_v3 = vpack.c.bf16 %v4494_v57, %v4493_v47  ;;  %v4622_v1 = vsel %vm4110_vm15, %v3854_v6, %v4366_v21  ;;  %v3859_v2 = vadd.f32 %v8587_v63, %v8812_v26  ;;  %v8903_v9 = vpop.f32.mrb[83].mxu1 }
 0x1a8   : > { %v3729_v7 = vadd.f32 %v8587_v63, %v8816_v39  ;;  %7401 = vst [vmem:[%s8442_s7 + $0x118] sm:$0xff] %v6905_v45   ;;  %v7220_v18 = vpack.c.bf16 %v4622_v1, %v4621_v48  ;;  %vm3987_vm0 = vcmp.ge.f32.partialorder %v3731_v59, 0.0  ;;  %v4243_v10 = vmul.f32 0.2, %v3731_v59 }
 0x1a9   : > { %7465 = vst [vmem:[%s8442_s7 + $0x318] sm:$0xff] %v7225_v54   ;;  %v3857_v43 = vadd.f32 %v8587_v63, %v8818_v35  ;;  %7400 = vst [vmem:[%s8442_s7 + $0x110] sm:$0xff] %v6900_v3   ;;  %vm4115_vm1 = vcmp.ge.f32.partialorder %v3859_v2, 0.0  ;;  %v4371_v44 = vmul.f32 0.2, %v3859_v2  ;;  %v3732_v13 = vadd.f32 %v8587_v63, %v8824_v52 }
 0x1aa   : > { %vm3985_vm2 = vcmp.ge.f32.partialorder %v3729_v7, 0.0  ;;  %v4241_v26 = vmul.f32 0.2, %v3729_v7  ;;  %7464 = vst [vmem:[%s8442_s7 + $0x310] sm:$0xff] %v7220_v18   ;;  %v4499_v14 = vsel %vm3987_vm0, %v3731_v59, %v4243_v10  ;;  %v3860_v4 = vadd.f32 %v8587_v63, %v8826_v38  ;;  %v8917_v5 = vpop.f32.mrb[84].mxu0  ;;  %v8919_v12 = vpop.f32.mrb[84].mxu1 }
 0x1ab   : > { %vm4113_vm3 = vcmp.ge.f32.partialorder %v3857_v43, 0.0  ;;  %v4369_v39 = vmul.f32 0.2, %v3857_v43  ;;  %v4627_v19 = vsel %vm4115_vm1, %v3859_v2, %v4371_v44  ;;  %v3730_v35 = vadd.f32 %v8587_v63, %v8832_v56  ;;  %v8923_v29 = vpop.f32.mrb[85].mxu0  ;;  %v8925_v52 = vpop.f32.mrb[85].mxu1 }
 0x1ac   : > { %v4497_v50 = vsel %vm3985_vm2, %v3729_v7, %v4241_v26  ;;  %vm3988_vm4 = vcmp.ge.f32.partialorder %v3732_v13, 0.0  ;;  %v4244_v22 = vmul.f32 0.2, %v3732_v13  ;;  %v3858_v25 = vadd.f32 %v8587_v63, %v8834_v41  ;;  %v8929_v32 = vpop.f32.mrb[86].mxu0  ;;  %v8931_v42 = vpop.f32.mrb[86].mxu1 }
 0x1ad   : > { %v4625_v24 = vsel %vm4113_vm3, %v3857_v43, %v4369_v39  ;;  %vm4116_vm5 = vcmp.ge.f32.partialorder %v3860_v4, 0.0  ;;  %v4372_v31 = vmul.f32 0.2, %v3860_v4  ;;  %vm3986_vm6 = vcmp.ge.f32.partialorder %v3730_v35, 0.0  ;;  %v8935_v40 = vpop.f32.mrb[87].mxu0  ;;  %v8937_v61 = vpop.f32.mrb[87].mxu1 }
 0x1ae   : > { %v4242_v38 = vmul.f32 0.2, %v3730_v35  ;;  %v4500_v36 = vsel %vm3988_vm4, %v3732_v13, %v4244_v22  ;;  %vm4114_vm7 = vcmp.ge.f32.partialorder %v3858_v25, 0.0  ;;  %v4370_v56 = vmul.f32 0.2, %v3858_v25 }
 0x1af   : > { %v3735_v15 = vadd.f32 %v8587_v63, %v8848_v11  ;;  %v6915_v41 = vpack.c.bf16 %v4500_v36, %v4499_v14  ;;  %v4628_v34 = vsel %vm4116_vm5, %v3860_v4, %v4372_v31  ;;  %v3863_v58 = vadd.f32 %v8587_v63, %v8850_v49 }
 0x1b0   : > { %v4498_v6 = vsel %vm3986_vm6, %v3730_v35, %v4242_v38  ;;  %v7235_v16 = vpack.c.bf16 %v4628_v34, %v4627_v19  ;;  %v4626_v11 = vsel %vm4114_vm7, %v3858_v25, %v4370_v56  ;;  %v3733_v55 = vadd.f32 %v8587_v63, %v8854_v20 }
 0x1b1   : > { %v6910_v47 = vpack.c.bf16 %v4498_v6, %v4497_v50  ;;  %vm3991_vm8 = vcmp.ge.f32.partialorder %v3735_v15, 0.0  ;;  %7403 = vst [vmem:[%s8442_s7 + $0x128] sm:$0xff] %v6915_v41   ;;  %v7230_v48 = vpack.c.bf16 %v4626_v11, %v4625_v24  ;;  %v4247_v51 = vmul.f32 0.2, %v3735_v15 }
 0x1b2   : > { %vm4119_vm9 = vcmp.ge.f32.partialorder %v3863_v58, 0.0  ;;  %v4375_v17 = vmul.f32 0.2, %v3863_v58  ;;  %7467 = vst [vmem:[%s8442_s7 + $0x328] sm:$0xff] %v7235_v16   ;;  %v3861_v49 = vadd.f32 %v8587_v63, %v8856_v62  ;;  %v3736_v21 = vadd.f32 %v8587_v63, %v8858_v46  ;;  %v8955_v1 = vpop.f32.mrb[88].mxu0  ;;  %v8957_v20 = vpop.f32.mrb[88].mxu1 }
 0x1b3   : > { %7402 = vst [vmem:[%s8442_s7 + $0x120] sm:$0xff] %v6910_v47   ;;  %v3864_v45 = vadd.f32 %v8587_v63, %v8860_v23  ;;  %7466 = vst [vmem:[%s8442_s7 + $0x320] sm:$0xff] %v7230_v48   ;;  %v4503_v54 = vsel %vm3991_vm8, %v3735_v15, %v4247_v51  ;;  %v3734_v59 = vadd.f32 %v8587_v63, %v8863_v0  ;;  %vm3989_vm10 = vcmp.ge.f32.partialorder %v3733_v55, 0.0  ;;  %v8959_v0 = vpop.f32.mrb[89].mxu0  ;;  %v8961_v43 = vpop.f32.mrb[89].mxu1 }
 0x1b4   : > { %v4631_v57 = vsel %vm4119_vm9, %v3863_v58, %v4375_v17  ;;  %v3862_v3 = vadd.f32 %v8587_v63, %v8875_v28  ;;  %v4245_v62 = vmul.f32 0.2, %v3733_v55  ;;  %vm4117_vm11 = vcmp.ge.f32.partialorder %v3861_v49, 0.0  ;;  %v8963_v14 = vpop.f32.mrb[90].mxu0  ;;  %v8965_v39 = vpop.f32.mrb[90].mxu1 }
 0x1b5   : > { %v4373_v46 = vmul.f32 0.2, %v3861_v49  ;;  %vm3992_vm12 = vcmp.ge.f32.partialorder %v3736_v21, 0.0  ;;  %v4248_v2 = vmul.f32 0.2, %v3736_v21  ;;  %vm4120_vm13 = vcmp.ge.f32.partialorder %v3864_v45, 0.0 }
 0x1b6   : > { %v4376_v23 = vmul.f32 0.2, %v3864_v45  ;;  %v4501_v7 = vsel %vm3989_vm10, %v3733_v55, %v4245_v62  ;;  %vm3990_vm14 = vcmp.ge.f32.partialorder %v3734_v59, 0.0  ;;  %v4246_v10 = vmul.f32 0.2, %v3734_v59  ;;  %v8969_v35 = vpop.f32.mrb[91].mxu0 }
 0x1b7   : > { %v4629_v18 = vsel %vm4117_vm11, %v3861_v49, %v4373_v46  ;;  %v4504_v28 = vsel %vm3992_vm12, %v3736_v21, %v4248_v2  ;;  %vm4118_vm15 = vcmp.ge.f32.partialorder %v3862_v3, 0.0  ;;  %v4374_v26 = vmul.f32 0.2, %v3862_v3  ;;  %v8971_v24 = vpop.f32.mrb[91].mxu1 }
 0x1b8   : > { %v4632_v44 = vsel %vm4120_vm13, %v3864_v45, %v4376_v23  ;;  %v6925_v13 = vpack.c.bf16 %v4504_v28, %v4503_v54  ;;  %v4502_v50 = vsel %vm3990_vm14, %v3734_v59, %v4246_v10  ;;  %v3739_v4 = vadd.f32 %v8587_v63, %v8883_v30 }
 0x1b9   : > { %v7245_v19 = vpack.c.bf16 %v4632_v44, %v4631_v57  ;;  %v6920_v22 = vpack.c.bf16 %v4502_v50, %v4501_v7  ;;  %v4630_v25 = vsel %vm4118_vm15, %v3862_v3, %v4374_v26  ;;  %v3867_v31 = vadd.f32 %v8587_v63, %v8885_v53 }
 0x1ba   : > { %v3737_v38 = vadd.f32 %v8587_v63, %v8887_v27  ;;  %7405 = vst [vmem:[%s8442_s7 + $0x138] sm:$0xff] %v6925_v13   ;;  %v7240_v36 = vpack.c.bf16 %v4630_v25, %v4629_v18  ;;  %vm3995_vm0 = vcmp.ge.f32.partialorder %v3739_v4, 0.0  ;;  %v4251_v56 = vmul.f32 0.2, %v3739_v4  ;;  %v8986_v27 = vld [vmem:[%s9428_s2] ss:$0 sm:$0xff] }
 0x1bb   : > { %7469 = vst [vmem:[%s8442_s7 + $0x338] sm:$0xff] %v7245_v19   ;;  %v3865_v30 = vadd.f32 %v8587_v63, %v8889_v37  ;;  %7404 = vst [vmem:[%s8442_s7 + $0x130] sm:$0xff] %v6920_v22   ;;  %vm4123_vm1 = vcmp.ge.f32.partialorder %v3867_v31, 0.0  ;;  %v4379_v15 = vmul.f32 0.2, %v3867_v31  ;;  %v3740_v6 = vadd.f32 %v8986_v27, %v8893_v60  ;;  %v8990_v58 = vpop.f32.mrb[92].mxu0 }
 0x1bc   : > { %vm3993_vm2 = vcmp.ge.f32.partialorder %v3737_v38, 0.0  ;;  %v4249_v41 = vmul.f32 0.2, %v3737_v38  ;;  %7468 = vst [vmem:[%s8442_s7 + $0x330] sm:$0xff] %v7240_v36   ;;  %v4507_v34 = vsel %vm3995_vm0, %v3739_v4, %v4251_v56  ;;  %v8992_v63 = vpop.f32.mrb[92].mxu1  ;;  %v3868_v47 = vadd.f32 %v8986_v27, %v8895_v33  ;;  %v8998_v48 = vpop.f32.mrb[93].mxu0 }
 0x1bd   : > { %vm4121_vm3 = vcmp.ge.f32.partialorder %v3865_v30, 0.0  ;;  %v4377_v53 = vmul.f32 0.2, %v3865_v30  ;;  %v4635_v37 = vsel %vm4123_vm1, %v3867_v31, %v4379_v15  ;;  %v3738_v11 = vadd.f32 %v8986_v27, %v8901_v8  ;;  %v9000_v51 = vpop.f32.mrb[93].mxu1  ;;  %v9004_v49 = vpop.f32.mrb[94].mxu0 }
 0x1be   : > { %v4505_v16 = vsel %vm3993_vm2, %v3737_v38, %v4249_v41  ;;  %vm3996_vm4 = vcmp.ge.f32.partialorder %v3740_v6, 0.0  ;;  %v4252_v55 = vmul.f32 0.2, %v3740_v6  ;;  %v3866_v60 = vadd.f32 %v8986_v27, %v8903_v9  ;;  %v9006_v21 = vpop.f32.mrb[94].mxu1  ;;  %v9010_v59 = vpop.f32.mrb[95].mxu0 }
 0x1bf   : > { %v4633_v17 = vsel %vm4121_vm3, %v3865_v30, %v4377_v53  ;;  %vm4124_vm5 = vcmp.ge.f32.partialorder %v3868_v47, 0.0  ;;  %v4380_v45 = vmul.f32 0.2, %v3868_v47  ;;  %vm3994_vm6 = vcmp.ge.f32.partialorder %v3738_v11, 0.0  ;;  %v9012_v3 = vpop.f32.mrb[95].mxu1 }
 0x1c0   : > { %v4250_v33 = vmul.f32 0.2, %v3738_v11  ;;  %v4508_v8 = vsel %vm3996_vm4, %v3740_v6, %v4252_v55  ;;  %vm4122_vm7 = vcmp.ge.f32.partialorder %v3866_v60, 0.0  ;;  %v4378_v54 = vmul.f32 0.2, %v3866_v60 }
 0x1c1   : > { %v3743_v57 = vadd.f32 %v8986_v27, %v8917_v5  ;;  %v6935_v9 = vpack.c.bf16 %v4508_v8, %v4507_v34  ;;  %v4636_v62 = vsel %vm4124_vm5, %v3868_v47, %v4380_v45  ;;  %v3871_v2 = vadd.f32 %v8986_v27, %v8919_v12 }
 0x1c2   : > { %v4506_v46 = vsel %vm3994_vm6, %v3738_v11, %v4250_v33  ;;  %v7255_v23 = vpack.c.bf16 %v4636_v62, %v4635_v37  ;;  %v4634_v18 = vsel %vm4122_vm7, %v3866_v60, %v4378_v54  ;;  %v9017_v44 = vpop.f32.mrb[96].mxu0  ;;  %v3741_v26 = vadd.f32 %v8986_v27, %v8923_v29  ;;  %v9029_v50 = vpop.f32.mrb[96].mxu1 }
 0x1c3   : > { %v6930_v7 = vpack.c.bf16 %v4506_v46, %v4505_v16  ;;  %vm3999_vm8 = vcmp.ge.f32.partialorder %v3743_v57, 0.0  ;;  %7407 = vst [vmem:[%s8442_s7 + $0x148] sm:$0xff] %v6935_v9   ;;  %v7250_v10 = vpack.c.bf16 %v4634_v18, %v4633_v17  ;;  %v4255_v5 = vmul.f32 0.2, %v3743_v57  ;;  %v9031_v4 = vpop.f32.mrb[97].mxu0  ;;  %v9039_v31 = vpop.f32.mrb[97].mxu1 }
 0x1c4   : > { %vm4127_vm9 = vcmp.ge.f32.partialorder %v3871_v2, 0.0  ;;  %v4383_v28 = vmul.f32 0.2, %v3871_v2  ;;  %7471 = vst [vmem:[%s8442_s7 + $0x348] sm:$0xff] %v7255_v23   ;;  %v3869_v12 = vadd.f32 %v8986_v27, %v8925_v52  ;;  %v3744_v13 = vadd.f32 %v8986_v27, %v8929_v32  ;;  %v9041_v32 = vpop.f32.mrb[98].mxu0 }
 0x1c5   : > { %7406 = vst [vmem:[%s8442_s7 + $0x140] sm:$0xff] %v6930_v7   ;;  %v3872_v19 = vadd.f32 %v8986_v27, %v8931_v42  ;;  %7470 = vst [vmem:[%s8442_s7 + $0x340] sm:$0xff] %v7250_v10   ;;  %v4511_v22 = vsel %vm3999_vm8, %v3743_v57, %v4255_v5  ;;  %v3742_v29 = vadd.f32 %v8986_v27, %v8935_v40  ;;  %vm3997_vm10 = vcmp.ge.f32.partialorder %v3741_v26, 0.0  ;;  %v9043_v40 = vpop.f32.mrb[98].mxu1  ;;  %v9045_v34 = vpop.f32.mrb[99].mxu0 }
 0x1c6   : > { %v4639_v25 = vsel %vm4127_vm9, %v3871_v2, %v4383_v28  ;;  %v3870_v52 = vadd.f32 %v8986_v27, %v8937_v61  ;;  %v4253_v42 = vmul.f32 0.2, %v3741_v26  ;;  %vm4125_vm11 = vcmp.ge.f32.partialorder %v3869_v12, 0.0  ;;  %v9047_v37 = vpop.f32.mrb[99].mxu1 }
 0x1c7   : > { %v4381_v38 = vmul.f32 0.2, %v3869_v12  ;;  %vm4000_vm12 = vcmp.ge.f32.partialorder %v3744_v13, 0.0  ;;  %v4256_v36 = vmul.f32 0.2, %v3744_v13  ;;  %vm4128_vm13 = vcmp.ge.f32.partialorder %v3872_v19, 0.0 }
 0x1c8   : > { %v4384_v56 = vmul.f32 0.2, %v3872_v19  ;;  %v4509_v30 = vsel %vm3997_vm10, %v3741_v26, %v4253_v42  ;;  %vm3998_vm14 = vcmp.ge.f32.partialorder %v3742_v29, 0.0  ;;  %v4254_v41 = vmul.f32 0.2, %v3742_v29 }
 0x1c9   : > { %v4637_v15 = vsel %vm4125_vm11, %v3869_v12, %v4381_v38  ;;  %v4512_v61 = vsel %vm4000_vm12, %v3744_v13, %v4256_v36  ;;  %vm4126_vm15 = vcmp.ge.f32.partialorder %v3870_v52, 0.0  ;;  %v4382_v6 = vmul.f32 0.2, %v3870_v52 }
 0x1ca   : > { %v4640_v53 = vsel %vm4128_vm13, %v3872_v19, %v4384_v56  ;;  %v6945_v16 = vpack.c.bf16 %v4512_v61, %v4511_v22  ;;  %v4510_v11 = vsel %vm3998_vm14, %v3742_v29, %v4254_v41  ;;  %v3747_v17 = vadd.f32 %v8986_v27, %v8955_v1  ;;  %v9055_v8 = vpop.f32.mrb[100].mxu0  ;;  %v9057_v54 = vpop.f32.mrb[100].mxu1 }
 0x1cb   : > { %v7265_v47 = vpack.c.bf16 %v4640_v53, %v4639_v25  ;;  %v6940_v55 = vpack.c.bf16 %v4510_v11, %v4509_v30  ;;  %v4638_v60 = vsel %vm4126_vm15, %v3870_v52, %v4382_v6  ;;  %v3875_v45 = vadd.f32 %v8986_v27, %v8957_v20  ;;  %v9063_v62 = vpop.f32.mrb[101].mxu0  ;;  %v9065_v46 = vpop.f32.mrb[101].mxu1 }
 0x1cc   : > { %v3745_v33 = vadd.f32 %v8986_v27, %v8959_v0  ;;  %7409 = vst [vmem:[%s8442_s7 + $0x158] sm:$0xff] %v6945_v16   ;;  %v7260_v57 = vpack.c.bf16 %v4638_v60, %v4637_v15  ;;  %vm4003_vm0 = vcmp.ge.f32.partialorder %v3747_v17, 0.0  ;;  %v4259_v9 = vmul.f32 0.2, %v3747_v17  ;;  %v9071_v18 = vpop.f32.mrb[102].mxu0  ;;  %v9073_v10 = vpop.f32.mrb[102].mxu1 }
 0x1cd   : > { %7473 = vst [vmem:[%s8442_s7 + $0x358] sm:$0xff] %v7265_v47   ;;  %v3873_v1 = vadd.f32 %v8986_v27, %v8961_v43  ;;  %7408 = vst [vmem:[%s8442_s7 + $0x150] sm:$0xff] %v6940_v55   ;;  %vm4131_vm1 = vcmp.ge.f32.partialorder %v3875_v45, 0.0  ;;  %v4387_v20 = vmul.f32 0.2, %v3875_v45  ;;  %v3748_v7 = vadd.f32 %v8986_v27, %v8963_v14  ;;  %v9079_v12 = vpop.f32.mrb[103].mxu0 }
 0x1ce   : > { %vm4001_vm2 = vcmp.ge.f32.partialorder %v3745_v33, 0.0  ;;  %v4257_v0 = vmul.f32 0.2, %v3745_v33  ;;  %7472 = vst [vmem:[%s8442_s7 + $0x350] sm:$0xff] %v7260_v57   ;;  %v4515_v2 = vsel %vm4003_vm0, %v3747_v17, %v4259_v9  ;;  %v3876_v28 = vadd.f32 %v8986_v27, %v8965_v39  ;;  %v9081_v13 = vpop.f32.mrb[103].mxu1 }
 0x1cf   : > { %vm4129_vm3 = vcmp.ge.f32.partialorder %v3873_v1, 0.0  ;;  %v4385_v23 = vmul.f32 0.2, %v3873_v1  ;;  %v4643_v43 = vsel %vm4131_vm1, %v3875_v45, %v4387_v20  ;;  %v3746_v26 = vadd.f32 %v8986_v27, %v8969_v35 }
 0x1d0   : > { %v4513_v5 = vsel %vm4001_vm2, %v3745_v33, %v4257_v0  ;;  %vm4004_vm4 = vcmp.ge.f32.partialorder %v3748_v7, 0.0  ;;  %v4260_v22 = vmul.f32 0.2, %v3748_v7  ;;  %v3874_v14 = vadd.f32 %v8986_v27, %v8971_v24 }
 0x1d1   : > { %v4641_v19 = vsel %vm4129_vm3, %v3873_v1, %v4385_v23  ;;  %vm4132_vm5 = vcmp.ge.f32.partialorder %v3876_v28, 0.0  ;;  %v4388_v25 = vmul.f32 0.2, %v3876_v28  ;;  %vm4002_vm6 = vcmp.ge.f32.partialorder %v3746_v26, 0.0 }
 0x1d2   : > { %v4258_v29 = vmul.f32 0.2, %v3746_v26  ;;  %v4516_v52 = vsel %vm4004_vm4, %v3748_v7, %v4260_v22  ;;  %vm4130_vm7 = vcmp.ge.f32.partialorder %v3874_v14, 0.0  ;;  %v4386_v39 = vmul.f32 0.2, %v3874_v14  ;;  %v9089_v24 = vpop.f32.mrb[104].mxu0 }
 0x1d3   : > { %v3751_v35 = vadd.f32 %v8986_v27, %v8990_v58  ;;  %v6955_v42 = vpack.c.bf16 %v4516_v52, %v4515_v2  ;;  %v4644_v38 = vsel %vm4132_vm5, %v3876_v28, %v4388_v25  ;;  %v3879_v56 = vadd.f32 %v8986_v27, %v8992_v63  ;;  %v9091_v30 = vpop.f32.mrb[104].mxu1  ;;  %v9093_v53 = vpop.f32.mrb[105].mxu0 }
 0x1d4   : > { %v4514_v36 = vsel %vm4002_vm6, %v3746_v26, %v4258_v29  ;;  %v7275_v15 = vpack.c.bf16 %v4644_v38, %v4643_v43  ;;  %v4642_v61 = vsel %vm4130_vm7, %v3874_v14, %v4386_v39  ;;  %v9095_v58 = vpop.f32.mrb[105].mxu1  ;;  %v9098_v63 = vpop.f32.mrb[106].mxu0  ;;  %v3749_v11 = vadd.f32 %v8986_v27, %v8998_v48 }
 0x1d5   : > { %v6950_v41 = vpack.c.bf16 %v4514_v36, %v4513_v5  ;;  %vm4007_vm8 = vcmp.ge.f32.partialorder %v3751_v35, 0.0  ;;  %7411 = vst [vmem:[%s8442_s7 + $0x168] sm:$0xff] %v6955_v42   ;;  %v7270_v6 = vpack.c.bf16 %v4642_v61, %v4641_v19  ;;  %v4263_v16 = vmul.f32 0.2, %v3751_v35  ;;  %v9110_v45 = vpop.f32.mrb[106].mxu1  ;;  %v9112_v33 = vpop.f32.mrb[107].mxu0 }
 0x1d6   : > { %vm4135_vm9 = vcmp.ge.f32.partialorder %v3879_v56, 0.0  ;;  %v4391_v47 = vmul.f32 0.2, %v3879_v56  ;;  %7475 = vst [vmem:[%s8442_s7 + $0x368] sm:$0xff] %v7275_v15   ;;  %v3877_v17 = vadd.f32 %v8986_v27, %v9000_v51  ;;  %v3752_v55 = vadd.f32 %v8986_v27, %v9004_v49  ;;  %v9120_v1 = vpop.f32.mrb[107].mxu1 }
 0x1d7   : > { %7410 = vst [vmem:[%s8442_s7 + $0x160] sm:$0xff] %v6950_v41   ;;  %v3880_v60 = vadd.f32 %v8986_v27, %v9006_v21  ;;  %7474 = vst [vmem:[%s8442_s7 + $0x360] sm:$0xff] %v7270_v6   ;;  %v4519_v57 = vsel %vm4007_vm8, %v3751_v35, %v4263_v16  ;;  %v3750_v48 = vadd.f32 %v8986_v27, %v9010_v59  ;;  %vm4005_vm10 = vcmp.ge.f32.partialorder %v3749_v11, 0.0 }
 0x1d8   : > { %v4647_v9 = vsel %vm4135_vm9, %v3879_v56, %v4391_v47  ;;  %v3878_v51 = vadd.f32 %v8986_v27, %v9012_v3  ;;  %v4261_v49 = vmul.f32 0.2, %v3749_v11  ;;  %vm4133_vm11 = vcmp.ge.f32.partialorder %v3877_v17, 0.0 }
 0x1d9   : > { %v4389_v21 = vmul.f32 0.2, %v3877_v17  ;;  %vm4008_vm12 = vcmp.ge.f32.partialorder %v3752_v55, 0.0  ;;  %v4264_v20 = vmul.f32 0.2, %v3752_v55  ;;  %vm4136_vm13 = vcmp.ge.f32.partialorder %v3880_v60, 0.0 }
 0x1da   : > { %v4392_v0 = vmul.f32 0.2, %v3880_v60  ;;  %v4517_v2 = vsel %vm4005_vm10, %v3749_v11, %v4261_v49  ;;  %vm4006_vm14 = vcmp.ge.f32.partialorder %v3750_v48, 0.0  ;;  %v4262_v7 = vmul.f32 0.2, %v3750_v48  ;;  %v9122_v3 = vpop.f32.mrb[108].mxu0 }
 0x1db   : > { %v4645_v23 = vsel %vm4133_vm11, %v3877_v17, %v4389_v21  ;;  %v4520_v43 = vsel %vm4008_vm12, %v3752_v55, %v4264_v20  ;;  %vm4134_vm15 = vcmp.ge.f32.partialorder %v3878_v51, 0.0  ;;  %v4390_v59 = vmul.f32 0.2, %v3878_v51  ;;  %v9126_v14 = vpop.f32.mrb[108].mxu1  ;;  %v9128_v25 = vpop.f32.mrb[109].mxu0 }
 0x1dc   : > { %v4648_v5 = vsel %vm4136_vm13, %v3880_v60, %v4392_v0  ;;  %v6965_v28 = vpack.c.bf16 %v4520_v43, %v4519_v57  ;;  %v4518_v19 = vsel %vm4006_vm14, %v3750_v48, %v4262_v7  ;;  %v3755_v22 = vadd.f32 %v8986_v27, %v9017_v44  ;;  %v9134_v42 = vpop.f32.mrb[109].mxu1  ;;  %v9136_v38 = vpop.f32.mrb[110].mxu0 }
 0x1dd   : > { %v7285_v26 = vpack.c.bf16 %v4648_v5, %v4647_v9  ;;  %v6960_v29 = vpack.c.bf16 %v4518_v19, %v4517_v2  ;;  %v4646_v52 = vsel %vm4134_vm15, %v3878_v51, %v4390_v59  ;;  %v3883_v39 = vadd.f32 %v8986_v27, %v9029_v50  ;;  %v9142_v15 = vpop.f32.mrb[110].mxu1  ;;  %v9144_v41 = vpop.f32.mrb[111].mxu0 }
 0x1de   : > { %v3753_v35 = vadd.f32 %v8986_v27, %v9031_v4  ;;  %7413 = vst [vmem:[%s8442_s7 + $0x178] sm:$0xff] %v6965_v28   ;;  %v7280_v44 = vpack.c.bf16 %v4646_v52, %v4645_v23  ;;  %vm4011_vm0 = vcmp.ge.f32.partialorder %v3755_v22, 0.0  ;;  %v4267_v36 = vmul.f32 0.2, %v3755_v22  ;;  %v9150_v47 = vpop.f32.mrb[111].mxu1 }
 0x1df   : > { %7477 = vst [vmem:[%s8442_s7 + $0x378] sm:$0xff] %v7285_v26   ;;  %v3881_v56 = vadd.f32 %v8986_v27, %v9039_v31  ;;  %7412 = vst [vmem:[%s8442_s7 + $0x170] sm:$0xff] %v6960_v29   ;;  %vm4139_vm1 = vcmp.ge.f32.partialorder %v3883_v39, 0.0  ;;  %v4395_v50 = vmul.f32 0.2, %v3883_v39  ;;  %v3756_v16 = vadd.f32 %v8986_v27, %v9041_v32 }
 0x1e0   : > { %vm4009_vm2 = vcmp.ge.f32.partialorder %v3753_v35, 0.0  ;;  %v4265_v4 = vmul.f32 0.2, %v3753_v35  ;;  %7476 = vst [vmem:[%s8442_s7 + $0x370] sm:$0xff] %v7280_v44   ;;  %v4523_v61 = vsel %vm4011_vm0, %v3755_v22, %v4267_v36  ;;  %v3884_v17 = vadd.f32 %v8986_v27, %v9043_v40 }
 0x1e1   : > { %vm4137_vm3 = vcmp.ge.f32.partialorder %v3881_v56, 0.0  ;;  %v4393_v6 = vmul.f32 0.2, %v3881_v56  ;;  %v4651_v11 = vsel %vm4139_vm1, %v3883_v39, %v4395_v50  ;;  %v3754_v55 = vadd.f32 %v8986_v27, %v9045_v34 }
 0x1e2   : > { %v4521_v31 = vsel %vm4009_vm2, %v3753_v35, %v4265_v4  ;;  %vm4012_vm4 = vcmp.ge.f32.partialorder %v3756_v16, 0.0  ;;  %v4268_v57 = vmul.f32 0.2, %v3756_v16  ;;  %v3882_v9 = vadd.f32 %v8986_v27, %v9047_v37  ;;  %v9160_v21 = vpop.f32.mrb[112].mxu0 }
 0x1e3   : > { %v4649_v60 = vsel %vm4137_vm3, %v3881_v56, %v4393_v6  ;;  %vm4140_vm5 = vcmp.ge.f32.partialorder %v3884_v17, 0.0  ;;  %v4396_v48 = vmul.f32 0.2, %v3884_v17  ;;  %vm4010_vm6 = vcmp.ge.f32.partialorder %v3754_v55, 0.0  ;;  %v9162_v34 = vpop.f32.mrb[112].mxu1  ;;  %v9166_v23 = vpop.f32.mrb[113].mxu0 }
 0x1e4   : > { %v4266_v32 = vmul.f32 0.2, %v3754_v55  ;;  %v4524_v51 = vsel %vm4012_vm4, %v3756_v16, %v4268_v57  ;;  %vm4138_vm7 = vcmp.ge.f32.partialorder %v3882_v9, 0.0  ;;  %v4394_v49 = vmul.f32 0.2, %v3882_v9  ;;  %v9168_v7 = vpop.f32.mrb[113].mxu1 }
 0x1e5   : > { %v3759_v40 = vadd.f32 %v8986_v27, %v9055_v8  ;;  %v6975_v20 = vpack.c.bf16 %v4524_v51, %v4523_v61  ;;  %v4652_v0 = vsel %vm4140_vm5, %v3884_v17, %v4396_v48  ;;  %v3887_v37 = vadd.f32 %v8986_v27, %v9057_v54  ;;  %v9170_v8 = vpop.f32.mrb[114].mxu0  ;;  %v9172_v28 = vpop.f32.mrb[114].mxu1 }
 0x1e6   : > { %v4522_v2 = vsel %vm4010_vm6, %v3754_v55, %v4266_v32  ;;  %v7295_v43 = vpack.c.bf16 %v4652_v0, %v4651_v11  ;;  %v4650_v59 = vsel %vm4138_vm7, %v3882_v9, %v4394_v49  ;;  %v9175_v54 = vpop.f32.mrb[115].mxu0  ;;  %v3757_v29 = vadd.f32 %v8986_v27, %v9063_v62  ;;  %v9187_v44 = vpop.f32.mrb[115].mxu1 }
 0x1e7   : > { %v6970_v5 = vpack.c.bf16 %v4522_v2, %v4521_v31  ;;  %vm4015_vm8 = vcmp.ge.f32.partialorder %v3759_v40, 0.0  ;;  %7415 = vst [vmem:[%s8442_s7 + $0x188] sm:$0xff] %v6975_v20   ;;  %v7290_v26 = vpack.c.bf16 %v4650_v59, %v4649_v60  ;;  %v4271_v19 = vmul.f32 0.2, %v3759_v40 }
 0x1e8   : > { %vm4143_vm9 = vcmp.ge.f32.partialorder %v3887_v37, 0.0  ;;  %v4399_v22 = vmul.f32 0.2, %v3887_v37  ;;  %7479 = vst [vmem:[%s8442_s7 + $0x388] sm:$0xff] %v7295_v43   ;;  %v3885_v52 = vadd.f32 %v8986_v27, %v9065_v46  ;;  %v3760_v39 = vadd.f32 %v8986_v27, %v9071_v18 }
 0x1e9   : > { %7414 = vst [vmem:[%s8442_s7 + $0x180] sm:$0xff] %v6970_v5   ;;  %v3888_v35 = vadd.f32 %v8986_v27, %v9073_v10  ;;  %7478 = vst [vmem:[%s8442_s7 + $0x380] sm:$0xff] %v7290_v26   ;;  %v4527_v36 = vsel %vm4015_vm8, %v3759_v40, %v4271_v19  ;;  %v3758_v50 = vadd.f32 %v8986_v27, %v9079_v12  ;;  %vm4013_vm10 = vcmp.ge.f32.partialorder %v3757_v29, 0.0 }
 0x1ea   : > { %v4655_v56 = vsel %vm4143_vm9, %v3887_v37, %v4399_v22  ;;  %v3886_v62 = vadd.f32 %v8986_v27, %v9081_v13  ;;  %v4269_v46 = vmul.f32 0.2, %v3757_v29  ;;  %vm4141_vm11 = vcmp.ge.f32.partialorder %v3885_v52, 0.0  ;;  %v9195_v11 = vpop.f32.mrb[116].mxu0 }
 0x1eb   : > { %v4397_v4 = vmul.f32 0.2, %v3885_v52  ;;  %vm4016_vm12 = vcmp.ge.f32.partialorder %v3760_v39, 0.0  ;;  %v4272_v18 = vmul.f32 0.2, %v3760_v39  ;;  %vm4144_vm13 = vcmp.ge.f32.partialorder %v3888_v35, 0.0 }
 0x1ec   : > { %v4400_v10 = vmul.f32 0.2, %v3888_v35  ;;  %v4525_v61 = vsel %vm4013_vm10, %v3757_v29, %v4269_v46  ;;  %vm4014_vm14 = vcmp.ge.f32.partialorder %v3758_v50, 0.0  ;;  %v4270_v16 = vmul.f32 0.2, %v3758_v50  ;;  %v9197_v31 = vpop.f32.mrb[116].mxu1 }
 0x1ed   : > { %v4653_v6 = vsel %vm4141_vm11, %v3885_v52, %v4397_v4  ;;  %v4528_v12 = vsel %vm4016_vm12, %v3760_v39, %v4272_v18  ;;  %vm4142_vm15 = vcmp.ge.f32.partialorder %v3886_v62, 0.0  ;;  %v4398_v13 = vmul.f32 0.2, %v3886_v62  ;;  %v9199_v55 = vpop.f32.mrb[117].mxu0  ;;  %v9201_v60 = vpop.f32.mrb[117].mxu1 }
 0x1ee   : > { %v4656_v17 = vsel %vm4144_vm13, %v3888_v35, %v4400_v10  ;;  %v6985_v57 = vpack.c.bf16 %v4528_v12, %v4527_v36  ;;  %v4526_v48 = vsel %vm4014_vm14, %v3758_v50, %v4270_v16  ;;  %v3763_v32 = vadd.f32 %v8986_v27, %v9089_v24  ;;  %v9205_v51 = vpop.f32.mrb[118].mxu0  ;;  %v9207_v49 = vpop.f32.mrb[118].mxu1 }
 0x1ef   : > { %v7305_v9 = vpack.c.bf16 %v4656_v17, %v4655_v56  ;;  %v6980_v40 = vpack.c.bf16 %v4526_v48, %v4525_v61  ;;  %v4654_v20 = vsel %vm4142_vm15, %v3886_v62, %v4398_v13  ;;  %v3891_v0 = vadd.f32 %v8986_v27, %v9091_v30  ;;  %v9213_v37 = vpop.f32.mrb[119].mxu0  ;;  %v9215_v43 = vpop.f32.mrb[119].mxu1 }
 0x1f0   : > { %v3761_v2 = vadd.f32 %v8986_v27, %v9093_v53  ;;  %7417 = vst [vmem:[%s8442_s7 + $0x198] sm:$0xff] %v6985_v57   ;;  %v7300_v24 = vpack.c.bf16 %v4654_v20, %v4653_v6  ;;  %vm4019_vm0 = vcmp.ge.f32.partialorder %v3763_v32, 0.0  ;;  %v4275_v5 = vmul.f32 0.2, %v3763_v32 }
 0x1f1   : > { %7481 = vst [vmem:[%s8442_s7 + $0x398] sm:$0xff] %v7305_v9   ;;  %v3889_v59 = vadd.f32 %v8986_v27, %v9095_v58  ;;  %7416 = vst [vmem:[%s8442_s7 + $0x190] sm:$0xff] %v6980_v40   ;;  %vm4147_vm1 = vcmp.ge.f32.partialorder %v3891_v0, 0.0  ;;  %v4403_v26 = vmul.f32 0.2, %v3891_v0  ;;  %v3764_v22 = vadd.f32 %v8986_v27, %v9098_v63 }
 0x1f2   : > { %vm4017_vm2 = vcmp.ge.f32.partialorder %v3761_v2, 0.0  ;;  %v4273_v30 = vmul.f32 0.2, %v3761_v2  ;;  %7480 = vst [vmem:[%s8442_s7 + $0x390] sm:$0xff] %v7300_v24   ;;  %v4531_v19 = vsel %vm4019_vm0, %v3763_v32, %v4275_v5  ;;  %v3892_v39 = vadd.f32 %v8986_v27, %v9110_v45  ;;  %v9229_v35 = vpop.f32.mrb[120].mxu0 }
 0x1f3   : > { %vm4145_vm3 = vcmp.ge.f32.partialorder %v3889_v59, 0.0  ;;  %v4401_v53 = vmul.f32 0.2, %v3889_v59  ;;  %v4659_v29 = vsel %vm4147_vm1, %v3891_v0, %v4403_v26  ;;  %v3762_v58 = vadd.f32 %v8986_v27, %v9112_v33  ;;  %v9233_v62 = vpop.f32.mrb[120].mxu1  ;;  %v9235_v46 = vpop.f32.mrb[121].mxu0 }
 0x1f4   : > { %v4529_v52 = vsel %vm4017_vm2, %v3761_v2, %v4273_v30  ;;  %vm4020_vm4 = vcmp.ge.f32.partialorder %v3764_v22, 0.0  ;;  %v4276_v56 = vmul.f32 0.2, %v3764_v22  ;;  %v3890_v50 = vadd.f32 %v8986_v27, %v9120_v1  ;;  %v9239_v10 = vpop.f32.mrb[121].mxu1  ;;  %v9241_v61 = vpop.f32.mrb[122].mxu0 }
 0x1f5   : > { %v4657_v36 = vsel %vm4145_vm3, %v3889_v59, %v4401_v53  ;;  %vm4148_vm5 = vcmp.ge.f32.partialorder %v3892_v39, 0.0  ;;  %v4404_v63 = vmul.f32 0.2, %v3892_v39  ;;  %vm4018_vm6 = vcmp.ge.f32.partialorder %v3762_v58, 0.0  ;;  %v9245_v17 = vpop.f32.mrb[122].mxu1  ;;  %v9247_v13 = vpop.f32.mrb[123].mxu0 }
 0x1f6   : > { %v4274_v4 = vmul.f32 0.2, %v3762_v58  ;;  %v4532_v45 = vsel %vm4020_vm4, %v3764_v22, %v4276_v56  ;;  %vm4146_vm7 = vcmp.ge.f32.partialorder %v3890_v50, 0.0  ;;  %v4402_v33 = vmul.f32 0.2, %v3890_v50  ;;  %v9249_v48 = vpop.f32.mrb[123].mxu1 }
 0x1f7   : > { %v3767_v18 = vadd.f32 %v8986_v27, %v9122_v3  ;;  %v6995_v1 = vpack.c.bf16 %v4532_v45, %v4531_v19  ;;  %v4660_v6 = vsel %vm4148_vm5, %v3892_v39, %v4404_v63  ;;  %v3895_v12 = vadd.f32 %v8986_v27, %v9126_v14 }
 0x1f8   : > { %v4530_v16 = vsel %vm4018_vm6, %v3762_v58, %v4274_v4  ;;  %v7315_v57 = vpack.c.bf16 %v4660_v6, %v4659_v29  ;;  %v4658_v3 = vsel %vm4146_vm7, %v3890_v50, %v4402_v33  ;;  %v3765_v14 = vadd.f32 %v8986_v27, %v9128_v25 }
 0x1f9   : > { %v6990_v9 = vpack.c.bf16 %v4530_v16, %v4529_v52  ;;  %vm4023_vm8 = vcmp.ge.f32.partialorder %v3767_v18, 0.0  ;;  %7419 = vst [vmem:[%s8442_s7 + $0x1a8] sm:$0xff] %v6995_v1   ;;  %v7310_v32 = vpack.c.bf16 %v4658_v3, %v4657_v36  ;;  %v4279_v40 = vmul.f32 0.2, %v3767_v18 }
 0x1fa   : > { %vm4151_vm9 = vcmp.ge.f32.partialorder %v3895_v12, 0.0  ;;  %v4407_v20 = vmul.f32 0.2, %v3895_v12  ;;  %7483 = vst [vmem:[%s8442_s7 + $0x3a8] sm:$0xff] %v7315_v57   ;;  %v3893_v0 = vadd.f32 %v8986_v27, %v9134_v42  ;;  %v3768_v2 = vadd.f32 %v8986_v27, %v9136_v38  ;;  %v9267_v19 = vpop.f32.mrb[124].mxu0 }
 0x1fb   : > { %7418 = vst [vmem:[%s8442_s7 + $0x1a0] sm:$0xff] %v6990_v9   ;;  %v3896_v24 = vadd.f32 %v8986_v27, %v9142_v15  ;;  %7482 = vst [vmem:[%s8442_s7 + $0x3a0] sm:$0xff] %v7310_v32   ;;  %v4535_v5 = vsel %vm4023_vm8, %v3767_v18, %v4279_v40  ;;  %v3766_v26 = vadd.f32 %v8986_v27, %v9144_v41  ;;  %vm4021_vm10 = vcmp.ge.f32.partialorder %v3765_v14, 0.0  ;;  %v9269_v52 = vpop.f32.mrb[124].mxu1  ;;  %v9271_v41 = vpop.f32.mrb[125].mxu0 }
 0x1fc   : > { %v4663_v59 = vsel %vm4151_vm9, %v3895_v12, %v4407_v20  ;;  %v3894_v30 = vadd.f32 %v8986_v27, %v9150_v47  ;;  %v4277_v25 = vmul.f32 0.2, %v3765_v14  ;;  %vm4149_vm11 = vcmp.ge.f32.partialorder %v3893_v0, 0.0  ;;  %v9273_v36 = vpop.f32.mrb[125].mxu1  ;;  %v9275_v56 = vpop.f32.mrb[126].mxu0 }
 0x1fd   : > { %v4405_v42 = vmul.f32 0.2, %v3893_v0  ;;  %vm4024_vm12 = vcmp.ge.f32.partialorder %v3768_v2, 0.0  ;;  %v4280_v38 = vmul.f32 0.2, %v3768_v2  ;;  %vm4152_vm13 = vcmp.ge.f32.partialorder %v3896_v24, 0.0 }
 0x1fe   : > { %v4408_v53 = vmul.f32 0.2, %v3896_v24  ;;  %v4533_v15 = vsel %vm4021_vm10, %v3765_v14, %v4277_v25  ;;  %vm4022_vm14 = vcmp.ge.f32.partialorder %v3766_v26, 0.0  ;;  %v4278_v29 = vmul.f32 0.2, %v3766_v26  ;;  %v9279_v33 = vpop.f32.mrb[126].mxu1 }
 0x1ff   : > { %v4661_v22 = vsel %vm4149_vm11, %v3893_v0, %v4405_v42  ;;  %v4536_v39 = vsel %vm4024_vm12, %v3768_v2, %v4280_v38  ;;  %vm4150_vm15 = vcmp.ge.f32.partialorder %v3894_v30, 0.0  ;;  %v4406_v58 = vmul.f32 0.2, %v3894_v30  ;;  %v9281_v18 = vpop.f32.mrb[127].mxu0  ;;  %v9287_v57 = vpop.f32.mrb[127].mxu1 }
 0x200   : > { %v4664_v47 = vsel %vm4152_vm13, %v3896_v24, %v4408_v53  ;;  %v7005_v50 = vpack.c.bf16 %v4536_v39, %v4535_v5  ;;  %v4534_v4 = vsel %vm4022_vm14, %v3766_v26, %v4278_v29  ;;  %v3771_v45 = vadd.f32 %v8986_v27, %v9160_v21 }
 0x201   : > { %v7325_v63 = vpack.c.bf16 %v4664_v47, %v4663_v59  ;;  %v7000_v1 = vpack.c.bf16 %v4534_v4, %v4533_v15  ;;  %v4662_v6 = vsel %vm4150_vm15, %v3894_v30, %v4406_v58  ;;  %v3899_v16 = vadd.f32 %v8986_v27, %v9162_v34 }
 0x202   : > { %v3769_v12 = vadd.f32 %v8986_v27, %v9166_v23  ;;  %7421 = vst [vmem:[%s8442_s7 + $0x1b8] sm:$0xff] %v7005_v50   ;;  %v7320_v9 = vpack.c.bf16 %v4662_v6, %v4661_v22  ;;  %vm4027_vm0 = vcmp.ge.f32.partialorder %v3771_v45, 0.0  ;;  %v4283_v21 = vmul.f32 0.2, %v3771_v45 }
 0x203   : > { %7485 = vst [vmem:[%s8442_s7 + $0x3b8] sm:$0xff] %v7325_v63   ;;  %v3897_v3 = vadd.f32 %v8986_v27, %v9168_v7  ;;  %7420 = vst [vmem:[%s8442_s7 + $0x1b0] sm:$0xff] %v7000_v1   ;;  %vm4155_vm1 = vcmp.ge.f32.partialorder %v3899_v16, 0.0  ;;  %v4411_v32 = vmul.f32 0.2, %v3899_v16  ;;  %v3772_v23 = vadd.f32 %v8986_v27, %v9170_v8 }
 0x204   : > { %vm4025_vm2 = vcmp.ge.f32.partialorder %v3769_v12, 0.0  ;;  %v4281_v40 = vmul.f32 0.2, %v3769_v12  ;;  %7484 = vst [vmem:[%s8442_s7 + $0x3b0] sm:$0xff] %v7320_v9   ;;  %v4539_v34 = vsel %vm4027_vm0, %v3771_v45, %v4283_v21  ;;  %v3900_v2 = vadd.f32 %v8986_v27, %v9172_v28 }
 0x205   : > { %vm4153_vm3 = vcmp.ge.f32.partialorder %v3897_v3, 0.0  ;;  %v4409_v20 = vmul.f32 0.2, %v3897_v3  ;;  %v4667_v14 = vsel %vm4155_vm1, %v3899_v16, %v4411_v32  ;;  %v3770_v7 = vadd.f32 %v8986_v27, %v9175_v54 }
 0x206   : > { %v4537_v0 = vsel %vm4025_vm2, %v3769_v12, %v4281_v40  ;;  %vm4028_vm4 = vcmp.ge.f32.partialorder %v3772_v23, 0.0  ;;  %v4284_v5 = vmul.f32 0.2, %v3772_v23  ;;  %v3898_v59 = vadd.f32 %v8986_v27, %v9187_v44 }
 0x207   : > { %v4665_v24 = vsel %vm4153_vm3, %v3897_v3, %v4409_v20  ;;  %vm4156_vm5 = vcmp.ge.f32.partialorder %v3900_v2, 0.0  ;;  %v4412_v26 = vmul.f32 0.2, %v3900_v2  ;;  %vm4026_vm6 = vcmp.ge.f32.partialorder %v3770_v7, 0.0 }
 0x208   : > { %v4282_v30 = vmul.f32 0.2, %v3770_v7  ;;  %v4540_v8 = vsel %vm4028_vm4, %v3772_v23, %v4284_v5  ;;  %vm4154_vm7 = vcmp.ge.f32.partialorder %v3898_v59, 0.0  ;;  %v4410_v25 = vmul.f32 0.2, %v3898_v59 }
 0x209   : > { %v3775_v28 = vadd.f32 %v8986_v27, %v9195_v11  ;;  %v7015_v54 = vpack.c.bf16 %v4540_v8, %v4539_v34  ;;  %v4668_v42 = vsel %vm4156_vm5, %v3900_v2, %v4412_v26  ;;  %v3903_v53 = vadd.f32 %v8986_v27, %v9197_v31 }
 0x20a   : > { %v4538_v38 = vsel %vm4026_vm6, %v3770_v7, %v4282_v30  ;;  %v7335_v44 = vpack.c.bf16 %v4668_v42, %v4667_v14  ;;  %v4666_v22 = vsel %vm4154_vm7, %v3898_v59, %v4410_v25  ;;  %v3773_v11 = vadd.f32 %v8986_v27, %v9199_v55 }
 0x20b   : > { %v7010_v15 = vpack.c.bf16 %v4538_v38, %v4537_v0  ;;  %vm4031_vm8 = vcmp.ge.f32.partialorder %v3775_v28, 0.0  ;;  %7423 = vst [vmem:[%s8442_s7 + $0x1c8] sm:$0xff] %v7015_v54   ;;  %v7330_v29 = vpack.c.bf16 %v4666_v22, %v4665_v24  ;;  %v4287_v39 = vmul.f32 0.2, %v3775_v28 }
 0x20c   : > { %vm4159_vm9 = vcmp.ge.f32.partialorder %v3903_v53, 0.0  ;;  %v4415_v47 = vmul.f32 0.2, %v3903_v53  ;;  %7487 = vst [vmem:[%s8442_s7 + $0x3c8] sm:$0xff] %v7335_v44   ;;  %v3901_v58 = vadd.f32 %v8986_v27, %v9201_v60  ;;  %v3776_v31 = vadd.f32 %v8986_v27, %v9205_v51 }
 0x20d   : > { %7422 = vst [vmem:[%s8442_s7 + $0x1c0] sm:$0xff] %v7010_v15   ;;  %v3904_v50 = vadd.f32 %v8986_v27, %v9207_v49  ;;  %7486 = vst [vmem:[%s8442_s7 + $0x3c0] sm:$0xff] %v7330_v29   ;;  %v4543_v63 = vsel %vm4031_vm8, %v3775_v28, %v4287_v39  ;;  %v3774_v45 = vadd.f32 %v8986_v27, %v9213_v37  ;;  %vm4029_vm10 = vcmp.ge.f32.partialorder %v3773_v11, 0.0 }
 0x20e   : > { %v4671_v4 = vsel %vm4159_vm9, %v3903_v53, %v4415_v47  ;;  %v3902_v1 = vadd.f32 %v8986_v27, %v9215_v43  ;;  %v4285_v55 = vmul.f32 0.2, %v3773_v11  ;;  %vm4157_vm11 = vcmp.ge.f32.partialorder %v3901_v58, 0.0 }
 0x20f   : > { %v4413_v6 = vmul.f32 0.2, %v3901_v58  ;;  %vm4032_vm12 = vcmp.ge.f32.partialorder %v3776_v31, 0.0  ;;  %v4288_v60 = vmul.f32 0.2, %v3776_v31  ;;  %vm4160_vm13 = vcmp.ge.f32.partialorder %v3904_v50, 0.0 }
 0x210   : > { %v4416_v51 = vmul.f32 0.2, %v3904_v50  ;;  %v4541_v16 = vsel %vm4029_vm10, %v3773_v11, %v4285_v55  ;;  %vm4030_vm14 = vcmp.ge.f32.partialorder %v3774_v45, 0.0  ;;  %v4286_v12 = vmul.f32 0.2, %v3774_v45 }
 0x211   : > { %v4669_v49 = vsel %vm4157_vm11, %v3901_v58, %v4413_v6  ;;  %v4544_v9 = vsel %vm4032_vm12, %v3776_v31, %v4288_v60  ;;  %vm4158_vm15 = vcmp.ge.f32.partialorder %v3902_v1, 0.0  ;;  %v4414_v37 = vmul.f32 0.2, %v3902_v1 }
 0x212   : > { %v4672_v21 = vsel %vm4160_vm13, %v3904_v50, %v4416_v51  ;;  %v7025_v43 = vpack.c.bf16 %v4544_v9, %v4543_v63  ;;  %v4542_v32 = vsel %vm4030_vm14, %v3774_v45, %v4286_v12  ;;  %v3779_v40 = vadd.f32 %v8986_v27, %v9229_v35 }
 0x213   : > { %v7345_v3 = vpack.c.bf16 %v4672_v21, %v4671_v4  ;;  %v7020_v34 = vpack.c.bf16 %v4542_v32, %v4541_v16  ;;  %v4670_v20 = vsel %vm4158_vm15, %v3902_v1, %v4414_v37  ;;  %v3907_v23 = vadd.f32 %v8986_v27, %v9233_v62 }
 0x214   : > { %v3777_v14 = vadd.f32 %v8986_v27, %v9235_v46  ;;  %7425 = vst [vmem:[%s8442_s7 + $0x1d8] sm:$0xff] %v7025_v43   ;;  %v7340_v0 = vpack.c.bf16 %v4670_v20, %v4669_v49  ;;  %vm4035_vm0 = vcmp.ge.f32.partialorder %v3779_v40, 0.0  ;;  %v4291_v2 = vmul.f32 0.2, %v3779_v40 }
 0x215   : > { %7489 = vst [vmem:[%s8442_s7 + $0x3d8] sm:$0xff] %v7345_v3   ;;  %v3905_v7 = vadd.f32 %v8986_v27, %v9239_v10  ;;  %7424 = vst [vmem:[%s8442_s7 + $0x1d0] sm:$0xff] %v7020_v34   ;;  %vm4163_vm1 = vcmp.ge.f32.partialorder %v3907_v23, 0.0  ;;  %v4419_v35 = vmul.f32 0.2, %v3907_v23  ;;  %v3780_v62 = vadd.f32 %v8986_v27, %v9241_v61 }
 0x216   : > { %vm4033_vm2 = vcmp.ge.f32.partialorder %v3777_v14, 0.0  ;;  %v4289_v24 = vmul.f32 0.2, %v3777_v14  ;;  %7488 = vst [vmem:[%s8442_s7 + $0x3d0] sm:$0xff] %v7340_v0   ;;  %v4547_v5 = vsel %vm4035_vm0, %v3779_v40, %v4291_v2  ;;  %v3908_v26 = vadd.f32 %v8986_v27, %v9245_v17 }
 0x217   : > { %vm4161_vm3 = vcmp.ge.f32.partialorder %v3905_v7, 0.0  ;;  %v4675_v46 = vsel %vm4163_vm1, %v3907_v23, %v4419_v35  ;;  %v4417_v59 = vmul.f32 0.2, %v3905_v7  ;;  %v3778_v30 = vadd.f32 %v8986_v27, %v9247_v13 }
 0x218   : > { %v4545_v10 = vsel %vm4033_vm2, %v3777_v14, %v4289_v24  ;;  %vm4036_vm4 = vcmp.ge.f32.partialorder %v3780_v62, 0.0  ;;  %v4292_v8 = vmul.f32 0.2, %v3780_v62  ;;  %v3906_v25 = vadd.f32 %v8986_v27, %v9249_v48 }
 0x219   : > { %vm4164_vm5 = vcmp.ge.f32.partialorder %v3908_v26, 0.0  ;;  %v4420_v28 = vmul.f32 0.2, %v3908_v26  ;;  %vm4034_vm6 = vcmp.ge.f32.partialorder %v3778_v30, 0.0  ;;  %v4290_v54 = vmul.f32 0.2, %v3778_v30 }
 0x21a   : > { %v4548_v61 = vsel %vm4036_vm4, %v3780_v62, %v4292_v8  ;;  %vm4162_vm7 = vcmp.ge.f32.partialorder %v3906_v25, 0.0  ;;  %v4418_v42 = vmul.f32 0.2, %v3906_v25  ;;  %v3783_v17 = vadd.f32 %v8986_v27, %v9267_v19 }
 0x21b   : > { %v7035_v13 = vpack.c.bf16 %v4548_v61, %v4547_v5  ;;  %v4676_v38 = vsel %vm4164_vm5, %v3908_v26, %v4420_v28  ;;  %v4546_v53 = vsel %vm4034_vm6, %v3778_v30, %v4290_v54  ;;  %v3911_v44 = vadd.f32 %v8986_v27, %v9269_v52 }
 0x21c   : > { %v4673_v48 = vsel %vm4161_vm3, %v3905_v7, %v4417_v59  ;;  %v7355_v15 = vpack.c.bf16 %v4676_v38, %v4675_v46  ;;  %v7030_v22 = vpack.c.bf16 %v4546_v53, %v4545_v10  ;;  %v4674_v29 = vsel %vm4162_vm7, %v3906_v25, %v4418_v42 }
 0x21d   : > { %7427 = vst [vmem:[%s8442_s7 + $0x1e8] sm:$0xff] %v7035_v13   ;;  %v7350_v39 = vpack.c.bf16 %v4674_v29, %v4673_v48  ;;  %vm4039_vm8 = vcmp.ge.f32.partialorder %v3783_v17, 0.0  ;;  %v4295_v47 = vmul.f32 0.2, %v3783_v17  ;;  %v4423_v11 = vmul.f32 0.2, %v3911_v44 }
 0x21e   : > { %7491 = vst [vmem:[%s8442_s7 + $0x3e8] sm:$0xff] %v7355_v15   ;;  %7426 = vst [vmem:[%s8442_s7 + $0x1e0] sm:$0xff] %v7030_v22   ;;  %v3781_v19 = vadd.f32 %v8986_v27, %v9271_v41  ;;  %v3909_v58 = vadd.f32 %v8986_v27, %v9273_v36  ;;  %v3784_v52 = vadd.f32 %v8986_v27, %v9275_v56  ;;  %vm4167_vm9 = vcmp.ge.f32.partialorder %v3911_v44, 0.0 }
 0x21f   : > { %v3912_v31 = vadd.f32 %v8986_v27, %v9279_v33  ;;  %7490 = vst [vmem:[%s8442_s7 + $0x3e0] sm:$0xff] %v7350_v39   ;;  %v3782_v50 = vadd.f32 %v8986_v27, %v9281_v18  ;;  %v3910_v63 = vadd.f32 %v8986_v27, %v9287_v57  ;;  %v4551_v41 = vsel %vm4039_vm8, %v3783_v17, %v4295_v47 }
 0x220   : > { %vm4037_vm10 = vcmp.ge.f32.partialorder %v3781_v19, 0.0  ;;  %v4293_v4 = vmul.f32 0.2, %v3781_v19  ;;  %v4421_v36 = vmul.f32 0.2, %v3909_v58  ;;  %vm4040_vm11 = vcmp.ge.f32.partialorder %v3784_v52, 0.0 }
 0x221   : > { %v4296_v45 = vmul.f32 0.2, %v3784_v52  ;;  %vm4168_vm12 = vcmp.ge.f32.partialorder %v3912_v31, 0.0  ;;  %v4424_v56 = vmul.f32 0.2, %v3912_v31  ;;  %v4679_v1 = vsel %vm4167_vm9, %v3911_v44, %v4423_v11 }
 0x222   : > { %vm4165_vm13 = vcmp.ge.f32.partialorder %v3909_v58, 0.0  ;;  %vm4038_vm14 = vcmp.ge.f32.partialorder %v3782_v50, 0.0  ;;  %v4294_v33 = vmul.f32 0.2, %v3782_v50  ;;  %vm4166_vm15 = vcmp.ge.f32.partialorder %v3910_v63, 0.0 }
 0x223   : > { %v4552_v18 = vsel %vm4040_vm11, %v3784_v52, %v4296_v45  ;;  %v4680_v55 = vsel %vm4168_vm12, %v3912_v31, %v4424_v56  ;;  %v4422_v27 = vmul.f32 0.2, %v3910_v63  ;;  %v4549_v57 = vsel %vm4037_vm10, %v3781_v19, %v4293_v4 }
 0x224   : > { %v7045_v6 = vpack.c.bf16 %v4552_v18, %v4551_v41  ;;  %v7365_v60 = vpack.c.bf16 %v4680_v55, %v4679_v1  ;;  %v4550_v51 = vsel %vm4038_vm14, %v3782_v50, %v4294_v33  ;;  %v4677_v16 = vsel %vm4165_vm13, %v3909_v58, %v4421_v36 }
 0x225   : > { %v7040_v49 = vpack.c.bf16 %v4550_v51, %v4549_v57  ;;  %v4678_v12 = vsel %vm4166_vm15, %v3910_v63, %v4422_v27 }
 0x226   : > { %7429 = vst [vmem:[%s8442_s7 + $0x1f8] sm:$0xff] %v7045_v6   ;;  %7493 = vst [vmem:[%s8442_s7 + $0x3f8] sm:$0xff] %v7365_v60   ;;  %v7360_v9 = vpack.c.bf16 %v4678_v12, %v4677_v16 }
 0x227   : > { %7428 = vst [vmem:[%s8442_s7 + $0x1f0] sm:$0xff] %v7040_v49  }
 0x228   : > { %7492 = vst [vmem:[%s8442_s7 + $0x3f0] sm:$0xff] %v7360_v9  }
 0x229   : > { %8126 = shalt.err (!%p8123_p5)
}
 0x22a   : > { %s8127_s4 = scalar_lea.hbm %s9370_s23, 16384  ;;  %s8131_s7 = scalar_lea.hbm %s9429_s3, 65536 }
 0x22b   : > { %p8128_p6 = scmp.ne.s32.totalorder %s9370_s23, %s8127_s4  ;;  %p8132_p10 = scmp.lt.u32.totalorder %s9370_s23, %s9429_s3 }
 0x22c   : > { %p8133_p11 = scmp.lt.u32.totalorder %s8131_s7, %s8127_s4  ;;  %p8135_p13 = scmp.lt.u32.totalorder %s8127_s4, %s9370_s23 }
 0x22d   : > { %p8129_p7 = pnand %p8128_p6, %p8256_p4 }
 0x22e   : > { %p8134_p12 = por %p8133_p11, %p8132_p10 }
 0x22f   : > { %p8130_p9 = pneg %p8129_p7 }
 0x230   : > { %p8136_p0 = por %p8135_p13, %p8134_p12 }
 0x232   : > { %p8137_p1 = pnand %p8136_p0, %p8130_p9 }
 0x234   : > { %8140 = shalt.err (!%p8137_p1)
}
 0x235   : > { %s8194_s10 = smov 64   ;;  %s8195_s11 = smov 4  }
 0x236   : > { %7918 = dma.vmem_to_hbm [thread:$0]  (%p8256_p4), %s9372_s19, 16384, %s9370_s23, %s9380_s26, %s8194_s10, %s8194_s10, %s8195_s11  }
 0x237 PF: > { %p7924_p2 = scmp.ge.s32.totalorder %s8191_s17, 2  ;;  %s5990_s18 = sand.u32 1, %s8171_s12  }
 0x238   : > { %s5991_s21 = scalar_lea.sflag [#allocation4], %s5990_s18 }
 0x239   : > { %p7921_p3 = pnand %p7924_p2, %p8263_p8 }
 0x23b   : > { %8166 = dma.done.wait (!%p7921_p3), %s5991_s21, 16384  }
 0x23c   : > { %8168 = vsyncadd (!%p7921_p3), %s5991_s21, 4294950912  ;;  %s16_s17 = sadd.s32 1, %s8191_s17   ;;  %s9432_s12 = smov %s8175_s13 }
 0x23d   : > { %p13_p5 = scmp.ge.s32.totalorder %s16_s17, 6   ;;  %s9433_s13 = smov %s8179_s14 }
 0x23e   : > { %s9434_s14 = smov %s8269_s25  ;;  %s9435_s15 = smov %s8187_s16 }
 0x23f   : > { %s9436_s16 = smov %s9438_s20  ;;  %15 = sbr.rel (!%p13_p5) target bundleno = 4 (0x4), region = 78 }
 0x246   :  { %5996 = vsyncpa [#allocation4], 1 }
 0x247   :  { %5998 = vsyncpa [#allocation4 + $0x1], 1 }

// kernel: wavegan_discriminator_forward.6
= control target key start
LH: loop header
LB: loop body
LE: loop exit
PB: predicated region body
PF: predicated region fallthrough
CT: control target
= control target key end

     0   :  { %8 = vsyncpa [#allocation4], 0  ;;  %s4988_s0 = inlined_call_operand.vmem [shape: bf16[2048,128], index: 0, kind: input, shape index: {}]   ;;  %s4989_s1 = inlined_call_operand.vmem [shape: bf16[128,128], index: 1, kind: input, shape index: {}]   ;;  %s4990_s2 = inlined_call_operand.vmem [shape: f32[1,128], index: 2, kind: input, shape index: {}]   ;;  %s4991_s3 = inlined_call_operand.hbm [shape: bf16[2048,128], index: 3, kind: output, shape index: {}]  }
   0x1   :  { %10 = vsyncpa [#allocation4 + $0x1], 0  ;;  %s4439_s12 = smov 0   ;;  %s4441_s13 = smov 0  }
   0x2   :  { %s4443_s14 = smov 0   ;;  %s4445_s15 = smov 0  }
   0x3   :  { %s4447_s16 = smov 0   ;;  %s4449_s17 = smov 0  }
   0x4 LB: > { %s3247_s18 = sadd.s32 4294967295, %s4414_s17   ;;  %s3248_s19 = sadd.s32 4294967294, %s4414_s17   ;;  %s4414_s17 = sphi %s4449_s17, %s16_s17   ;;  %s4410_s16 = sphi %s4447_s16, %s4998_s16   ;;  %s4406_s15 = sphi %s4445_s15, %s4997_s15   ;;  %s4402_s14 = sphi %s4443_s14, %s4996_s14   ;;  %s4398_s13 = sphi %s4441_s13, %s4995_s13   ;;  %s4394_s12 = sphi %s4439_s12, %s4994_s12  }
   0x5   : > { %s28_s20 = sadd.s32 1, %s4410_s16  ;;  %s110_s21 = sadd.s32 1, %s4402_s14 }
   0x6   : > { %p30_p0 = scmp.ge.s32.totalorder %s28_s20, 2  ;;  %p120_p1 = scmp.ne.s32.totalorder %s4402_s14, %s4398_s13 }
   0x7   : > { %p121_p2 = scmp.eq.s32.totalorder %s3247_s18, 1  ;;  %p126_p3 = scmp.ne.s32.totalorder %s4398_s13, %s4394_s12 }
   0x8   : > { %s5000_s20 = smov (%p30_p0, %s28_s20), 0  ;;  %p127_p5 = scmp.eq.s32.totalorder %s3248_s19, 1 }
   0x9   : > { %p4479_p4 = por %p121_p2, %p120_p1  ;;  %s107_s23 = ssub.s32 %s4410_s16, %s5000_s20 }
   0xa   : > { %p3252_p6 = scmp.ge.s32.totalorder %s4414_s17, 1  ;;  %p108_p7 = scmp.eq.s32.totalorder %s107_s23, 0 }
   0xb   : > { %p4486_p8 = por %p127_p5, %p126_p3  ;;  %p169_p9 = scmp.lt.s32.totalorder %s4414_s17, 3 }
   0xc   : > { %s4492_s25 = scalar_select %p108_p7, %s4402_s14, %s110_s21  }
   0xd   : > { %p170_p10 = pnand %p3252_p6, %p169_p9 }
   0xe   : > { %v4263_v0 = vld [vmem:[%s4989_s1] sm:$0xff] (!%p170_p10)   ;;  %s3254_s28 = sshll.u32 (!%p170_p10), %s4406_s15, 7  ;;  %v4264_v1 = vld [vmem:[%s4989_s1 + $0x8] sm:$0xff] (!%p170_p10)   ;;  %v4265_v2 = vld [vmem:[%s4989_s1 + $0x10] sm:$0xff] (!%p170_p10)   ;;  %s198_s5 = sand.u32 (!%p170_p10), 1, %s4398_s13  }
   0xf   : > { %173 = sbr.rel (%p170_p10) target bundleno = 422 (0x1a6), region = 32  ;;  %p202_p11 = scmp.lt.s32.totalorder (!%p170_p10), %s3254_s28, 255  ;;  %4046 = vmatprep.subr.bf16.mxu0 (!%p170_p10), %v4263_v0  ;;  %4190 = vmatprep.subr.bf16.mxu1 (!%p170_p10), %v4263_v0  ;;  %v4266_v3 = vld [vmem:[%s4989_s1 + $0x18] sm:$0xff] (!%p170_p10)   ;;  %v4267_v6 = vld [vmem:[%s4989_s1 + $0x20] sm:$0xff] (!%p170_p10)   ;;  %v4268_v7 = vld [vmem:[%s4989_s1 + $0x28] sm:$0xff] (!%p170_p10)  }
  0x10   : > { %4047 = vmatpush3.bf16.msra.mxu0 (!%p170_p10), %v4263_v0  ;;  %4198 = vmatpush3.bf16.msra.mxu1 (!%p170_p10), %v4263_v0  ;;  %v4269_v8 = vld [vmem:[%s4989_s1 + $0x30] sm:$0xff] (!%p170_p10)   ;;  %v4270_v9 = vld [vmem:[%s4989_s1 + $0x38] sm:$0xff] (!%p170_p10)   ;;  %s3590_s10 = sshll.u32 (!%p170_p10), %s4406_s15, 13  ;;  %s4942_s21 = scalar_lea.sflag (!%p170_p10), [#allocation4], %s198_s5 }
  0x11   : > { %4048 = vmatprep.subr.bf16.mxu0 (!%p170_p10), %v4264_v1  ;;  %4191 = vmatprep.subr.bf16.mxu1 (!%p170_p10), %v4264_v1  ;;  %s4932_s19 = scalar_lea.hbm (!%p170_p10), %s4991_s3, %s3590_s10  ;;  %s4416_s26 = smov (!%p170_p10), [#allocation3]  }
  0x12   : > { %s4340_s27 = sshll.u32 (!%p170_p10), %s4416_s26, 4  ;;  %s4341_s27 = int_to_ptr.vmem [resolvable:$false] %s4340_s27 }
  0x14   : > { %4049 = vmatpush3.bf16.msra.mxu0 (!%p170_p10), %v4264_v1  ;;  %4199 = vmatpush3.bf16.msra.mxu1 (!%p170_p10), %v4264_v1 }
  0x15   : > { %4050 = vmatprep.subr.bf16.mxu0 (!%p170_p10), %v4265_v2  ;;  %4192 = vmatprep.subr.bf16.mxu1 (!%p170_p10), %v4265_v2 }
  0x16   : > { %s5002_s28 = smov (!%p202_p11, %s3254_s28), 255 }
  0x17   : > { %s3255_s6 = sshll.u32 %s5002_s28, 2  ;;  %s4342_s28 = scalar_lea.vmem %s4341_s27, 16384 }
  0x18   : > { %s4507_s9 = scalar_lea.vmem %s4988_s0, %s3255_s6  ;;  %4051 = vmatpush3.bf16.msra.mxu0 %v4265_v2  ;;  %4200 = vmatpush3.bf16.msra.mxu1 %v4265_v2  ;;  %s3253_s6 = sshll.u32 %s198_s5, 9 }
  0x19   : > { %v4271_v4 = vld [vmem:[%s4507_s9] sm:$0xff]   ;;  %4052 = vmatprep.subr.bf16.mxu0 %v4266_v3  ;;  %4193 = vmatprep.subr.bf16.mxu1 %v4266_v3  ;;  %v4273_v10 = vld [vmem:[%s4507_s9 + $0x8] sm:$0xff]   ;;  %v4275_v12 = vld [vmem:[%s4507_s9 + $0x10] sm:$0xff]   ;;  %s4608_s7 = scalar_lea.vmem [#allocation3], %s3253_s6 }
  0x1a   : > { %v4272_v5 = vld [vmem:[%s4507_s9 + $0x100] sm:$0xff]   ;;  %4062 = vmatprep.mubr.bf16.mxu0 %v4271_v4  ;;  %v4274_v11 = vld [vmem:[%s4507_s9 + $0x108] sm:$0xff]   ;;  %v4276_v13 = vld [vmem:[%s4507_s9 + $0x110] sm:$0xff]   ;;  %s3159_s11 = sshll.u32 %s4608_s7, 4  ;;  %s4934_s11 = int_to_ptr.vmem [resolvable:$true] %s3159_s11 }
  0x1b   : > { %4126 = vmatprep.mubr.bf16.mxu1 %v4272_v5  ;;  %v4277_v14 = vld [vmem:[%s4507_s9 + $0x18] sm:$0xff]   ;;  %v4279_v16 = vld [vmem:[%s4507_s9 + $0x20] sm:$0xff]   ;;  %v4281_v18 = vld [vmem:[%s4507_s9 + $0x28] sm:$0xff]   ;;  %s4336_s23 = scalar_lea.vmem %s4934_s11, 8192  ;;  %p4343_p1 = scmp.lt.s32.totalorder %s4934_s11, %s4341_s27 }
  0x1c   : > { %4053 = vmatpush3.bf16.msra.mxu0 %v4266_v3  ;;  %4201 = vmatpush3.bf16.msra.mxu1 %v4266_v3  ;;  %v4278_v15 = vld [vmem:[%s4507_s9 + $0x118] sm:$0xff]   ;;  %v4280_v17 = vld [vmem:[%s4507_s9 + $0x120] sm:$0xff]   ;;  %v4282_v19 = vld [vmem:[%s4507_s9 + $0x128] sm:$0xff]   ;;  %p4337_p12 = scmp.ne.s32.totalorder %s4934_s11, %s4336_s23  ;;  %p4344_p2 = scmp.lt.s32.totalorder %s4342_s28, %s4336_s23 }
  0x1d   : > { %4054 = vmatprep.subr.bf16.mxu0 %v4267_v6  ;;  %4194 = vmatprep.subr.bf16.mxu1 %v4267_v6  ;;  %v4283_v20 = vld [vmem:[%s4507_s9 + $0x30] sm:$0xff]   ;;  %v4285_v22 = vld [vmem:[%s4507_s9 + $0x38] sm:$0xff]   ;;  %v4287_v24 = vld [vmem:[%s4507_s9 + $0x40] sm:$0xff]  }
  0x1e   : > { %v4284_v21 = vld [vmem:[%s4507_s9 + $0x130] sm:$0xff]   ;;  %v4286_v23 = vld [vmem:[%s4507_s9 + $0x138] sm:$0xff]   ;;  %v4288_v25 = vld [vmem:[%s4507_s9 + $0x140] sm:$0xff]   ;;  %p4338_p13 = pnand %p4337_p12, %p4479_p4  ;;  %p4345_p3 = por %p4344_p2, %p4343_p1 }
  0x1f   : > { %v4289_v26 = vld [vmem:[%s4507_s9 + $0x48] sm:$0xff]   ;;  %v4291_v28 = vld [vmem:[%s4507_s9 + $0x50] sm:$0xff]   ;;  %v4293_v30 = vld [vmem:[%s4507_s9 + $0x58] sm:$0xff]  }
  0x20   : > { %4055 = vmatpush3.bf16.msra.mxu0 %v4267_v6  ;;  %4202 = vmatpush3.bf16.msra.mxu1 %v4267_v6  ;;  %v4290_v27 = vld [vmem:[%s4507_s9 + $0x148] sm:$0xff]   ;;  %v4292_v29 = vld [vmem:[%s4507_s9 + $0x150] sm:$0xff]   ;;  %v4294_v31 = vld [vmem:[%s4507_s9 + $0x158] sm:$0xff]   ;;  %p4339_p0 = pneg %p4338_p13 }
  0x21   : > { %4056 = vmatprep.subr.bf16.mxu0 %v4268_v7  ;;  %4195 = vmatprep.subr.bf16.mxu1 %v4268_v7  ;;  %v4295_v32 = vld [vmem:[%s4507_s9 + $0x60] sm:$0xff]   ;;  %v4297_v34 = vld [vmem:[%s4507_s9 + $0x68] sm:$0xff]   ;;  %v4299_v36 = vld [vmem:[%s4507_s9 + $0x70] sm:$0xff]  }
  0x22   : > { %v4296_v33 = vld [vmem:[%s4507_s9 + $0x160] sm:$0xff]   ;;  %v4298_v35 = vld [vmem:[%s4507_s9 + $0x168] sm:$0xff]   ;;  %v4300_v37 = vld [vmem:[%s4507_s9 + $0x170] sm:$0xff]   ;;  %p4346_p5 = pnand %p4345_p3, %p4339_p0 }
  0x23   : > { %v4301_v38 = vld [vmem:[%s4507_s9 + $0x78] sm:$0xff]   ;;  %v4303_v40 = vld [vmem:[%s4507_s9 + $0x80] sm:$0xff]   ;;  %v4305_v42 = vld [vmem:[%s4507_s9 + $0x88] sm:$0xff]  }
  0x24   : > { %4057 = vmatpush3.bf16.msra.mxu0 %v4268_v7  ;;  %4203 = vmatpush3.bf16.msra.mxu1 %v4268_v7  ;;  %v4302_v39 = vld [vmem:[%s4507_s9 + $0x178] sm:$0xff]   ;;  %v4304_v41 = vld [vmem:[%s4507_s9 + $0x180] sm:$0xff]   ;;  %v4306_v43 = vld [vmem:[%s4507_s9 + $0x188] sm:$0xff]  }
  0x25   : > { %4058 = vmatprep.subr.bf16.mxu0 %v4269_v8  ;;  %4196 = vmatprep.subr.bf16.mxu1 %v4269_v8  ;;  %v4307_v44 = vld [vmem:[%s4507_s9 + $0x90] sm:$0xff]   ;;  %v4309_v46 = vld [vmem:[%s4507_s9 + $0x98] sm:$0xff]   ;;  %v4311_v48 = vld [vmem:[%s4507_s9 + $0xa0] sm:$0xff]  }
  0x26   : > { %v4308_v45 = vld [vmem:[%s4507_s9 + $0x190] sm:$0xff]   ;;  %v4310_v47 = vld [vmem:[%s4507_s9 + $0x198] sm:$0xff]   ;;  %v4312_v49 = vld [vmem:[%s4507_s9 + $0x1a0] sm:$0xff]  }
  0x27   : > { %v4313_v50 = vld [vmem:[%s4507_s9 + $0xa8] sm:$0xff]   ;;  %v4315_v52 = vld [vmem:[%s4507_s9 + $0xb0] sm:$0xff]   ;;  %v4317_v54 = vld [vmem:[%s4507_s9 + $0xb8] sm:$0xff]  }
  0x28   : > { %4059 = vmatpush3.bf16.msra.mxu0 %v4269_v8  ;;  %4204 = vmatpush3.bf16.msra.mxu1 %v4269_v8  ;;  %v4314_v51 = vld [vmem:[%s4507_s9 + $0x1a8] sm:$0xff]   ;;  %v4316_v53 = vld [vmem:[%s4507_s9 + $0x1b0] sm:$0xff]   ;;  %v4318_v55 = vld [vmem:[%s4507_s9 + $0x1b8] sm:$0xff]  }
  0x29   : > { %4060 = vmatprep.subr.bf16.mxu0 %v4270_v9  ;;  %4197 = vmatprep.subr.bf16.mxu1 %v4270_v9  ;;  %v4319_v56 = vld [vmem:[%s4507_s9 + $0xc0] sm:$0xff]   ;;  %v4321_v58 = vld [vmem:[%s4507_s9 + $0xc8] sm:$0xff]   ;;  %v4323_v60 = vld [vmem:[%s4507_s9 + $0xd0] sm:$0xff]  }
  0x2a   : > { %v4320_v57 = vld [vmem:[%s4507_s9 + $0x1c0] sm:$0xff]   ;;  %v4322_v59 = vld [vmem:[%s4507_s9 + $0x1c8] sm:$0xff]   ;;  %v4324_v61 = vld [vmem:[%s4507_s9 + $0x1d0] sm:$0xff]  }
  0x2b   : > { %v4325_v62 = vld [vmem:[%s4507_s9 + $0xd8] sm:$0xff]   ;;  %v4327_v0 = vld [vmem:[%s4507_s9 + $0xe0] sm:$0xff]   ;;  %v4329_v2 = vld [vmem:[%s4507_s9 + $0xe8] sm:$0xff]  }
  0x2c   : > { %4061 = vmatpush3.bf16.msra.mxu0 %v4270_v9  ;;  %4205 = vmatpush3.bf16.msra.mxu1 %v4270_v9  ;;  %v4326_v63 = vld [vmem:[%s4507_s9 + $0x1d8] sm:$0xff]   ;;  %v4328_v1 = vld [vmem:[%s4507_s9 + $0x1e0] sm:$0xff]   ;;  %v4330_v3 = vld [vmem:[%s4507_s9 + $0x1e8] sm:$0xff]  }
  0x2d   : > { %v4331_v4 = vld [vmem:[%s4507_s9 + $0xf0] sm:$0xff]   ;;  %v4333_v6 = vld [vmem:[%s4507_s9 + $0xf8] sm:$0xff]   ;;  %v4591_v8 = vld [vmem:[%s4990_s2] ss:$0 sm:$0xff] }
  0x2e   : > { %v4332_v5 = vld [vmem:[%s4507_s9 + $0x1f0] sm:$0xff]   ;;  %v4334_v7 = vld [vmem:[%s4507_s9 + $0x1f8] sm:$0xff]  }
  0x2f   : > { %4063 = vmatmul.mubr.bf16.vlgmr.msra.gmra.mrb[0].mxu0 %v4273_v10  ;;  %4127 = vmatmul.mubr.bf16.vlgmr.msra.gmra.mrb[0].mxu1 %v4274_v11 }
  0x30   : > { %4066 = vmatprep.mubr.bf16.mxu0 %v4275_v12  ;;  %4130 = vmatprep.mubr.bf16.mxu1 %v4276_v13 }
  0x37   : > { %4067 = vmatmul.mubr.bf16.gmra.mrb[4].mxu0 %v4277_v14  ;;  %4131 = vmatmul.mubr.bf16.gmra.mrb[4].mxu1 %v4278_v15 }
  0x38   : > { %4070 = vmatprep.mubr.bf16.mxu0 %v4279_v16  ;;  %4134 = vmatprep.mubr.bf16.mxu1 %v4280_v17 }
  0x3f   : > { %4071 = vmatmul.mubr.bf16.gmra.mrb[8].mxu0 %v4281_v18  ;;  %4135 = vmatmul.mubr.bf16.gmra.mrb[8].mxu1 %v4282_v19 }
  0x40   : > { %4074 = vmatprep.mubr.bf16.mxu0 %v4283_v20  ;;  %4138 = vmatprep.mubr.bf16.mxu1 %v4284_v21 }
  0x47   : > { %4075 = vmatmul.mubr.bf16.gmra.mrb[12].mxu0 %v4285_v22  ;;  %4139 = vmatmul.mubr.bf16.gmra.mrb[12].mxu1 %v4286_v23 }
  0x48   : > { %4078 = vmatprep.mubr.bf16.mxu0 %v4287_v24  ;;  %4142 = vmatprep.mubr.bf16.mxu1 %v4288_v25 }
  0x4f   : > { %4079 = vmatmul.mubr.bf16.gmra.mrb[16].mxu0 %v4289_v26  ;;  %4143 = vmatmul.mubr.bf16.gmra.mrb[16].mxu1 %v4290_v27 }
  0x50   : > { %4082 = vmatprep.mubr.bf16.mxu0 %v4291_v28  ;;  %4146 = vmatprep.mubr.bf16.mxu1 %v4292_v29 }
  0x57   : > { %4083 = vmatmul.mubr.bf16.gmra.mrb[20].mxu0 %v4293_v30  ;;  %4147 = vmatmul.mubr.bf16.gmra.mrb[20].mxu1 %v4294_v31 }
  0x58   : > { %4086 = vmatprep.mubr.bf16.mxu0 %v4295_v32  ;;  %4150 = vmatprep.mubr.bf16.mxu1 %v4296_v33 }
  0x5f   : > { %4087 = vmatmul.mubr.bf16.gmra.mrb[24].mxu0 %v4297_v34  ;;  %4151 = vmatmul.mubr.bf16.gmra.mrb[24].mxu1 %v4298_v35 }
  0x60   : > { %4090 = vmatprep.mubr.bf16.mxu0 %v4299_v36  ;;  %4154 = vmatprep.mubr.bf16.mxu1 %v4300_v37 }
  0x67   : > { %4091 = vmatmul.mubr.bf16.gmra.mrb[28].mxu0 %v4301_v38  ;;  %4155 = vmatmul.mubr.bf16.gmra.mrb[28].mxu1 %v4302_v39 }
  0x68   : > { %4094 = vmatprep.mubr.bf16.mxu0 %v4303_v40  ;;  %4158 = vmatprep.mubr.bf16.mxu1 %v4304_v41 }
  0x6f   : > { %4095 = vmatmul.mubr.bf16.gmra.mrb[32].mxu0 %v4305_v42  ;;  %4159 = vmatmul.mubr.bf16.gmra.mrb[32].mxu1 %v4306_v43 }
  0x70   : > { %4098 = vmatprep.mubr.bf16.mxu0 %v4307_v44  ;;  %4162 = vmatprep.mubr.bf16.mxu1 %v4308_v45 }
  0x77   : > { %4099 = vmatmul.mubr.bf16.gmra.mrb[36].mxu0 %v4309_v46  ;;  %4163 = vmatmul.mubr.bf16.gmra.mrb[36].mxu1 %v4310_v47 }
  0x78   : > { %4102 = vmatprep.mubr.bf16.mxu0 %v4311_v48  ;;  %4166 = vmatprep.mubr.bf16.mxu1 %v4312_v49 }
  0x7f   : > { %4103 = vmatmul.mubr.bf16.gmra.mrb[40].mxu0 %v4313_v50  ;;  %4167 = vmatmul.mubr.bf16.gmra.mrb[40].mxu1 %v4314_v51 }
  0x80   : > { %4106 = vmatprep.mubr.bf16.mxu0 %v4315_v52  ;;  %4170 = vmatprep.mubr.bf16.mxu1 %v4316_v53 }
  0x87   : > { %4107 = vmatmul.mubr.bf16.gmra.mrb[44].mxu0 %v4317_v54  ;;  %4171 = vmatmul.mubr.bf16.gmra.mrb[44].mxu1 %v4318_v55 }
  0x88   : > { %4110 = vmatprep.mubr.bf16.mxu0 %v4319_v56  ;;  %4174 = vmatprep.mubr.bf16.mxu1 %v4320_v57 }
  0x8f   : > { %4111 = vmatmul.mubr.bf16.gmra.mrb[48].mxu0 %v4321_v58  ;;  %4175 = vmatmul.mubr.bf16.gmra.mrb[48].mxu1 %v4322_v59 }
  0x90   : > { %4114 = vmatprep.mubr.bf16.mxu0 %v4323_v60  ;;  %4178 = vmatprep.mubr.bf16.mxu1 %v4324_v61 }
  0x97   : > { %4115 = vmatmul.mubr.bf16.gmra.mrb[52].mxu0 %v4325_v62  ;;  %4179 = vmatmul.mubr.bf16.gmra.mrb[52].mxu1 %v4326_v63 }
  0x98   : > { %4118 = vmatprep.mubr.bf16.mxu0 %v4327_v0  ;;  %4182 = vmatprep.mubr.bf16.mxu1 %v4328_v1 }
  0x9f   : > { %4119 = vmatmul.mubr.bf16.gmra.mrb[56].mxu0 %v4329_v2  ;;  %4183 = vmatmul.mubr.bf16.gmra.mrb[56].mxu1 %v4330_v3 }
  0xa0   : > { %4122 = vmatprep.mubr.bf16.mxu0 %v4331_v4  ;;  %4186 = vmatprep.mubr.bf16.mxu1 %v4332_v5 }
  0xa7   : > { %4123 = vmatmul.mubr.bf16.gmra.mrb[60].mxu0 %v4333_v6  ;;  %4187 = vmatmul.mubr.bf16.gmra.mrb[60].mxu1 %v4334_v7 }
 0x102   : > { %v4064_v9 = vpop.f32.mrb[0].mxu0  ;;  %v4128_v10 = vpop.f32.mrb[0].mxu1 }
 0x103   : > { %v1995_v11 = vadd.f32 %v4064_v9, %v4591_v8  ;;  %v2059_v12 = vadd.f32 %v4128_v10, %v4591_v8  ;;  %v1088_v13 = vpop.f32.mrb[1].mxu0  ;;  %v1344_v14 = vpop.f32.mrb[1].mxu1 }
 0x104   : > { %v1993_v15 = vadd.f32 %v4591_v8, %v1088_v13  ;;  %v2057_v16 = vadd.f32 %v4591_v8, %v1344_v14  ;;  %v4065_v17 = vpop.f32.mrb[2].mxu0  ;;  %v4129_v18 = vpop.f32.mrb[2].mxu1 }
 0x105   : > { %vm2123_vm0 = vcmp.ge.f32.partialorder %v1995_v11, 0.0  ;;  %v2251_v19 = vmul.f32 0.2, %v1995_v11  ;;  %vm2187_vm1 = vcmp.ge.f32.partialorder %v2059_v12, 0.0  ;;  %v2315_v20 = vmul.f32 0.2, %v2059_v12 }
 0x106   : > { %vm2121_vm2 = vcmp.ge.f32.partialorder %v1993_v15, 0.0  ;;  %v2249_v21 = vmul.f32 0.2, %v1993_v15  ;;  %vm2185_vm3 = vcmp.ge.f32.partialorder %v2057_v16, 0.0  ;;  %v2313_v22 = vmul.f32 0.2, %v2057_v16 }
 0x107   : > { %v1996_v23 = vadd.f32 %v4065_v17, %v4591_v8  ;;  %v2060_v24 = vadd.f32 %v4129_v18, %v4591_v8  ;;  %v1091_v25 = vpop.f32.mrb[3].mxu0  ;;  %v1347_v26 = vpop.f32.mrb[3].mxu1  ;;  %v2379_v27 = vsel %vm2123_vm0, %v1995_v11, %v2251_v19  ;;  %v2443_v28 = vsel %vm2187_vm1, %v2059_v12, %v2315_v20 }
 0x108   : > { %v1994_v29 = vadd.f32 %v4591_v8, %v1091_v25  ;;  %v2058_v30 = vadd.f32 %v4591_v8, %v1347_v26  ;;  %v2377_v35 = vsel %vm2121_vm2, %v1993_v15, %v2249_v21  ;;  %v2441_v36 = vsel %vm2185_vm3, %v2057_v16, %v2313_v22 }
 0x109   : > { %vm2124_vm4 = vcmp.ge.f32.partialorder %v1996_v23, 0.0  ;;  %v2252_v31 = vmul.f32 0.2, %v1996_v23  ;;  %vm2188_vm5 = vcmp.ge.f32.partialorder %v2060_v24, 0.0  ;;  %v2316_v32 = vmul.f32 0.2, %v2060_v24 }
 0x10a   : > { %vm2122_vm6 = vcmp.ge.f32.partialorder %v1994_v29, 0.0  ;;  %v2250_v33 = vmul.f32 0.2, %v1994_v29  ;;  %vm2186_vm7 = vcmp.ge.f32.partialorder %v2058_v30, 0.0  ;;  %v2314_v34 = vmul.f32 0.2, %v2058_v30 }
 0x10b   : > { %v2380_v37 = vsel %vm2124_vm4, %v1996_v23, %v2252_v31  ;;  %v2444_v38 = vsel %vm2188_vm5, %v2060_v24, %v2316_v32  ;;  %v4068_v39 = vpop.f32.mrb[4].mxu0  ;;  %v4132_v40 = vpop.f32.mrb[4].mxu1 }
 0x10c   : > { %v3599_v41 = vpack.c.bf16 %v2380_v37, %v2379_v27  ;;  %v3759_v42 = vpack.c.bf16 %v2444_v38, %v2443_v28  ;;  %v2378_v43 = vsel %vm2122_vm6, %v1994_v29, %v2250_v33  ;;  %v2442_v44 = vsel %vm2186_vm7, %v2058_v30, %v2314_v34  ;;  %v1104_v45 = vpop.f32.mrb[5].mxu0  ;;  %v1360_v46 = vpop.f32.mrb[5].mxu1 }
 0x10d   : > { %v3594_v47 = vpack.c.bf16 %v2378_v43, %v2377_v35  ;;  %v3754_v48 = vpack.c.bf16 %v2442_v44, %v2441_v36  ;;  %v1999_v49 = vadd.f32 %v4068_v39, %v4591_v8  ;;  %v2063_v50 = vadd.f32 %v4132_v40, %v4591_v8  ;;  %v4069_v51 = vpop.f32.mrb[6].mxu0  ;;  %v4133_v52 = vpop.f32.mrb[6].mxu1 }
 0x10e   : > { %3911 = vst [vmem:[%s4608_s7 + $0x8] sm:$0xff] %v3599_v41   ;;  %3943 = vst [vmem:[%s4608_s7 + $0x108] sm:$0xff] %v3759_v42   ;;  %v1997_v53 = vadd.f32 %v4591_v8, %v1104_v45  ;;  %v2061_v54 = vadd.f32 %v4591_v8, %v1360_v46  ;;  %v2000_v55 = vadd.f32 %v4069_v51, %v4591_v8  ;;  %v1107_v57 = vpop.f32.mrb[7].mxu0  ;;  %v1363_v58 = vpop.f32.mrb[7].mxu1 }
 0x10f   : > { %v2064_v56 = vadd.f32 %v4133_v52, %v4591_v8  ;;  %3595 = vst [vmem:[%s4608_s7] sm:$0xff] %v3594_v47   ;;  %3942 = vst [vmem:[%s4608_s7 + $0x100] sm:$0xff] %v3754_v48   ;;  %vm2127_vm8 = vcmp.ge.f32.partialorder %v1999_v49, 0.0  ;;  %v2255_v59 = vmul.f32 0.2, %v1999_v49  ;;  %vm2191_vm9 = vcmp.ge.f32.partialorder %v2063_v50, 0.0 }
 0x110   : > { %v2319_v60 = vmul.f32 0.2, %v2063_v50  ;;  %vm2125_vm10 = vcmp.ge.f32.partialorder %v1997_v53, 0.0  ;;  %v2253_v61 = vmul.f32 0.2, %v1997_v53  ;;  %vm2189_vm11 = vcmp.ge.f32.partialorder %v2061_v54, 0.0 }
 0x111   : > { %v2317_v62 = vmul.f32 0.2, %v2061_v54  ;;  %v2383_v63 = vsel %vm2127_vm8, %v1999_v49, %v2255_v59  ;;  %vm2128_vm12 = vcmp.ge.f32.partialorder %v2000_v55, 0.0  ;;  %v2256_v1 = vmul.f32 0.2, %v2000_v55 }
 0x112   : > { %v2447_v0 = vsel %vm2191_vm9, %v2063_v50, %v2319_v60  ;;  %v2381_v2 = vsel %vm2125_vm10, %v1997_v53, %v2253_v61  ;;  %vm2192_vm13 = vcmp.ge.f32.partialorder %v2064_v56, 0.0  ;;  %v2320_v4 = vmul.f32 0.2, %v2064_v56  ;;  %v4072_v5 = vpop.f32.mrb[8].mxu0  ;;  %v4136_v6 = vpop.f32.mrb[8].mxu1 }
 0x113   : > { %v2445_v3 = vsel %vm2189_vm11, %v2061_v54, %v2317_v62  ;;  %v2384_v7 = vsel %vm2128_vm12, %v2000_v55, %v2256_v1  ;;  %v1998_v9 = vadd.f32 %v4591_v8, %v1107_v57  ;;  %v2062_v10 = vadd.f32 %v4591_v8, %v1363_v58  ;;  %v1120_v12 = vpop.f32.mrb[9].mxu0  ;;  %v1376_v13 = vpop.f32.mrb[9].mxu1 }
 0x114   : > { %v2003_v11 = vadd.f32 %v4072_v5, %v4591_v8  ;;  %v3609_v14 = vpack.c.bf16 %v2384_v7, %v2383_v63  ;;  %v2448_v15 = vsel %vm2192_vm13, %v2064_v56, %v2320_v4  ;;  %v2067_v16 = vadd.f32 %v4136_v6, %v4591_v8  ;;  %v4073_v18 = vpop.f32.mrb[10].mxu0  ;;  %v4137_v19 = vpop.f32.mrb[10].mxu1 }
 0x115   : > { %v2001_v17 = vadd.f32 %v4591_v8, %v1120_v12  ;;  %v3769_v20 = vpack.c.bf16 %v2448_v15, %v2447_v0  ;;  %vm2126_vm14 = vcmp.ge.f32.partialorder %v1998_v9, 0.0  ;;  %v2254_v21 = vmul.f32 0.2, %v1998_v9  ;;  %v1123_v22 = vpop.f32.mrb[11].mxu0  ;;  %v1379_v23 = vpop.f32.mrb[11].mxu1 }
 0x116   : > { %vm2190_vm15 = vcmp.ge.f32.partialorder %v2062_v10, 0.0  ;;  %3913 = vst [vmem:[%s4608_s7 + $0x18] sm:$0xff] %v3609_v14   ;;  %v2318_v24 = vmul.f32 0.2, %v2062_v10  ;;  %vm2131_vm0 = vcmp.ge.f32.partialorder %v2003_v11, 0.0  ;;  %vm2195_vm1 = vcmp.ge.f32.partialorder %v2067_v16, 0.0 }
 0x117   : > { %v2259_v25 = vmul.f32 0.2, %v2003_v11  ;;  %3945 = vst [vmem:[%s4608_s7 + $0x118] sm:$0xff] %v3769_v20   ;;  %v2382_v26 = vsel %vm2126_vm14, %v1998_v9, %v2254_v21  ;;  %v2323_v27 = vmul.f32 0.2, %v2067_v16  ;;  %vm2129_vm2 = vcmp.ge.f32.partialorder %v2001_v17, 0.0 }
 0x118   : > { %v2257_v28 = vmul.f32 0.2, %v2001_v17  ;;  %v3604_v29 = vpack.c.bf16 %v2382_v26, %v2381_v2  ;;  %v2446_v30 = vsel %vm2190_vm15, %v2062_v10, %v2318_v24  ;;  %v2065_v32 = vadd.f32 %v4591_v8, %v1376_v13 }
 0x119   : > { %v2387_v31 = vsel %vm2131_vm0, %v2003_v11, %v2259_v25  ;;  %v3764_v33 = vpack.c.bf16 %v2446_v30, %v2445_v3  ;;  %v2451_v34 = vsel %vm2195_vm1, %v2067_v16, %v2323_v27  ;;  %v2004_v36 = vadd.f32 %v4073_v18, %v4591_v8 }
 0x11a   : > { %v2385_v35 = vsel %vm2129_vm2, %v2001_v17, %v2257_v28  ;;  %3912 = vst [vmem:[%s4608_s7 + $0x10] sm:$0xff] %v3604_v29   ;;  %vm2193_vm3 = vcmp.ge.f32.partialorder %v2065_v32, 0.0  ;;  %v2321_v37 = vmul.f32 0.2, %v2065_v32  ;;  %v2068_v38 = vadd.f32 %v4137_v19, %v4591_v8  ;;  %v4076_v40 = vpop.f32.mrb[12].mxu0  ;;  %v4140_v41 = vpop.f32.mrb[12].mxu1 }
 0x11b   : > { %v2002_v39 = vadd.f32 %v4591_v8, %v1123_v22  ;;  %3944 = vst [vmem:[%s4608_s7 + $0x110] sm:$0xff] %v3764_v33   ;;  %vm2132_vm4 = vcmp.ge.f32.partialorder %v2004_v36, 0.0  ;;  %v2260_v42 = vmul.f32 0.2, %v2004_v36  ;;  %v2066_v43 = vadd.f32 %v4591_v8, %v1379_v23  ;;  %v1136_v45 = vpop.f32.mrb[13].mxu0  ;;  %v1392_v46 = vpop.f32.mrb[13].mxu1 }
 0x11c   : > { %v2007_v44 = vadd.f32 %v4076_v40, %v4591_v8  ;;  %v2449_v47 = vsel %vm2193_vm3, %v2065_v32, %v2321_v37  ;;  %vm2196_vm5 = vcmp.ge.f32.partialorder %v2068_v38, 0.0  ;;  %v2324_v48 = vmul.f32 0.2, %v2068_v38  ;;  %v4077_v49 = vpop.f32.mrb[14].mxu0  ;;  %v4141_v50 = vpop.f32.mrb[14].mxu1 }
 0x11d   : > { %vm2130_vm6 = vcmp.ge.f32.partialorder %v2002_v39, 0.0  ;;  %v2388_v51 = vsel %vm2132_vm4, %v2004_v36, %v2260_v42  ;;  %v2258_v52 = vmul.f32 0.2, %v2002_v39  ;;  %vm2194_vm7 = vcmp.ge.f32.partialorder %v2066_v43, 0.0  ;;  %v1139_v54 = vpop.f32.mrb[15].mxu0  ;;  %v1395_v58 = vpop.f32.mrb[15].mxu1 }
 0x11e   : > { %v2322_v53 = vmul.f32 0.2, %v2066_v43  ;;  %v3619_v55 = vpack.c.bf16 %v2388_v51, %v2387_v31  ;;  %v2452_v56 = vsel %vm2196_vm5, %v2068_v38, %v2324_v48  ;;  %vm2135_vm8 = vcmp.ge.f32.partialorder %v2007_v44, 0.0 }
 0x11f   : > { %v2263_v57 = vmul.f32 0.2, %v2007_v44  ;;  %v3779_v59 = vpack.c.bf16 %v2452_v56, %v2451_v34  ;;  %v2386_v60 = vsel %vm2130_vm6, %v2002_v39, %v2258_v52  ;;  %v2071_v62 = vadd.f32 %v4140_v41, %v4591_v8 }
 0x120   : > { %v2450_v61 = vsel %vm2194_vm7, %v2066_v43, %v2322_v53  ;;  %3915 = vst [vmem:[%s4608_s7 + $0x28] sm:$0xff] %v3619_v55   ;;  %v3614_v63 = vpack.c.bf16 %v2386_v60, %v2385_v35  ;;  %v2005_v2 = vadd.f32 %v4591_v8, %v1136_v45  ;;  %v2069_v4 = vadd.f32 %v4591_v8, %v1392_v46 }
 0x121   : > { %v3774_v0 = vpack.c.bf16 %v2450_v61, %v2449_v47  ;;  %v2391_v1 = vsel %vm2135_vm8, %v2007_v44, %v2263_v57  ;;  %3947 = vst [vmem:[%s4608_s7 + $0x128] sm:$0xff] %v3779_v59   ;;  %vm2199_vm9 = vcmp.ge.f32.partialorder %v2071_v62, 0.0  ;;  %v2327_v3 = vmul.f32 0.2, %v2071_v62 }
 0x122   : > { %v2008_v5 = vadd.f32 %v4077_v49, %v4591_v8  ;;  %3914 = vst [vmem:[%s4608_s7 + $0x20] sm:$0xff] %v3614_v63   ;;  %vm2133_vm10 = vcmp.ge.f32.partialorder %v2005_v2, 0.0  ;;  %v2261_v6 = vmul.f32 0.2, %v2005_v2  ;;  %v2072_v7 = vadd.f32 %v4141_v50, %v4591_v8  ;;  %v4080_v10 = vpop.f32.mrb[16].mxu0  ;;  %v4144_v11 = vpop.f32.mrb[16].mxu1 }
 0x123   : > { %3946 = vst [vmem:[%s4608_s7 + $0x120] sm:$0xff] %v3774_v0   ;;  %v2006_v9 = vadd.f32 %v4591_v8, %v1139_v54  ;;  %v2455_v12 = vsel %vm2199_vm9, %v2071_v62, %v2327_v3  ;;  %vm2197_vm11 = vcmp.ge.f32.partialorder %v2069_v4, 0.0  ;;  %v2325_v13 = vmul.f32 0.2, %v2069_v4  ;;  %v1152_v14 = vpop.f32.mrb[17].mxu0  ;;  %v1408_v15 = vpop.f32.mrb[17].mxu1 }
 0x124   : > { %vm2136_vm12 = vcmp.ge.f32.partialorder %v2008_v5, 0.0  ;;  %v2389_v16 = vsel %vm2133_vm10, %v2005_v2, %v2261_v6  ;;  %v2264_v17 = vmul.f32 0.2, %v2008_v5  ;;  %vm2200_vm13 = vcmp.ge.f32.partialorder %v2072_v7, 0.0  ;;  %v4081_v19 = vpop.f32.mrb[18].mxu0  ;;  %v4145_v23 = vpop.f32.mrb[18].mxu1 }
 0x125   : > { %v2328_v18 = vmul.f32 0.2, %v2072_v7  ;;  %v2453_v20 = vsel %vm2197_vm11, %v2069_v4, %v2325_v13  ;;  %vm2134_vm14 = vcmp.ge.f32.partialorder %v2006_v9, 0.0  ;;  %v2262_v21 = vmul.f32 0.2, %v2006_v9  ;;  %v1155_v24 = vpop.f32.mrb[19].mxu0 }
 0x126   : > { %v2070_v22 = vadd.f32 %v4591_v8, %v1395_v58  ;;  %v2392_v25 = vsel %vm2136_vm12, %v2008_v5, %v2264_v17  ;;  %v2011_v27 = vadd.f32 %v4080_v10, %v4591_v8  ;;  %v2075_v28 = vadd.f32 %v4144_v11, %v4591_v8  ;;  %v1411_v29 = vpop.f32.mrb[19].mxu1 }
 0x127   : > { %v2456_v26 = vsel %vm2200_vm13, %v2072_v7, %v2328_v18  ;;  %v3629_v30 = vpack.c.bf16 %v2392_v25, %v2391_v1  ;;  %v2390_v32 = vsel %vm2134_vm14, %v2006_v9, %v2262_v21  ;;  %v2009_v37 = vadd.f32 %v4591_v8, %v1152_v14 }
 0x128   : > { %v3789_v31 = vpack.c.bf16 %v2456_v26, %v2455_v12  ;;  %vm2198_vm15 = vcmp.ge.f32.partialorder %v2070_v22, 0.0  ;;  %v3624_v33 = vpack.c.bf16 %v2390_v32, %v2389_v16  ;;  %v2326_v34 = vmul.f32 0.2, %v2070_v22 }
 0x129   : > { %vm2139_vm0 = vcmp.ge.f32.partialorder %v2011_v27, 0.0  ;;  %v2267_v35 = vmul.f32 0.2, %v2011_v27  ;;  %3917 = vst [vmem:[%s4608_s7 + $0x38] sm:$0xff] %v3629_v30   ;;  %vm2203_vm1 = vcmp.ge.f32.partialorder %v2075_v28, 0.0  ;;  %v2073_v38 = vadd.f32 %v4591_v8, %v1408_v15 }
 0x12a   : > { %3949 = vst [vmem:[%s4608_s7 + $0x138] sm:$0xff] %v3789_v31   ;;  %v2331_v36 = vmul.f32 0.2, %v2075_v28  ;;  %3916 = vst [vmem:[%s4608_s7 + $0x30] sm:$0xff] %v3624_v33   ;;  %v2454_v39 = vsel %vm2198_vm15, %v2070_v22, %v2326_v34  ;;  %v2012_v41 = vadd.f32 %v4081_v19, %v4591_v8  ;;  %v2076_v42 = vadd.f32 %v4145_v23, %v4591_v8  ;;  %v4084_v43 = vpop.f32.mrb[20].mxu0  ;;  %v4148_v44 = vpop.f32.mrb[20].mxu1 }
 0x12b   : > { %v2395_v40 = vsel %vm2139_vm0, %v2011_v27, %v2267_v35  ;;  %v3784_v45 = vpack.c.bf16 %v2454_v39, %v2453_v20  ;;  %vm2137_vm2 = vcmp.ge.f32.partialorder %v2009_v37, 0.0  ;;  %v2265_v47 = vmul.f32 0.2, %v2009_v37  ;;  %v1168_v48 = vpop.f32.mrb[21].mxu0  ;;  %v1424_v49 = vpop.f32.mrb[21].mxu1 }
 0x12c   : > { %v2459_v46 = vsel %vm2203_vm1, %v2075_v28, %v2331_v36  ;;  %vm2201_vm3 = vcmp.ge.f32.partialorder %v2073_v38, 0.0  ;;  %v2329_v50 = vmul.f32 0.2, %v2073_v38  ;;  %vm2140_vm4 = vcmp.ge.f32.partialorder %v2012_v41, 0.0  ;;  %v4085_v55 = vpop.f32.mrb[22].mxu0  ;;  %v4149_v56 = vpop.f32.mrb[22].mxu1 }
 0x12d   : > { %v2268_v51 = vmul.f32 0.2, %v2012_v41  ;;  %3948 = vst [vmem:[%s4608_s7 + $0x130] sm:$0xff] %v3784_v45   ;;  %v2393_v52 = vsel %vm2137_vm2, %v2009_v37, %v2265_v47  ;;  %vm2204_vm5 = vcmp.ge.f32.partialorder %v2076_v42, 0.0  ;;  %v2332_v53 = vmul.f32 0.2, %v2076_v42 }
 0x12e   : > { %v2010_v54 = vadd.f32 %v4591_v8, %v1155_v24  ;;  %v2457_v57 = vsel %vm2201_vm3, %v2073_v38, %v2329_v50  ;;  %v2074_v59 = vadd.f32 %v4591_v8, %v1411_v29  ;;  %v2015_v60 = vadd.f32 %v4084_v43, %v4591_v8  ;;  %v1171_v61 = vpop.f32.mrb[23].mxu0  ;;  %v1427_v62 = vpop.f32.mrb[23].mxu1 }
 0x12f   : > { %v2396_v58 = vsel %vm2140_vm4, %v2012_v41, %v2268_v51  ;;  %v2460_v0 = vsel %vm2204_vm5, %v2076_v42, %v2332_v53  ;;  %v2079_v6 = vadd.f32 %v4148_v44, %v4591_v8  ;;  %v2013_v7 = vadd.f32 %v4591_v8, %v1168_v48 }
 0x130   : > { %v3639_v63 = vpack.c.bf16 %v2396_v58, %v2395_v40  ;;  %vm2138_vm6 = vcmp.ge.f32.partialorder %v2010_v54, 0.0  ;;  %v2266_v1 = vmul.f32 0.2, %v2010_v54  ;;  %v3799_v2 = vpack.c.bf16 %v2460_v0, %v2459_v46 }
 0x131   : > { %vm2202_vm7 = vcmp.ge.f32.partialorder %v2074_v59, 0.0  ;;  %v2330_v3 = vmul.f32 0.2, %v2074_v59  ;;  %vm2143_vm8 = vcmp.ge.f32.partialorder %v2015_v60, 0.0  ;;  %v2271_v5 = vmul.f32 0.2, %v2015_v60 }
 0x132   : > { %3919 = vst [vmem:[%s4608_s7 + $0x48] sm:$0xff] %v3639_v63   ;;  %v2394_v4 = vsel %vm2138_vm6, %v2010_v54, %v2266_v1  ;;  %3951 = vst [vmem:[%s4608_s7 + $0x148] sm:$0xff] %v3799_v2   ;;  %v2077_v11 = vadd.f32 %v4591_v8, %v1424_v49  ;;  %v2016_v12 = vadd.f32 %v4085_v55, %v4591_v8  ;;  %v4088_v13 = vpop.f32.mrb[24].mxu0  ;;  %v4152_v14 = vpop.f32.mrb[24].mxu1  ;;  %vm2207_vm9 = vcmp.ge.f32.partialorder %v2079_v6, 0.0 }
 0x133   : > { %v3634_v9 = vpack.c.bf16 %v2394_v4, %v2393_v52  ;;  %v2458_v10 = vsel %vm2202_vm7, %v2074_v59, %v2330_v3  ;;  %v2399_v16 = vsel %vm2143_vm8, %v2015_v60, %v2271_v5  ;;  %v2335_v17 = vmul.f32 0.2, %v2079_v6  ;;  %v1184_v18 = vpop.f32.mrb[25].mxu0  ;;  %v1440_v19 = vpop.f32.mrb[25].mxu1 }
 0x134   : > { %v3794_v15 = vpack.c.bf16 %v2458_v10, %v2457_v57  ;;  %vm2141_vm10 = vcmp.ge.f32.partialorder %v2013_v7, 0.0  ;;  %v2269_v20 = vmul.f32 0.2, %v2013_v7  ;;  %vm2205_vm11 = vcmp.ge.f32.partialorder %v2077_v11, 0.0  ;;  %v4089_v25 = vpop.f32.mrb[26].mxu0  ;;  %v4153_v26 = vpop.f32.mrb[26].mxu1 }
 0x135   : > { %3918 = vst [vmem:[%s4608_s7 + $0x40] sm:$0xff] %v3634_v9   ;;  %v2333_v21 = vmul.f32 0.2, %v2077_v11  ;;  %v2463_v22 = vsel %vm2207_vm9, %v2079_v6, %v2335_v17  ;;  %vm2144_vm12 = vcmp.ge.f32.partialorder %v2016_v12, 0.0  ;;  %v2272_v23 = vmul.f32 0.2, %v2016_v12 }
 0x136   : > { %3950 = vst [vmem:[%s4608_s7 + $0x140] sm:$0xff] %v3794_v15   ;;  %v2080_v24 = vadd.f32 %v4149_v56, %v4591_v8  ;;  %v2397_v27 = vsel %vm2141_vm10, %v2013_v7, %v2269_v20  ;;  %v2014_v29 = vadd.f32 %v4591_v8, %v1171_v61  ;;  %v2078_v30 = vadd.f32 %v4591_v8, %v1427_v62  ;;  %v1187_v31 = vpop.f32.mrb[27].mxu0  ;;  %v1443_v32 = vpop.f32.mrb[27].mxu1 }
 0x137   : > { %v2461_v28 = vsel %vm2205_vm11, %v2077_v11, %v2333_v21  ;;  %v2400_v33 = vsel %vm2144_vm12, %v2016_v12, %v2272_v23  ;;  %v2019_v35 = vadd.f32 %v4088_v13, %v4591_v8  ;;  %v2083_v43 = vadd.f32 %v4152_v14, %v4591_v8 }
 0x138   : > { %vm2208_vm13 = vcmp.ge.f32.partialorder %v2080_v24, 0.0  ;;  %v2336_v34 = vmul.f32 0.2, %v2080_v24  ;;  %v3649_v36 = vpack.c.bf16 %v2400_v33, %v2399_v16  ;;  %vm2142_vm14 = vcmp.ge.f32.partialorder %v2014_v29, 0.0 }
 0x139   : > { %v2270_v37 = vmul.f32 0.2, %v2014_v29  ;;  %vm2206_vm15 = vcmp.ge.f32.partialorder %v2078_v30, 0.0  ;;  %v2334_v39 = vmul.f32 0.2, %v2078_v30  ;;  %vm2147_vm0 = vcmp.ge.f32.partialorder %v2019_v35, 0.0 }
 0x13a   : > { %v2464_v38 = vsel %vm2208_vm13, %v2080_v24, %v2336_v34  ;;  %v2275_v40 = vmul.f32 0.2, %v2019_v35  ;;  %3921 = vst [vmem:[%s4608_s7 + $0x58] sm:$0xff] %v3649_v36   ;;  %v2017_v44 = vadd.f32 %v4591_v8, %v1184_v18  ;;  %v4092_v45 = vpop.f32.mrb[28].mxu0  ;;  %v4156_v46 = vpop.f32.mrb[28].mxu1  ;;  %v2081_v50 = vadd.f32 %v4591_v8, %v1440_v19 }
 0x13b   : > { %v3809_v41 = vpack.c.bf16 %v2464_v38, %v2463_v22  ;;  %v2398_v42 = vsel %vm2142_vm14, %v2014_v29, %v2270_v37  ;;  %v2462_v48 = vsel %vm2206_vm15, %v2078_v30, %v2334_v39  ;;  %v1200_v51 = vpop.f32.mrb[29].mxu0  ;;  %v1456_v52 = vpop.f32.mrb[29].mxu1  ;;  %vm2211_vm1 = vcmp.ge.f32.partialorder %v2083_v43, 0.0 }
 0x13c   : > { %v3644_v47 = vpack.c.bf16 %v2398_v42, %v2397_v27  ;;  %v2403_v49 = vsel %vm2147_vm0, %v2019_v35, %v2275_v40  ;;  %v3804_v53 = vpack.c.bf16 %v2462_v48, %v2461_v28  ;;  %v2339_v54 = vmul.f32 0.2, %v2083_v43  ;;  %v4093_v55 = vpop.f32.mrb[30].mxu0  ;;  %v4157_v56 = vpop.f32.mrb[30].mxu1 }
 0x13d   : > { %3953 = vst [vmem:[%s4608_s7 + $0x158] sm:$0xff] %v3809_v41   ;;  %vm2145_vm2 = vcmp.ge.f32.partialorder %v2017_v44, 0.0  ;;  %v2273_v57 = vmul.f32 0.2, %v2017_v44  ;;  %vm2209_vm3 = vcmp.ge.f32.partialorder %v2081_v50, 0.0  ;;  %v2020_v59 = vadd.f32 %v4089_v25, %v4591_v8  ;;  %v1203_v60 = vpop.f32.mrb[31].mxu0 }
 0x13e   : > { %3920 = vst [vmem:[%s4608_s7 + $0x50] sm:$0xff] %v3644_v47   ;;  %v2337_v58 = vmul.f32 0.2, %v2081_v50  ;;  %3952 = vst [vmem:[%s4608_s7 + $0x150] sm:$0xff] %v3804_v53   ;;  %v2467_v61 = vsel %vm2211_vm1, %v2083_v43, %v2339_v54  ;;  %v2084_v62 = vadd.f32 %v4153_v26, %v4591_v8  ;;  %v2018_v63 = vadd.f32 %v4591_v8, %v1187_v31  ;;  %v1459_v1 = vpop.f32.mrb[31].mxu1 }
 0x13f   : > { %v2082_v0 = vadd.f32 %v4591_v8, %v1443_v32  ;;  %v2401_v2 = vsel %vm2145_vm2, %v2017_v44, %v2273_v57  ;;  %vm2148_vm4 = vcmp.ge.f32.partialorder %v2020_v59, 0.0  ;;  %v2276_v4 = vmul.f32 0.2, %v2020_v59 }
 0x140   : > { %v2465_v3 = vsel %vm2209_vm3, %v2081_v50, %v2337_v58  ;;  %vm2212_vm5 = vcmp.ge.f32.partialorder %v2084_v62, 0.0  ;;  %v2340_v5 = vmul.f32 0.2, %v2084_v62  ;;  %vm2146_vm6 = vcmp.ge.f32.partialorder %v2018_v63, 0.0 }
 0x141   : > { %v2274_v6 = vmul.f32 0.2, %v2018_v63  ;;  %v2404_v7 = vsel %vm2148_vm4, %v2020_v59, %v2276_v4  ;;  %vm2210_vm7 = vcmp.ge.f32.partialorder %v2082_v0, 0.0  ;;  %v2338_v9 = vmul.f32 0.2, %v2082_v0 }
 0x142   : > { %v2023_v10 = vadd.f32 %v4092_v45, %v4591_v8  ;;  %v3659_v11 = vpack.c.bf16 %v2404_v7, %v2403_v49  ;;  %v2468_v12 = vsel %vm2212_vm5, %v2084_v62, %v2340_v5  ;;  %v2087_v14 = vadd.f32 %v4156_v46, %v4591_v8  ;;  %v4096_v15 = vpop.f32.mrb[32].mxu0  ;;  %v4160_v16 = vpop.f32.mrb[32].mxu1 }
 0x143   : > { %v2402_v13 = vsel %vm2146_vm6, %v2018_v63, %v2274_v6  ;;  %v3819_v17 = vpack.c.bf16 %v2468_v12, %v2467_v61  ;;  %v2466_v19 = vsel %vm2210_vm7, %v2082_v0, %v2338_v9  ;;  %v1216_v20 = vpop.f32.mrb[33].mxu0  ;;  %v1472_v21 = vpop.f32.mrb[33].mxu1  ;;  %v2021_v26 = vadd.f32 %v4591_v8, %v1200_v51 }
 0x144   : > { %v3654_v18 = vpack.c.bf16 %v2402_v13, %v2401_v2  ;;  %vm2151_vm8 = vcmp.ge.f32.partialorder %v2023_v10, 0.0  ;;  %3923 = vst [vmem:[%s4608_s7 + $0x68] sm:$0xff] %v3659_v11   ;;  %v3814_v22 = vpack.c.bf16 %v2466_v19, %v2465_v3  ;;  %v2279_v23 = vmul.f32 0.2, %v2023_v10  ;;  %v4097_v25 = vpop.f32.mrb[34].mxu0  ;;  %v4161_v30 = vpop.f32.mrb[34].mxu1 }
 0x145   : > { %vm2215_vm9 = vcmp.ge.f32.partialorder %v2087_v14, 0.0  ;;  %v2343_v24 = vmul.f32 0.2, %v2087_v14  ;;  %3955 = vst [vmem:[%s4608_s7 + $0x168] sm:$0xff] %v3819_v17   ;;  %v2085_v27 = vadd.f32 %v4591_v8, %v1456_v52  ;;  %v2024_v28 = vadd.f32 %v4093_v55, %v4591_v8  ;;  %v1219_v31 = vpop.f32.mrb[35].mxu0  ;;  %v1475_v36 = vpop.f32.mrb[35].mxu1 }
 0x146   : > { %3922 = vst [vmem:[%s4608_s7 + $0x60] sm:$0xff] %v3654_v18   ;;  %v2088_v29 = vadd.f32 %v4157_v56, %v4591_v8  ;;  %3954 = vst [vmem:[%s4608_s7 + $0x160] sm:$0xff] %v3814_v22   ;;  %v2407_v32 = vsel %vm2151_vm8, %v2023_v10, %v2279_v23  ;;  %v2022_v34 = vadd.f32 %v4591_v8, %v1203_v60  ;;  %vm2149_vm10 = vcmp.ge.f32.partialorder %v2021_v26, 0.0 }
 0x147   : > { %v2471_v33 = vsel %vm2215_vm9, %v2087_v14, %v2343_v24  ;;  %v2086_v35 = vadd.f32 %v4591_v8, %v1459_v1  ;;  %v2277_v37 = vmul.f32 0.2, %v2021_v26  ;;  %vm2213_vm11 = vcmp.ge.f32.partialorder %v2085_v27, 0.0 }
 0x148   : > { %v2341_v38 = vmul.f32 0.2, %v2085_v27  ;;  %vm2152_vm12 = vcmp.ge.f32.partialorder %v2024_v28, 0.0  ;;  %v2280_v39 = vmul.f32 0.2, %v2024_v28  ;;  %vm2216_vm13 = vcmp.ge.f32.partialorder %v2088_v29, 0.0 }
 0x149   : > { %v2344_v40 = vmul.f32 0.2, %v2088_v29  ;;  %v2405_v41 = vsel %vm2149_vm10, %v2021_v26, %v2277_v37  ;;  %vm2150_vm14 = vcmp.ge.f32.partialorder %v2022_v34, 0.0  ;;  %v2278_v43 = vmul.f32 0.2, %v2022_v34 }
 0x14a   : > { %v2469_v42 = vsel %vm2213_vm11, %v2085_v27, %v2341_v38  ;;  %v2408_v44 = vsel %vm2152_vm12, %v2024_v28, %v2280_v39  ;;  %vm2214_vm15 = vcmp.ge.f32.partialorder %v2086_v35, 0.0  ;;  %v2342_v46 = vmul.f32 0.2, %v2086_v35  ;;  %v4100_v47 = vpop.f32.mrb[36].mxu0  ;;  %v4164_v48 = vpop.f32.mrb[36].mxu1 }
 0x14b   : > { %v2472_v45 = vsel %vm2216_vm13, %v2088_v29, %v2344_v40  ;;  %v3669_v49 = vpack.c.bf16 %v2408_v44, %v2407_v32  ;;  %v2406_v51 = vsel %vm2150_vm14, %v2022_v34, %v2278_v43  ;;  %v2027_v52 = vadd.f32 %v4096_v15, %v4591_v8  ;;  %v4694_v53 = vpop.f32.mrb[37].mxu0  ;;  %v4696_v54 = vpop.f32.mrb[37].mxu1 }
 0x14c   : > { %v3829_v50 = vpack.c.bf16 %v2472_v45, %v2471_v33  ;;  %v3664_v55 = vpack.c.bf16 %v2406_v51, %v2405_v41  ;;  %v2470_v56 = vsel %vm2214_vm15, %v2086_v35, %v2342_v46  ;;  %v2091_v57 = vadd.f32 %v4160_v16, %v4591_v8  ;;  %v4101_v59 = vpop.f32.mrb[38].mxu0  ;;  %v4165_v60 = vpop.f32.mrb[38].mxu1 }
 0x14d   : > { %v2025_v58 = vadd.f32 %v4591_v8, %v1216_v20  ;;  %3925 = vst [vmem:[%s4608_s7 + $0x78] sm:$0xff] %v3669_v49   ;;  %v3824_v61 = vpack.c.bf16 %v2470_v56, %v2469_v42  ;;  %vm2155_vm0 = vcmp.ge.f32.partialorder %v2027_v52, 0.0  ;;  %v2283_v62 = vmul.f32 0.2, %v2027_v52  ;;  %v1235_v0 = vpop.f32.mrb[39].mxu0  ;;  %v1491_v1 = vpop.f32.mrb[39].mxu1 }
 0x14e   : > { %3957 = vst [vmem:[%s4608_s7 + $0x178] sm:$0xff] %v3829_v50   ;;  %v2089_v63 = vadd.f32 %v4591_v8, %v1472_v21  ;;  %3924 = vst [vmem:[%s4608_s7 + $0x70] sm:$0xff] %v3664_v55   ;;  %vm2219_vm1 = vcmp.ge.f32.partialorder %v2091_v57, 0.0  ;;  %v2347_v2 = vmul.f32 0.2, %v2091_v57  ;;  %v2028_v6 = vadd.f32 %v4097_v25, %v4591_v8 }
 0x14f   : > { %vm2153_vm2 = vcmp.ge.f32.partialorder %v2025_v58, 0.0  ;;  %v2281_v3 = vmul.f32 0.2, %v2025_v58  ;;  %3956 = vst [vmem:[%s4608_s7 + $0x170] sm:$0xff] %v3824_v61   ;;  %v2411_v4 = vsel %vm2155_vm0, %v2027_v52, %v2283_v62  ;;  %v2092_v10 = vadd.f32 %v4161_v30, %v4591_v8 }
 0x150   : > { %vm2217_vm3 = vcmp.ge.f32.partialorder %v2089_v63, 0.0  ;;  %v2345_v5 = vmul.f32 0.2, %v2089_v63  ;;  %v2475_v7 = vsel %vm2219_vm1, %v2091_v57, %v2347_v2  ;;  %v2026_v11 = vadd.f32 %v4591_v8, %v1219_v31 }
 0x151   : > { %v2409_v9 = vsel %vm2153_vm2, %v2025_v58, %v2281_v3  ;;  %vm2156_vm4 = vcmp.ge.f32.partialorder %v2028_v6, 0.0  ;;  %v2284_v13 = vmul.f32 0.2, %v2028_v6  ;;  %v2090_v14 = vadd.f32 %v4591_v8, %v1475_v36 }
 0x152   : > { %v2473_v12 = vsel %vm2217_vm3, %v2089_v63, %v2345_v5  ;;  %vm2220_vm5 = vcmp.ge.f32.partialorder %v2092_v10, 0.0  ;;  %v2348_v15 = vmul.f32 0.2, %v2092_v10  ;;  %vm2154_vm6 = vcmp.ge.f32.partialorder %v2026_v11, 0.0  ;;  %v4104_v20 = vpop.f32.mrb[40].mxu0  ;;  %v4168_v21 = vpop.f32.mrb[40].mxu1 }
 0x153   : > { %v2282_v16 = vmul.f32 0.2, %v2026_v11  ;;  %v2412_v17 = vsel %vm2156_vm4, %v2028_v6, %v2284_v13  ;;  %vm2218_vm7 = vcmp.ge.f32.partialorder %v2090_v14, 0.0  ;;  %v2346_v18 = vmul.f32 0.2, %v2090_v14  ;;  %v1248_v26 = vpop.f32.mrb[41].mxu0 }
 0x154   : > { %v2031_v19 = vadd.f32 %v4100_v47, %v4591_v8  ;;  %v3679_v22 = vpack.c.bf16 %v2412_v17, %v2411_v4  ;;  %v2476_v23 = vsel %vm2220_vm5, %v2092_v10, %v2348_v15  ;;  %v2095_v25 = vadd.f32 %v4164_v48, %v4591_v8  ;;  %v1504_v27 = vpop.f32.mrb[41].mxu1  ;;  %v4711_v31 = vpop.f32.mrb[42].mxu0 }
 0x155   : > { %v2410_v24 = vsel %vm2154_vm6, %v2026_v11, %v2282_v16  ;;  %v3839_v28 = vpack.c.bf16 %v2476_v23, %v2475_v7  ;;  %v2474_v30 = vsel %vm2218_vm7, %v2090_v14, %v2346_v18  ;;  %v4713_v32 = vpop.f32.mrb[42].mxu1  ;;  %v4716_v36 = vpop.f32.mrb[43].mxu0  ;;  %v2029_v37 = vadd.f32 %v4591_v8, %v4694_v53  ;;  %v4755_v16 = vld [vmem:[%s4990_s2] ss:$0 sm:$0xff] }
 0x156   : > { %v3674_v29 = vpack.c.bf16 %v2410_v24, %v2409_v9  ;;  %vm2159_vm8 = vcmp.ge.f32.partialorder %v2031_v19, 0.0  ;;  %3927 = vst [vmem:[%s4608_s7 + $0x88] sm:$0xff] %v3679_v22   ;;  %v3834_v33 = vpack.c.bf16 %v2474_v30, %v2473_v12  ;;  %v2287_v34 = vmul.f32 0.2, %v2031_v19  ;;  %v4726_v41 = vpop.f32.mrb[43].mxu1 }
 0x157   : > { %vm2223_vm9 = vcmp.ge.f32.partialorder %v2095_v25, 0.0  ;;  %v2351_v35 = vmul.f32 0.2, %v2095_v25  ;;  %3959 = vst [vmem:[%s4608_s7 + $0x188] sm:$0xff] %v3839_v28   ;;  %v2093_v38 = vadd.f32 %v4591_v8, %v4696_v54  ;;  %v2032_v39 = vadd.f32 %v4101_v59, %v4591_v8 }
 0x158   : > { %3926 = vst [vmem:[%s4608_s7 + $0x80] sm:$0xff] %v3674_v29   ;;  %v2096_v40 = vadd.f32 %v4165_v60, %v4591_v8  ;;  %3958 = vst [vmem:[%s4608_s7 + $0x180] sm:$0xff] %v3834_v33   ;;  %v2415_v42 = vsel %vm2159_vm8, %v2031_v19, %v2287_v34  ;;  %v2030_v44 = vadd.f32 %v4591_v8, %v1235_v0  ;;  %vm2157_vm10 = vcmp.ge.f32.partialorder %v2029_v37, 0.0 }
 0x159   : > { %v2479_v43 = vsel %vm2223_vm9, %v2095_v25, %v2351_v35  ;;  %v2094_v45 = vadd.f32 %v4591_v8, %v1491_v1  ;;  %v2285_v46 = vmul.f32 0.2, %v2029_v37  ;;  %vm2221_vm11 = vcmp.ge.f32.partialorder %v2093_v38, 0.0 }
 0x15a   : > { %v2349_v47 = vmul.f32 0.2, %v2093_v38  ;;  %vm2160_vm12 = vcmp.ge.f32.partialorder %v2032_v39, 0.0  ;;  %v2288_v48 = vmul.f32 0.2, %v2032_v39  ;;  %vm2224_vm13 = vcmp.ge.f32.partialorder %v2096_v40, 0.0 }
 0x15b   : > { %v2352_v49 = vmul.f32 0.2, %v2096_v40  ;;  %v2413_v50 = vsel %vm2157_vm10, %v2029_v37, %v2285_v46  ;;  %vm2158_vm14 = vcmp.ge.f32.partialorder %v2030_v44, 0.0  ;;  %v2286_v52 = vmul.f32 0.2, %v2030_v44  ;;  %v4108_v53 = vpop.f32.mrb[44].mxu0 }
 0x15c   : > { %v2477_v51 = vsel %vm2221_vm11, %v2093_v38, %v2349_v47  ;;  %v4172_v54 = vpop.f32.mrb[44].mxu1  ;;  %v2416_v55 = vsel %vm2160_vm12, %v2032_v39, %v2288_v48  ;;  %vm2222_vm15 = vcmp.ge.f32.partialorder %v2094_v45, 0.0  ;;  %v2350_v57 = vmul.f32 0.2, %v2094_v45  ;;  %v4732_v58 = vpop.f32.mrb[45].mxu0 }
 0x15d   : > { %v2480_v56 = vsel %vm2224_vm13, %v2096_v40, %v2352_v49  ;;  %v4734_v59 = vpop.f32.mrb[45].mxu1  ;;  %v3689_v60 = vpack.c.bf16 %v2416_v55, %v2415_v42  ;;  %v2414_v62 = vsel %vm2158_vm14, %v2030_v44, %v2286_v52  ;;  %v2035_v63 = vadd.f32 %v4104_v20, %v4591_v8  ;;  %v4737_v0 = vpop.f32.mrb[46].mxu0 }
 0x15e   : > { %v3849_v61 = vpack.c.bf16 %v2480_v56, %v2479_v43  ;;  %v4739_v1 = vpop.f32.mrb[46].mxu1  ;;  %v3684_v2 = vpack.c.bf16 %v2414_v62, %v2413_v50  ;;  %v2478_v3 = vsel %vm2222_vm15, %v2094_v45, %v2350_v57  ;;  %v2099_v4 = vadd.f32 %v4168_v21, %v4591_v8  ;;  %v4743_v6 = vpop.f32.mrb[47].mxu0 }
 0x15f   : > { %v2033_v5 = vadd.f32 %v4591_v8, %v1248_v26  ;;  %v4745_v7 = vpop.f32.mrb[47].mxu1  ;;  %3929 = vst [vmem:[%s4608_s7 + $0x98] sm:$0xff] %v3689_v60   ;;  %v3844_v9 = vpack.c.bf16 %v2478_v3, %v2477_v51  ;;  %vm2163_vm0 = vcmp.ge.f32.partialorder %v2035_v63, 0.0  ;;  %v2291_v10 = vmul.f32 0.2, %v2035_v63 }
 0x160   : > { %3961 = vst [vmem:[%s4608_s7 + $0x198] sm:$0xff] %v3849_v61   ;;  %v2097_v11 = vadd.f32 %v4591_v8, %v1504_v27  ;;  %3928 = vst [vmem:[%s4608_s7 + $0x90] sm:$0xff] %v3684_v2   ;;  %vm2227_vm1 = vcmp.ge.f32.partialorder %v2099_v4, 0.0  ;;  %v2355_v12 = vmul.f32 0.2, %v2099_v4  ;;  %v2036_v17 = vadd.f32 %v4755_v16, %v4711_v31 }
 0x161   : > { %vm2161_vm2 = vcmp.ge.f32.partialorder %v2033_v5, 0.0  ;;  %v2289_v13 = vmul.f32 0.2, %v2033_v5  ;;  %3960 = vst [vmem:[%s4608_s7 + $0x190] sm:$0xff] %v3844_v9   ;;  %v2419_v14 = vsel %vm2163_vm0, %v2035_v63, %v2291_v10  ;;  %v2100_v8 = vadd.f32 %v4755_v16, %v4713_v32 }
 0x162   : > { %vm2225_vm3 = vcmp.ge.f32.partialorder %v2097_v11, 0.0  ;;  %v2353_v15 = vmul.f32 0.2, %v2097_v11  ;;  %v2483_v18 = vsel %vm2227_vm1, %v2099_v4, %v2355_v12  ;;  %v2034_v20 = vadd.f32 %v4755_v16, %v4716_v36  ;;  %v4763_v21 = vpop.f32.mrb[48].mxu0  ;;  %v4765_v22 = vpop.f32.mrb[48].mxu1 }
 0x163   : > { %v2417_v19 = vsel %vm2161_vm2, %v2033_v5, %v2289_v13  ;;  %vm2164_vm4 = vcmp.ge.f32.partialorder %v2036_v17, 0.0  ;;  %v2292_v24 = vmul.f32 0.2, %v2036_v17  ;;  %v2098_v25 = vadd.f32 %v4755_v16, %v4726_v41  ;;  %v4769_v26 = vpop.f32.mrb[49].mxu0  ;;  %v4771_v27 = vpop.f32.mrb[49].mxu1 }
 0x164   : > { %v2481_v23 = vsel %vm2225_vm3, %v2097_v11, %v2353_v15  ;;  %vm2228_vm5 = vcmp.ge.f32.partialorder %v2100_v8, 0.0  ;;  %v2356_v28 = vmul.f32 0.2, %v2100_v8  ;;  %vm2162_vm6 = vcmp.ge.f32.partialorder %v2034_v20, 0.0  ;;  %v4774_v33 = vpop.f32.mrb[50].mxu0  ;;  %v4776_v34 = vpop.f32.mrb[50].mxu1 }
 0x165   : > { %v2290_v29 = vmul.f32 0.2, %v2034_v20  ;;  %v2420_v30 = vsel %vm2164_vm4, %v2036_v17, %v2292_v24  ;;  %vm2226_vm7 = vcmp.ge.f32.partialorder %v2098_v25, 0.0  ;;  %v2354_v31 = vmul.f32 0.2, %v2098_v25  ;;  %v4779_v39 = vpop.f32.mrb[51].mxu0 }
 0x166   : > { %v2039_v32 = vadd.f32 %v4755_v16, %v4108_v53  ;;  %v3699_v35 = vpack.c.bf16 %v2420_v30, %v2419_v14  ;;  %v2484_v36 = vsel %vm2228_vm5, %v2100_v8, %v2356_v28  ;;  %v2103_v38 = vadd.f32 %v4755_v16, %v4172_v54  ;;  %v4781_v40 = vpop.f32.mrb[51].mxu1 }
 0x167   : > { %v2418_v37 = vsel %vm2162_vm6, %v2034_v20, %v2290_v29  ;;  %v3859_v41 = vpack.c.bf16 %v2484_v36, %v2483_v18  ;;  %v2482_v43 = vsel %vm2226_vm7, %v2098_v25, %v2354_v31  ;;  %v2037_v47 = vadd.f32 %v4755_v16, %v4732_v58 }
 0x168   : > { %v3694_v42 = vpack.c.bf16 %v2418_v37, %v2417_v19  ;;  %vm2167_vm8 = vcmp.ge.f32.partialorder %v2039_v32, 0.0  ;;  %3931 = vst [vmem:[%s4608_s7 + $0xa8] sm:$0xff] %v3699_v35   ;;  %v3854_v44 = vpack.c.bf16 %v2482_v43, %v2481_v23  ;;  %v2295_v45 = vmul.f32 0.2, %v2039_v32 }
 0x169   : > { %vm2231_vm9 = vcmp.ge.f32.partialorder %v2103_v38, 0.0  ;;  %v2359_v46 = vmul.f32 0.2, %v2103_v38  ;;  %3963 = vst [vmem:[%s4608_s7 + $0x1a8] sm:$0xff] %v3859_v41   ;;  %v2101_v48 = vadd.f32 %v4755_v16, %v4734_v59  ;;  %v2040_v49 = vadd.f32 %v4755_v16, %v4737_v0 }
 0x16a   : > { %3930 = vst [vmem:[%s4608_s7 + $0xa0] sm:$0xff] %v3694_v42   ;;  %v2104_v50 = vadd.f32 %v4755_v16, %v4739_v1  ;;  %3962 = vst [vmem:[%s4608_s7 + $0x1a0] sm:$0xff] %v3854_v44   ;;  %v2423_v51 = vsel %vm2167_vm8, %v2039_v32, %v2295_v45  ;;  %v2038_v53 = vadd.f32 %v4755_v16, %v4743_v6  ;;  %v4799_v55 = vpop.f32.mrb[52].mxu0  ;;  %v4801_v56 = vpop.f32.mrb[52].mxu1  ;;  %vm2165_vm10 = vcmp.ge.f32.partialorder %v2037_v47, 0.0 }
 0x16b   : > { %v2487_v52 = vsel %vm2231_vm9, %v2103_v38, %v2359_v46  ;;  %v2102_v54 = vadd.f32 %v4755_v16, %v4745_v7  ;;  %v2293_v57 = vmul.f32 0.2, %v2037_v47  ;;  %vm2229_vm11 = vcmp.ge.f32.partialorder %v2101_v48, 0.0  ;;  %v4803_v0 = vpop.f32.mrb[53].mxu0  ;;  %v4805_v1 = vpop.f32.mrb[53].mxu1 }
 0x16c   : > { %v2357_v58 = vmul.f32 0.2, %v2101_v48  ;;  %vm2168_vm12 = vcmp.ge.f32.partialorder %v2040_v49, 0.0  ;;  %v2296_v59 = vmul.f32 0.2, %v2040_v49  ;;  %vm2232_vm13 = vcmp.ge.f32.partialorder %v2104_v50, 0.0 }
 0x16d   : > { %v2360_v60 = vmul.f32 0.2, %v2104_v50  ;;  %v2421_v61 = vsel %vm2165_vm10, %v2037_v47, %v2293_v57  ;;  %vm2166_vm14 = vcmp.ge.f32.partialorder %v2038_v53, 0.0  ;;  %v2294_v63 = vmul.f32 0.2, %v2038_v53  ;;  %v4807_v5 = vpop.f32.mrb[54].mxu0 }
 0x16e   : > { %v2485_v62 = vsel %vm2229_vm11, %v2101_v48, %v2357_v58  ;;  %v2424_v2 = vsel %vm2168_vm12, %v2040_v49, %v2296_v59  ;;  %vm2230_vm15 = vcmp.ge.f32.partialorder %v2102_v54, 0.0  ;;  %v2358_v4 = vmul.f32 0.2, %v2102_v54  ;;  %v4809_v6 = vpop.f32.mrb[54].mxu1  ;;  %v4813_v12 = vpop.f32.mrb[55].mxu0 }
 0x16f   : > { %v2488_v3 = vsel %vm2232_vm13, %v2104_v50, %v2360_v60  ;;  %v3709_v7 = vpack.c.bf16 %v2424_v2, %v2423_v51  ;;  %v2422_v10 = vsel %vm2166_vm14, %v2038_v53, %v2294_v63  ;;  %v2043_v11 = vadd.f32 %v4755_v16, %v4763_v21  ;;  %v4815_v13 = vpop.f32.mrb[55].mxu1 }
 0x170   : > { %v3869_v9 = vpack.c.bf16 %v2488_v3, %v2487_v52  ;;  %v3704_v14 = vpack.c.bf16 %v2422_v10, %v2421_v61  ;;  %v2486_v15 = vsel %vm2230_vm15, %v2102_v54, %v2358_v4  ;;  %v2107_v17 = vadd.f32 %v4755_v16, %v4765_v22 }
 0x171   : > { %v2041_v18 = vadd.f32 %v4755_v16, %v4769_v26  ;;  %3933 = vst [vmem:[%s4608_s7 + $0xb8] sm:$0xff] %v3709_v7   ;;  %v3864_v19 = vpack.c.bf16 %v2486_v15, %v2485_v62  ;;  %vm2171_vm0 = vcmp.ge.f32.partialorder %v2043_v11, 0.0  ;;  %v2299_v8 = vmul.f32 0.2, %v2043_v11 }
 0x172   : > { %3965 = vst [vmem:[%s4608_s7 + $0x1b8] sm:$0xff] %v3869_v9   ;;  %v2105_v20 = vadd.f32 %v4755_v16, %v4771_v27  ;;  %3932 = vst [vmem:[%s4608_s7 + $0xb0] sm:$0xff] %v3704_v14   ;;  %vm2235_vm1 = vcmp.ge.f32.partialorder %v2107_v17, 0.0  ;;  %v2363_v21 = vmul.f32 0.2, %v2107_v17  ;;  %v2044_v25 = vadd.f32 %v4755_v16, %v4774_v33  ;;  %v4829_v26 = vpop.f32.mrb[56].mxu0 }
 0x173   : > { %vm2169_vm2 = vcmp.ge.f32.partialorder %v2041_v18, 0.0  ;;  %v2297_v23 = vmul.f32 0.2, %v2041_v18  ;;  %3964 = vst [vmem:[%s4608_s7 + $0x1b0] sm:$0xff] %v3864_v19   ;;  %v2427_v24 = vsel %vm2171_vm0, %v2043_v11, %v2299_v8  ;;  %v4831_v28 = vpop.f32.mrb[56].mxu1  ;;  %v2108_v27 = vadd.f32 %v4755_v16, %v4776_v34  ;;  %v4837_v32 = vpop.f32.mrb[57].mxu0 }
 0x174   : > { %vm2233_vm3 = vcmp.ge.f32.partialorder %v2105_v20, 0.0  ;;  %v2361_v22 = vmul.f32 0.2, %v2105_v20  ;;  %v2491_v29 = vsel %vm2235_vm1, %v2107_v17, %v2363_v21  ;;  %v2042_v31 = vadd.f32 %v4755_v16, %v4779_v39  ;;  %v4839_v35 = vpop.f32.mrb[57].mxu1  ;;  %v4843_v38 = vpop.f32.mrb[58].mxu0 }
 0x175   : > { %v2425_v30 = vsel %vm2169_vm2, %v2041_v18, %v2297_v23  ;;  %vm2172_vm4 = vcmp.ge.f32.partialorder %v2044_v25, 0.0  ;;  %v2300_v37 = vmul.f32 0.2, %v2044_v25  ;;  %v2106_v33 = vadd.f32 %v4755_v16, %v4781_v40  ;;  %v4845_v41 = vpop.f32.mrb[58].mxu1  ;;  %v4849_v45 = vpop.f32.mrb[59].mxu0 }
 0x176   : > { %v2489_v36 = vsel %vm2233_vm3, %v2105_v20, %v2361_v22  ;;  %vm2236_vm5 = vcmp.ge.f32.partialorder %v2108_v27, 0.0  ;;  %v2364_v42 = vmul.f32 0.2, %v2108_v27  ;;  %vm2170_vm6 = vcmp.ge.f32.partialorder %v2042_v31, 0.0  ;;  %v4851_v46 = vpop.f32.mrb[59].mxu1 }
 0x177   : > { %v2298_v34 = vmul.f32 0.2, %v2042_v31  ;;  %v2428_v39 = vsel %vm2172_vm4, %v2044_v25, %v2300_v37  ;;  %vm2234_vm7 = vcmp.ge.f32.partialorder %v2106_v33, 0.0  ;;  %v2362_v43 = vmul.f32 0.2, %v2106_v33 }
 0x178   : > { %v2047_v44 = vadd.f32 %v4755_v16, %v4799_v55  ;;  %v3719_v40 = vpack.c.bf16 %v2428_v39, %v2427_v24  ;;  %v2492_v47 = vsel %vm2236_vm5, %v2108_v27, %v2364_v42  ;;  %v2111_v49 = vadd.f32 %v4755_v16, %v4801_v56 }
 0x179   : > { %v2426_v48 = vsel %vm2170_vm6, %v2042_v31, %v2298_v34  ;;  %v3879_v50 = vpack.c.bf16 %v2492_v47, %v2491_v29  ;;  %v2490_v52 = vsel %vm2234_vm7, %v2106_v33, %v2362_v43  ;;  %v2045_v58 = vadd.f32 %v4755_v16, %v4803_v0 }
 0x17a   : > { %v3714_v51 = vpack.c.bf16 %v2426_v48, %v2425_v30  ;;  %vm2175_vm8 = vcmp.ge.f32.partialorder %v2047_v44, 0.0  ;;  %3935 = vst [vmem:[%s4608_s7 + $0xc8] sm:$0xff] %v3719_v40   ;;  %v3874_v53 = vpack.c.bf16 %v2490_v52, %v2489_v36  ;;  %v2303_v54 = vmul.f32 0.2, %v2047_v44  ;;  %v4856_v57 = vpop.f32.mrb[60].mxu0  ;;  %v4868_v61 = vpop.f32.mrb[60].mxu1 }
 0x17b   : > { %vm2239_vm9 = vcmp.ge.f32.partialorder %v2111_v49, 0.0  ;;  %v2367_v55 = vmul.f32 0.2, %v2111_v49  ;;  %3967 = vst [vmem:[%s4608_s7 + $0x1c8] sm:$0xff] %v3879_v50   ;;  %v2109_v56 = vadd.f32 %v4755_v16, %v4805_v1  ;;  %v2048_v59 = vadd.f32 %v4755_v16, %v4807_v5  ;;  %v4870_v62 = vpop.f32.mrb[61].mxu0  ;;  %v4878_v3 = vpop.f32.mrb[61].mxu1 }
 0x17c   : > { %3934 = vst [vmem:[%s4608_s7 + $0xc0] sm:$0xff] %v3714_v51   ;;  %v2112_v60 = vadd.f32 %v4755_v16, %v4809_v6  ;;  %3966 = vst [vmem:[%s4608_s7 + $0x1c0] sm:$0xff] %v3874_v53   ;;  %v2431_v63 = vsel %vm2175_vm8, %v2047_v44, %v2303_v54  ;;  %v2046_v0 = vadd.f32 %v4755_v16, %v4813_v12  ;;  %v4880_v4 = vpop.f32.mrb[62].mxu0  ;;  %vm2173_vm10 = vcmp.ge.f32.partialorder %v2045_v58, 0.0  ;;  %v4882_v12 = vpop.f32.mrb[62].mxu1 }
 0x17d   : > { %v2495_v2 = vsel %vm2239_vm9, %v2111_v49, %v2367_v55  ;;  %v2110_v1 = vadd.f32 %v4755_v16, %v4815_v13  ;;  %v2301_v5 = vmul.f32 0.2, %v2045_v58  ;;  %vm2237_vm11 = vcmp.ge.f32.partialorder %v2109_v56, 0.0  ;;  %v4884_v13 = vpop.f32.mrb[63].mxu0  ;;  %v1587_v19 = vpop.f32.mrb[63].mxu1 }
 0x17e   : > { %v2365_v6 = vmul.f32 0.2, %v2109_v56  ;;  %vm2176_vm12 = vcmp.ge.f32.partialorder %v2048_v59, 0.0  ;;  %v2304_v7 = vmul.f32 0.2, %v2048_v59  ;;  %vm2240_vm13 = vcmp.ge.f32.partialorder %v2112_v60, 0.0 }
 0x17f   : > { %v2368_v9 = vmul.f32 0.2, %v2112_v60  ;;  %v2429_v10 = vsel %vm2173_vm10, %v2045_v58, %v2301_v5  ;;  %vm2174_vm14 = vcmp.ge.f32.partialorder %v2046_v0, 0.0  ;;  %v2302_v14 = vmul.f32 0.2, %v2046_v0 }
 0x180   : > { %v2493_v11 = vsel %vm2237_vm11, %v2109_v56, %v2365_v6  ;;  %v2432_v15 = vsel %vm2176_vm12, %v2048_v59, %v2304_v7  ;;  %vm2238_vm15 = vcmp.ge.f32.partialorder %v2110_v1, 0.0  ;;  %v2366_v18 = vmul.f32 0.2, %v2110_v1 }
 0x181   : > { %v2496_v17 = vsel %vm2240_vm13, %v2112_v60, %v2368_v9  ;;  %v3729_v8 = vpack.c.bf16 %v2432_v15, %v2431_v63  ;;  %v2430_v21 = vsel %vm2174_vm14, %v2046_v0, %v2302_v14  ;;  %v2051_v23 = vadd.f32 %v4755_v16, %v4829_v26 }
 0x182   : > { %v3889_v20 = vpack.c.bf16 %v2496_v17, %v2495_v2  ;;  %v3724_v24 = vpack.c.bf16 %v2430_v21, %v2429_v10  ;;  %v2494_v22 = vsel %vm2238_vm15, %v2110_v1, %v2366_v18  ;;  %v2115_v25 = vadd.f32 %v4755_v16, %v4831_v28 }
 0x183   : > { %v2049_v29 = vadd.f32 %v4755_v16, %v4837_v32  ;;  %3937 = vst [vmem:[%s4608_s7 + $0xd8] sm:$0xff] %v3729_v8   ;;  %v3884_v30 = vpack.c.bf16 %v2494_v22, %v2493_v11  ;;  %vm2179_vm0 = vcmp.ge.f32.partialorder %v2051_v23, 0.0  ;;  %v2307_v27 = vmul.f32 0.2, %v2051_v23 }
 0x184   : > { %3969 = vst [vmem:[%s4608_s7 + $0x1d8] sm:$0xff] %v3889_v20   ;;  %v2113_v31 = vadd.f32 %v4755_v16, %v4839_v35  ;;  %3936 = vst [vmem:[%s4608_s7 + $0xd0] sm:$0xff] %v3724_v24   ;;  %vm2243_vm1 = vcmp.ge.f32.partialorder %v2115_v25, 0.0  ;;  %v2371_v26 = vmul.f32 0.2, %v2115_v25  ;;  %v2052_v28 = vadd.f32 %v4755_v16, %v4843_v38 }
 0x185   : > { %vm2177_vm2 = vcmp.ge.f32.partialorder %v2049_v29, 0.0  ;;  %v2305_v36 = vmul.f32 0.2, %v2049_v29  ;;  %3968 = vst [vmem:[%s4608_s7 + $0x1d0] sm:$0xff] %v3884_v30   ;;  %v2435_v37 = vsel %vm2179_vm0, %v2051_v23, %v2307_v27  ;;  %v2116_v42 = vadd.f32 %v4755_v16, %v4845_v41 }
 0x186   : > { %vm2241_vm3 = vcmp.ge.f32.partialorder %v2113_v31, 0.0  ;;  %v2499_v32 = vsel %vm2243_vm1, %v2115_v25, %v2371_v26  ;;  %v2369_v33 = vmul.f32 0.2, %v2113_v31  ;;  %v2050_v34 = vadd.f32 %v4755_v16, %v4849_v45 }
 0x187   : > { %v2433_v35 = vsel %vm2177_vm2, %v2049_v29, %v2305_v36  ;;  %vm2180_vm4 = vcmp.ge.f32.partialorder %v2052_v28, 0.0  ;;  %v2308_v39 = vmul.f32 0.2, %v2052_v28  ;;  %v2114_v43 = vadd.f32 %v4755_v16, %v4851_v46 }
 0x188   : > { %vm2244_vm5 = vcmp.ge.f32.partialorder %v2116_v42, 0.0  ;;  %v2372_v44 = vmul.f32 0.2, %v2116_v42  ;;  %vm2178_vm6 = vcmp.ge.f32.partialorder %v2050_v34, 0.0  ;;  %v2306_v40 = vmul.f32 0.2, %v2050_v34 }
 0x189   : > { %v2436_v38 = vsel %vm2180_vm4, %v2052_v28, %v2308_v39  ;;  %vm2242_vm7 = vcmp.ge.f32.partialorder %v2114_v43, 0.0  ;;  %v2370_v47 = vmul.f32 0.2, %v2114_v43  ;;  %v2055_v41 = vadd.f32 %v4755_v16, %v4856_v57 }
 0x18a   : > { %v3739_v45 = vpack.c.bf16 %v2436_v38, %v2435_v37  ;;  %v2500_v48 = vsel %vm2244_vm5, %v2116_v42, %v2372_v44  ;;  %v2434_v49 = vsel %vm2178_vm6, %v2050_v34, %v2306_v40  ;;  %v2119_v50 = vadd.f32 %v4755_v16, %v4868_v61 }
 0x18b   : > { %v2497_v46 = vsel %vm2241_vm3, %v2113_v31, %v2369_v33  ;;  %v3899_v51 = vpack.c.bf16 %v2500_v48, %v2499_v32  ;;  %v3734_v52 = vpack.c.bf16 %v2434_v49, %v2433_v35  ;;  %v2498_v53 = vsel %vm2242_vm7, %v2114_v43, %v2370_v47 }
 0x18c   : > { %3939 = vst [vmem:[%s4608_s7 + $0xe8] sm:$0xff] %v3739_v45   ;;  %v3894_v54 = vpack.c.bf16 %v2498_v53, %v2497_v46  ;;  %vm2183_vm8 = vcmp.ge.f32.partialorder %v2055_v41, 0.0  ;;  %v2311_v55 = vmul.f32 0.2, %v2055_v41  ;;  %v2375_v58 = vmul.f32 0.2, %v2119_v50 }
 0x18d   : > { %3971 = vst [vmem:[%s4608_s7 + $0x1e8] sm:$0xff] %v3899_v51   ;;  %3938 = vst [vmem:[%s4608_s7 + $0xe0] sm:$0xff] %v3734_v52   ;;  %v2053_v57 = vadd.f32 %v4755_v16, %v4870_v62  ;;  %v2117_v56 = vadd.f32 %v4755_v16, %v4878_v3  ;;  %v2056_v59 = vadd.f32 %v4755_v16, %v4880_v4  ;;  %vm2247_vm9 = vcmp.ge.f32.partialorder %v2119_v50, 0.0 }
 0x18e   : > { %v2120_v60 = vadd.f32 %v4755_v16, %v4882_v12  ;;  %3970 = vst [vmem:[%s4608_s7 + $0x1e0] sm:$0xff] %v3894_v54   ;;  %v2054_v61 = vadd.f32 %v4755_v16, %v4884_v13  ;;  %v2118_v63 = vadd.f32 %v4755_v16, %v1587_v19  ;;  %v2439_v2 = vsel %vm2183_vm8, %v2055_v41, %v2311_v55 }
 0x18f   : > { %vm2181_vm10 = vcmp.ge.f32.partialorder %v2053_v57, 0.0  ;;  %v2309_v62 = vmul.f32 0.2, %v2053_v57  ;;  %v2373_v0 = vmul.f32 0.2, %v2117_v56  ;;  %vm2184_vm11 = vcmp.ge.f32.partialorder %v2056_v59, 0.0 }
 0x190   : > { %v2312_v1 = vmul.f32 0.2, %v2056_v59  ;;  %vm2248_vm12 = vcmp.ge.f32.partialorder %v2120_v60, 0.0  ;;  %v2376_v3 = vmul.f32 0.2, %v2120_v60  ;;  %v2503_v4 = vsel %vm2247_vm9, %v2119_v50, %v2375_v58 }
 0x191   : > { %vm2245_vm13 = vcmp.ge.f32.partialorder %v2117_v56, 0.0  ;;  %vm2182_vm14 = vcmp.ge.f32.partialorder %v2054_v61, 0.0  ;;  %v2310_v5 = vmul.f32 0.2, %v2054_v61  ;;  %vm2246_vm15 = vcmp.ge.f32.partialorder %v2118_v63, 0.0 }
 0x192   : > { %v2440_v6 = vsel %vm2184_vm11, %v2056_v59, %v2312_v1  ;;  %v2504_v7 = vsel %vm2248_vm12, %v2120_v60, %v2376_v3  ;;  %v2374_v16 = vmul.f32 0.2, %v2118_v63  ;;  %v2437_v9 = vsel %vm2181_vm10, %v2053_v57, %v2309_v62 }
 0x193   : > { %v3749_v10 = vpack.c.bf16 %v2440_v6, %v2439_v2  ;;  %v3909_v11 = vpack.c.bf16 %v2504_v7, %v2503_v4  ;;  %v2438_v14 = vsel %vm2182_vm14, %v2054_v61, %v2310_v5  ;;  %v2501_v12 = vsel %vm2245_vm13, %v2117_v56, %v2373_v0 }
 0x194   : > { %v3744_v13 = vpack.c.bf16 %v2438_v14, %v2437_v9  ;;  %v2502_v15 = vsel %vm2246_vm15, %v2118_v63, %v2374_v16 }
 0x195   : > { %3941 = vst [vmem:[%s4608_s7 + $0xf8] sm:$0xff] %v3749_v10   ;;  %3973 = vst [vmem:[%s4608_s7 + $0x1f8] sm:$0xff] %v3909_v11   ;;  %v3904_v17 = vpack.c.bf16 %v2502_v15, %v2501_v12 }
 0x196   : > { %3940 = vst [vmem:[%s4608_s7 + $0xf0] sm:$0xff] %v3744_v13  }
 0x197   : > { %3972 = vst [vmem:[%s4608_s7 + $0x1f0] sm:$0xff] %v3904_v17  }
 0x198   : > { %4349 = shalt.err (!%p4346_p5)
}
 0x199   : > { %s4350_s29 = scalar_lea.hbm %s4932_s19, 8192  ;;  %s4354_s5 = scalar_lea.hbm %s4991_s3, 16384 }
 0x19a   : > { %p4351_p6 = scmp.ne.s32.totalorder %s4932_s19, %s4350_s29  ;;  %p4355_p10 = scmp.lt.u32.totalorder %s4932_s19, %s4991_s3 }
 0x19b   : > { %p4356_p11 = scmp.lt.u32.totalorder %s4354_s5, %s4350_s29  ;;  %p4358_p13 = scmp.lt.u32.totalorder %s4350_s29, %s4932_s19 }
 0x19c   : > { %p4352_p7 = pnand %p4351_p6, %p4479_p4 }
 0x19d   : > { %p4357_p12 = por %p4356_p11, %p4355_p10 }
 0x19e   : > { %p4353_p9 = pneg %p4352_p7 }
 0x19f   : > { %p4359_p0 = por %p4358_p13, %p4357_p12 }
 0x1a1   : > { %p4360_p1 = pnand %p4359_p0, %p4353_p9 }
 0x1a3   : > { %4363 = shalt.err (!%p4360_p1)
}
 0x1a4   : > { %s4417_s8 = smov 64   ;;  %s4418_s9 = smov 4  }
 0x1a5   : > { %4206 = dma.vmem_to_hbm [thread:$0]  (%p4479_p4), %s4934_s11, 8192, %s4932_s19, %s4942_s21, %s4417_s8, %s4417_s8, %s4418_s9  }
 0x1a6 PF: > { %p4212_p2 = scmp.ge.s32.totalorder %s4414_s17, 2  ;;  %s3174_s10 = sand.u32 1, %s4394_s12  }
 0x1a7   : > { %s3175_s18 = scalar_lea.sflag [#allocation4], %s3174_s10 }
 0x1a8   : > { %p4209_p3 = pnand %p4212_p2, %p4486_p8 }
 0x1aa   : > { %4389 = dma.done.wait (!%p4209_p3), %s3175_s18, 8192  }
 0x1ab   : > { %4391 = vsyncadd (!%p4209_p3), %s3175_s18, 4294959104  ;;  %s16_s17 = sadd.s32 1, %s4414_s17   ;;  %s4994_s12 = smov %s4398_s13 }
 0x1ac   : > { %p13_p5 = scmp.ge.s32.totalorder %s16_s17, 4   ;;  %s4995_s13 = smov %s4402_s14 }
 0x1ad   : > { %s4996_s14 = smov %s4492_s25  ;;  %s4997_s15 = smov %s4410_s16 }
 0x1ae   : > { %s4998_s16 = smov %s5000_s20  ;;  %15 = sbr.rel (!%p13_p5) target bundleno = 4 (0x4), region = 78 }
 0x1b5   :  { %3180 = vsyncpa [#allocation4], 1 }
 0x1b6   :  { %3182 = vsyncpa [#allocation4 + $0x1], 1 }

// kernel: wavegan_discriminator_forward.7
= control target key start
LH: loop header
LB: loop body
LE: loop exit
PB: predicated region body
PF: predicated region fallthrough
CT: control target
= control target key end

     0   :  { %8 = vsyncpa [#allocation4], 0  ;;  %s2107_s0 = inlined_call_operand.vmem [shape: bf16[512,256], index: 0, kind: input, shape index: {}]   ;;  %s2108_s1 = inlined_call_operand.vmem [shape: bf16[256,128], index: 1, kind: input, shape index: {}]   ;;  %s2109_s2 = inlined_call_operand.vmem [shape: f32[1,128], index: 2, kind: input, shape index: {}]   ;;  %s2110_s3 = inlined_call_operand.hbm [shape: bf16[512,128], index: 3, kind: output, shape index: {}]  }
   0x1   :  { %10 = vsyncpa [#allocation4 + $0x1], 0  ;;  %s1851_s12 = smov 0   ;;  %s1853_s13 = smov 0  }
   0x2   :  { %s1855_s14 = smov 0   ;;  %s1857_s15 = smov 0  }
   0x3   :  { %s1859_s16 = smov 0   ;;  %s1861_s17 = smov 0  }
   0x4 LB: > { %s1274_s18 = sadd.s32 4294967295, %s1826_s17   ;;  %s1275_s19 = sadd.s32 4294967294, %s1826_s17   ;;  %s1826_s17 = sphi %s1861_s17, %s16_s17   ;;  %s1822_s16 = sphi %s1859_s16, %s2117_s16   ;;  %s1818_s15 = sphi %s1857_s15, %s2116_s15   ;;  %s1814_s14 = sphi %s1855_s14, %s2115_s14   ;;  %s1810_s13 = sphi %s1853_s13, %s2114_s13   ;;  %s1806_s12 = sphi %s1851_s12, %s2113_s12  }
   0x5   : > { %s28_s20 = sadd.s32 1, %s1822_s16  ;;  %s110_s21 = sadd.s32 1, %s1814_s14 }
   0x6   : > { %p30_p0 = scmp.ge.s32.totalorder %s28_s20, 2  ;;  %p120_p1 = scmp.ne.s32.totalorder %s1814_s14, %s1810_s13 }
   0x7   : > { %p121_p2 = scmp.eq.s32.totalorder %s1274_s18, 1  ;;  %p126_p3 = scmp.ne.s32.totalorder %s1810_s13, %s1806_s12 }
   0x8   : > { %s2119_s20 = smov (%p30_p0, %s28_s20), 0  ;;  %p127_p5 = scmp.eq.s32.totalorder %s1275_s19, 1 }
   0x9   : > { %p1891_p4 = por %p121_p2, %p120_p1  ;;  %s107_s23 = ssub.s32 %s1822_s16, %s2119_s20 }
   0xa   : > { %p1279_p6 = scmp.ge.s32.totalorder %s1826_s17, 1  ;;  %p108_p7 = scmp.eq.s32.totalorder %s107_s23, 0 }
   0xb   : > { %p1898_p8 = por %p127_p5, %p126_p3  ;;  %p172_p9 = scmp.lt.s32.totalorder %s1826_s17, 3 }
   0xc   : > { %s1904_s25 = scalar_select %p108_p7, %s1814_s14, %s110_s21  }
   0xd   : > { %p173_p10 = pnand %p1279_p6, %p172_p9 }
   0xe   : > { %v1684_v0 = vld [vmem:[%s2108_s1 + $0x40] sm:$0xff] (!%p173_p10)   ;;  %s1281_s28 = sshll.u32 (!%p173_p10), %s1818_s15, 5  ;;  %v1686_v2 = vld [vmem:[%s2108_s1 + $0x48] sm:$0xff] (!%p173_p10)   ;;  %v1688_v4 = vld [vmem:[%s2108_s1 + $0x50] sm:$0xff] (!%p173_p10)   ;;  %s1828_s19 = smov (!%p173_p10), [#allocation3]  }
   0xf   : > { %176 = sbr.rel (%p173_p10) target bundleno = 343 (0x157), region = 32  ;;  %v1685_v1 = vld [vmem:[%s2108_s1] sm:$0xff] (!%p173_p10)   ;;  %1499 = vmatprep.subr.bf16.mxu0 (!%p173_p10), %v1684_v0  ;;  %1611 = vmatprep.subr.bf16.mxu1 (!%p173_p10), %v1684_v0  ;;  %v1687_v3 = vld [vmem:[%s2108_s1 + $0x8] sm:$0xff] (!%p173_p10)   ;;  %p208_p11 = scmp.lt.s32.totalorder (!%p173_p10), %s1281_s28, 63  ;;  %v1689_v5 = vld [vmem:[%s2108_s1 + $0x10] sm:$0xff] (!%p173_p10)  }
  0x10   : > { %1500 = vmatpush3.bf16.msra.mxu0 (!%p173_p10), %v1685_v1  ;;  %1619 = vmatpush3.bf16.msra.mxu1 (!%p173_p10), %v1685_v1  ;;  %v1690_v6 = vld [vmem:[%s2108_s1 + $0x58] sm:$0xff] (!%p173_p10)   ;;  %v1692_v8 = vld [vmem:[%s2108_s1 + $0x60] sm:$0xff] (!%p173_p10)   ;;  %v1694_v10 = vld [vmem:[%s2108_s1 + $0x68] sm:$0xff] (!%p173_p10)   ;;  %s1752_s21 = sshll.u32 (!%p173_p10), %s1828_s19, 4  ;;  %s1753_s21 = int_to_ptr.vmem [resolvable:$false] %s1752_s21 }
  0x11   : > { %1501 = vmatprep.subr.bf16.mxu0 (!%p173_p10), %v1686_v2  ;;  %1612 = vmatprep.subr.bf16.mxu1 (!%p173_p10), %v1686_v2  ;;  %v1691_v7 = vld [vmem:[%s2108_s1 + $0x18] sm:$0xff] (!%p173_p10)   ;;  %v1693_v9 = vld [vmem:[%s2108_s1 + $0x20] sm:$0xff] (!%p173_p10)   ;;  %v1695_v13 = vld [vmem:[%s2108_s1 + $0x28] sm:$0xff] (!%p173_p10)   ;;  %s1754_s23 = scalar_lea.vmem (!%p173_p10), %s1753_s21, 4096 }
  0x12   : > { %v1696_v14 = vld [vmem:[%s2108_s1 + $0x70] sm:$0xff] (!%p173_p10)   ;;  %v1698_v16 = vld [vmem:[%s2108_s1 + $0x78] sm:$0xff] (!%p173_p10)   ;;  %v1995_v51 = vld [vmem:[%s2109_s2] ss:$0 sm:$0xff] (!%p173_p10) }
  0x13   : > { %v1697_v15 = vld [vmem:[%s2108_s1 + $0x30] sm:$0xff] (!%p173_p10)   ;;  %v1699_v17 = vld [vmem:[%s2108_s1 + $0x38] sm:$0xff] (!%p173_p10)  }
  0x14   : > { %1502 = vmatpush3.bf16.msra.mxu0 (!%p173_p10), %v1687_v3  ;;  %1620 = vmatpush3.bf16.msra.mxu1 (!%p173_p10), %v1687_v3 }
  0x15   : > { %1503 = vmatprep.subr.bf16.mxu0 (!%p173_p10), %v1688_v4  ;;  %1613 = vmatprep.subr.bf16.mxu1 (!%p173_p10), %v1688_v4 }
  0x16   : > { %s2121_s28 = smov (!%p208_p11, %s1281_s28), 63 }
  0x17   : > { %s1370_s26 = sshll.u32 %s2121_s28, 3  ;;  %s1403_s28 = sshll.u32 %s1818_s15, 11 }
  0x18   : > { %1504 = vmatpush3.bf16.msra.mxu0 %v1689_v5  ;;  %1621 = vmatpush3.bf16.msra.mxu1 %v1689_v5  ;;  %s1937_s5 = scalar_lea.vmem %s2107_s0, %s1370_s26  ;;  %s2053_s11 = scalar_lea.hbm %s2110_s3, %s1403_s28 }
  0x19   : > { %1505 = vmatprep.subr.bf16.mxu0 %v1690_v6  ;;  %1614 = vmatprep.subr.bf16.mxu1 %v1690_v6  ;;  %v1702_v11 = vld [vmem:[%s1937_s5 + $0x4] ss:$8 sps:$4 sm:$0xff]   ;;  %v1700_v18 = vld [vmem:[%s1937_s5] ss:$8 sps:$4 sm:$0xff]   ;;  %v1706_v20 = vld [vmem:[%s1937_s5 + $0x14] ss:$8 sps:$4 sm:$0xff]  }
  0x1a   : > { %v1705_v12 = vld [vmem:[%s1937_s5 + $0x84] ss:$8 sps:$4 sm:$0xff]   ;;  %646 = vmatprep.mubr.bf16.mxu0 %v1702_v11  ;;  %v1703_v19 = vld [vmem:[%s1937_s5 + $0x80] ss:$8 sps:$4 sm:$0xff]   ;;  %v1708_v21 = vld [vmem:[%s1937_s5 + $0x94] ss:$8 sps:$4 sm:$0xff]  }
  0x1b   : > { %710 = vmatprep.mubr.bf16.mxu1 %v1705_v12  ;;  %v1710_v22 = vld [vmem:[%s1937_s5 + $0x10] ss:$8 sps:$4 sm:$0xff]   ;;  %v1712_v24 = vld [vmem:[%s1937_s5 + $0x24] ss:$8 sps:$4 sm:$0xff]   ;;  %v1716_v26 = vld [vmem:[%s1937_s5 + $0x20] ss:$8 sps:$4 sm:$0xff]  }
  0x1c   : > { %1506 = vmatpush3.bf16.msra.mxu0 %v1691_v7  ;;  %1622 = vmatpush3.bf16.msra.mxu1 %v1691_v7  ;;  %v1711_v23 = vld [vmem:[%s1937_s5 + $0x90] ss:$8 sps:$4 sm:$0xff]   ;;  %v1714_v25 = vld [vmem:[%s1937_s5 + $0xa4] ss:$8 sps:$4 sm:$0xff]   ;;  %v1717_v27 = vld [vmem:[%s1937_s5 + $0xa0] ss:$8 sps:$4 sm:$0xff]  }
  0x1d   : > { %1507 = vmatprep.subr.bf16.mxu0 %v1692_v8  ;;  %1615 = vmatprep.subr.bf16.mxu1 %v1692_v8  ;;  %v1718_v28 = vld [vmem:[%s1937_s5 + $0x34] ss:$8 sps:$4 sm:$0xff]   ;;  %v1722_v30 = vld [vmem:[%s1937_s5 + $0x30] ss:$8 sps:$4 sm:$0xff]   ;;  %v1724_v32 = vld [vmem:[%s1937_s5 + $0x44] ss:$8 sps:$4 sm:$0xff]  }
  0x1e   : > { %v1720_v29 = vld [vmem:[%s1937_s5 + $0xb4] ss:$8 sps:$4 sm:$0xff]   ;;  %v1723_v31 = vld [vmem:[%s1937_s5 + $0xb0] ss:$8 sps:$4 sm:$0xff]   ;;  %v1726_v33 = vld [vmem:[%s1937_s5 + $0xc4] ss:$8 sps:$4 sm:$0xff]  }
  0x1f   : > { %v1728_v34 = vld [vmem:[%s1937_s5 + $0x40] ss:$8 sps:$4 sm:$0xff]   ;;  %v1730_v36 = vld [vmem:[%s1937_s5 + $0x54] ss:$8 sps:$4 sm:$0xff]   ;;  %v1734_v38 = vld [vmem:[%s1937_s5 + $0x50] ss:$8 sps:$4 sm:$0xff]  }
  0x20   : > { %1508 = vmatpush3.bf16.msra.mxu0 %v1693_v9  ;;  %1623 = vmatpush3.bf16.msra.mxu1 %v1693_v9  ;;  %v1729_v35 = vld [vmem:[%s1937_s5 + $0xc0] ss:$8 sps:$4 sm:$0xff]   ;;  %v1732_v37 = vld [vmem:[%s1937_s5 + $0xd4] ss:$8 sps:$4 sm:$0xff]   ;;  %v1735_v39 = vld [vmem:[%s1937_s5 + $0xd0] ss:$8 sps:$4 sm:$0xff]  }
  0x21   : > { %1509 = vmatprep.subr.bf16.mxu0 %v1694_v10  ;;  %1616 = vmatprep.subr.bf16.mxu1 %v1694_v10  ;;  %v1736_v40 = vld [vmem:[%s1937_s5 + $0x64] ss:$8 sps:$4 sm:$0xff]   ;;  %v1740_v42 = vld [vmem:[%s1937_s5 + $0x60] ss:$8 sps:$4 sm:$0xff]   ;;  %v1742_v44 = vld [vmem:[%s1937_s5 + $0x74] ss:$8 sps:$4 sm:$0xff]  }
  0x22   : > { %v1738_v41 = vld [vmem:[%s1937_s5 + $0xe4] ss:$8 sps:$4 sm:$0xff]   ;;  %v1741_v43 = vld [vmem:[%s1937_s5 + $0xe0] ss:$8 sps:$4 sm:$0xff]   ;;  %v1744_v45 = vld [vmem:[%s1937_s5 + $0xf4] ss:$8 sps:$4 sm:$0xff]  }
  0x23   : > { %v1746_v46 = vld [vmem:[%s1937_s5 + $0x70] ss:$8 sps:$4 sm:$0xff]  }
  0x24   : > { %1510 = vmatpush3.bf16.msra.mxu0 %v1695_v13  ;;  %1624 = vmatpush3.bf16.msra.mxu1 %v1695_v13  ;;  %v1747_v47 = vld [vmem:[%s1937_s5 + $0xf0] ss:$8 sps:$4 sm:$0xff]   ;;  %s203_s5 = sand.u32 1, %s1810_s13  }
  0x25   : > { %1511 = vmatprep.subr.bf16.mxu0 %v1696_v14  ;;  %1617 = vmatprep.subr.bf16.mxu1 %v1696_v14  ;;  %s1280_s6 = sshll.u32 %s203_s5, 7  ;;  %s2061_s15 = scalar_lea.sflag [#allocation4], %s203_s5 }
  0x26   : > { %s2006_s7 = scalar_lea.vmem [#allocation3], %s1280_s6 }
  0x27   : > { %s1183_s8 = sshll.u32 %s2006_s7, 4  ;;  %s2055_s8 = int_to_ptr.vmem [resolvable:$true] %s1183_s8 }
  0x28   : > { %1512 = vmatpush3.bf16.msra.mxu0 %v1697_v15  ;;  %1625 = vmatpush3.bf16.msra.mxu1 %v1697_v15  ;;  %s1748_s18 = scalar_lea.vmem %s2055_s8, 2048  ;;  %p1755_p1 = scmp.lt.s32.totalorder %s2055_s8, %s1753_s21 }
  0x29   : > { %1513 = vmatprep.subr.bf16.mxu0 %v1698_v16  ;;  %1618 = vmatprep.subr.bf16.mxu1 %v1698_v16  ;;  %p1749_p12 = scmp.ne.s32.totalorder %s2055_s8, %s1748_s18  ;;  %p1756_p2 = scmp.lt.s32.totalorder %s1754_s23, %s1748_s18 }
  0x2b   : > { %p1750_p13 = pnand %p1749_p12, %p1891_p4  ;;  %p1757_p3 = por %p1756_p2, %p1755_p1 }
  0x2c   : > { %1514 = vmatpush3.bf16.msra.mxu0 %v1699_v17  ;;  %1626 = vmatpush3.bf16.msra.mxu1 %v1699_v17 }
  0x2d   : > { %p1751_p0 = pneg %p1750_p13 }
  0x2f   : > { %647 = vmatmul.mubr.bf16.vlgmr.msra.gmra.mrb[0].mxu0 %v1700_v18  ;;  %711 = vmatmul.mubr.bf16.vlgmr.msra.gmra.mrb[0].mxu1 %v1703_v19  ;;  %p1758_p5 = pnand %p1757_p3, %p1751_p0 }
  0x30   : > { %654 = vmatprep.mubr.bf16.mxu0 %v1706_v20  ;;  %718 = vmatprep.mubr.bf16.mxu1 %v1708_v21 }
  0x37   : > { %655 = vmatmul.mubr.bf16.gmra.mrb[4].mxu0 %v1710_v22  ;;  %719 = vmatmul.mubr.bf16.gmra.mrb[4].mxu1 %v1711_v23 }
  0x38   : > { %662 = vmatprep.mubr.bf16.mxu0 %v1712_v24  ;;  %726 = vmatprep.mubr.bf16.mxu1 %v1714_v25 }
  0x3f   : > { %663 = vmatmul.mubr.bf16.gmra.mrb[8].mxu0 %v1716_v26  ;;  %727 = vmatmul.mubr.bf16.gmra.mrb[8].mxu1 %v1717_v27 }
  0x40   : > { %670 = vmatprep.mubr.bf16.mxu0 %v1718_v28  ;;  %734 = vmatprep.mubr.bf16.mxu1 %v1720_v29 }
  0x47   : > { %671 = vmatmul.mubr.bf16.gmra.mrb[12].mxu0 %v1722_v30  ;;  %735 = vmatmul.mubr.bf16.gmra.mrb[12].mxu1 %v1723_v31 }
  0x48   : > { %678 = vmatprep.mubr.bf16.mxu0 %v1724_v32  ;;  %742 = vmatprep.mubr.bf16.mxu1 %v1726_v33 }
  0x4f   : > { %679 = vmatmul.mubr.bf16.gmra.mrb[16].mxu0 %v1728_v34  ;;  %743 = vmatmul.mubr.bf16.gmra.mrb[16].mxu1 %v1729_v35 }
  0x50   : > { %686 = vmatprep.mubr.bf16.mxu0 %v1730_v36  ;;  %750 = vmatprep.mubr.bf16.mxu1 %v1732_v37 }
  0x57   : > { %687 = vmatmul.mubr.bf16.gmra.mrb[20].mxu0 %v1734_v38  ;;  %751 = vmatmul.mubr.bf16.gmra.mrb[20].mxu1 %v1735_v39 }
  0x58   : > { %694 = vmatprep.mubr.bf16.mxu0 %v1736_v40  ;;  %758 = vmatprep.mubr.bf16.mxu1 %v1738_v41 }
  0x5f   : > { %695 = vmatmul.mubr.bf16.gmra.mrb[24].mxu0 %v1740_v42  ;;  %759 = vmatmul.mubr.bf16.gmra.mrb[24].mxu1 %v1741_v43 }
  0x60   : > { %702 = vmatprep.mubr.bf16.mxu0 %v1742_v44  ;;  %766 = vmatprep.mubr.bf16.mxu1 %v1744_v45 }
  0x67   : > { %703 = vmatmul.mubr.bf16.gmra.mrb[28].mxu0 %v1746_v46  ;;  %767 = vmatmul.mubr.bf16.gmra.mrb[28].mxu1 %v1747_v47 }
 0x102   : > { %v1515_v48 = vpop.f32.mrb[0].mxu0  ;;  %v1563_v49 = vpop.f32.mrb[0].mxu1 }
 0x103   : > { %v1516_v50 = vpop.f32.mrb[1].mxu0  ;;  %v1564_v52 = vpop.f32.mrb[1].mxu1 }
 0x104   : > { %v1517_v53 = vadd.f32 %v1516_v50, %v1515_v48  ;;  %v1565_v54 = vadd.f32 %v1564_v52, %v1563_v49  ;;  %v1518_v55 = vpop.f32.mrb[2].mxu0  ;;  %v1566_v56 = vpop.f32.mrb[2].mxu1 }
 0x105   : > { %v1519_v57 = vpop.f32.mrb[3].mxu0  ;;  %v1567_v58 = vpop.f32.mrb[3].mxu1 }
 0x106   : > { %v881_v59 = vadd.f32 %v1517_v53, %v1995_v51  ;;  %v897_v60 = vadd.f32 %v1565_v54, %v1995_v51  ;;  %v1520_v61 = vadd.f32 %v1519_v57, %v1518_v55  ;;  %v1568_v62 = vadd.f32 %v1567_v58, %v1566_v56 }
 0x108   : > { %v945_v63 = vmul.f32 0.2, %v881_v59  ;;  %v961_v0 = vmul.f32 0.2, %v897_v60  ;;  %vm913_vm0 = vcmp.ge.f32.partialorder %v881_v59, 0.0  ;;  %vm929_vm1 = vcmp.ge.f32.partialorder %v897_v60, 0.0 }
 0x109   : > { %v882_v1 = vadd.f32 %v1520_v61, %v1995_v51  ;;  %v898_v2 = vadd.f32 %v1568_v62, %v1995_v51 }
 0x10a   : > { %v1521_v3 = vpop.f32.mrb[4].mxu0  ;;  %v1569_v4 = vpop.f32.mrb[4].mxu1  ;;  %v977_v7 = vsel %vm913_vm0, %v881_v59, %v945_v63  ;;  %v993_v8 = vsel %vm929_vm1, %v897_v60, %v961_v0 }
 0x10b   : > { %vm914_vm2 = vcmp.ge.f32.partialorder %v882_v1, 0.0  ;;  %v946_v5 = vmul.f32 0.2, %v882_v1  ;;  %vm930_vm3 = vcmp.ge.f32.partialorder %v898_v2, 0.0  ;;  %v962_v6 = vmul.f32 0.2, %v898_v2 }
 0x10c   : > { %v1522_v9 = vpop.f32.mrb[5].mxu0  ;;  %v1570_v10 = vpop.f32.mrb[5].mxu1 }
 0x10d   : > { %v978_v11 = vsel %vm914_vm2, %v882_v1, %v946_v5  ;;  %v994_v12 = vsel %vm930_vm3, %v898_v2, %v962_v6  ;;  %v1523_v13 = vadd.f32 %v1522_v9, %v1521_v3  ;;  %v1571_v14 = vadd.f32 %v1570_v10, %v1569_v4  ;;  %v1524_v15 = vpop.f32.mrb[6].mxu0  ;;  %v1572_v16 = vpop.f32.mrb[6].mxu1 }
 0x10e   : > { %v1407_v17 = vpack.c.bf16 %v978_v11, %v977_v7  ;;  %v1447_v18 = vpack.c.bf16 %v994_v12, %v993_v8  ;;  %v1525_v19 = vpop.f32.mrb[7].mxu0  ;;  %v1573_v20 = vpop.f32.mrb[7].mxu1 }
 0x10f   : > { %v883_v21 = vadd.f32 %v1523_v13, %v1995_v51  ;;  %v899_v22 = vadd.f32 %v1571_v14, %v1995_v51  ;;  %v1526_v23 = vadd.f32 %v1525_v19, %v1524_v15  ;;  %v1574_v24 = vadd.f32 %v1573_v20, %v1572_v16 }
 0x110   : > { %1408 = vst [vmem:[%s2006_s7] sm:$0xff] %v1407_v17   ;;  %1491 = vst [vmem:[%s2006_s7 + $0x40] sm:$0xff] %v1447_v18  }
 0x111   : > { %v947_v25 = vmul.f32 0.2, %v883_v21  ;;  %v963_v26 = vmul.f32 0.2, %v899_v22  ;;  %v884_v27 = vadd.f32 %v1526_v23, %v1995_v51  ;;  %v900_v28 = vadd.f32 %v1574_v24, %v1995_v51 }
 0x112   : > { %v1527_v29 = vpop.f32.mrb[8].mxu0  ;;  %v1575_v30 = vpop.f32.mrb[8].mxu1  ;;  %vm915_vm4 = vcmp.ge.f32.partialorder %v883_v21, 0.0  ;;  %vm931_vm5 = vcmp.ge.f32.partialorder %v899_v22, 0.0 }
 0x113   : > { %v1528_v31 = vpop.f32.mrb[9].mxu0  ;;  %v1576_v32 = vpop.f32.mrb[9].mxu1  ;;  %vm916_vm6 = vcmp.ge.f32.partialorder %v884_v27, 0.0  ;;  %v948_v33 = vmul.f32 0.2, %v884_v27  ;;  %vm932_vm7 = vcmp.ge.f32.partialorder %v900_v28, 0.0  ;;  %v979_v39 = vsel %vm915_vm4, %v883_v21, %v947_v25 }
 0x114   : > { %v964_v34 = vmul.f32 0.2, %v900_v28  ;;  %v1529_v35 = vadd.f32 %v1528_v31, %v1527_v29  ;;  %v1577_v36 = vadd.f32 %v1576_v32, %v1575_v30  ;;  %v1530_v37 = vpop.f32.mrb[10].mxu0  ;;  %v1578_v38 = vpop.f32.mrb[10].mxu1  ;;  %v995_v40 = vsel %vm931_vm5, %v899_v22, %v963_v26 }
 0x115   : > { %v980_v41 = vsel %vm916_vm6, %v884_v27, %v948_v33  ;;  %v1531_v43 = vpop.f32.mrb[11].mxu0  ;;  %v1579_v44 = vpop.f32.mrb[11].mxu1 }
 0x116   : > { %v996_v42 = vsel %vm932_vm7, %v900_v28, %v964_v34  ;;  %v1412_v45 = vpack.c.bf16 %v980_v41, %v979_v39  ;;  %v885_v47 = vadd.f32 %v1529_v35, %v1995_v51  ;;  %v901_v48 = vadd.f32 %v1577_v36, %v1995_v51 }
 0x117   : > { %v1452_v46 = vpack.c.bf16 %v996_v42, %v995_v40  ;;  %v1532_v49 = vadd.f32 %v1531_v43, %v1530_v37  ;;  %v1580_v50 = vadd.f32 %v1579_v44, %v1578_v38 }
 0x118   : > { %1484 = vst [vmem:[%s2006_s7 + $0x8] sm:$0xff] %v1412_v45   ;;  %v949_v52 = vmul.f32 0.2, %v885_v47  ;;  %v965_v53 = vmul.f32 0.2, %v901_v48  ;;  %vm917_vm8 = vcmp.ge.f32.partialorder %v885_v47, 0.0 }
 0x119   : > { %1492 = vst [vmem:[%s2006_s7 + $0x48] sm:$0xff] %v1452_v46   ;;  %v886_v54 = vadd.f32 %v1532_v49, %v1995_v51  ;;  %v902_v55 = vadd.f32 %v1580_v50, %v1995_v51  ;;  %vm933_vm9 = vcmp.ge.f32.partialorder %v901_v48, 0.0 }
 0x11a   : > { %v1533_v56 = vpop.f32.mrb[12].mxu0  ;;  %v1581_v57 = vpop.f32.mrb[12].mxu1  ;;  %v981_v2 = vsel %vm917_vm8, %v885_v47, %v949_v52  ;;  %v997_v3 = vsel %vm933_vm9, %v901_v48, %v965_v53 }
 0x11b   : > { %v1534_v58 = vpop.f32.mrb[13].mxu0  ;;  %v1582_v59 = vpop.f32.mrb[13].mxu1  ;;  %vm918_vm10 = vcmp.ge.f32.partialorder %v886_v54, 0.0  ;;  %v950_v60 = vmul.f32 0.2, %v886_v54  ;;  %vm934_vm11 = vcmp.ge.f32.partialorder %v902_v55, 0.0 }
 0x11c   : > { %v966_v61 = vmul.f32 0.2, %v902_v55  ;;  %v1535_v62 = vadd.f32 %v1534_v58, %v1533_v56  ;;  %v1583_v63 = vadd.f32 %v1582_v59, %v1581_v57  ;;  %v1536_v0 = vpop.f32.mrb[14].mxu0  ;;  %v1584_v1 = vpop.f32.mrb[14].mxu1 }
 0x11d   : > { %v982_v4 = vsel %vm918_vm10, %v886_v54, %v950_v60  ;;  %v1537_v6 = vpop.f32.mrb[15].mxu0  ;;  %v1585_v7 = vpop.f32.mrb[15].mxu1 }
 0x11e   : > { %v998_v5 = vsel %vm934_vm11, %v902_v55, %v966_v61  ;;  %v1417_v8 = vpack.c.bf16 %v982_v4, %v981_v2  ;;  %v887_v10 = vadd.f32 %v1535_v62, %v1995_v51  ;;  %v903_v11 = vadd.f32 %v1583_v63, %v1995_v51 }
 0x11f   : > { %v1457_v9 = vpack.c.bf16 %v998_v5, %v997_v3  ;;  %v1538_v12 = vadd.f32 %v1537_v6, %v1536_v0  ;;  %v1586_v13 = vadd.f32 %v1585_v7, %v1584_v1 }
 0x120   : > { %1485 = vst [vmem:[%s2006_s7 + $0x10] sm:$0xff] %v1417_v8   ;;  %v951_v14 = vmul.f32 0.2, %v887_v10  ;;  %v967_v15 = vmul.f32 0.2, %v903_v11  ;;  %vm919_vm12 = vcmp.ge.f32.partialorder %v887_v10, 0.0 }
 0x121   : > { %1493 = vst [vmem:[%s2006_s7 + $0x50] sm:$0xff] %v1457_v9   ;;  %v888_v16 = vadd.f32 %v1538_v12, %v1995_v51  ;;  %v904_v17 = vadd.f32 %v1586_v13, %v1995_v51  ;;  %vm935_vm13 = vcmp.ge.f32.partialorder %v903_v11, 0.0 }
 0x122   : > { %v1539_v18 = vpop.f32.mrb[16].mxu0  ;;  %v1587_v19 = vpop.f32.mrb[16].mxu1  ;;  %v983_v28 = vsel %vm919_vm12, %v887_v10, %v951_v14  ;;  %v999_v29 = vsel %vm935_vm13, %v903_v11, %v967_v15 }
 0x123   : > { %v1540_v20 = vpop.f32.mrb[17].mxu0  ;;  %v1588_v21 = vpop.f32.mrb[17].mxu1  ;;  %vm920_vm14 = vcmp.ge.f32.partialorder %v888_v16, 0.0  ;;  %v952_v22 = vmul.f32 0.2, %v888_v16  ;;  %vm936_vm15 = vcmp.ge.f32.partialorder %v904_v17, 0.0 }
 0x124   : > { %v968_v23 = vmul.f32 0.2, %v904_v17  ;;  %v1541_v24 = vadd.f32 %v1540_v20, %v1539_v18  ;;  %v1589_v25 = vadd.f32 %v1588_v21, %v1587_v19  ;;  %v1542_v26 = vpop.f32.mrb[18].mxu0  ;;  %v1590_v27 = vpop.f32.mrb[18].mxu1 }
 0x125   : > { %v984_v30 = vsel %vm920_vm14, %v888_v16, %v952_v22  ;;  %v1543_v32 = vpop.f32.mrb[19].mxu0  ;;  %v1591_v33 = vpop.f32.mrb[19].mxu1 }
 0x126   : > { %v1000_v31 = vsel %vm936_vm15, %v904_v17, %v968_v23  ;;  %v1422_v34 = vpack.c.bf16 %v984_v30, %v983_v28  ;;  %v889_v36 = vadd.f32 %v1541_v24, %v1995_v51  ;;  %v905_v37 = vadd.f32 %v1589_v25, %v1995_v51 }
 0x127   : > { %v1462_v35 = vpack.c.bf16 %v1000_v31, %v999_v29  ;;  %v1544_v38 = vadd.f32 %v1543_v32, %v1542_v26  ;;  %v1592_v39 = vadd.f32 %v1591_v33, %v1590_v27 }
 0x128   : > { %1486 = vst [vmem:[%s2006_s7 + $0x18] sm:$0xff] %v1422_v34   ;;  %v953_v40 = vmul.f32 0.2, %v889_v36  ;;  %v969_v41 = vmul.f32 0.2, %v905_v37  ;;  %vm921_vm0 = vcmp.ge.f32.partialorder %v889_v36, 0.0 }
 0x129   : > { %1494 = vst [vmem:[%s2006_s7 + $0x58] sm:$0xff] %v1462_v35   ;;  %v890_v42 = vadd.f32 %v1544_v38, %v1995_v51  ;;  %v906_v43 = vadd.f32 %v1592_v39, %v1995_v51  ;;  %vm937_vm1 = vcmp.ge.f32.partialorder %v905_v37, 0.0 }
 0x12a   : > { %v1545_v44 = vpop.f32.mrb[20].mxu0  ;;  %v1593_v45 = vpop.f32.mrb[20].mxu1  ;;  %v985_v55 = vsel %vm921_vm0, %v889_v36, %v953_v40  ;;  %v1001_v56 = vsel %vm937_vm1, %v905_v37, %v969_v41 }
 0x12b   : > { %v1546_v46 = vpop.f32.mrb[21].mxu0  ;;  %v1594_v47 = vpop.f32.mrb[21].mxu1  ;;  %vm922_vm2 = vcmp.ge.f32.partialorder %v890_v42, 0.0  ;;  %v954_v48 = vmul.f32 0.2, %v890_v42  ;;  %vm938_vm3 = vcmp.ge.f32.partialorder %v906_v43, 0.0 }
 0x12c   : > { %v970_v49 = vmul.f32 0.2, %v906_v43  ;;  %v1547_v50 = vadd.f32 %v1546_v46, %v1545_v44  ;;  %v1595_v52 = vadd.f32 %v1594_v47, %v1593_v45  ;;  %v1548_v53 = vpop.f32.mrb[22].mxu0  ;;  %v1596_v54 = vpop.f32.mrb[22].mxu1 }
 0x12d   : > { %v986_v57 = vsel %vm922_vm2, %v890_v42, %v954_v48  ;;  %v1549_v59 = vpop.f32.mrb[23].mxu0  ;;  %v1597_v60 = vpop.f32.mrb[23].mxu1 }
 0x12e   : > { %v1002_v58 = vsel %vm938_vm3, %v906_v43, %v970_v49  ;;  %v1427_v61 = vpack.c.bf16 %v986_v57, %v985_v55  ;;  %v891_v63 = vadd.f32 %v1547_v50, %v1995_v51  ;;  %v907_v0 = vadd.f32 %v1595_v52, %v1995_v51 }
 0x12f   : > { %v1467_v62 = vpack.c.bf16 %v1002_v58, %v1001_v56  ;;  %v1550_v1 = vadd.f32 %v1549_v59, %v1548_v53  ;;  %v1598_v2 = vadd.f32 %v1597_v60, %v1596_v54 }
 0x130   : > { %1487 = vst [vmem:[%s2006_s7 + $0x20] sm:$0xff] %v1427_v61   ;;  %v955_v3 = vmul.f32 0.2, %v891_v63  ;;  %v971_v4 = vmul.f32 0.2, %v907_v0  ;;  %vm923_vm4 = vcmp.ge.f32.partialorder %v891_v63, 0.0 }
 0x131   : > { %1495 = vst [vmem:[%s2006_s7 + $0x60] sm:$0xff] %v1467_v62   ;;  %v892_v5 = vadd.f32 %v1550_v1, %v1995_v51  ;;  %v908_v6 = vadd.f32 %v1598_v2, %v1995_v51  ;;  %vm939_vm5 = vcmp.ge.f32.partialorder %v907_v0, 0.0 }
 0x132   : > { %v1551_v7 = vpop.f32.mrb[24].mxu0  ;;  %v1599_v8 = vpop.f32.mrb[24].mxu1  ;;  %v987_v17 = vsel %vm923_vm4, %v891_v63, %v955_v3  ;;  %v1003_v18 = vsel %vm939_vm5, %v907_v0, %v971_v4 }
 0x133   : > { %v1552_v9 = vpop.f32.mrb[25].mxu0  ;;  %v1600_v10 = vpop.f32.mrb[25].mxu1  ;;  %vm924_vm6 = vcmp.ge.f32.partialorder %v892_v5, 0.0  ;;  %v956_v11 = vmul.f32 0.2, %v892_v5  ;;  %vm940_vm7 = vcmp.ge.f32.partialorder %v908_v6, 0.0 }
 0x134   : > { %v972_v12 = vmul.f32 0.2, %v908_v6  ;;  %v1553_v13 = vadd.f32 %v1552_v9, %v1551_v7  ;;  %v1601_v14 = vadd.f32 %v1600_v10, %v1599_v8  ;;  %v1554_v15 = vpop.f32.mrb[26].mxu0  ;;  %v1602_v16 = vpop.f32.mrb[26].mxu1 }
 0x135   : > { %v988_v19 = vsel %vm924_vm6, %v892_v5, %v956_v11  ;;  %v1555_v21 = vpop.f32.mrb[27].mxu0  ;;  %v1603_v22 = vpop.f32.mrb[27].mxu1 }
 0x136   : > { %v1004_v20 = vsel %vm940_vm7, %v908_v6, %v972_v12  ;;  %v1432_v23 = vpack.c.bf16 %v988_v19, %v987_v17  ;;  %v893_v25 = vadd.f32 %v1553_v13, %v1995_v51  ;;  %v909_v26 = vadd.f32 %v1601_v14, %v1995_v51 }
 0x137   : > { %v1472_v24 = vpack.c.bf16 %v1004_v20, %v1003_v18  ;;  %v1556_v27 = vadd.f32 %v1555_v21, %v1554_v15  ;;  %v1604_v28 = vadd.f32 %v1603_v22, %v1602_v16 }
 0x138   : > { %1488 = vst [vmem:[%s2006_s7 + $0x28] sm:$0xff] %v1432_v23   ;;  %v957_v29 = vmul.f32 0.2, %v893_v25  ;;  %v973_v30 = vmul.f32 0.2, %v909_v26  ;;  %vm925_vm8 = vcmp.ge.f32.partialorder %v893_v25, 0.0 }
 0x139   : > { %1496 = vst [vmem:[%s2006_s7 + $0x68] sm:$0xff] %v1472_v24   ;;  %v894_v31 = vadd.f32 %v1556_v27, %v1995_v51  ;;  %v910_v32 = vadd.f32 %v1604_v28, %v1995_v51  ;;  %vm941_vm9 = vcmp.ge.f32.partialorder %v909_v26, 0.0 }
 0x13a   : > { %v1557_v33 = vpop.f32.mrb[28].mxu0  ;;  %v1605_v34 = vpop.f32.mrb[28].mxu1  ;;  %v989_v43 = vsel %vm925_vm8, %v893_v25, %v957_v29  ;;  %v1005_v44 = vsel %vm941_vm9, %v909_v26, %v973_v30 }
 0x13b   : > { %v1558_v35 = vpop.f32.mrb[29].mxu0  ;;  %v1606_v36 = vpop.f32.mrb[29].mxu1  ;;  %vm926_vm10 = vcmp.ge.f32.partialorder %v894_v31, 0.0  ;;  %v958_v37 = vmul.f32 0.2, %v894_v31  ;;  %vm942_vm11 = vcmp.ge.f32.partialorder %v910_v32, 0.0 }
 0x13c   : > { %v974_v38 = vmul.f32 0.2, %v910_v32  ;;  %v1559_v39 = vadd.f32 %v1558_v35, %v1557_v33  ;;  %v1607_v40 = vadd.f32 %v1606_v36, %v1605_v34  ;;  %v1560_v41 = vpop.f32.mrb[30].mxu0  ;;  %v1608_v42 = vpop.f32.mrb[30].mxu1 }
 0x13d   : > { %v990_v45 = vsel %vm926_vm10, %v894_v31, %v958_v37  ;;  %v1561_v47 = vpop.f32.mrb[31].mxu0  ;;  %v1609_v48 = vpop.f32.mrb[31].mxu1 }
 0x13e   : > { %v1006_v46 = vsel %vm942_vm11, %v910_v32, %v974_v38  ;;  %v1437_v49 = vpack.c.bf16 %v990_v45, %v989_v43  ;;  %v895_v52 = vadd.f32 %v1559_v39, %v1995_v51  ;;  %v911_v53 = vadd.f32 %v1607_v40, %v1995_v51 }
 0x13f   : > { %v1477_v50 = vpack.c.bf16 %v1006_v46, %v1005_v44  ;;  %v1562_v54 = vadd.f32 %v1561_v47, %v1560_v41  ;;  %v1610_v55 = vadd.f32 %v1609_v48, %v1608_v42 }
 0x140   : > { %1489 = vst [vmem:[%s2006_s7 + $0x30] sm:$0xff] %v1437_v49   ;;  %v959_v56 = vmul.f32 0.2, %v895_v52  ;;  %v975_v57 = vmul.f32 0.2, %v911_v53  ;;  %vm927_vm12 = vcmp.ge.f32.partialorder %v895_v52, 0.0 }
 0x141   : > { %1497 = vst [vmem:[%s2006_s7 + $0x70] sm:$0xff] %v1477_v50   ;;  %v896_v58 = vadd.f32 %v1562_v54, %v1995_v51  ;;  %v912_v59 = vadd.f32 %v1610_v55, %v1995_v51  ;;  %vm943_vm13 = vcmp.ge.f32.partialorder %v911_v53, 0.0 }
 0x142   : > { %v991_v62 = vsel %vm927_vm12, %v895_v52, %v959_v56  ;;  %v1007_v63 = vsel %vm943_vm13, %v911_v53, %v975_v57 }
 0x143   : > { %vm928_vm14 = vcmp.ge.f32.partialorder %v896_v58, 0.0  ;;  %v960_v60 = vmul.f32 0.2, %v896_v58  ;;  %vm944_vm15 = vcmp.ge.f32.partialorder %v912_v59, 0.0  ;;  %v976_v61 = vmul.f32 0.2, %v912_v59 }
 0x145   : > { %v992_v0 = vsel %vm928_vm14, %v896_v58, %v960_v60  ;;  %v1008_v1 = vsel %vm944_vm15, %v912_v59, %v976_v61 }
 0x146   : > { %v1442_v51 = vpack.c.bf16 %v992_v0, %v991_v62  ;;  %v1482_v2 = vpack.c.bf16 %v1008_v1, %v1007_v63 }
 0x148   : > { %1490 = vst [vmem:[%s2006_s7 + $0x38] sm:$0xff] %v1442_v51   ;;  %1498 = vst [vmem:[%s2006_s7 + $0x78] sm:$0xff] %v1482_v2  }
 0x149   : > { %1761 = shalt.err (!%p1758_p5)
}
 0x14a   : > { %s1762_s26 = scalar_lea.hbm %s2053_s11, 2048  ;;  %s1766_s30 = scalar_lea.hbm %s2110_s3, 4096 }
 0x14b   : > { %p1763_p6 = scmp.ne.s32.totalorder %s2053_s11, %s1762_s26  ;;  %p1767_p10 = scmp.lt.u32.totalorder %s2053_s11, %s2110_s3 }
 0x14c   : > { %p1768_p11 = scmp.lt.u32.totalorder %s1766_s30, %s1762_s26  ;;  %p1770_p13 = scmp.lt.u32.totalorder %s1762_s26, %s2053_s11 }
 0x14d   : > { %p1764_p7 = pnand %p1763_p6, %p1891_p4 }
 0x14e   : > { %p1769_p12 = por %p1768_p11, %p1767_p10 }
 0x14f   : > { %p1765_p9 = pneg %p1764_p7 }
 0x150   : > { %p1771_p0 = por %p1770_p13, %p1769_p12 }
 0x152   : > { %p1772_p1 = pnand %p1771_p0, %p1765_p9 }
 0x154   : > { %1775 = shalt.err (!%p1772_p1)
}
 0x155   : > { %s1829_s6 = smov 64   ;;  %s1830_s7 = smov 4  }
 0x156   : > { %1627 = dma.vmem_to_hbm [thread:$0]  (%p1891_p4), %s2055_s8, 2048, %s2053_s11, %s2061_s15, %s1829_s6, %s1829_s6, %s1830_s7  }
 0x157 PF: > { %p1633_p2 = scmp.ge.s32.totalorder %s1826_s17, 2  ;;  %s1198_s28 = sand.u32 1, %s1806_s12  }
 0x158   : > { %s1199_s9 = scalar_lea.sflag [#allocation4], %s1198_s28 }
 0x159   : > { %p1630_p3 = pnand %p1633_p2, %p1898_p8 }
 0x15b   : > { %1801 = dma.done.wait (!%p1630_p3), %s1199_s9, 2048  }
 0x15c   : > { %1803 = vsyncadd (!%p1630_p3), %s1199_s9, 4294965248  ;;  %s16_s17 = sadd.s32 1, %s1826_s17   ;;  %s2113_s12 = smov %s1810_s13 }
 0x15d   : > { %p13_p5 = scmp.ge.s32.totalorder %s16_s17, 4   ;;  %s2114_s13 = smov %s1814_s14 }
 0x15e   : > { %s2115_s14 = smov %s1904_s25  ;;  %s2116_s15 = smov %s1822_s16 }
 0x15f   : > { %s2117_s16 = smov %s2119_s20  ;;  %15 = sbr.rel (!%p13_p5) target bundleno = 4 (0x4), region = 78 }
 0x166   :  { %1204 = vsyncpa [#allocation4], 1 }
 0x167   :  { %1206 = vsyncpa [#allocation4 + $0x1], 1 }

// kernel: wavegan_discriminator_forward.8
= control target key start
LH: loop header
LB: loop body
LE: loop exit
PB: predicated region body
PF: predicated region fallthrough
CT: control target
= control target key end

     0   :  { %8 = vsyncpa [#allocation4], 0  ;;  %s1592_s0 = inlined_call_operand.vmem [shape: bf16[128,512], index: 0, kind: input, shape index: {}]   ;;  %s1593_s1 = inlined_call_operand.vmem [shape: bf16[512,128], index: 1, kind: input, shape index: {}]   ;;  %s1594_s2 = inlined_call_operand.vmem [shape: f32[1,128], index: 2, kind: input, shape index: {}]   ;;  %s1595_s3 = inlined_call_operand.hbm [shape: bf16[128,128], index: 3, kind: output, shape index: {}]  }
   0x1   :  { %10 = vsyncpa [#allocation4 + $0x1], 0  ;;  %s1340_s12 = smov 0   ;;  %s1342_s13 = smov 0  }
   0x2   :  { %s1344_s14 = smov 0   ;;  %s1346_s15 = smov 0  }
   0x3   :  { %s1348_s16 = smov 0   ;;  %s1350_s17 = smov 0  }
   0x4 LB: > { %s939_s18 = sadd.s32 4294967295, %s1315_s17   ;;  %s940_s19 = sadd.s32 4294967294, %s1315_s17   ;;  %s1315_s17 = sphi %s1350_s17, %s16_s17   ;;  %s1311_s16 = sphi %s1348_s16, %s1602_s16   ;;  %s1307_s15 = sphi %s1346_s15, %s1601_s15   ;;  %s1303_s14 = sphi %s1344_s14, %s1600_s14   ;;  %s1299_s13 = sphi %s1342_s13, %s1599_s13   ;;  %s1295_s12 = sphi %s1340_s12, %s1598_s12  }
   0x5   : > { %s28_s20 = sadd.s32 1, %s1311_s16  ;;  %s110_s21 = sadd.s32 1, %s1303_s14 }
   0x6   : > { %p30_p0 = scmp.ge.s32.totalorder %s28_s20, 2  ;;  %p120_p1 = scmp.ne.s32.totalorder %s1303_s14, %s1299_s13 }
   0x7   : > { %p121_p2 = scmp.eq.s32.totalorder %s939_s18, 1  ;;  %p126_p3 = scmp.ne.s32.totalorder %s1299_s13, %s1295_s12 }
   0x8   : > { %s1604_s20 = smov (%p30_p0, %s28_s20), 0  ;;  %p127_p5 = scmp.eq.s32.totalorder %s940_s19, 1 }
   0x9   : > { %p1380_p4 = por %p121_p2, %p120_p1  ;;  %s107_s23 = ssub.s32 %s1311_s16, %s1604_s20 }
   0xa   : > { %p944_p6 = scmp.ge.s32.totalorder %s1315_s17, 1  ;;  %p108_p7 = scmp.eq.s32.totalorder %s107_s23, 0 }
   0xb   : > { %p1387_p8 = por %p127_p5, %p126_p3  ;;  %p172_p9 = scmp.lt.s32.totalorder %s1315_s17, 3 }
   0xc   : > { %s1393_s25 = scalar_select %p108_p7, %s1303_s14, %s110_s21  }
   0xd   : > { %p173_p10 = pnand %p944_p6, %p172_p9 }
   0xe   : > { %v1181_v0 = vld [vmem:[%s1593_s1 + $0x40] sm:$0xff] (!%p173_p10)   ;;  %v1185_v4 = vld [vmem:[%s1593_s1 + $0x48] sm:$0xff] (!%p173_p10)   ;;  %v1189_v8 = vld [vmem:[%s1593_s1 + $0x50] sm:$0xff] (!%p173_p10)   ;;  %s946_s21 = sshll.u32 (!%p173_p10), %s1307_s15, 3  ;;  %s203_s30 = sand.u32 (!%p173_p10), 1, %s1299_s13  }
   0xf   : > { %176 = sbr.rel (%p173_p10) target bundleno = 314 (0x13a), region = 32  ;;  %v1182_v1 = vld [vmem:[%s1593_s1 + $0xc0] sm:$0xff] (!%p173_p10)   ;;  %1044 = vmatprep.subr.bf16.mxu0 (!%p173_p10), %v1181_v0  ;;  %v1186_v5 = vld [vmem:[%s1593_s1 + $0xc8] sm:$0xff] (!%p173_p10)   ;;  %v1190_v9 = vld [vmem:[%s1593_s1 + $0xd0] sm:$0xff] (!%p173_p10)   ;;  %p208_p11 = scmp.lt.s32.totalorder (!%p173_p10), %s946_s21, 15 }
  0x10   : > { %v1183_v2 = vld [vmem:[%s1593_s1] sm:$0xff] (!%p173_p10)   ;;  %1084 = vmatprep.subr.bf16.mxu1 (!%p173_p10), %v1182_v1  ;;  %v1187_v6 = vld [vmem:[%s1593_s1 + $0x8] sm:$0xff] (!%p173_p10)   ;;  %v1191_v10 = vld [vmem:[%s1593_s1 + $0x10] sm:$0xff] (!%p173_p10)   ;;  %s1020_s6 = sshll.u32 (!%p173_p10), %s1307_s15, 9  ;;  %s1546_s11 = scalar_lea.sflag (!%p173_p10), [#allocation4], %s203_s30 }
  0x11   : > { %v1184_v3 = vld [vmem:[%s1593_s1 + $0x80] sm:$0xff] (!%p173_p10)   ;;  %1045 = vmatpush3.bf16.msra.mxu0 (!%p173_p10), %v1183_v2  ;;  %v1188_v7 = vld [vmem:[%s1593_s1 + $0x88] sm:$0xff] (!%p173_p10)   ;;  %v1192_v11 = vld [vmem:[%s1593_s1 + $0x90] sm:$0xff] (!%p173_p10)   ;;  %s1539_s10 = scalar_lea.hbm (!%p173_p10), %s1595_s3, %s1020_s6  ;;  %s1317_s18 = smov (!%p173_p10), [#allocation3]  }
  0x12   : > { %1085 = vmatpush3.bf16.msra.mxu1 (!%p173_p10), %v1184_v3  ;;  %1046 = vmatprep.subr.bf16.mxu0 (!%p173_p10), %v1185_v4  ;;  %v1193_v12 = vld [vmem:[%s1593_s1 + $0x58] sm:$0xff] (!%p173_p10)   ;;  %v1197_v16 = vld [vmem:[%s1593_s1 + $0x60] sm:$0xff] (!%p173_p10)   ;;  %v1201_v20 = vld [vmem:[%s1593_s1 + $0x68] sm:$0xff] (!%p173_p10)  }
  0x13   : > { %1086 = vmatprep.subr.bf16.mxu1 (!%p173_p10), %v1186_v5  ;;  %v1194_v13 = vld [vmem:[%s1593_s1 + $0xd8] sm:$0xff] (!%p173_p10)   ;;  %v1198_v17 = vld [vmem:[%s1593_s1 + $0xe0] sm:$0xff] (!%p173_p10)   ;;  %v1202_v21 = vld [vmem:[%s1593_s1 + $0xe8] sm:$0xff] (!%p173_p10)  }
  0x14   : > { %v1195_v14 = vld [vmem:[%s1593_s1 + $0x18] sm:$0xff] (!%p173_p10)   ;;  %v1199_v18 = vld [vmem:[%s1593_s1 + $0x20] sm:$0xff] (!%p173_p10)   ;;  %v1203_v22 = vld [vmem:[%s1593_s1 + $0x28] sm:$0xff] (!%p173_p10)  }
  0x15   : > { %1047 = vmatpush3.bf16.msra.mxu0 (!%p173_p10), %v1187_v6  ;;  %v1196_v15 = vld [vmem:[%s1593_s1 + $0x98] sm:$0xff] (!%p173_p10)   ;;  %v1200_v19 = vld [vmem:[%s1593_s1 + $0xa0] sm:$0xff] (!%p173_p10)   ;;  %v1204_v23 = vld [vmem:[%s1593_s1 + $0xa8] sm:$0xff] (!%p173_p10)  }
  0x16   : > { %1087 = vmatpush3.bf16.msra.mxu1 %v1188_v7  ;;  %1048 = vmatprep.subr.bf16.mxu0 %v1189_v8  ;;  %s1606_s21 = smov (!%p208_p11, %s946_s21), 15  ;;  %v1205_v24 = vld [vmem:[%s1593_s1 + $0x70] sm:$0xff]   ;;  %v1209_v28 = vld [vmem:[%s1593_s1 + $0x78] sm:$0xff]   ;;  %v1516_v57 = vld [vmem:[%s1594_s2] ss:$0 sm:$0xff] }
  0x17   : > { %1088 = vmatprep.subr.bf16.mxu1 %v1190_v9  ;;  %v1206_v25 = vld [vmem:[%s1593_s1 + $0xf0] sm:$0xff]   ;;  %s1011_s4 = sshll.u32 %s1606_s21, 4  ;;  %v1210_v29 = vld [vmem:[%s1593_s1 + $0xf8] sm:$0xff]  }
  0x18   : > { %v1207_v26 = vld [vmem:[%s1593_s1 + $0x30] sm:$0xff]   ;;  %s1489_s19 = scalar_lea.vmem %s1592_s0, %s1011_s4  ;;  %v1211_v30 = vld [vmem:[%s1593_s1 + $0x38] sm:$0xff]   ;;  %s945_s4 = sshll.u32 %s203_s30, 5 }
  0x19   : > { %1049 = vmatpush3.bf16.msra.mxu0 %v1191_v10  ;;  %v1208_v27 = vld [vmem:[%s1593_s1 + $0xb0] sm:$0xff]   ;;  %v1212_v31 = vld [vmem:[%s1593_s1 + $0xb8] sm:$0xff]   ;;  %s1524_s5 = scalar_lea.vmem [#allocation3], %s945_s4 }
  0x1a   : > { %1089 = vmatpush3.bf16.msra.mxu1 %v1192_v11  ;;  %1050 = vmatprep.subr.bf16.mxu0 %v1193_v12  ;;  %v1213_v32 = vld [vmem:[%s1489_s19] ss:$16 sps:$4 sm:$0xff]   ;;  %v1215_v33 = vld [vmem:[%s1489_s19 + $0x4] ss:$16 sps:$4 sm:$0xff]   ;;  %v1216_v34 = vld [vmem:[%s1489_s19 + $0x8] ss:$16 sps:$4 sm:$0xff]  }
  0x1b   : > { %1090 = vmatprep.subr.bf16.mxu1 %v1194_v13  ;;  %v1218_v35 = vld [vmem:[%s1489_s19 + $0xc] ss:$16 sps:$4 sm:$0xff]   ;;  %630 = vmatprep.mubr.bf16.mxu0 %v1215_v33  ;;  %v1219_v36 = vld [vmem:[%s1489_s19 + $0x24] ss:$16 sps:$4 sm:$0xff]   ;;  %v1223_v38 = vld [vmem:[%s1489_s19 + $0x20] ss:$16 sps:$4 sm:$0xff]  }
  0x1c   : > { %695 = vmatprep.mubr.bf16.mxu1 %v1218_v35  ;;  %v1221_v37 = vld [vmem:[%s1489_s19 + $0x2c] ss:$16 sps:$4 sm:$0xff]   ;;  %v1224_v39 = vld [vmem:[%s1489_s19 + $0x28] ss:$16 sps:$4 sm:$0xff]   ;;  %v1225_v40 = vld [vmem:[%s1489_s19 + $0x44] ss:$16 sps:$4 sm:$0xff]  }
  0x1d   : > { %1051 = vmatpush3.bf16.msra.mxu0 %v1195_v14  ;;  %v1227_v41 = vld [vmem:[%s1489_s19 + $0x4c] ss:$16 sps:$4 sm:$0xff]   ;;  %v1229_v42 = vld [vmem:[%s1489_s19 + $0x40] ss:$16 sps:$4 sm:$0xff]   ;;  %v1230_v43 = vld [vmem:[%s1489_s19 + $0x48] ss:$16 sps:$4 sm:$0xff]  }
  0x1e   : > { %1091 = vmatpush3.bf16.msra.mxu1 %v1196_v15  ;;  %1052 = vmatprep.subr.bf16.mxu0 %v1197_v16  ;;  %v1231_v44 = vld [vmem:[%s1489_s19 + $0x64] ss:$16 sps:$4 sm:$0xff]   ;;  %v1233_v45 = vld [vmem:[%s1489_s19 + $0x6c] ss:$16 sps:$4 sm:$0xff]   ;;  %v1235_v46 = vld [vmem:[%s1489_s19 + $0x60] ss:$16 sps:$4 sm:$0xff]  }
  0x1f   : > { %1092 = vmatprep.subr.bf16.mxu1 %v1198_v17  ;;  %v1236_v47 = vld [vmem:[%s1489_s19 + $0x68] ss:$16 sps:$4 sm:$0xff]   ;;  %s848_s7 = sshll.u32 %s1524_s5, 4  ;;  %s1241_s19 = sshll.u32 %s1317_s18, 4  ;;  %s1541_s7 = int_to_ptr.vmem [resolvable:$true] %s848_s7  ;;  %s1242_s19 = int_to_ptr.vmem [resolvable:$false] %s1241_s19 }
  0x20   : > { %s1237_s15 = scalar_lea.vmem %s1541_s7, 512  ;;  %s1243_s21 = scalar_lea.vmem %s1242_s19, 1024 }
  0x21   : > { %1053 = vmatpush3.bf16.msra.mxu0 %v1199_v18  ;;  %p1238_p12 = scmp.ne.s32.totalorder %s1541_s7, %s1237_s15  ;;  %p1244_p1 = scmp.lt.s32.totalorder %s1541_s7, %s1242_s19 }
  0x22   : > { %1093 = vmatpush3.bf16.msra.mxu1 %v1200_v19  ;;  %1054 = vmatprep.subr.bf16.mxu0 %v1201_v20  ;;  %p1245_p2 = scmp.lt.s32.totalorder %s1243_s21, %s1237_s15 }
  0x23   : > { %1094 = vmatprep.subr.bf16.mxu1 %v1202_v21  ;;  %p1239_p13 = pnand %p1238_p12, %p1380_p4 }
  0x24   : > { %p1246_p3 = por %p1245_p2, %p1244_p1 }
  0x25   : > { %1055 = vmatpush3.bf16.msra.mxu0 %v1203_v22  ;;  %p1240_p0 = pneg %p1239_p13 }
  0x26   : > { %1095 = vmatpush3.bf16.msra.mxu1 %v1204_v23  ;;  %1056 = vmatprep.subr.bf16.mxu0 %v1205_v24 }
  0x27   : > { %1096 = vmatprep.subr.bf16.mxu1 %v1206_v25  ;;  %p1247_p5 = pnand %p1246_p3, %p1240_p0 }
  0x29   : > { %1057 = vmatpush3.bf16.msra.mxu0 %v1207_v26 }
  0x2a   : > { %1097 = vmatpush3.bf16.msra.mxu1 %v1208_v27  ;;  %1058 = vmatprep.subr.bf16.mxu0 %v1209_v28 }
  0x2b   : > { %1098 = vmatprep.subr.bf16.mxu1 %v1210_v29 }
  0x2d   : > { %1059 = vmatpush3.bf16.msra.mxu0 %v1211_v30 }
  0x2e   : > { %1099 = vmatpush3.bf16.msra.mxu1 %v1212_v31 }
  0x30   : > { %631 = vmatmul.mubr.bf16.vlgmr.msra.gmra.mrb[0].mxu0 %v1213_v32 }
  0x31   : > { %696 = vmatmul.mubr.bf16.vlgmr.msra.gmra.mrb[0].mxu1 %v1216_v34  ;;  %638 = vmatprep.mubr.bf16.mxu0 %v1219_v36 }
  0x32   : > { %703 = vmatprep.mubr.bf16.mxu1 %v1221_v37 }
  0x38   : > { %639 = vmatmul.mubr.bf16.gmra.mrb[4].mxu0 %v1223_v38 }
  0x39   : > { %704 = vmatmul.mubr.bf16.gmra.mrb[4].mxu1 %v1224_v39  ;;  %646 = vmatprep.mubr.bf16.mxu0 %v1225_v40 }
  0x3a   : > { %711 = vmatprep.mubr.bf16.mxu1 %v1227_v41 }
  0x40   : > { %647 = vmatmul.mubr.bf16.gmra.mrb[8].mxu0 %v1229_v42 }
  0x41   : > { %712 = vmatmul.mubr.bf16.gmra.mrb[8].mxu1 %v1230_v43  ;;  %654 = vmatprep.mubr.bf16.mxu0 %v1231_v44 }
  0x42   : > { %719 = vmatprep.mubr.bf16.mxu1 %v1233_v45 }
  0x48   : > { %655 = vmatmul.mubr.bf16.gmra.mrb[12].mxu0 %v1235_v46 }
  0x49   : > { %720 = vmatmul.mubr.bf16.gmra.mrb[12].mxu1 %v1236_v47 }
 0x103   : > { %v1060_v48 = vpop.f32.mrb[0].mxu0 }
 0x104   : > { %v1100_v49 = vpop.f32.mrb[0].mxu1  ;;  %v1061_v50 = vpop.f32.mrb[1].mxu0 }
 0x105   : > { %v1062_v51 = vadd.f32 %v1061_v50, %v1060_v48  ;;  %v1101_v52 = vpop.f32.mrb[1].mxu1  ;;  %v1063_v53 = vpop.f32.mrb[2].mxu0 }
 0x106   : > { %v1102_v54 = vadd.f32 %v1101_v52, %v1100_v49  ;;  %v1103_v55 = vpop.f32.mrb[2].mxu1  ;;  %v1064_v56 = vpop.f32.mrb[3].mxu0 }
 0x107   : > { %v1065_v58 = vadd.f32 %v1064_v56, %v1063_v53  ;;  %v1104_v59 = vpop.f32.mrb[3].mxu1 }
 0x108   : > { %v698_v60 = vadd.f32 %v1102_v54, %v1062_v51  ;;  %v1105_v61 = vadd.f32 %v1104_v59, %v1103_v55 }
 0x10a   : > { %v762_v62 = vadd.f32 %v1516_v57, %v698_v60  ;;  %v701_v63 = vadd.f32 %v1105_v61, %v1065_v58 }
 0x10b   : > { %v1066_v0 = vpop.f32.mrb[4].mxu0 }
 0x10c   : > { %v778_v1 = vmul.f32 0.2, %v762_v62  ;;  %v763_v2 = vadd.f32 %v1516_v57, %v701_v63  ;;  %v1106_v3 = vpop.f32.mrb[4].mxu1  ;;  %v1067_v4 = vpop.f32.mrb[5].mxu0  ;;  %vm770_vm0 = vcmp.ge.f32.partialorder %v762_v62, 0.0 }
 0x10d   : > { %v1068_v5 = vadd.f32 %v1067_v4, %v1066_v0  ;;  %v1107_v6 = vpop.f32.mrb[5].mxu1  ;;  %v1069_v7 = vpop.f32.mrb[6].mxu0 }
 0x10e   : > { %vm771_vm1 = vcmp.ge.f32.partialorder %v763_v2, 0.0  ;;  %v779_v8 = vmul.f32 0.2, %v763_v2  ;;  %v1108_v9 = vadd.f32 %v1107_v6, %v1106_v3  ;;  %v1109_v10 = vpop.f32.mrb[6].mxu1  ;;  %v1070_v11 = vpop.f32.mrb[7].mxu0  ;;  %v786_v14 = vsel %vm770_vm0, %v762_v62, %v778_v1 }
 0x10f   : > { %v1071_v12 = vadd.f32 %v1070_v11, %v1069_v7  ;;  %v1110_v13 = vpop.f32.mrb[7].mxu1 }
 0x110   : > { %v787_v15 = vsel %vm771_vm1, %v763_v2, %v779_v8  ;;  %v706_v16 = vadd.f32 %v1108_v9, %v1068_v5  ;;  %v1111_v17 = vadd.f32 %v1110_v13, %v1109_v10 }
 0x111   : > { %v1024_v18 = vpack.c.bf16 %v787_v15, %v786_v14 }
 0x112   : > { %v764_v19 = vadd.f32 %v1516_v57, %v706_v16  ;;  %v709_v20 = vadd.f32 %v1111_v17, %v1071_v12 }
 0x113   : > { %1025 = vst [vmem:[%s1524_s5] sm:$0xff] %v1024_v18   ;;  %v1072_v21 = vpop.f32.mrb[8].mxu0 }
 0x114   : > { %v780_v22 = vmul.f32 0.2, %v764_v19  ;;  %v765_v23 = vadd.f32 %v1516_v57, %v709_v20  ;;  %v1112_v24 = vpop.f32.mrb[8].mxu1  ;;  %v1073_v25 = vpop.f32.mrb[9].mxu0  ;;  %vm772_vm2 = vcmp.ge.f32.partialorder %v764_v19, 0.0 }
 0x115   : > { %v1074_v26 = vadd.f32 %v1073_v25, %v1072_v21  ;;  %v1113_v27 = vpop.f32.mrb[9].mxu1  ;;  %v1075_v28 = vpop.f32.mrb[10].mxu0 }
 0x116   : > { %vm773_vm3 = vcmp.ge.f32.partialorder %v765_v23, 0.0  ;;  %v781_v29 = vmul.f32 0.2, %v765_v23  ;;  %v1114_v30 = vadd.f32 %v1113_v27, %v1112_v24  ;;  %v1115_v31 = vpop.f32.mrb[10].mxu1  ;;  %v1076_v32 = vpop.f32.mrb[11].mxu0  ;;  %v788_v35 = vsel %vm772_vm2, %v764_v19, %v780_v22 }
 0x117   : > { %v1077_v33 = vadd.f32 %v1076_v32, %v1075_v28  ;;  %v1116_v34 = vpop.f32.mrb[11].mxu1 }
 0x118   : > { %v789_v36 = vsel %vm773_vm3, %v765_v23, %v781_v29  ;;  %v714_v37 = vadd.f32 %v1114_v30, %v1074_v26  ;;  %v1117_v38 = vadd.f32 %v1116_v34, %v1115_v31 }
 0x119   : > { %v1029_v39 = vpack.c.bf16 %v789_v36, %v788_v35 }
 0x11a   : > { %v766_v40 = vadd.f32 %v1516_v57, %v714_v37  ;;  %v717_v41 = vadd.f32 %v1117_v38, %v1077_v33 }
 0x11b   : > { %1041 = vst [vmem:[%s1524_s5 + $0x8] sm:$0xff] %v1029_v39   ;;  %v1078_v42 = vpop.f32.mrb[12].mxu0 }
 0x11c   : > { %v782_v43 = vmul.f32 0.2, %v766_v40  ;;  %v767_v44 = vadd.f32 %v1516_v57, %v717_v41  ;;  %v1118_v45 = vpop.f32.mrb[12].mxu1  ;;  %v1079_v46 = vpop.f32.mrb[13].mxu0  ;;  %vm774_vm4 = vcmp.ge.f32.partialorder %v766_v40, 0.0 }
 0x11d   : > { %v1080_v47 = vadd.f32 %v1079_v46, %v1078_v42  ;;  %v1119_v48 = vpop.f32.mrb[13].mxu1  ;;  %v1081_v49 = vpop.f32.mrb[14].mxu0 }
 0x11e   : > { %vm775_vm5 = vcmp.ge.f32.partialorder %v767_v44, 0.0  ;;  %v783_v50 = vmul.f32 0.2, %v767_v44  ;;  %v1120_v51 = vadd.f32 %v1119_v48, %v1118_v45  ;;  %v1121_v52 = vpop.f32.mrb[14].mxu1  ;;  %v1082_v53 = vpop.f32.mrb[15].mxu0  ;;  %v790_v56 = vsel %vm774_vm4, %v766_v40, %v782_v43 }
 0x11f   : > { %v1083_v54 = vadd.f32 %v1082_v53, %v1081_v49  ;;  %v1122_v55 = vpop.f32.mrb[15].mxu1 }
 0x120   : > { %v791_v58 = vsel %vm775_vm5, %v767_v44, %v783_v50  ;;  %v722_v59 = vadd.f32 %v1120_v51, %v1080_v47  ;;  %v1123_v60 = vadd.f32 %v1122_v55, %v1121_v52 }
 0x121   : > { %v1034_v61 = vpack.c.bf16 %v791_v58, %v790_v56 }
 0x122   : > { %v768_v62 = vadd.f32 %v1516_v57, %v722_v59  ;;  %v725_v63 = vadd.f32 %v1123_v60, %v1083_v54 }
 0x123   : > { %1042 = vst [vmem:[%s1524_s5 + $0x10] sm:$0xff] %v1034_v61  }
 0x124   : > { %v784_v0 = vmul.f32 0.2, %v768_v62  ;;  %v769_v1 = vadd.f32 %v1516_v57, %v725_v63  ;;  %vm776_vm6 = vcmp.ge.f32.partialorder %v768_v62, 0.0 }
 0x126   : > { %vm777_vm7 = vcmp.ge.f32.partialorder %v769_v1, 0.0  ;;  %v785_v2 = vmul.f32 0.2, %v769_v1  ;;  %v792_v3 = vsel %vm776_vm6, %v768_v62, %v784_v0 }
 0x128   : > { %v793_v4 = vsel %vm777_vm7, %v769_v1, %v785_v2 }
 0x129   : > { %v1039_v5 = vpack.c.bf16 %v793_v4, %v792_v3 }
 0x12b   : > { %1043 = vst [vmem:[%s1524_s5 + $0x18] sm:$0xff] %v1039_v5  }
 0x12c   : > { %1250 = shalt.err (!%p1247_p5)
}
 0x12d   : > { %s1251_s23 = scalar_lea.hbm %s1539_s10, 512  ;;  %s1255_s28 = scalar_lea.hbm %s1595_s3, 1024 }
 0x12e   : > { %p1252_p6 = scmp.ne.s32.totalorder %s1539_s10, %s1251_s23  ;;  %p1256_p10 = scmp.lt.u32.totalorder %s1539_s10, %s1595_s3 }
 0x12f   : > { %p1257_p11 = scmp.lt.u32.totalorder %s1255_s28, %s1251_s23  ;;  %p1259_p13 = scmp.lt.u32.totalorder %s1251_s23, %s1539_s10 }
 0x130   : > { %p1253_p7 = pnand %p1252_p6, %p1380_p4 }
 0x131   : > { %p1258_p12 = por %p1257_p11, %p1256_p10 }
 0x132   : > { %p1254_p9 = pneg %p1253_p7 }
 0x133   : > { %p1260_p0 = por %p1259_p13, %p1258_p12 }
 0x135   : > { %p1261_p1 = pnand %p1260_p0, %p1254_p9 }
 0x137   : > { %1264 = shalt.err (!%p1261_p1)
}
 0x138   : > { %s1318_s4 = smov 64   ;;  %s1319_s5 = smov 4  }
 0x139   : > { %1124 = dma.vmem_to_hbm [thread:$0]  (%p1380_p4), %s1541_s7, 512, %s1539_s10, %s1546_s11, %s1318_s4, %s1318_s4, %s1319_s5  }
 0x13a PF: > { %p1130_p2 = scmp.ge.s32.totalorder %s1315_s17, 2  ;;  %s863_s6 = sand.u32 1, %s1295_s12  }
 0x13b   : > { %s864_s8 = scalar_lea.sflag [#allocation4], %s863_s6 }
 0x13c   : > { %p1127_p3 = pnand %p1130_p2, %p1387_p8 }
 0x13e   : > { %1290 = dma.done.wait (!%p1127_p3), %s864_s8, 512  }
 0x13f   : > { %1292 = vsyncadd (!%p1127_p3), %s864_s8, 4294966784  ;;  %s16_s17 = sadd.s32 1, %s1315_s17   ;;  %s1598_s12 = smov %s1299_s13 }
 0x140   : > { %p13_p5 = scmp.ge.s32.totalorder %s16_s17, 4   ;;  %s1599_s13 = smov %s1303_s14 }
 0x141   : > { %s1600_s14 = smov %s1393_s25  ;;  %s1601_s15 = smov %s1311_s16 }
 0x142   : > { %s1602_s16 = smov %s1604_s20  ;;  %15 = sbr.rel (!%p13_p5) target bundleno = 4 (0x4), region = 78 }
 0x149   :  { %869 = vsyncpa [#allocation4], 1 }
 0x14a   :  { %871 = vsyncpa [#allocation4 + $0x1], 1 }

// kernel: wavegan_discriminator_forward.9
= control target key start
LH: loop header
LB: loop body
LE: loop exit
PB: predicated region body
PF: predicated region fallthrough
CT: control target
= control target key end

     0   :  { %s1331_s12 = smov 0   ;;  %s1333_s13 = smov 0   ;;  %s1551_s0 = inlined_call_operand.vmem [shape: bf16[32,896], index: 0, kind: input, shape index: {}]   ;;  %s1552_s1 = inlined_call_operand.vmem [shape: bf16[896,128], index: 1, kind: input, shape index: {}]   ;;  %s1553_s2 = inlined_call_operand.vmem [shape: f32[1,128], index: 2, kind: input, shape index: {}]   ;;  %s1554_s3 = inlined_call_operand.vmem [shape: bf16[32,128], index: 3, kind: output, shape index: {}]  }
   0x1   :  { %s1335_s14 = smov 0  }
   0x2 LB: > { %s25_s15 = sadd.s32 1, %s1303_s13  ;;  %p1017_p0 = scmp.ge.s32.totalorder %s1307_s14, 1  ;;  %s1307_s14 = sphi %s1335_s14, %s13_s14   ;;  %s1303_s13 = sphi %s1333_s13, %s1556_s13   ;;  %s1299_s12 = sphi %s1331_s12, %s1555_s12  }
   0x3   : > { %p27_p1 = scmp.ge.s32.totalorder %s25_s15, 2  ;;  %p169_p2 = scmp.lt.s32.totalorder %s1307_s14, 3 }
   0x5   : > { %s1558_s15 = smov (%p27_p1, %s25_s15), 0  ;;  %p170_p3 = pnand %p1017_p0, %p169_p2 }
   0x6   : > { %v1219_v0 = vld [vmem:[%s1552_s1 + $0x40] sm:$0xff] (!%p170_p3)   ;;  %v1223_v4 = vld [vmem:[%s1552_s1 + $0x48] sm:$0xff] (!%p170_p3)   ;;  %v1227_v8 = vld [vmem:[%s1552_s1 + $0x50] sm:$0xff] (!%p170_p3)   ;;  %s1018_s23 = sshll.u32 (!%p170_p3), %s1299_s12, 1  ;;  %v1309_v36 = vmov (!%p170_p3), 0.0   ;;  %vm1310_vm0 = vmmov (!%p170_p3), 0  }
   0x7   : > { %173 = sbr.rel (%p170_p3) target bundleno = 301 (0x12d), region = 32  ;;  %v1220_v1 = vld [vmem:[%s1552_s1 + $0xc0] sm:$0xff] (!%p170_p3)   ;;  %1097 = vmatprep.subr.bf16.mxu0 (!%p170_p3), %v1219_v0  ;;  %v1224_v5 = vld [vmem:[%s1552_s1 + $0xc8] sm:$0xff] (!%p170_p3)   ;;  %v1228_v9 = vld [vmem:[%s1552_s1 + $0xd0] sm:$0xff] (!%p170_p3)   ;;  %p205_p4 = scmp.lt.s32.totalorder (!%p170_p3), %s1018_s23, 3 }
   0x8   : > { %v1221_v2 = vld [vmem:[%s1552_s1] sm:$0xff] (!%p170_p3)   ;;  %1119 = vmatprep.subr.bf16.mxu1 (!%p170_p3), %v1220_v1  ;;  %v1225_v6 = vld [vmem:[%s1552_s1 + $0x8] sm:$0xff] (!%p170_p3)   ;;  %v1229_v10 = vld [vmem:[%s1552_s1 + $0x10] sm:$0xff] (!%p170_p3)  }
   0x9   : > { %v1222_v3 = vld [vmem:[%s1552_s1 + $0x80] sm:$0xff] (!%p170_p3)   ;;  %1098 = vmatpush3.bf16.msra.mxu0 (!%p170_p3), %v1221_v2  ;;  %v1226_v7 = vld [vmem:[%s1552_s1 + $0x88] sm:$0xff] (!%p170_p3)   ;;  %v1230_v11 = vld [vmem:[%s1552_s1 + $0x90] sm:$0xff] (!%p170_p3)  }
   0xa   : > { %1120 = vmatpush3.bf16.msra.mxu1 (!%p170_p3), %v1222_v3  ;;  %1099 = vmatprep.subr.bf16.mxu0 (!%p170_p3), %v1223_v4  ;;  %v1231_v12 = vld [vmem:[%s1552_s1 + $0x58] sm:$0xff] (!%p170_p3)   ;;  %v1235_v16 = vld [vmem:[%s1552_s1 + $0x60] sm:$0xff] (!%p170_p3)   ;;  %v1239_v20 = vld [vmem:[%s1552_s1 + $0x68] sm:$0xff] (!%p170_p3)  }
   0xb   : > { %1121 = vmatprep.subr.bf16.mxu1 (!%p170_p3), %v1224_v5  ;;  %v1232_v13 = vld [vmem:[%s1552_s1 + $0xd8] sm:$0xff] (!%p170_p3)   ;;  %v1236_v17 = vld [vmem:[%s1552_s1 + $0xe0] sm:$0xff] (!%p170_p3)   ;;  %v1240_v21 = vld [vmem:[%s1552_s1 + $0xe8] sm:$0xff] (!%p170_p3)  }
   0xc   : > { %v1233_v14 = vld [vmem:[%s1552_s1 + $0x18] sm:$0xff] (!%p170_p3)   ;;  %v1237_v18 = vld [vmem:[%s1552_s1 + $0x20] sm:$0xff] (!%p170_p3)   ;;  %v1241_v22 = vld [vmem:[%s1552_s1 + $0x28] sm:$0xff] (!%p170_p3)  }
   0xd   : > { %1100 = vmatpush3.bf16.msra.mxu0 (!%p170_p3), %v1225_v6  ;;  %v1234_v15 = vld [vmem:[%s1552_s1 + $0x98] sm:$0xff] (!%p170_p3)   ;;  %v1238_v19 = vld [vmem:[%s1552_s1 + $0xa0] sm:$0xff] (!%p170_p3)   ;;  %v1242_v23 = vld [vmem:[%s1552_s1 + $0xa8] sm:$0xff] (!%p170_p3)  }
   0xe   : > { %1122 = vmatpush3.bf16.msra.mxu1 %v1226_v7  ;;  %1101 = vmatprep.subr.bf16.mxu0 %v1227_v8  ;;  %s1560_s23 = smov (!%p205_p4, %s1018_s23), 3  ;;  %v1243_v24 = vld [vmem:[%s1552_s1 + $0x70] sm:$0xff]   ;;  %v1247_v28 = vld [vmem:[%s1552_s1 + $0x78] sm:$0xff]   ;;  %v1257_v37 = vld [vmem:[%s1552_s1 + $0x140] sm:$0xff]  }
   0xf   : > { %1123 = vmatprep.subr.bf16.mxu1 %v1228_v9  ;;  %v1244_v25 = vld [vmem:[%s1552_s1 + $0xf0] sm:$0xff]   ;;  %s1192_s22 = smul.u32 28, %s1560_s23  ;;  %v1248_v29 = vld [vmem:[%s1552_s1 + $0xf8] sm:$0xff]   ;;  %v1258_v38 = vld [vmem:[%s1552_s1 + $0x100] sm:$0xff]   ;;  %s1021_s20 = sshll.u32 %s1560_s23, 2 }
  0x10   : > { %v1245_v26 = vld [vmem:[%s1552_s1 + $0x30] sm:$0xff]   ;;  %v1249_v30 = vld [vmem:[%s1552_s1 + $0x38] sm:$0xff]   ;;  %v1259_v39 = vld [vmem:[%s1552_s1 + $0x180] sm:$0xff]   ;;  %s225_s24 = scalar_lea.vmem %s1554_s3, %s1021_s20 }
  0x11   : > { %1102 = vmatpush3.bf16.msra.mxu0 %v1229_v10  ;;  %v1246_v27 = vld [vmem:[%s1552_s1 + $0xb0] sm:$0xff]   ;;  %s1448_s6 = scalar_lea.vmem %s1551_s0, %s1192_s22  ;;  %v1250_v31 = vld [vmem:[%s1552_s1 + $0xb8] sm:$0xff]   ;;  %v1260_v40 = vld [vmem:[%s1552_s1 + $0x148] sm:$0xff]  }
  0x12   : > { %1124 = vmatpush3.bf16.msra.mxu1 %v1230_v11  ;;  %1103 = vmatprep.subr.bf16.mxu0 %v1231_v12  ;;  %v1251_v32 = vld [vmem:[%s1448_s6] ss:$28 sps:$4 sm:$0xff]   ;;  %v1254_v34 = vld [vmem:[%s1448_s6 + $0x8] ss:$28 sps:$4 sm:$0xff]   ;;  %v1263_v43 = vld [vmem:[%s1552_s1 + $0x150] sm:$0xff]  }
  0x13   : > { %1125 = vmatprep.subr.bf16.mxu1 %v1232_v13  ;;  %v1253_v33 = vld [vmem:[%s1448_s6 + $0x4] ss:$28 sps:$4 sm:$0xff]   ;;  %v1256_v35 = vld [vmem:[%s1448_s6 + $0xc] ss:$28 sps:$4 sm:$0xff]   ;;  %v1264_v44 = vld [vmem:[%s1552_s1 + $0x110] sm:$0xff]  }
  0x14   : > { %760 = vmatprep.mubr.bf16.mxu0 %v1253_v33  ;;  %801 = vmatprep.mubr.bf16.mxu1 %v1256_v35  ;;  %v1261_v41 = vld [vmem:[%s1552_s1 + $0x108] sm:$0xff]   ;;  %v1265_v45 = vld [vmem:[%s1552_s1 + $0x190] sm:$0xff]   ;;  %v1266_v46 = vld [vmem:[%s1552_s1 + $0x158] sm:$0xff]  }
  0x15   : > { %1104 = vmatpush3.bf16.msra.mxu0 %v1233_v14  ;;  %v1262_v42 = vld [vmem:[%s1552_s1 + $0x188] sm:$0xff]   ;;  %v1267_v47 = vld [vmem:[%s1552_s1 + $0x118] sm:$0xff]   ;;  %v1269_v49 = vld [vmem:[%s1552_s1 + $0x160] sm:$0xff]  }
  0x16   : > { %1126 = vmatpush3.bf16.msra.mxu1 %v1234_v15  ;;  %1105 = vmatprep.subr.bf16.mxu0 %v1235_v16  ;;  %v1268_v48 = vld [vmem:[%s1552_s1 + $0x198] sm:$0xff]   ;;  %v1270_v50 = vld [vmem:[%s1552_s1 + $0x120] sm:$0xff]   ;;  %v1272_v52 = vld [vmem:[%s1552_s1 + $0x168] sm:$0xff]  }
  0x17   : > { %1127 = vmatprep.subr.bf16.mxu1 %v1236_v17  ;;  %v1271_v51 = vld [vmem:[%s1552_s1 + $0x1a0] sm:$0xff]   ;;  %v1273_v53 = vld [vmem:[%s1552_s1 + $0x128] sm:$0xff]   ;;  %v1275_v55 = vld [vmem:[%s1552_s1 + $0x170] sm:$0xff]  }
  0x18   : > { %v1274_v54 = vld [vmem:[%s1552_s1 + $0x1a8] sm:$0xff]   ;;  %v1276_v56 = vld [vmem:[%s1552_s1 + $0x130] sm:$0xff]   ;;  %v1278_v59 = vld [vmem:[%s1552_s1 + $0x178] sm:$0xff]  }
  0x19   : > { %1106 = vmatpush3.bf16.msra.mxu0 %v1237_v18  ;;  %v1277_v57 = vld [vmem:[%s1552_s1 + $0x1b0] sm:$0xff]   ;;  %v1279_v60 = vld [vmem:[%s1552_s1 + $0x138] sm:$0xff]  }
  0x1a   : > { %1128 = vmatpush3.bf16.msra.mxu1 %v1238_v19  ;;  %1107 = vmatprep.subr.bf16.mxu0 %v1239_v20  ;;  %v1282_v58 = vld [vmem:[%s1448_s6 + $0x14] ss:$28 sps:$4 sm:$0xff]   ;;  %v1283_v61 = vld [vmem:[%s1552_s1 + $0x1b8] sm:$0xff]  }
  0x1b   : > { %1129 = vmatprep.subr.bf16.mxu1 %v1240_v21  ;;  %v1280_v62 = vld [vmem:[%s1448_s6 + $0x10] ss:$28 sps:$4 sm:$0xff]   ;;  %v1284_v63 = vld [vmem:[%s1448_s6 + $0x18] ss:$28 sps:$4 sm:$0xff]  }
  0x1d   : > { %1108 = vmatpush3.bf16.msra.mxu0 %v1241_v22 }
  0x1e   : > { %1130 = vmatpush3.bf16.msra.mxu1 %v1242_v23  ;;  %1109 = vmatprep.subr.bf16.mxu0 %v1243_v24 }
  0x1f   : > { %1131 = vmatprep.subr.bf16.mxu1 %v1244_v25  ;;  %v1085_v25 = vld [vmem:[%s1553_s2] ss:$0 sm:$0xff] }
  0x21   : > { %1110 = vmatpush3.bf16.msra.mxu0 %v1245_v26 }
  0x22   : > { %1132 = vmatpush3.bf16.msra.mxu1 %v1246_v27  ;;  %1111 = vmatprep.subr.bf16.mxu0 %v1247_v28 }
  0x23   : > { %1133 = vmatprep.subr.bf16.mxu1 %v1248_v29 }
  0x25   : > { %1112 = vmatpush3.bf16.msra.mxu0 %v1249_v30 }
  0x26   : > { %1134 = vmatpush3.bf16.msra.mxu1 %v1250_v31  ;;  %1141 = vmatprep.subr.bf16.mxu0 %v1257_v37 }
  0x27   : > { %1172 = vmatprep.subr.bf16.mxu1 %v1309_v36 }
  0x28   : > { %761 = vmatmul.mubr.bf16.vlgmr.msra.gmra.mrb[0].mxu0 %v1251_v32 }
  0x29   : > { %802 = vmatmul.mubr.bf16.vlgmr.msra.gmra.mrb[0].mxu1 %v1254_v34  ;;  %1142 = vmatpush3.bf16.msra.mxu0 %v1258_v38 }
  0x2a   : > { %1188 = vmatprep.mubr.msk.bf16.mxu1 %vm1310_vm0, %v1309_v36  ;;  %1173 = vmatpush3.bf16.msra.mxu1 %v1259_v39 }
  0x2b   : > { %1143 = vmatprep.subr.bf16.mxu0 %v1260_v40  ;;  %1174 = vmatprep.subr.bf16.mxu1 %v1309_v36 }
  0x2c   : > { %842 = vmatprep.mubr.bf16.mxu0 %v1282_v58 }
  0x2d   : > { %1144 = vmatpush3.bf16.msra.mxu0 %v1261_v41 }
  0x2e   : > { %1175 = vmatpush3.bf16.msra.mxu1 %v1262_v42  ;;  %1145 = vmatprep.subr.bf16.mxu0 %v1263_v43 }
  0x2f   : > { %1176 = vmatprep.subr.bf16.mxu1 %v1309_v36 }
  0x31   : > { %1146 = vmatpush3.bf16.msra.mxu0 %v1264_v44 }
  0x32   : > { %1177 = vmatpush3.bf16.msra.mxu1 %v1265_v45  ;;  %1147 = vmatprep.subr.bf16.mxu0 %v1266_v46 }
  0x33   : > { %1178 = vmatprep.subr.bf16.mxu1 %v1309_v36 }
  0x35   : > { %1148 = vmatpush3.bf16.msra.mxu0 %v1267_v47 }
  0x36   : > { %1179 = vmatpush3.bf16.msra.mxu1 %v1268_v48  ;;  %1149 = vmatprep.subr.bf16.mxu0 %v1269_v49 }
  0x37   : > { %1180 = vmatprep.subr.bf16.mxu1 %v1309_v36 }
  0x39   : > { %1150 = vmatpush3.bf16.msra.mxu0 %v1270_v50 }
  0x3a   : > { %1181 = vmatpush3.bf16.msra.mxu1 %v1271_v51  ;;  %1151 = vmatprep.subr.bf16.mxu0 %v1272_v52 }
  0x3b   : > { %1182 = vmatprep.subr.bf16.mxu1 %v1309_v36 }
  0x3d   : > { %1152 = vmatpush3.bf16.msra.mxu0 %v1273_v53 }
  0x3e   : > { %1183 = vmatpush3.bf16.msra.mxu1 %v1274_v54  ;;  %1153 = vmatprep.subr.bf16.mxu0 %v1275_v55 }
  0x3f   : > { %1184 = vmatprep.subr.bf16.mxu1 %v1309_v36 }
  0x41   : > { %1154 = vmatpush3.bf16.msra.mxu0 %v1276_v56 }
  0x42   : > { %1185 = vmatpush3.bf16.msra.mxu1 %v1277_v57  ;;  %1155 = vmatprep.subr.bf16.mxu0 %v1278_v59 }
  0x43   : > { %1186 = vmatprep.subr.bf16.mxu1 %v1309_v36 }
  0x45   : > { %1156 = vmatpush3.bf16.msra.mxu0 %v1279_v60 }
  0x46   : > { %1187 = vmatpush3.bf16.msra.mxu1 %v1283_v61 }
  0x48   : > { %843 = vmatmul.mubr.bf16.vlgmr.msra.gmra.mrb[4].mxu0 %v1280_v62 }
  0x49   : > { %1189 = vmatmul.mubr.bf16.vlgmr.msra.gmra.mrb[4].mxu1 %v1284_v63 }
  0xfb   : > { %v1113_v0 = vpop.f32.mrb[0].mxu0 }
  0xfc   : > { %v1135_v1 = vpop.f32.mrb[0].mxu1  ;;  %v1114_v2 = vpop.f32.mrb[1].mxu0 }
  0xfd   : > { %v1115_v3 = vadd.f32 %v1114_v2, %v1113_v0  ;;  %v1136_v4 = vpop.f32.mrb[1].mxu1  ;;  %v1116_v5 = vpop.f32.mrb[2].mxu0 }
  0xfe   : > { %v1137_v6 = vadd.f32 %v1136_v4, %v1135_v1  ;;  %v1138_v7 = vpop.f32.mrb[2].mxu1  ;;  %v1117_v8 = vpop.f32.mrb[3].mxu0 }
  0xff   : > { %v1118_v9 = vadd.f32 %v1117_v8, %v1116_v5  ;;  %v1139_v10 = vpop.f32.mrb[3].mxu1 }
 0x100   : > { %v804_v11 = vadd.f32 %v1137_v6, %v1115_v3  ;;  %v1140_v12 = vadd.f32 %v1139_v10, %v1138_v7 }
 0x102   : > { %v807_v13 = vadd.f32 %v1140_v12, %v1118_v9 }
 0x11b   : > { %v1157_v14 = vpop.f32.mrb[4].mxu0 }
 0x11c   : > { %v1158_v15 = vpop.f32.mrb[5].mxu0  ;;  %v885_v16 = vpop.f32.mrb[4].mxu1 }
 0x11d   : > { %v1159_v17 = vadd.f32 %v1158_v15, %v1157_v14  ;;  %v1160_v18 = vpop.f32.mrb[6].mxu0  ;;  %v1190_v19 = vpop.f32.mrb[5].mxu1 }
 0x11e   : > { %v1161_v20 = vpop.f32.mrb[7].mxu0  ;;  %v888_v21 = vpop.f32.mrb[6].mxu1 }
 0x11f   : > { %v845_v22 = vadd.f32 %v1159_v17, %v804_v11  ;;  %v1162_v23 = vadd.f32 %v1161_v20, %v1160_v18  ;;  %v1191_v24 = vpop.f32.mrb[7].mxu1 }
 0x121   : > { %v886_v26 = vadd.f32 %v885_v16, %v845_v22  ;;  %v848_v27 = vadd.f32 %v1162_v23, %v807_v13 }
 0x123   : > { %v908_v28 = vadd.f32 %v1085_v25, %v886_v26  ;;  %v889_v29 = vadd.f32 %v888_v21, %v848_v27 }
 0x125   : > { %v912_v30 = vmul.f32 0.2, %v908_v28  ;;  %v909_v31 = vadd.f32 %v1085_v25, %v889_v29  ;;  %vm910_vm1 = vcmp.ge.f32.partialorder %v908_v28, 0.0 }
 0x127   : > { %vm911_vm2 = vcmp.ge.f32.partialorder %v909_v31, 0.0  ;;  %v913_v32 = vmul.f32 0.2, %v909_v31  ;;  %v914_v33 = vsel %vm910_vm1, %v908_v28, %v912_v30 }
 0x129   : > { %v915_v34 = vsel %vm911_vm2, %v909_v31, %v913_v32 }
 0x12a   : > { %v1095_v35 = vpack.c.bf16 %v915_v34, %v914_v33 }
 0x12c   : > { %1096 = vst [vmem:[%s225_s24] sm:$0xff] %v1095_v35  }
 0x12d PF: > { %s13_s14 = sadd.s32 1, %s1307_s14   ;;  %s1555_s12 = smov %s1303_s13 }
 0x12e   : > { %p10_p5 = scmp.ge.s32.totalorder %s13_s14, 4   ;;  %s1556_s13 = smov %s1558_s15 }
 0x130   :  { %12 = sbr.rel (!%p10_p5) target bundleno = 2 (0x2), region = 73 }

</bundles_post_ra>
